<compile_context>
chip_gen: v7x
topology: tpu7x:2x2x1
jax: 0.10.0
libtpu: 0.0.40
codegen_flags: <defaults>
</compile_context>

<pallas_src>
import functools
import math

import numpy as np
import jax
import jax.numpy as jnp
from jax.experimental import pallas as pl
from jax.experimental.pallas import tpu as pltpu


def _transposed_upsample_kernel(x_ref, w_ref, b_ref, o_ref, xpad_ref, *,
                                cin, cout, h, w, ks, seg, accw, hp, nb):
    """Polyphase ConvTranspose2d(stride=2, ks=5) for a block of `nb` images.

    x_ref   : (nb, cin, h, w)            VMEM  raw input block
    w_ref   : (cin*ks*ks, accw)          VMEM  weights, lane-broadcast per cout segment
    b_ref   : (1, accw)                  VMEM  bias, lane-broadcast per cout segment
    o_ref   : (nb, 2, 2, hp, accw)       VMEM  phase-separated, channel-folded output
    xpad_ref: (nb, cin, rows, seg+2)     VMEM  zero-padded input scratch (no cout copies)
    """
    f32 = jnp.float32

    # Zero the padded-input scratch (pad borders must be 0; the interior is overwritten
    # right below).  Runs once per TensorCore: the grid has exactly one step per core.
    xpad_ref[...] = jnp.zeros(xpad_ref.shape, f32)

    # Scatter this block's images into the interior of the padded scratch
    # (one store covering all nb*cin images; no per-cout replication stores).
    xpad_ref[:, :, 2:2 + h, 2:2 + w] = x_ref[...].astype(f32)

    # Bias folded into accumulator init (broadcast hoisted: JAX does not CSE it).
    bias_tile = jnp.broadcast_to(b_ref[...].astype(f32), (hp, accw))

    # TODO(synk): replace the static unroll with a batch grid axis / fori_loop once nb
    # grows beyond a few images.
    for bb in range(nb):
        # One accumulator per output phase; cout is folded into the lane dimension.
        acc = [[bias_tile, bias_tile], [bias_tile, bias_tile]]
        for ci in range(cin):
            # Hoisted lane realignment: build the 3 lane-shifted, cout-tiled views once
            # per (bb, ci) and reuse them across the whole j (row) loop.
            # xtile[i][row, co*seg + r] = xpad[bb, ci, row, (2 - i) + r]   (any co)
            xtile = []
            for i in range(3):
                base = xpad_ref[bb, ci, :, 2 - i: 2 - i + seg]            # (rows, seg)
                xtile.append(jnp.concatenate([base] * cout, axis=-1))      # (rows, accw)
            for j in range(3):          # tap row-offset group: kh = 2*j + ph
                for i in range(3):      # tap col-offset group: kw = 2*i + pw
                    patch = xtile[i][2 - j: 2 - j + hp, :]                 # (hp, accw)
                    for ph in range(2):
                        kh = 2 * j + ph
                        if kh >= ks:
                            continue
                        for pw in range(2):
                            kw = 2 * i + pw
                            if kw >= ks:
                                continue
                            widx = (ci * ks + kh) * ks + kw
                            acc[ph][pw] = acc[ph][pw] + patch * w_ref[widx:widx + 1, :]
        for ph in range(2):
            for pw in range(2):
                o_ref[bb, ph, pw] = acc[ph][pw].astype(o_ref.dtype)


def _round_up(v, m):
    return (v + m - 1) // m * m


def _num_tensorcores():
    """Best-effort TensorCore count query; falls back to 1 (always correct)."""
    try:
        info = pltpu.get_tpu_info()
    except Exception:
        return 1
    for attr in ("num_cores", "core_count", "num_tensorcores", "tensorcore_count",
                 "tensor_core_count", "cores_per_chip", "num_cores_per_chip"):
        val = getattr(info, attr, None)
        if val is None:
            continue
        try:
            ival = int(val)
        except Exception:
            continue
        if 1 <= ival <= 16:
            return ival
    return 1


def transposed_upsample(x, weight, bias, *, stride=2):
    """Equivalent of nn.ConvTranspose2d(cin, cout, ks=5, stride=2)(x).

    x      : (N, Cin, H, W)        float32, NCHW
    weight : (Cin, Cout, ks, ks)   PyTorch ConvTranspose2d weight layout
    bias   : (Cout,)
    returns: (N, Cout, (H-1)*stride+ks, (W-1)*stride+ks)
    """
    assert stride == 2, "TransposedUpsample uses stride=2"
    n, cin, h, w = x.shape
    wcin, cout, ks, ks2 = weight.shape
    assert wcin == cin and ks == ks2
    assert ks == 5, "polyphase geometry below is specialized for ks=5"
    ho = (h - 1) * stride + ks
    wo = (w - 1) * stride + ks

    # Lane layout: output channel co owns lanes [co*seg, (co+1)*seg).  seg is the
    # smallest width >= w+4 making cout*seg a multiple of 128 (lane-dense vregs).
    g = 128 // math.gcd(cout, 128)
    seg = _round_up(w + 4, g)
    accw = cout * seg
    hp = _round_up(h + 2, 8)           # per-phase output rows, sublane-aligned (cropped)
    rows_scr = _round_up(hp + 2, 8)    # padded-input rows reachable by the j=0 tap group
    w_scr = seg + 2                    # 2 extra tail lanes for the i<2 lane shifts

    # Parameter prep (tiny; once per weight in a real model): lane-broadcast every
    # weight / bias scalar across its output channel's lane segment.
    w_lane = jnp.repeat(jnp.transpose(weight, (0, 2, 3, 1)), seg, axis=-1)
    w_lane = w_lane.reshape(cin * ks * ks, accw).astype(jnp.float32)
    b_lane = jnp.repeat(bias.astype(jnp.float32), seg).reshape(1, accw)

    # One grid step per TensorCore: single block on single-TC parts (v5e/v6e),
    # 2-way "parallel" split on dual-TC parts (v7x).
    ncores = _num_tensorcores()
    grid_n = ncores if (ncores > 1 and n % ncores == 0) else 1
    nb = n // grid_n

    kernel = functools.partial(
        _transposed_upsample_kernel,
        cin=cin, cout=cout, h=h, w=w, ks=ks, seg=seg, accw=accw, hp=hp, nb=nb)

    itemsize = jnp.dtype(x.dtype).itemsize
    flops = 2 * n * cin * cout * ks * ks * h * w
    bytes_accessed = (x.size * itemsize + w_lane.size * 4 + b_lane.size * 4
                      + n * 2 * 2 * hp * accw * itemsize)

    vmem_est = (2 * nb * cin * h * w * itemsize                 # input block, dbl-buffered
                + 2 * nb * 2 * 2 * hp * accw * itemsize         # output block, dbl-buffered
                + w_lane.size * 4 + b_lane.size * 4             # resident params
                + nb * cin * rows_scr * _round_up(w_scr, 128) * 4)  # padded-input scratch
    vmem_limit = int(min(32 * 1024 * 1024, max(8 * 1024 * 1024, 2 * vmem_est)))

    out = pl.pallas_call(
        kernel,
        out_shape=jax.ShapeDtypeStruct((n, 2, 2, hp, accw), x.dtype),
        grid=(grid_n,),
        in_specs=[
            pl.BlockSpec((nb, cin, h, w), lambda b: (b, 0, 0, 0)),
            pl.BlockSpec((cin * ks * ks, accw), lambda b: (0, 0)),
            pl.BlockSpec((1, accw), lambda b: (0, 0)),
        ],
        out_specs=pl.BlockSpec((nb, 2, 2, hp, accw),
                               lambda b: (b, 0, 0, 0, 0)),
        scratch_shapes=[pltpu.VMEM((nb, cin, rows_scr, w_scr), jnp.float32)],
        compiler_params=pltpu.CompilerParams(
            dimension_semantics=("parallel",),
            vmem_limit_bytes=vmem_limit),
        cost_estimate=pl.CostEstimate(
            flops=flops, transcendentals=0, bytes_accessed=bytes_accessed),
    )(x, w_lane, b_lane)

    # Un-fold the lane-dense, phase-separated kernel layout back to NCHW and crop:
    # out[b, ph, pw, q, co*seg + r] == y[b, co, 2q+ph, 2r+pw]
    y = out.reshape(n, 2, 2, hp, cout, seg)[:, :, :, :h + 2, :, :w + 2]
    y = jnp.transpose(y, (0, 4, 3, 1, 5, 2))               # (n, cout, h+2, 2, w+2, 2)
    y = y.reshape(n, cout, 2 * (h + 2), 2 * (w + 2))[:, :, :ho, :wo]
    return y


def _ref_conv_transpose2d(x, w, b, stride):
    """Independent NumPy reference matching PyTorch ConvTranspose2d semantics."""
    n, cin, h, wdt = x.shape
    _, cout, ks, _ = w.shape
    ho = (h - 1) * stride + ks
    wo = (wdt - 1) * stride + ks
    y = np.zeros((n, cout, ho, wo), np.float32)
    for ih in range(h):
        for iw in range(wdt):
            contrib = np.einsum("nc,codk->nodk", x[:, :, ih, iw], w)
            y[:, :, ih * stride:ih * stride + ks, iw * stride:iw * stride + ks] += contrib
    return y + b[None, :, None, None]


if __name__ == "__main__":
    key = jax.random.PRNGKey(0)
    k1, k2, k3 = jax.random.split(key, 3)

    N, C, H, W = 2, 4, 16, 16
    ks, stride = 5, 2
    Cout = C  # out_channels defaults to channels

    x = jax.random.normal(k1, (N, C, H, W), jnp.float32)
    # Deterministic synthetic init (mimics uniform(-1/sqrt(fan), 1/sqrt(fan))).
    bound = 1.0 / math.sqrt(C * ks * ks)
    weight = jax.random.uniform(k2, (C, Cout, ks, ks), jnp.float32, -bound, bound)
    bias = jax.random.uniform(k3, (Cout,), jnp.float32, -bound, bound)

    y = transposed_upsample(x, weight, bias, stride=stride)
    y = jax.block_until_ready(y)

    assert y.shape == (N, Cout, (H - 1) * stride + ks, (W - 1) * stride + ks), y.shape

    y_ref = _ref_conv_transpose2d(
        np.asarray(x), np.asarray(weight), np.asarray(bias), stride)
    np.testing.assert_allclose(np.asarray(y), y_ref, rtol=1e-4, atol=1e-4)

    print("KERNEL_OK")
</pallas_src>

<mosaic_0001>
module attributes {stable_mosaic.version = 11 : i64} {
  func.func @_transposed_upsample_kernel(%arg0: i32, %arg1: memref<2x4x16x16xf32, #tpu.memory_space<vmem>>, %arg2: memref<100x128xf32, #tpu.memory_space<vmem>>, %arg3: memref<1x128xf32, #tpu.memory_space<vmem>>, %arg4: memref<2x2x2x24x128xf32, #tpu.memory_space<vmem>>, %arg5: memref<2x4x32x34xf32, #tpu.memory_space<vmem>>) attributes {dimension_semantics = [#tpu.dimension_semantics<parallel>], iteration_bounds = array<i64: 1>, scalar_prefetch = 0 : i64, scratch_operands = 1 : i64, tpu.core_type = #tpu.core_type<tc>, window_params = [{transform_indices = @transform_0, window_bounds = array<i64: 2, 4, 16, 16>}, {pipeline_mode = #tpu.pipeline_mode<synchronous>, transform_indices = @transform_1, window_bounds = array<i64: 100, 128>}, {pipeline_mode = #tpu.pipeline_mode<synchronous>, transform_indices = @transform_2, window_bounds = array<i64: 1, 128>}, {transform_indices = @transform_3, window_bounds = array<i64: 2, 2, 2, 24, 128>}]} {
    %cst = arith.constant 0.000000e+00 : f32
    %0 = vector.broadcast %cst : f32 to vector<2x4x32x34xf32>
    %c0 = arith.constant 0 : index
    %c0_0 = arith.constant 0 : index
    %c0_1 = arith.constant 0 : index
    %c0_2 = arith.constant 0 : index
    %1 = vector.load %arg5[%c0, %c0_0, %c0_1, %c0_2] : memref<2x4x32x34xf32, #tpu.memory_space<vmem>>, vector<2x4x32x34xf32>
    tpu.vector_store %arg5[%c0, %c0_0, %c0_1, %c0_2], %0 {strides = array<i32>} : memref<2x4x32x34xf32, #tpu.memory_space<vmem>>, vector<2x4x32x34xf32>,
    %c0_3 = arith.constant 0 : index
    %c0_4 = arith.constant 0 : index
    %c0_5 = arith.constant 0 : index
    %c0_6 = arith.constant 0 : index
    %2 = vector.load %arg1[%c0_3, %c0_4, %c0_5, %c0_6] : memref<2x4x16x16xf32, #tpu.memory_space<vmem>>, vector<2x4x16x16xf32>
    %c0_7 = arith.constant 0 : index
    %c0_8 = arith.constant 0 : index
    %c2 = arith.constant 2 : index
    %c2_9 = arith.constant 2 : index
    %3 = vector.load %arg5[%c0_7, %c0_8, %c2, %c2_9] : memref<2x4x32x34xf32, #tpu.memory_space<vmem>>, vector<2x4x16x16xf32>
    tpu.vector_store %arg5[%c0_7, %c0_8, %c2, %c2_9], %2 {strides = array<i32>} : memref<2x4x32x34xf32, #tpu.memory_space<vmem>>, vector<2x4x16x16xf32>,
    %c0_10 = arith.constant 0 : index
    %c0_11 = arith.constant 0 : index
    %4 = vector.load %arg3[%c0_10, %c0_11] : memref<1x128xf32, #tpu.memory_space<vmem>>, vector<1x128xf32>
    %5 = vector.shape_cast %4 : vector<1x128xf32> to vector<1x128xf32>
    %6 = vector.broadcast %5 : vector<1x128xf32> to vector<24x128xf32>
    %c0_12 = arith.constant 0 : index
    %c0_13 = arith.constant 0 : index
    %c0_14 = arith.constant 0 : index
    %c2_15 = arith.constant 2 : index
    %7 = vector.load %arg5[%c0_12, %c0_13, %c0_14, %c2_15] : memref<2x4x32x34xf32, #tpu.memory_space<vmem>>, vector<1x1x32x32xf32>
    %8 = vector.shape_cast %7 : vector<1x1x32x32xf32> to vector<32x32xf32>
    %9 = tpu.concatenate %8, %8, %8, %8 in 1 : vector<32x32xf32>, vector<32x32xf32>, vector<32x32xf32>, vector<32x32xf32> -> vector<32x128xf32>
    %c0_16 = arith.constant 0 : index
    %c0_17 = arith.constant 0 : index
    %c0_18 = arith.constant 0 : index
    %c1 = arith.constant 1 : index
    %10 = vector.load %arg5[%c0_16, %c0_17, %c0_18, %c1] : memref<2x4x32x34xf32, #tpu.memory_space<vmem>>, vector<1x1x32x32xf32>
    %11 = vector.shape_cast %10 : vector<1x1x32x32xf32> to vector<32x32xf32>
    %12 = tpu.concatenate %11, %11, %11, %11 in 1 : vector<32x32xf32>, vector<32x32xf32>, vector<32x32xf32>, vector<32x32xf32> -> vector<32x128xf32>
    %c0_19 = arith.constant 0 : index
    %c0_20 = arith.constant 0 : index
    %c0_21 = arith.constant 0 : index
    %c0_22 = arith.constant 0 : index
    %13 = vector.load %arg5[%c0_19, %c0_20, %c0_21, %c0_22] : memref<2x4x32x34xf32, #tpu.memory_space<vmem>>, vector<1x1x32x32xf32>
    %14 = vector.shape_cast %13 : vector<1x1x32x32xf32> to vector<32x32xf32>
    %15 = tpu.concatenate %14, %14, %14, %14 in 1 : vector<32x32xf32>, vector<32x32xf32>, vector<32x32xf32>, vector<32x32xf32> -> vector<32x128xf32>
    %16 = vector.extract_strided_slice %9 {offsets = [2, 0], sizes = [24, 128], strides = [1, 1]} : vector<32x128xf32> to vector<24x128xf32>
    %c0_23 = arith.constant 0 : index
    %c0_24 = arith.constant 0 : index
    %17 = vector.load %arg2[%c0_23, %c0_24] : memref<100x128xf32, #tpu.memory_space<vmem>>, vector<1x128xf32>
    %18 = vector.broadcast %17 : vector<1x128xf32> to vector<24x128xf32>
    %19 = arith.mulf %16, %18 : vector<24x128xf32>
    %20 = arith.addf %6, %19 : vector<24x128xf32>
    %c1_25 = arith.constant 1 : index
    %c0_26 = arith.constant 0 : index
    %21 = vector.load %arg2[%c1_25, %c0_26] : memref<100x128xf32, #tpu.memory_space<vmem>>, vector<1x128xf32>
    %22 = vector.broadcast %21 : vector<1x128xf32> to vector<24x128xf32>
    %23 = arith.mulf %16, %22 : vector<24x128xf32>
    %24 = arith.addf %6, %23 : vector<24x128xf32>
    %c5 = arith.constant 5 : index
    %c0_27 = arith.constant 0 : index
    %25 = vector.load %arg2[%c5, %c0_27] : memref<100x128xf32, #tpu.memory_space<vmem>>, vector<1x128xf32>
    %26 = vector.broadcast %25 : vector<1x128xf32> to vector<24x128xf32>
    %27 = arith.mulf %16, %26 : vector<24x128xf32>
    %28 = arith.addf %6, %27 : vector<24x128xf32>
    %c6 = arith.constant 6 : index
    %c0_28 = arith.constant 0 : index
    %29 = vector.load %arg2[%c6, %c0_28] : memref<100x128xf32, #tpu.memory_space<vmem>>, vector<1x128xf32>
    %30 = vector.broadcast %29 : vector<1x128xf32> to vector<24x128xf32>
    %31 = arith.mulf %16, %30 : vector<24x128xf32>
    %32 = arith.addf %6, %31 : vector<24x128xf32>
    %33 = vector.extract_strided_slice %12 {offsets = [2, 0], sizes = [24, 128], strides = [1, 1]} : vector<32x128xf32> to vector<24x128xf32>
    %c2_29 = arith.constant 2 : index
    %c0_30 = arith.constant 0 : index
    %34 = vector.load %arg2[%c2_29, %c0_30] : memref<100x128xf32, #tpu.memory_space<vmem>>, vector<1x128xf32>
    %35 = vector.broadcast %34 : vector<1x128xf32> to vector<24x128xf32>
    %36 = arith.mulf %33, %35 : vector<24x128xf32>
    %37 = arith.addf %20, %36 : vector<24x128xf32>
    %c3 = arith.constant 3 : index
    %c0_31 = arith.constant 0 : index
    %38 = vector.load %arg2[%c3, %c0_31] : memref<100x128xf32, #tpu.memory_space<vmem>>, vector<1x128xf32>
    %39 = vector.broadcast %38 : vector<1x128xf32> to vector<24x128xf32>
    %40 = arith.mulf %33, %39 : vector<24x128xf32>
    %41 = arith.addf %24, %40 : vector<24x128xf32>
    %c7 = arith.constant 7 : index
    %c0_32 = arith.constant 0 : index
    %42 = vector.load %arg2[%c7, %c0_32] : memref<100x128xf32, #tpu.memory_space<vmem>>, vector<1x128xf32>
    %43 = vector.broadcast %42 : vector<1x128xf32> to vector<24x128xf32>
    %44 = arith.mulf %33, %43 : vector<24x128xf32>
    %45 = arith.addf %28, %44 : vector<24x128xf32>
    %c8 = arith.constant 8 : index
    %c0_33 = arith.constant 0 : index
    %46 = vector.load %arg2[%c8, %c0_33] : memref<100x128xf32, #tpu.memory_space<vmem>>, vector<1x128xf32>
    %47 = vector.broadcast %46 : vector<1x128xf32> to vector<24x128xf32>
    %48 = arith.mulf %33, %47 : vector<24x128xf32>
    %49 = arith.addf %32, %48 : vector<24x128xf32>
    %50 = vector.extract_strided_slice %15 {offsets = [2, 0], sizes = [24, 128], strides = [1, 1]} : vector<32x128xf32> to vector<24x128xf32>
    %c4 = arith.constant 4 : index
    %c0_34 = arith.constant 0 : index
    %51 = vector.load %arg2[%c4, %c0_34] : memref<100x128xf32, #tpu.memory_space<vmem>>, vector<1x128xf32>
    %52 = vector.broadcast %51 : vector<1x128xf32> to vector<24x128xf32>
    %53 = arith.mulf %50, %52 : vector<24x128xf32>
    %54 = arith.addf %37, %53 : vector<24x128xf32>
    %c9 = arith.constant 9 : index
    %c0_35 = arith.constant 0 : index
    %55 = vector.load %arg2[%c9, %c0_35] : memref<100x128xf32, #tpu.memory_space<vmem>>, vector<1x128xf32>
    %56 = vector.broadcast %55 : vector<1x128xf32> to vector<24x128xf32>
    %57 = arith.mulf %50, %56 : vector<24x128xf32>
    %58 = arith.addf %45, %57 : vector<24x128xf32>
    %59 = vector.extract_strided_slice %9 {offsets = [1, 0], sizes = [24, 128], strides = [1, 1]} : vector<32x128xf32> to vector<24x128xf32>
    %c10 = arith.constant 10 : index
    %c0_36 = arith.constant 0 : index
    %60 = vector.load %arg2[%c10, %c0_36] : memref<100x128xf32, #tpu.memory_space<vmem>>, vector<1x128xf32>
    %61 = vector.broadcast %60 : vector<1x128xf32> to vector<24x128xf32>
    %62 = arith.mulf %59, %61 : vector<24x128xf32>
    %63 = arith.addf %54, %62 : vector<24x128xf32>
    %c11 = arith.constant 11 : index
    %c0_37 = arith.constant 0 : index
    %64 = vector.load %arg2[%c11, %c0_37] : memref<100x128xf32, #tpu.memory_space<vmem>>, vector<1x128xf32>
    %65 = vector.broadcast %64 : vector<1x128xf32> to vector<24x128xf32>
    %66 = arith.mulf %59, %65 : vector<24x128xf32>
    %67 = arith.addf %41, %66 : vector<24x128xf32>
    %c15 = arith.constant 15 : index
    %c0_38 = arith.constant 0 : index
    %68 = vector.load %arg2[%c15, %c0_38] : memref<100x128xf32, #tpu.memory_space<vmem>>, vector<1x128xf32>
    %69 = vector.broadcast %68 : vector<1x128xf32> to vector<24x128xf32>
    %70 = arith.mulf %59, %69 : vector<24x128xf32>
    %71 = arith.addf %58, %70 : vector<24x128xf32>
    %c16 = arith.constant 16 : index
    %c0_39 = arith.constant 0 : index
    %72 = vector.load %arg2[%c16, %c0_39] : memref<100x128xf32, #tpu.memory_space<vmem>>, vector<1x128xf32>
    %73 = vector.broadcast %72 : vector<1x128xf32> to vector<24x128xf32>
    %74 = arith.mulf %59, %73 : vector<24x128xf32>
    %75 = arith.addf %49, %74 : vector<24x128xf32>
    %76 = vector.extract_strided_slice %12 {offsets = [1, 0], sizes = [24, 128], strides = [1, 1]} : vector<32x128xf32> to vector<24x128xf32>
    %c12 = arith.constant 12 : index
    %c0_40 = arith.constant 0 : index
    %77 = vector.load %arg2[%c12, %c0_40] : memref<100x128xf32, #tpu.memory_space<vmem>>, vector<1x128xf32>
    %78 = vector.broadcast %77 : vector<1x128xf32> to vector<24x128xf32>
    %79 = arith.mulf %76, %78 : vector<24x128xf32>
    %80 = arith.addf %63, %79 : vector<24x128xf32>
    %c13 = arith.constant 13 : index
    %c0_41 = arith.constant 0 : index
    %81 = vector.load %arg2[%c13, %c0_41] : memref<100x128xf32, #tpu.memory_space<vmem>>, vector<1x128xf32>
    %82 = vector.broadcast %81 : vector<1x128xf32> to vector<24x128xf32>
    %83 = arith.mulf %76, %82 : vector<24x128xf32>
    %84 = arith.addf %67, %83 : vector<24x128xf32>
    %c17 = arith.constant 17 : index
    %c0_42 = arith.constant 0 : index
    %85 = vector.load %arg2[%c17, %c0_42] : memref<100x128xf32, #tpu.memory_space<vmem>>, vector<1x128xf32>
    %86 = vector.broadcast %85 : vector<1x128xf32> to vector<24x128xf32>
    %87 = arith.mulf %76, %86 : vector<24x128xf32>
    %88 = arith.addf %71, %87 : vector<24x128xf32>
    %c18 = arith.constant 18 : index
    %c0_43 = arith.constant 0 : index
    %89 = vector.load %arg2[%c18, %c0_43] : memref<100x128xf32, #tpu.memory_space<vmem>>, vector<1x128xf32>
    %90 = vector.broadcast %89 : vector<1x128xf32> to vector<24x128xf32>
    %91 = arith.mulf %76, %90 : vector<24x128xf32>
    %92 = arith.addf %75, %91 : vector<24x128xf32>
    %93 = vector.extract_strided_slice %15 {offsets = [1, 0], sizes = [24, 128], strides = [1, 1]} : vector<32x128xf32> to vector<24x128xf32>
    %c14 = arith.constant 14 : index
    %c0_44 = arith.constant 0 : index
    %94 = vector.load %arg2[%c14, %c0_44] : memref<100x128xf32, #tpu.memory_space<vmem>>, vector<1x128xf32>
    %95 = vector.broadcast %94 : vector<1x128xf32> to vector<24x128xf32>
    %96 = arith.mulf %93, %95 : vector<24x128xf32>
    %97 = arith.addf %80, %96 : vector<24x128xf32>
    %c19 = arith.constant 19 : index
    %c0_45 = arith.constant 0 : index
    %98 = vector.load %arg2[%c19, %c0_45] : memref<100x128xf32, #tpu.memory_space<vmem>>, vector<1x128xf32>
    %99 = vector.broadcast %98 : vector<1x128xf32> to vector<24x128xf32>
    %100 = arith.mulf %93, %99 : vector<24x128xf32>
    %101 = arith.addf %88, %100 : vector<24x128xf32>
    %102 = vector.extract_strided_slice %9 {offsets = [0, 0], sizes = [24, 128], strides = [1, 1]} : vector<32x128xf32> to vector<24x128xf32>
    %c20 = arith.constant 20 : index
    %c0_46 = arith.constant 0 : index
    %103 = vector.load %arg2[%c20, %c0_46] : memref<100x128xf32, #tpu.memory_space<vmem>>, vector<1x128xf32>
    %104 = vector.broadcast %103 : vector<1x128xf32> to vector<24x128xf32>
    %105 = arith.mulf %102, %104 : vector<24x128xf32>
    %106 = arith.addf %97, %105 : vector<24x128xf32>
    %c21 = arith.constant 21 : index
    %c0_47 = arith.constant 0 : index
    %107 = vector.load %arg2[%c21, %c0_47] : memref<100x128xf32, #tpu.memory_space<vmem>>, vector<1x128xf32>
    %108 = vector.broadcast %107 : vector<1x128xf32> to vector<24x128xf32>
    %109 = arith.mulf %102, %108 : vector<24x128xf32>
    %110 = arith.addf %84, %109 : vector<24x128xf32>
    %111 = vector.extract_strided_slice %12 {offsets = [0, 0], sizes = [24, 128], strides = [1, 1]} : vector<32x128xf32> to vector<24x128xf32>
    %c22 = arith.constant 22 : index
    %c0_48 = arith.constant 0 : index
    %112 = vector.load %arg2[%c22, %c0_48] : memref<100x128xf32, #tpu.memory_space<vmem>>, vector<1x128xf32>
    %113 = vector.broadcast %112 : vector<1x128xf32> to vector<24x128xf32>
    %114 = arith.mulf %111, %113 : vector<24x128xf32>
    %115 = arith.addf %106, %114 : vector<24x128xf32>
    %c23 = arith.constant 23 : index
    %c0_49 = arith.constant 0 : index
    %116 = vector.load %arg2[%c23, %c0_49] : memref<100x128xf32, #tpu.memory_space<vmem>>, vector<1x128xf32>
    %117 = vector.broadcast %116 : vector<1x128xf32> to vector<24x128xf32>
    %118 = arith.mulf %111, %117 : vector<24x128xf32>
    %119 = arith.addf %110, %118 : vector<24x128xf32>
    %120 = vector.extract_strided_slice %15 {offsets = [0, 0], sizes = [24, 128], strides = [1, 1]} : vector<32x128xf32> to vector<24x128xf32>
    %c24 = arith.constant 24 : index
    %c0_50 = arith.constant 0 : index
    %121 = vector.load %arg2[%c24, %c0_50] : memref<100x128xf32, #tpu.memory_space<vmem>>, vector<1x128xf32>
    %122 = vector.broadcast %121 : vector<1x128xf32> to vector<24x128xf32>
    %123 = arith.mulf %120, %122 : vector<24x128xf32>
    %124 = arith.addf %115, %123 : vector<24x128xf32>
    %c0_51 = arith.constant 0 : index
    %c1_52 = arith.constant 1 : index
    %c0_53 = arith.constant 0 : index
    %c2_54 = arith.constant 2 : index
    %125 = vector.load %arg5[%c0_51, %c1_52, %c0_53, %c2_54] : memref<2x4x32x34xf32, #tpu.memory_space<vmem>>, vector<1x1x32x32xf32>
    %126 = vector.shape_cast %125 : vector<1x1x32x32xf32> to vector<32x32xf32>
    %127 = tpu.concatenate %126, %126, %126, %126 in 1 : vector<32x32xf32>, vector<32x32xf32>, vector<32x32xf32>, vector<32x32xf32> -> vector<32x128xf32>
    %c0_55 = arith.constant 0 : index
    %c1_56 = arith.constant 1 : index
    %c0_57 = arith.constant 0 : index
    %c1_58 = arith.constant 1 : index
    %128 = vector.load %arg5[%c0_55, %c1_56, %c0_57, %c1_58] : memref<2x4x32x34xf32, #tpu.memory_space<vmem>>, vector<1x1x32x32xf32>
    %129 = vector.shape_cast %128 : vector<1x1x32x32xf32> to vector<32x32xf32>
    %130 = tpu.concatenate %129, %129, %129, %129 in 1 : vector<32x32xf32>, vector<32x32xf32>, vector<32x32xf32>, vector<32x32xf32> -> vector<32x128xf32>
    %c0_59 = arith.constant 0 : index
    %c1_60 = arith.constant 1 : index
    %c0_61 = arith.constant 0 : index
    %c0_62 = arith.constant 0 : index
    %131 = vector.load %arg5[%c0_59, %c1_60, %c0_61, %c0_62] : memref<2x4x32x34xf32, #tpu.memory_space<vmem>>, vector<1x1x32x32xf32>
    %132 = vector.shape_cast %131 : vector<1x1x32x32xf32> to vector<32x32xf32>
    %133 = tpu.concatenate %132, %132, %132, %132 in 1 : vector<32x32xf32>, vector<32x32xf32>, vector<32x32xf32>, vector<32x32xf32> -> vector<32x128xf32>
    %134 = vector.extract_strided_slice %127 {offsets = [2, 0], sizes = [24, 128], strides = [1, 1]} : vector<32x128xf32> to vector<24x128xf32>
    %c25 = arith.constant 25 : index
    %c0_63 = arith.constant 0 : index
    %135 = vector.load %arg2[%c25, %c0_63] : memref<100x128xf32, #tpu.memory_space<vmem>>, vector<1x128xf32>
    %136 = vector.broadcast %135 : vector<1x128xf32> to vector<24x128xf32>
    %137 = arith.mulf %134, %136 : vector<24x128xf32>
    %138 = arith.addf %124, %137 : vector<24x128xf32>
    %c26 = arith.constant 26 : index
    %c0_64 = arith.constant 0 : index
    %139 = vector.load %arg2[%c26, %c0_64] : memref<100x128xf32, #tpu.memory_space<vmem>>, vector<1x128xf32>
    %140 = vector.broadcast %139 : vector<1x128xf32> to vector<24x128xf32>
    %141 = arith.mulf %134, %140 : vector<24x128xf32>
    %142 = arith.addf %119, %141 : vector<24x128xf32>
    %c30 = arith.constant 30 : index
    %c0_65 = arith.constant 0 : index
    %143 = vector.load %arg2[%c30, %c0_65] : memref<100x128xf32, #tpu.memory_space<vmem>>, vector<1x128xf32>
    %144 = vector.broadcast %143 : vector<1x128xf32> to vector<24x128xf32>
    %145 = arith.mulf %134, %144 : vector<24x128xf32>
    %146 = arith.addf %101, %145 : vector<24x128xf32>
    %c31 = arith.constant 31 : index
    %c0_66 = arith.constant 0 : index
    %147 = vector.load %arg2[%c31, %c0_66] : memref<100x128xf32, #tpu.memory_space<vmem>>, vector<1x128xf32>
    %148 = vector.broadcast %147 : vector<1x128xf32> to vector<24x128xf32>
    %149 = arith.mulf %134, %148 : vector<24x128xf32>
    %150 = arith.addf %92, %149 : vector<24x128xf32>
    %151 = vector.extract_strided_slice %130 {offsets = [2, 0], sizes = [24, 128], strides = [1, 1]} : vector<32x128xf32> to vector<24x128xf32>
    %c27 = arith.constant 27 : index
    %c0_67 = arith.constant 0 : index
    %152 = vector.load %arg2[%c27, %c0_67] : memref<100x128xf32, #tpu.memory_space<vmem>>, vector<1x128xf32>
    %153 = vector.broadcast %152 : vector<1x128xf32> to vector<24x128xf32>
    %154 = arith.mulf %151, %153 : vector<24x128xf32>
    %155 = arith.addf %138, %154 : vector<24x128xf32>
    %c28 = arith.constant 28 : index
    %c0_68 = arith.constant 0 : index
    %156 = vector.load %arg2[%c28, %c0_68] : memref<100x128xf32, #tpu.memory_space<vmem>>, vector<1x128xf32>
    %157 = vector.broadcast %156 : vector<1x128xf32> to vector<24x128xf32>
    %158 = arith.mulf %151, %157 : vector<24x128xf32>
    %159 = arith.addf %142, %158 : vector<24x128xf32>
    %c32 = arith.constant 32 : index
    %c0_69 = arith.constant 0 : index
    %160 = vector.load %arg2[%c32, %c0_69] : memref<100x128xf32, #tpu.memory_space<vmem>>, vector<1x128xf32>
    %161 = vector.broadcast %160 : vector<1x128xf32> to vector<24x128xf32>
    %162 = arith.mulf %151, %161 : vector<24x128xf32>
    %163 = arith.addf %146, %162 : vector<24x128xf32>
    %c33 = arith.constant 33 : index
    %c0_70 = arith.constant 0 : index
    %164 = vector.load %arg2[%c33, %c0_70] : memref<100x128xf32, #tpu.memory_space<vmem>>, vector<1x128xf32>
    %165 = vector.broadcast %164 : vector<1x128xf32> to vector<24x128xf32>
    %166 = arith.mulf %151, %165 : vector<24x128xf32>
    %167 = arith.addf %150, %166 : vector<24x128xf32>
    %168 = vector.extract_strided_slice %133 {offsets = [2, 0], sizes = [24, 128], strides = [1, 1]} : vector<32x128xf32> to vector<24x128xf32>
    %c29 = arith.constant 29 : index
    %c0_71 = arith.constant 0 : index
    %169 = vector.load %arg2[%c29, %c0_71] : memref<100x128xf32, #tpu.memory_space<vmem>>, vector<1x128xf32>
    %170 = vector.broadcast %169 : vector<1x128xf32> to vector<24x128xf32>
    %171 = arith.mulf %168, %170 : vector<24x128xf32>
    %172 = arith.addf %155, %171 : vector<24x128xf32>
    %c34 = arith.constant 34 : index
    %c0_72 = arith.constant 0 : index
    %173 = vector.load %arg2[%c34, %c0_72] : memref<100x128xf32, #tpu.memory_space<vmem>>, vector<1x128xf32>
    %174 = vector.broadcast %173 : vector<1x128xf32> to vector<24x128xf32>
    %175 = arith.mulf %168, %174 : vector<24x128xf32>
    %176 = arith.addf %163, %175 : vector<24x128xf32>
    %177 = vector.extract_strided_slice %127 {offsets = [1, 0], sizes = [24, 128], strides = [1, 1]} : vector<32x128xf32> to vector<24x128xf32>
    %c35 = arith.constant 35 : index
    %c0_73 = arith.constant 0 : index
    %178 = vector.load %arg2[%c35, %c0_73] : memref<100x128xf32, #tpu.memory_space<vmem>>, vector<1x128xf32>
    %179 = vector.broadcast %178 : vector<1x128xf32> to vector<24x128xf32>
    %180 = arith.mulf %177, %179 : vector<24x128xf32>
    %181 = arith.addf %172, %180 : vector<24x128xf32>
    %c36 = arith.constant 36 : index
    %c0_74 = arith.constant 0 : index
    %182 = vector.load %arg2[%c36, %c0_74] : memref<100x128xf32, #tpu.memory_space<vmem>>, vector<1x128xf32>
    %183 = vector.broadcast %182 : vector<1x128xf32> to vector<24x128xf32>
    %184 = arith.mulf %177, %183 : vector<24x128xf32>
    %185 = arith.addf %159, %184 : vector<24x128xf32>
    %c40 = arith.constant 40 : index
    %c0_75 = arith.constant 0 : index
    %186 = vector.load %arg2[%c40, %c0_75] : memref<100x128xf32, #tpu.memory_space<vmem>>, vector<1x128xf32>
    %187 = vector.broadcast %186 : vector<1x128xf32> to vector<24x128xf32>
    %188 = arith.mulf %177, %187 : vector<24x128xf32>
    %189 = arith.addf %176, %188 : vector<24x128xf32>
    %c41 = arith.constant 41 : index
    %c0_76 = arith.constant 0 : index
    %190 = vector.load %arg2[%c41, %c0_76] : memref<100x128xf32, #tpu.memory_space<vmem>>, vector<1x128xf32>
    %191 = vector.broadcast %190 : vector<1x128xf32> to vector<24x128xf32>
    %192 = arith.mulf %177, %191 : vector<24x128xf32>
    %193 = arith.addf %167, %192 : vector<24x128xf32>
    %194 = vector.extract_strided_slice %130 {offsets = [1, 0], sizes = [24, 128], strides = [1, 1]} : vector<32x128xf32> to vector<24x128xf32>
    %c37 = arith.constant 37 : index
    %c0_77 = arith.constant 0 : index
    %195 = vector.load %arg2[%c37, %c0_77] : memref<100x128xf32, #tpu.memory_space<vmem>>, vector<1x128xf32>
    %196 = vector.broadcast %195 : vector<1x128xf32> to vector<24x128xf32>
    %197 = arith.mulf %194, %196 : vector<24x128xf32>
    %198 = arith.addf %181, %197 : vector<24x128xf32>
    %c38 = arith.constant 38 : index
    %c0_78 = arith.constant 0 : index
    %199 = vector.load %arg2[%c38, %c0_78] : memref<100x128xf32, #tpu.memory_space<vmem>>, vector<1x128xf32>
    %200 = vector.broadcast %199 : vector<1x128xf32> to vector<24x128xf32>
    %201 = arith.mulf %194, %200 : vector<24x128xf32>
    %202 = arith.addf %185, %201 : vector<24x128xf32>
    %c42 = arith.constant 42 : index
    %c0_79 = arith.constant 0 : index
    %203 = vector.load %arg2[%c42, %c0_79] : memref<100x128xf32, #tpu.memory_space<vmem>>, vector<1x128xf32>
    %204 = vector.broadcast %203 : vector<1x128xf32> to vector<24x128xf32>
    %205 = arith.mulf %194, %204 : vector<24x128xf32>
    %206 = arith.addf %189, %205 : vector<24x128xf32>
    %c43 = arith.constant 43 : index
    %c0_80 = arith.constant 0 : index
    %207 = vector.load %arg2[%c43, %c0_80] : memref<100x128xf32, #tpu.memory_space<vmem>>, vector<1x128xf32>
    %208 = vector.broadcast %207 : vector<1x128xf32> to vector<24x128xf32>
    %209 = arith.mulf %194, %208 : vector<24x128xf32>
    %210 = arith.addf %193, %209 : vector<24x128xf32>
    %211 = vector.extract_strided_slice %133 {offsets = [1, 0], sizes = [24, 128], strides = [1, 1]} : vector<32x128xf32> to vector<24x128xf32>
    %c39 = arith.constant 39 : index
    %c0_81 = arith.constant 0 : index
    %212 = vector.load %arg2[%c39, %c0_81] : memref<100x128xf32, #tpu.memory_space<vmem>>, vector<1x128xf32>
    %213 = vector.broadcast %212 : vector<1x128xf32> to vector<24x128xf32>
    %214 = arith.mulf %211, %213 : vector<24x128xf32>
    %215 = arith.addf %198, %214 : vector<24x128xf32>
    %c44 = arith.constant 44 : index
    %c0_82 = arith.constant 0 : index
    %216 = vector.load %arg2[%c44, %c0_82] : memref<100x128xf32, #tpu.memory_space<vmem>>, vector<1x128xf32>
    %217 = vector.broadcast %216 : vector<1x128xf32> to vector<24x128xf32>
    %218 = arith.mulf %211, %217 : vector<24x128xf32>
    %219 = arith.addf %206, %218 : vector<24x128xf32>
    %220 = vector.extract_strided_slice %127 {offsets = [0, 0], sizes = [24, 128], strides = [1, 1]} : vector<32x128xf32> to vector<24x128xf32>
    %c45 = arith.constant 45 : index
    %c0_83 = arith.constant 0 : index
    %221 = vector.load %arg2[%c45, %c0_83] : memref<100x128xf32, #tpu.memory_space<vmem>>, vector<1x128xf32>
    %222 = vector.broadcast %221 : vector<1x128xf32> to vector<24x128xf32>
    %223 = arith.mulf %220, %222 : vector<24x128xf32>
    %224 = arith.addf %215, %223 : vector<24x128xf32>
    %c46 = arith.constant 46 : index
    %c0_84 = arith.constant 0 : index
    %225 = vector.load %arg2[%c46, %c0_84] : memref<100x128xf32, #tpu.memory_space<vmem>>, vector<1x128xf32>
    %226 = vector.broadcast %225 : vector<1x128xf32> to vector<24x128xf32>
    %227 = arith.mulf %220, %226 : vector<24x128xf32>
    %228 = arith.addf %202, %227 : vector<24x128xf32>
    %229 = vector.extract_strided_slice %130 {offsets = [0, 0], sizes = [24, 128], strides = [1, 1]} : vector<32x128xf32> to vector<24x128xf32>
    %c47 = arith.constant 47 : index
    %c0_85 = arith.constant 0 : index
    %230 = vector.load %arg2[%c47, %c0_85] : memref<100x128xf32, #tpu.memory_space<vmem>>, vector<1x128xf32>
    %231 = vector.broadcast %230 : vector<1x128xf32> to vector<24x128xf32>
    %232 = arith.mulf %229, %231 : vector<24x128xf32>
    %233 = arith.addf %224, %232 : vector<24x128xf32>
    %c48 = arith.constant 48 : index
    %c0_86 = arith.constant 0 : index
    %234 = vector.load %arg2[%c48, %c0_86] : memref<100x128xf32, #tpu.memory_space<vmem>>, vector<1x128xf32>
    %235 = vector.broadcast %234 : vector<1x128xf32> to vector<24x128xf32>
    %236 = arith.mulf %229, %235 : vector<24x128xf32>
    %237 = arith.addf %228, %236 : vector<24x128xf32>
    %238 = vector.extract_strided_slice %133 {offsets = [0, 0], sizes = [24, 128], strides = [1, 1]} : vector<32x128xf32> to vector<24x128xf32>
    %c49 = arith.constant 49 : index
    %c0_87 = arith.constant 0 : index
    %239 = vector.load %arg2[%c49, %c0_87] : memref<100x128xf32, #tpu.memory_space<vmem>>, vector<1x128xf32>
    %240 = vector.broadcast %239 : vector<1x128xf32> to vector<24x128xf32>
    %241 = arith.mulf %238, %240 : vector<24x128xf32>
    %242 = arith.addf %233, %241 : vector<24x128xf32>
    %c0_88 = arith.constant 0 : index
    %c2_89 = arith.constant 2 : index
    %c0_90 = arith.constant 0 : index
    %c2_91 = arith.constant 2 : index
    %243 = vector.load %arg5[%c0_88, %c2_89, %c0_90, %c2_91] : memref<2x4x32x34xf32, #tpu.memory_space<vmem>>, vector<1x1x32x32xf32>
    %244 = vector.shape_cast %243 : vector<1x1x32x32xf32> to vector<32x32xf32>
    %245 = tpu.concatenate %244, %244, %244, %244 in 1 : vector<32x32xf32>, vector<32x32xf32>, vector<32x32xf32>, vector<32x32xf32> -> vector<32x128xf32>
    %c0_92 = arith.constant 0 : index
    %c2_93 = arith.constant 2 : index
    %c0_94 = arith.constant 0 : index
    %c1_95 = arith.constant 1 : index
    %246 = vector.load %arg5[%c0_92, %c2_93, %c0_94, %c1_95] : memref<2x4x32x34xf32, #tpu.memory_space<vmem>>, vector<1x1x32x32xf32>
    %247 = vector.shape_cast %246 : vector<1x1x32x32xf32> to vector<32x32xf32>
    %248 = tpu.concatenate %247, %247, %247, %247 in 1 : vector<32x32xf32>, vector<32x32xf32>, vector<32x32xf32>, vector<32x32xf32> -> vector<32x128xf32>
    %c0_96 = arith.constant 0 : index
    %c2_97 = arith.constant 2 : index
    %c0_98 = arith.constant 0 : index
    %c0_99 = arith.constant 0 : index
    %249 = vector.load %arg5[%c0_96, %c2_97, %c0_98, %c0_99] : memref<2x4x32x34xf32, #tpu.memory_space<vmem>>, vector<1x1x32x32xf32>
    %250 = vector.shape_cast %249 : vector<1x1x32x32xf32> to vector<32x32xf32>
    %251 = tpu.concatenate %250, %250, %250, %250 in 1 : vector<32x32xf32>, vector<32x32xf32>, vector<32x32xf32>, vector<32x32xf32> -> vector<32x128xf32>
    %252 = vector.extract_strided_slice %245 {offsets = [2, 0], sizes = [24, 128], strides = [1, 1]} : vector<32x128xf32> to vector<24x128xf32>
    %c50 = arith.constant 50 : index
    %c0_100 = arith.constant 0 : index
    %253 = vector.load %arg2[%c50, %c0_100] : memref<100x128xf32, #tpu.memory_space<vmem>>, vector<1x128xf32>
    %254 = vector.broadcast %253 : vector<1x128xf32> to vector<24x128xf32>
    %255 = arith.mulf %252, %254 : vector<24x128xf32>
    %256 = arith.addf %242, %255 : vector<24x128xf32>
    %c51 = arith.constant 51 : index
    %c0_101 = arith.constant 0 : index
    %257 = vector.load %arg2[%c51, %c0_101] : memref<100x128xf32, #tpu.memory_space<vmem>>, vector<1x128xf32>
    %258 = vector.broadcast %257 : vector<1x128xf32> to vector<24x128xf32>
    %259 = arith.mulf %252, %258 : vector<24x128xf32>
    %260 = arith.addf %237, %259 : vector<24x128xf32>
    %c55 = arith.constant 55 : index
    %c0_102 = arith.constant 0 : index
    %261 = vector.load %arg2[%c55, %c0_102] : memref<100x128xf32, #tpu.memory_space<vmem>>, vector<1x128xf32>
    %262 = vector.broadcast %261 : vector<1x128xf32> to vector<24x128xf32>
    %263 = arith.mulf %252, %262 : vector<24x128xf32>
    %264 = arith.addf %219, %263 : vector<24x128xf32>
    %c56 = arith.constant 56 : index
    %c0_103 = arith.constant 0 : index
    %265 = vector.load %arg2[%c56, %c0_103] : memref<100x128xf32, #tpu.memory_space<vmem>>, vector<1x128xf32>
    %266 = vector.broadcast %265 : vector<1x128xf32> to vector<24x128xf32>
    %267 = arith.mulf %252, %266 : vector<24x128xf32>
    %268 = arith.addf %210, %267 : vector<24x128xf32>
    %269 = vector.extract_strided_slice %248 {offsets = [2, 0], sizes = [24, 128], strides = [1, 1]} : vector<32x128xf32> to vector<24x128xf32>
    %c52 = arith.constant 52 : index
    %c0_104 = arith.constant 0 : index
    %270 = vector.load %arg2[%c52, %c0_104] : memref<100x128xf32, #tpu.memory_space<vmem>>, vector<1x128xf32>
    %271 = vector.broadcast %270 : vector<1x128xf32> to vector<24x128xf32>
    %272 = arith.mulf %269, %271 : vector<24x128xf32>
    %273 = arith.addf %256, %272 : vector<24x128xf32>
    %c53 = arith.constant 53 : index
    %c0_105 = arith.constant 0 : index
    %274 = vector.load %arg2[%c53, %c0_105] : memref<100x128xf32, #tpu.memory_space<vmem>>, vector<1x128xf32>
    %275 = vector.broadcast %274 : vector<1x128xf32> to vector<24x128xf32>
    %276 = arith.mulf %269, %275 : vector<24x128xf32>
    %277 = arith.addf %260, %276 : vector<24x128xf32>
    %c57 = arith.constant 57 : index
    %c0_106 = arith.constant 0 : index
    %278 = vector.load %arg2[%c57, %c0_106] : memref<100x128xf32, #tpu.memory_space<vmem>>, vector<1x128xf32>
    %279 = vector.broadcast %278 : vector<1x128xf32> to vector<24x128xf32>
    %280 = arith.mulf %269, %279 : vector<24x128xf32>
    %281 = arith.addf %264, %280 : vector<24x128xf32>
    %c58 = arith.constant 58 : index
    %c0_107 = arith.constant 0 : index
    %282 = vector.load %arg2[%c58, %c0_107] : memref<100x128xf32, #tpu.memory_space<vmem>>, vector<1x128xf32>
    %283 = vector.broadcast %282 : vector<1x128xf32> to vector<24x128xf32>
    %284 = arith.mulf %269, %283 : vector<24x128xf32>
    %285 = arith.addf %268, %284 : vector<24x128xf32>
    %286 = vector.extract_strided_slice %251 {offsets = [2, 0], sizes = [24, 128], strides = [1, 1]} : vector<32x128xf32> to vector<24x128xf32>
    %c54 = arith.constant 54 : index
    %c0_108 = arith.constant 0 : index
    %287 = vector.load %arg2[%c54, %c0_108] : memref<100x128xf32, #tpu.memory_space<vmem>>, vector<1x128xf32>
    %288 = vector.broadcast %287 : vector<1x128xf32> to vector<24x128xf32>
    %289 = arith.mulf %286, %288 : vector<24x128xf32>
    %290 = arith.addf %273, %289 : vector<24x128xf32>
    %c59 = arith.constant 59 : index
    %c0_109 = arith.constant 0 : index
    %291 = vector.load %arg2[%c59, %c0_109] : memref<100x128xf32, #tpu.memory_space<vmem>>, vector<1x128xf32>
    %292 = vector.broadcast %291 : vector<1x128xf32> to vector<24x128xf32>
    %293 = arith.mulf %286, %292 : vector<24x128xf32>
    %294 = arith.addf %281, %293 : vector<24x128xf32>
    %295 = vector.extract_strided_slice %245 {offsets = [1, 0], sizes = [24, 128], strides = [1, 1]} : vector<32x128xf32> to vector<24x128xf32>
    %c60 = arith.constant 60 : index
    %c0_110 = arith.constant 0 : index
    %296 = vector.load %arg2[%c60, %c0_110] : memref<100x128xf32, #tpu.memory_space<vmem>>, vector<1x128xf32>
    %297 = vector.broadcast %296 : vector<1x128xf32> to vector<24x128xf32>
    %298 = arith.mulf %295, %297 : vector<24x128xf32>
    %299 = arith.addf %290, %298 : vector<24x128xf32>
    %c61 = arith.constant 61 : index
    %c0_111 = arith.constant 0 : index
    %300 = vector.load %arg2[%c61, %c0_111] : memref<100x128xf32, #tpu.memory_space<vmem>>, vector<1x128xf32>
    %301 = vector.broadcast %300 : vector<1x128xf32> to vector<24x128xf32>
    %302 = arith.mulf %295, %301 : vector<24x128xf32>
    %303 = arith.addf %277, %302 : vector<24x128xf32>
    %c65 = arith.constant 65 : index
    %c0_112 = arith.constant 0 : index
    %304 = vector.load %arg2[%c65, %c0_112] : memref<100x128xf32, #tpu.memory_space<vmem>>, vector<1x128xf32>
    %305 = vector.broadcast %304 : vector<1x128xf32> to vector<24x128xf32>
    %306 = arith.mulf %295, %305 : vector<24x128xf32>
    %307 = arith.addf %294, %306 : vector<24x128xf32>
    %c66 = arith.constant 66 : index
    %c0_113 = arith.constant 0 : index
    %308 = vector.load %arg2[%c66, %c0_113] : memref<100x128xf32, #tpu.memory_space<vmem>>, vector<1x128xf32>
    %309 = vector.broadcast %308 : vector<1x128xf32> to vector<24x128xf32>
    %310 = arith.mulf %295, %309 : vector<24x128xf32>
    %311 = arith.addf %285, %310 : vector<24x128xf32>
    %312 = vector.extract_strided_slice %248 {offsets = [1, 0], sizes = [24, 128], strides = [1, 1]} : vector<32x128xf32> to vector<24x128xf32>
    %c62 = arith.constant 62 : index
    %c0_114 = arith.constant 0 : index
    %313 = vector.load %arg2[%c62, %c0_114] : memref<100x128xf32, #tpu.memory_space<vmem>>, vector<1x128xf32>
    %314 = vector.broadcast %313 : vector<1x128xf32> to vector<24x128xf32>
    %315 = arith.mulf %312, %314 : vector<24x128xf32>
    %316 = arith.addf %299, %315 : vector<24x128xf32>
    %c63 = arith.constant 63 : index
    %c0_115 = arith.constant 0 : index
    %317 = vector.load %arg2[%c63, %c0_115] : memref<100x128xf32, #tpu.memory_space<vmem>>, vector<1x128xf32>
    %318 = vector.broadcast %317 : vector<1x128xf32> to vector<24x128xf32>
    %319 = arith.mulf %312, %318 : vector<24x128xf32>
    %320 = arith.addf %303, %319 : vector<24x128xf32>
    %c67 = arith.constant 67 : index
    %c0_116 = arith.constant 0 : index
    %321 = vector.load %arg2[%c67, %c0_116] : memref<100x128xf32, #tpu.memory_space<vmem>>, vector<1x128xf32>
    %322 = vector.broadcast %321 : vector<1x128xf32> to vector<24x128xf32>
    %323 = arith.mulf %312, %322 : vector<24x128xf32>
    %324 = arith.addf %307, %323 : vector<24x128xf32>
    %c68 = arith.constant 68 : index
    %c0_117 = arith.constant 0 : index
    %325 = vector.load %arg2[%c68, %c0_117] : memref<100x128xf32, #tpu.memory_space<vmem>>, vector<1x128xf32>
    %326 = vector.broadcast %325 : vector<1x128xf32> to vector<24x128xf32>
    %327 = arith.mulf %312, %326 : vector<24x128xf32>
    %328 = arith.addf %311, %327 : vector<24x128xf32>
    %329 = vector.extract_strided_slice %251 {offsets = [1, 0], sizes = [24, 128], strides = [1, 1]} : vector<32x128xf32> to vector<24x128xf32>
    %c64 = arith.constant 64 : index
    %c0_118 = arith.constant 0 : index
    %330 = vector.load %arg2[%c64, %c0_118] : memref<100x128xf32, #tpu.memory_space<vmem>>, vector<1x128xf32>
    %331 = vector.broadcast %330 : vector<1x128xf32> to vector<24x128xf32>
    %332 = arith.mulf %329, %331 : vector<24x128xf32>
    %333 = arith.addf %316, %332 : vector<24x128xf32>
    %c69 = arith.constant 69 : index
    %c0_119 = arith.constant 0 : index
    %334 = vector.load %arg2[%c69, %c0_119] : memref<100x128xf32, #tpu.memory_space<vmem>>, vector<1x128xf32>
    %335 = vector.broadcast %334 : vector<1x128xf32> to vector<24x128xf32>
    %336 = arith.mulf %329, %335 : vector<24x128xf32>
    %337 = arith.addf %324, %336 : vector<24x128xf32>
    %338 = vector.extract_strided_slice %245 {offsets = [0, 0], sizes = [24, 128], strides = [1, 1]} : vector<32x128xf32> to vector<24x128xf32>
    %c70 = arith.constant 70 : index
    %c0_120 = arith.constant 0 : index
    %339 = vector.load %arg2[%c70, %c0_120] : memref<100x128xf32, #tpu.memory_space<vmem>>, vector<1x128xf32>
    %340 = vector.broadcast %339 : vector<1x128xf32> to vector<24x128xf32>
    %341 = arith.mulf %338, %340 : vector<24x128xf32>
    %342 = arith.addf %333, %341 : vector<24x128xf32>
    %c71 = arith.constant 71 : index
    %c0_121 = arith.constant 0 : index
    %343 = vector.load %arg2[%c71, %c0_121] : memref<100x128xf32, #tpu.memory_space<vmem>>, vector<1x128xf32>
    %344 = vector.broadcast %343 : vector<1x128xf32> to vector<24x128xf32>
    %345 = arith.mulf %338, %344 : vector<24x128xf32>
    %346 = arith.addf %320, %345 : vector<24x128xf32>
    %347 = vector.extract_strided_slice %248 {offsets = [0, 0], sizes = [24, 128], strides = [1, 1]} : vector<32x128xf32> to vector<24x128xf32>
    %c72 = arith.constant 72 : index
    %c0_122 = arith.constant 0 : index
    %348 = vector.load %arg2[%c72, %c0_122] : memref<100x128xf32, #tpu.memory_space<vmem>>, vector<1x128xf32>
    %349 = vector.broadcast %348 : vector<1x128xf32> to vector<24x128xf32>
    %350 = arith.mulf %347, %349 : vector<24x128xf32>
    %351 = arith.addf %342, %350 : vector<24x128xf32>
    %c73 = arith.constant 73 : index
    %c0_123 = arith.constant 0 : index
    %352 = vector.load %arg2[%c73, %c0_123] : memref<100x128xf32, #tpu.memory_space<vmem>>, vector<1x128xf32>
    %353 = vector.broadcast %352 : vector<1x128xf32> to vector<24x128xf32>
    %354 = arith.mulf %347, %353 : vector<24x128xf32>
    %355 = arith.addf %346, %354 : vector<24x128xf32>
    %356 = vector.extract_strided_slice %251 {offsets = [0, 0], sizes = [24, 128], strides = [1, 1]} : vector<32x128xf32> to vector<24x128xf32>
    %c74 = arith.constant 74 : index
    %c0_124 = arith.constant 0 : index
    %357 = vector.load %arg2[%c74, %c0_124] : memref<100x128xf32, #tpu.memory_space<vmem>>, vector<1x128xf32>
    %358 = vector.broadcast %357 : vector<1x128xf32> to vector<24x128xf32>
    %359 = arith.mulf %356, %358 : vector<24x128xf32>
    %360 = arith.addf %351, %359 : vector<24x128xf32>
    %c0_125 = arith.constant 0 : index
    %c3_126 = arith.constant 3 : index
    %c0_127 = arith.constant 0 : index
    %c2_128 = arith.constant 2 : index
    %361 = vector.load %arg5[%c0_125, %c3_126, %c0_127, %c2_128] : memref<2x4x32x34xf32, #tpu.memory_space<vmem>>, vector<1x1x32x32xf32>
    %362 = vector.shape_cast %361 : vector<1x1x32x32xf32> to vector<32x32xf32>
    %363 = tpu.concatenate %362, %362, %362, %362 in 1 : vector<32x32xf32>, vector<32x32xf32>, vector<32x32xf32>, vector<32x32xf32> -> vector<32x128xf32>
    %c0_129 = arith.constant 0 : index
    %c3_130 = arith.constant 3 : index
    %c0_131 = arith.constant 0 : index
    %c1_132 = arith.constant 1 : index
    %364 = vector.load %arg5[%c0_129, %c3_130, %c0_131, %c1_132] : memref<2x4x32x34xf32, #tpu.memory_space<vmem>>, vector<1x1x32x32xf32>
    %365 = vector.shape_cast %364 : vector<1x1x32x32xf32> to vector<32x32xf32>
    %366 = tpu.concatenate %365, %365, %365, %365 in 1 : vector<32x32xf32>, vector<32x32xf32>, vector<32x32xf32>, vector<32x32xf32> -> vector<32x128xf32>
    %c0_133 = arith.constant 0 : index
    %c3_134 = arith.constant 3 : index
    %c0_135 = arith.constant 0 : index
    %c0_136 = arith.constant 0 : index
    %367 = vector.load %arg5[%c0_133, %c3_134, %c0_135, %c0_136] : memref<2x4x32x34xf32, #tpu.memory_space<vmem>>, vector<1x1x32x32xf32>
    %368 = vector.shape_cast %367 : vector<1x1x32x32xf32> to vector<32x32xf32>
    %369 = tpu.concatenate %368, %368, %368, %368 in 1 : vector<32x32xf32>, vector<32x32xf32>, vector<32x32xf32>, vector<32x32xf32> -> vector<32x128xf32>
    %370 = vector.extract_strided_slice %363 {offsets = [2, 0], sizes = [24, 128], strides = [1, 1]} : vector<32x128xf32> to vector<24x128xf32>
    %c75 = arith.constant 75 : index
    %c0_137 = arith.constant 0 : index
    %371 = vector.load %arg2[%c75, %c0_137] : memref<100x128xf32, #tpu.memory_space<vmem>>, vector<1x128xf32>
    %372 = vector.broadcast %371 : vector<1x128xf32> to vector<24x128xf32>
    %373 = arith.mulf %370, %372 : vector<24x128xf32>
    %374 = arith.addf %360, %373 : vector<24x128xf32>
    %c76 = arith.constant 76 : index
    %c0_138 = arith.constant 0 : index
    %375 = vector.load %arg2[%c76, %c0_138] : memref<100x128xf32, #tpu.memory_space<vmem>>, vector<1x128xf32>
    %376 = vector.broadcast %375 : vector<1x128xf32> to vector<24x128xf32>
    %377 = arith.mulf %370, %376 : vector<24x128xf32>
    %378 = arith.addf %355, %377 : vector<24x128xf32>
    %c80 = arith.constant 80 : index
    %c0_139 = arith.constant 0 : index
    %379 = vector.load %arg2[%c80, %c0_139] : memref<100x128xf32, #tpu.memory_space<vmem>>, vector<1x128xf32>
    %380 = vector.broadcast %379 : vector<1x128xf32> to vector<24x128xf32>
    %381 = arith.mulf %370, %380 : vector<24x128xf32>
    %382 = arith.addf %337, %381 : vector<24x128xf32>
    %c81 = arith.constant 81 : index
    %c0_140 = arith.constant 0 : index
    %383 = vector.load %arg2[%c81, %c0_140] : memref<100x128xf32, #tpu.memory_space<vmem>>, vector<1x128xf32>
    %384 = vector.broadcast %383 : vector<1x128xf32> to vector<24x128xf32>
    %385 = arith.mulf %370, %384 : vector<24x128xf32>
    %386 = arith.addf %328, %385 : vector<24x128xf32>
    %387 = vector.extract_strided_slice %366 {offsets = [2, 0], sizes = [24, 128], strides = [1, 1]} : vector<32x128xf32> to vector<24x128xf32>
    %c77 = arith.constant 77 : index
    %c0_141 = arith.constant 0 : index
    %388 = vector.load %arg2[%c77, %c0_141] : memref<100x128xf32, #tpu.memory_space<vmem>>, vector<1x128xf32>
    %389 = vector.broadcast %388 : vector<1x128xf32> to vector<24x128xf32>
    %390 = arith.mulf %387, %389 : vector<24x128xf32>
    %391 = arith.addf %374, %390 : vector<24x128xf32>
    %c78 = arith.constant 78 : index
    %c0_142 = arith.constant 0 : index
    %392 = vector.load %arg2[%c78, %c0_142] : memref<100x128xf32, #tpu.memory_space<vmem>>, vector<1x128xf32>
    %393 = vector.broadcast %392 : vector<1x128xf32> to vector<24x128xf32>
    %394 = arith.mulf %387, %393 : vector<24x128xf32>
    %395 = arith.addf %378, %394 : vector<24x128xf32>
    %c82 = arith.constant 82 : index
    %c0_143 = arith.constant 0 : index
    %396 = vector.load %arg2[%c82, %c0_143] : memref<100x128xf32, #tpu.memory_space<vmem>>, vector<1x128xf32>
    %397 = vector.broadcast %396 : vector<1x128xf32> to vector<24x128xf32>
    %398 = arith.mulf %387, %397 : vector<24x128xf32>
    %399 = arith.addf %382, %398 : vector<24x128xf32>
    %c83 = arith.constant 83 : index
    %c0_144 = arith.constant 0 : index
    %400 = vector.load %arg2[%c83, %c0_144] : memref<100x128xf32, #tpu.memory_space<vmem>>, vector<1x128xf32>
    %401 = vector.broadcast %400 : vector<1x128xf32> to vector<24x128xf32>
    %402 = arith.mulf %387, %401 : vector<24x128xf32>
    %403 = arith.addf %386, %402 : vector<24x128xf32>
    %404 = vector.extract_strided_slice %369 {offsets = [2, 0], sizes = [24, 128], strides = [1, 1]} : vector<32x128xf32> to vector<24x128xf32>
    %c79 = arith.constant 79 : index
    %c0_145 = arith.constant 0 : index
    %405 = vector.load %arg2[%c79, %c0_145] : memref<100x128xf32, #tpu.memory_space<vmem>>, vector<1x128xf32>
    %406 = vector.broadcast %405 : vector<1x128xf32> to vector<24x128xf32>
    %407 = arith.mulf %404, %406 : vector<24x128xf32>
    %408 = arith.addf %391, %407 : vector<24x128xf32>
    %c84 = arith.constant 84 : index
    %c0_146 = arith.constant 0 : index
    %409 = vector.load %arg2[%c84, %c0_146] : memref<100x128xf32, #tpu.memory_space<vmem>>, vector<1x128xf32>
    %410 = vector.broadcast %409 : vector<1x128xf32> to vector<24x128xf32>
    %411 = arith.mulf %404, %410 : vector<24x128xf32>
    %412 = arith.addf %399, %411 : vector<24x128xf32>
    %413 = vector.extract_strided_slice %363 {offsets = [1, 0], sizes = [24, 128], strides = [1, 1]} : vector<32x128xf32> to vector<24x128xf32>
    %c85 = arith.constant 85 : index
    %c0_147 = arith.constant 0 : index
    %414 = vector.load %arg2[%c85, %c0_147] : memref<100x128xf32, #tpu.memory_space<vmem>>, vector<1x128xf32>
    %415 = vector.broadcast %414 : vector<1x128xf32> to vector<24x128xf32>
    %416 = arith.mulf %413, %415 : vector<24x128xf32>
    %417 = arith.addf %408, %416 : vector<24x128xf32>
    %c86 = arith.constant 86 : index
    %c0_148 = arith.constant 0 : index
    %418 = vector.load %arg2[%c86, %c0_148] : memref<100x128xf32, #tpu.memory_space<vmem>>, vector<1x128xf32>
    %419 = vector.broadcast %418 : vector<1x128xf32> to vector<24x128xf32>
    %420 = arith.mulf %413, %419 : vector<24x128xf32>
    %421 = arith.addf %395, %420 : vector<24x128xf32>
    %c90 = arith.constant 90 : index
    %c0_149 = arith.constant 0 : index
    %422 = vector.load %arg2[%c90, %c0_149] : memref<100x128xf32, #tpu.memory_space<vmem>>, vector<1x128xf32>
    %423 = vector.broadcast %422 : vector<1x128xf32> to vector<24x128xf32>
    %424 = arith.mulf %413, %423 : vector<24x128xf32>
    %425 = arith.addf %412, %424 : vector<24x128xf32>
    %c91 = arith.constant 91 : index
    %c0_150 = arith.constant 0 : index
    %426 = vector.load %arg2[%c91, %c0_150] : memref<100x128xf32, #tpu.memory_space<vmem>>, vector<1x128xf32>
    %427 = vector.broadcast %426 : vector<1x128xf32> to vector<24x128xf32>
    %428 = arith.mulf %413, %427 : vector<24x128xf32>
    %429 = arith.addf %403, %428 : vector<24x128xf32>
    %430 = vector.extract_strided_slice %366 {offsets = [1, 0], sizes = [24, 128], strides = [1, 1]} : vector<32x128xf32> to vector<24x128xf32>
    %c87 = arith.constant 87 : index
    %c0_151 = arith.constant 0 : index
    %431 = vector.load %arg2[%c87, %c0_151] : memref<100x128xf32, #tpu.memory_space<vmem>>, vector<1x128xf32>
    %432 = vector.broadcast %431 : vector<1x128xf32> to vector<24x128xf32>
    %433 = arith.mulf %430, %432 : vector<24x128xf32>
    %434 = arith.addf %417, %433 : vector<24x128xf32>
    %c88 = arith.constant 88 : index
    %c0_152 = arith.constant 0 : index
    %435 = vector.load %arg2[%c88, %c0_152] : memref<100x128xf32, #tpu.memory_space<vmem>>, vector<1x128xf32>
    %436 = vector.broadcast %435 : vector<1x128xf32> to vector<24x128xf32>
    %437 = arith.mulf %430, %436 : vector<24x128xf32>
    %438 = arith.addf %421, %437 : vector<24x128xf32>
    %c92 = arith.constant 92 : index
    %c0_153 = arith.constant 0 : index
    %439 = vector.load %arg2[%c92, %c0_153] : memref<100x128xf32, #tpu.memory_space<vmem>>, vector<1x128xf32>
    %440 = vector.broadcast %439 : vector<1x128xf32> to vector<24x128xf32>
    %441 = arith.mulf %430, %440 : vector<24x128xf32>
    %442 = arith.addf %425, %441 : vector<24x128xf32>
    %c93 = arith.constant 93 : index
    %c0_154 = arith.constant 0 : index
    %443 = vector.load %arg2[%c93, %c0_154] : memref<100x128xf32, #tpu.memory_space<vmem>>, vector<1x128xf32>
    %444 = vector.broadcast %443 : vector<1x128xf32> to vector<24x128xf32>
    %445 = arith.mulf %430, %444 : vector<24x128xf32>
    %446 = arith.addf %429, %445 : vector<24x128xf32>
    %447 = vector.extract_strided_slice %369 {offsets = [1, 0], sizes = [24, 128], strides = [1, 1]} : vector<32x128xf32> to vector<24x128xf32>
    %c89 = arith.constant 89 : index
    %c0_155 = arith.constant 0 : index
    %448 = vector.load %arg2[%c89, %c0_155] : memref<100x128xf32, #tpu.memory_space<vmem>>, vector<1x128xf32>
    %449 = vector.broadcast %448 : vector<1x128xf32> to vector<24x128xf32>
    %450 = arith.mulf %447, %449 : vector<24x128xf32>
    %451 = arith.addf %434, %450 : vector<24x128xf32>
    %c94 = arith.constant 94 : index
    %c0_156 = arith.constant 0 : index
    %452 = vector.load %arg2[%c94, %c0_156] : memref<100x128xf32, #tpu.memory_space<vmem>>, vector<1x128xf32>
    %453 = vector.broadcast %452 : vector<1x128xf32> to vector<24x128xf32>
    %454 = arith.mulf %447, %453 : vector<24x128xf32>
    %455 = arith.addf %442, %454 : vector<24x128xf32>
    %456 = vector.extract_strided_slice %363 {offsets = [0, 0], sizes = [24, 128], strides = [1, 1]} : vector<32x128xf32> to vector<24x128xf32>
    %c95 = arith.constant 95 : index
    %c0_157 = arith.constant 0 : index
    %457 = vector.load %arg2[%c95, %c0_157] : memref<100x128xf32, #tpu.memory_space<vmem>>, vector<1x128xf32>
    %458 = vector.broadcast %457 : vector<1x128xf32> to vector<24x128xf32>
    %459 = arith.mulf %456, %458 : vector<24x128xf32>
    %460 = arith.addf %451, %459 : vector<24x128xf32>
    %c96 = arith.constant 96 : index
    %c0_158 = arith.constant 0 : index
    %461 = vector.load %arg2[%c96, %c0_158] : memref<100x128xf32, #tpu.memory_space<vmem>>, vector<1x128xf32>
    %462 = vector.broadcast %461 : vector<1x128xf32> to vector<24x128xf32>
    %463 = arith.mulf %456, %462 : vector<24x128xf32>
    %464 = arith.addf %438, %463 : vector<24x128xf32>
    %465 = vector.extract_strided_slice %366 {offsets = [0, 0], sizes = [24, 128], strides = [1, 1]} : vector<32x128xf32> to vector<24x128xf32>
    %c97 = arith.constant 97 : index
    %c0_159 = arith.constant 0 : index
    %466 = vector.load %arg2[%c97, %c0_159] : memref<100x128xf32, #tpu.memory_space<vmem>>, vector<1x128xf32>
    %467 = vector.broadcast %466 : vector<1x128xf32> to vector<24x128xf32>
    %468 = arith.mulf %465, %467 : vector<24x128xf32>
    %469 = arith.addf %460, %468 : vector<24x128xf32>
    %c98 = arith.constant 98 : index
    %c0_160 = arith.constant 0 : index
    %470 = vector.load %arg2[%c98, %c0_160] : memref<100x128xf32, #tpu.memory_space<vmem>>, vector<1x128xf32>
    %471 = vector.broadcast %470 : vector<1x128xf32> to vector<24x128xf32>
    %472 = arith.mulf %465, %471 : vector<24x128xf32>
    %473 = arith.addf %464, %472 : vector<24x128xf32>
    %474 = vector.extract_strided_slice %369 {offsets = [0, 0], sizes = [24, 128], strides = [1, 1]} : vector<32x128xf32> to vector<24x128xf32>
    %c99 = arith.constant 99 : index
    %c0_161 = arith.constant 0 : index
    %475 = vector.load %arg2[%c99, %c0_161] : memref<100x128xf32, #tpu.memory_space<vmem>>, vector<1x128xf32>
    %476 = vector.broadcast %475 : vector<1x128xf32> to vector<24x128xf32>
    %477 = arith.mulf %474, %476 : vector<24x128xf32>
    %478 = arith.addf %469, %477 : vector<24x128xf32>
    %c0_162 = arith.constant 0 : index
    %c0_163 = arith.constant 0 : index
    %c0_164 = arith.constant 0 : index
    %c0_165 = arith.constant 0 : index
    %c0_166 = arith.constant 0 : index
    %479 = vector.load %arg4[%c0_162, %c0_163, %c0_164, %c0_165, %c0_166] : memref<2x2x2x24x128xf32, #tpu.memory_space<vmem>>, vector<1x1x1x24x128xf32>
    %480 = vector.shape_cast %479 : vector<1x1x1x24x128xf32> to vector<24x128xf32>
    %481 = vector.shape_cast %478 : vector<24x128xf32> to vector<1x1x1x24x128xf32>
    tpu.vector_store %arg4[%c0_162, %c0_163, %c0_164, %c0_165, %c0_166], %481 {strides = array<i32>} : memref<2x2x2x24x128xf32, #tpu.memory_space<vmem>>, vector<1x1x1x24x128xf32>,
    %c0_167 = arith.constant 0 : index
    %c0_168 = arith.constant 0 : index
    %c1_169 = arith.constant 1 : index
    %c0_170 = arith.constant 0 : index
    %c0_171 = arith.constant 0 : index
    %482 = vector.load %arg4[%c0_167, %c0_168, %c1_169, %c0_170, %c0_171] : memref<2x2x2x24x128xf32, #tpu.memory_space<vmem>>, vector<1x1x1x24x128xf32>
    %483 = vector.shape_cast %482 : vector<1x1x1x24x128xf32> to vector<24x128xf32>
    %484 = vector.shape_cast %473 : vector<24x128xf32> to vector<1x1x1x24x128xf32>
    tpu.vector_store %arg4[%c0_167, %c0_168, %c1_169, %c0_170, %c0_171], %484 {strides = array<i32>} : memref<2x2x2x24x128xf32, #tpu.memory_space<vmem>>, vector<1x1x1x24x128xf32>,
    %c0_172 = arith.constant 0 : index
    %c1_173 = arith.constant 1 : index
    %c0_174 = arith.constant 0 : index
    %c0_175 = arith.constant 0 : index
    %c0_176 = arith.constant 0 : index
    %485 = vector.load %arg4[%c0_172, %c1_173, %c0_174, %c0_175, %c0_176] : memref<2x2x2x24x128xf32, #tpu.memory_space<vmem>>, vector<1x1x1x24x128xf32>
    %486 = vector.shape_cast %485 : vector<1x1x1x24x128xf32> to vector<24x128xf32>
    %487 = vector.shape_cast %455 : vector<24x128xf32> to vector<1x1x1x24x128xf32>
    tpu.vector_store %arg4[%c0_172, %c1_173, %c0_174, %c0_175, %c0_176], %487 {strides = array<i32>} : memref<2x2x2x24x128xf32, #tpu.memory_space<vmem>>, vector<1x1x1x24x128xf32>,
    %c0_177 = arith.constant 0 : index
    %c1_178 = arith.constant 1 : index
    %c1_179 = arith.constant 1 : index
    %c0_180 = arith.constant 0 : index
    %c0_181 = arith.constant 0 : index
    %488 = vector.load %arg4[%c0_177, %c1_178, %c1_179, %c0_180, %c0_181] : memref<2x2x2x24x128xf32, #tpu.memory_space<vmem>>, vector<1x1x1x24x128xf32>
    %489 = vector.shape_cast %488 : vector<1x1x1x24x128xf32> to vector<24x128xf32>
    %490 = vector.shape_cast %446 : vector<24x128xf32> to vector<1x1x1x24x128xf32>
    tpu.vector_store %arg4[%c0_177, %c1_178, %c1_179, %c0_180, %c0_181], %490 {strides = array<i32>} : memref<2x2x2x24x128xf32, #tpu.memory_space<vmem>>, vector<1x1x1x24x128xf32>,
    %c1_182 = arith.constant 1 : index
    %c0_183 = arith.constant 0 : index
    %c0_184 = arith.constant 0 : index
    %c2_185 = arith.constant 2 : index
    %491 = vector.load %arg5[%c1_182, %c0_183, %c0_184, %c2_185] : memref<2x4x32x34xf32, #tpu.memory_space<vmem>>, vector<1x1x32x32xf32>
    %492 = vector.shape_cast %491 : vector<1x1x32x32xf32> to vector<32x32xf32>
    %493 = tpu.concatenate %492, %492, %492, %492 in 1 : vector<32x32xf32>, vector<32x32xf32>, vector<32x32xf32>, vector<32x32xf32> -> vector<32x128xf32>
    %c1_186 = arith.constant 1 : index
    %c0_187 = arith.constant 0 : index
    %c0_188 = arith.constant 0 : index
    %c1_189 = arith.constant 1 : index
    %494 = vector.load %arg5[%c1_186, %c0_187, %c0_188, %c1_189] : memref<2x4x32x34xf32, #tpu.memory_space<vmem>>, vector<1x1x32x32xf32>
    %495 = vector.shape_cast %494 : vector<1x1x32x32xf32> to vector<32x32xf32>
    %496 = tpu.concatenate %495, %495, %495, %495 in 1 : vector<32x32xf32>, vector<32x32xf32>, vector<32x32xf32>, vector<32x32xf32> -> vector<32x128xf32>
    %c1_190 = arith.constant 1 : index
    %c0_191 = arith.constant 0 : index
    %c0_192 = arith.constant 0 : index
    %c0_193 = arith.constant 0 : index
    %497 = vector.load %arg5[%c1_190, %c0_191, %c0_192, %c0_193] : memref<2x4x32x34xf32, #tpu.memory_space<vmem>>, vector<1x1x32x32xf32>
    %498 = vector.shape_cast %497 : vector<1x1x32x32xf32> to vector<32x32xf32>
    %499 = tpu.concatenate %498, %498, %498, %498 in 1 : vector<32x32xf32>, vector<32x32xf32>, vector<32x32xf32>, vector<32x32xf32> -> vector<32x128xf32>
    %500 = vector.extract_strided_slice %493 {offsets = [2, 0], sizes = [24, 128], strides = [1, 1]} : vector<32x128xf32> to vector<24x128xf32>
    %c0_194 = arith.constant 0 : index
    %c0_195 = arith.constant 0 : index
    %501 = vector.load %arg2[%c0_194, %c0_195] : memref<100x128xf32, #tpu.memory_space<vmem>>, vector<1x128xf32>
    %502 = vector.broadcast %501 : vector<1x128xf32> to vector<24x128xf32>
    %503 = arith.mulf %500, %502 : vector<24x128xf32>
    %504 = arith.addf %6, %503 : vector<24x128xf32>
    %c1_196 = arith.constant 1 : index
    %c0_197 = arith.constant 0 : index
    %505 = vector.load %arg2[%c1_196, %c0_197] : memref<100x128xf32, #tpu.memory_space<vmem>>, vector<1x128xf32>
    %506 = vector.broadcast %505 : vector<1x128xf32> to vector<24x128xf32>
    %507 = arith.mulf %500, %506 : vector<24x128xf32>
    %508 = arith.addf %6, %507 : vector<24x128xf32>
    %c5_198 = arith.constant 5 : index
    %c0_199 = arith.constant 0 : index
    %509 = vector.load %arg2[%c5_198, %c0_199] : memref<100x128xf32, #tpu.memory_space<vmem>>, vector<1x128xf32>
    %510 = vector.broadcast %509 : vector<1x128xf32> to vector<24x128xf32>
    %511 = arith.mulf %500, %510 : vector<24x128xf32>
    %512 = arith.addf %6, %511 : vector<24x128xf32>
    %c6_200 = arith.constant 6 : index
    %c0_201 = arith.constant 0 : index
    %513 = vector.load %arg2[%c6_200, %c0_201] : memref<100x128xf32, #tpu.memory_space<vmem>>, vector<1x128xf32>
    %514 = vector.broadcast %513 : vector<1x128xf32> to vector<24x128xf32>
    %515 = arith.mulf %500, %514 : vector<24x128xf32>
    %516 = arith.addf %6, %515 : vector<24x128xf32>
    %517 = vector.extract_strided_slice %496 {offsets = [2, 0], sizes = [24, 128], strides = [1, 1]} : vector<32x128xf32> to vector<24x128xf32>
    %c2_202 = arith.constant 2 : index
    %c0_203 = arith.constant 0 : index
    %518 = vector.load %arg2[%c2_202, %c0_203] : memref<100x128xf32, #tpu.memory_space<vmem>>, vector<1x128xf32>
    %519 = vector.broadcast %518 : vector<1x128xf32> to vector<24x128xf32>
    %520 = arith.mulf %517, %519 : vector<24x128xf32>
    %521 = arith.addf %504, %520 : vector<24x128xf32>
    %c3_204 = arith.constant 3 : index
    %c0_205 = arith.constant 0 : index
    %522 = vector.load %arg2[%c3_204, %c0_205] : memref<100x128xf32, #tpu.memory_space<vmem>>, vector<1x128xf32>
    %523 = vector.broadcast %522 : vector<1x128xf32> to vector<24x128xf32>
    %524 = arith.mulf %517, %523 : vector<24x128xf32>
    %525 = arith.addf %508, %524 : vector<24x128xf32>
    %c7_206 = arith.constant 7 : index
    %c0_207 = arith.constant 0 : index
    %526 = vector.load %arg2[%c7_206, %c0_207] : memref<100x128xf32, #tpu.memory_space<vmem>>, vector<1x128xf32>
    %527 = vector.broadcast %526 : vector<1x128xf32> to vector<24x128xf32>
    %528 = arith.mulf %517, %527 : vector<24x128xf32>
    %529 = arith.addf %512, %528 : vector<24x128xf32>
    %c8_208 = arith.constant 8 : index
    %c0_209 = arith.constant 0 : index
    %530 = vector.load %arg2[%c8_208, %c0_209] : memref<100x128xf32, #tpu.memory_space<vmem>>, vector<1x128xf32>
    %531 = vector.broadcast %530 : vector<1x128xf32> to vector<24x128xf32>
    %532 = arith.mulf %517, %531 : vector<24x128xf32>
    %533 = arith.addf %516, %532 : vector<24x128xf32>
    %534 = vector.extract_strided_slice %499 {offsets = [2, 0], sizes = [24, 128], strides = [1, 1]} : vector<32x128xf32> to vector<24x128xf32>
    %c4_210 = arith.constant 4 : index
    %c0_211 = arith.constant 0 : index
    %535 = vector.load %arg2[%c4_210, %c0_211] : memref<100x128xf32, #tpu.memory_space<vmem>>, vector<1x128xf32>
    %536 = vector.broadcast %535 : vector<1x128xf32> to vector<24x128xf32>
    %537 = arith.mulf %534, %536 : vector<24x128xf32>
    %538 = arith.addf %521, %537 : vector<24x128xf32>
    %c9_212 = arith.constant 9 : index
    %c0_213 = arith.constant 0 : index
    %539 = vector.load %arg2[%c9_212, %c0_213] : memref<100x128xf32, #tpu.memory_space<vmem>>, vector<1x128xf32>
    %540 = vector.broadcast %539 : vector<1x128xf32> to vector<24x128xf32>
    %541 = arith.mulf %534, %540 : vector<24x128xf32>
    %542 = arith.addf %529, %541 : vector<24x128xf32>
    %543 = vector.extract_strided_slice %493 {offsets = [1, 0], sizes = [24, 128], strides = [1, 1]} : vector<32x128xf32> to vector<24x128xf32>
    %c10_214 = arith.constant 10 : index
    %c0_215 = arith.constant 0 : index
    %544 = vector.load %arg2[%c10_214, %c0_215] : memref<100x128xf32, #tpu.memory_space<vmem>>, vector<1x128xf32>
    %545 = vector.broadcast %544 : vector<1x128xf32> to vector<24x128xf32>
    %546 = arith.mulf %543, %545 : vector<24x128xf32>
    %547 = arith.addf %538, %546 : vector<24x128xf32>
    %c11_216 = arith.constant 11 : index
    %c0_217 = arith.constant 0 : index
    %548 = vector.load %arg2[%c11_216, %c0_217] : memref<100x128xf32, #tpu.memory_space<vmem>>, vector<1x128xf32>
    %549 = vector.broadcast %548 : vector<1x128xf32> to vector<24x128xf32>
    %550 = arith.mulf %543, %549 : vector<24x128xf32>
    %551 = arith.addf %525, %550 : vector<24x128xf32>
    %c15_218 = arith.constant 15 : index
    %c0_219 = arith.constant 0 : index
    %552 = vector.load %arg2[%c15_218, %c0_219] : memref<100x128xf32, #tpu.memory_space<vmem>>, vector<1x128xf32>
    %553 = vector.broadcast %552 : vector<1x128xf32> to vector<24x128xf32>
    %554 = arith.mulf %543, %553 : vector<24x128xf32>
    %555 = arith.addf %542, %554 : vector<24x128xf32>
    %c16_220 = arith.constant 16 : index
    %c0_221 = arith.constant 0 : index
    %556 = vector.load %arg2[%c16_220, %c0_221] : memref<100x128xf32, #tpu.memory_space<vmem>>, vector<1x128xf32>
    %557 = vector.broadcast %556 : vector<1x128xf32> to vector<24x128xf32>
    %558 = arith.mulf %543, %557 : vector<24x128xf32>
    %559 = arith.addf %533, %558 : vector<24x128xf32>
    %560 = vector.extract_strided_slice %496 {offsets = [1, 0], sizes = [24, 128], strides = [1, 1]} : vector<32x128xf32> to vector<24x128xf32>
    %c12_222 = arith.constant 12 : index
    %c0_223 = arith.constant 0 : index
    %561 = vector.load %arg2[%c12_222, %c0_223] : memref<100x128xf32, #tpu.memory_space<vmem>>, vector<1x128xf32>
    %562 = vector.broadcast %561 : vector<1x128xf32> to vector<24x128xf32>
    %563 = arith.mulf %560, %562 : vector<24x128xf32>
    %564 = arith.addf %547, %563 : vector<24x128xf32>
    %c13_224 = arith.constant 13 : index
    %c0_225 = arith.constant 0 : index
    %565 = vector.load %arg2[%c13_224, %c0_225] : memref<100x128xf32, #tpu.memory_space<vmem>>, vector<1x128xf32>
    %566 = vector.broadcast %565 : vector<1x128xf32> to vector<24x128xf32>
    %567 = arith.mulf %560, %566 : vector<24x128xf32>
    %568 = arith.addf %551, %567 : vector<24x128xf32>
    %c17_226 = arith.constant 17 : index
    %c0_227 = arith.constant 0 : index
    %569 = vector.load %arg2[%c17_226, %c0_227] : memref<100x128xf32, #tpu.memory_space<vmem>>, vector<1x128xf32>
    %570 = vector.broadcast %569 : vector<1x128xf32> to vector<24x128xf32>
    %571 = arith.mulf %560, %570 : vector<24x128xf32>
    %572 = arith.addf %555, %571 : vector<24x128xf32>
    %c18_228 = arith.constant 18 : index
    %c0_229 = arith.constant 0 : index
    %573 = vector.load %arg2[%c18_228, %c0_229] : memref<100x128xf32, #tpu.memory_space<vmem>>, vector<1x128xf32>
    %574 = vector.broadcast %573 : vector<1x128xf32> to vector<24x128xf32>
    %575 = arith.mulf %560, %574 : vector<24x128xf32>
    %576 = arith.addf %559, %575 : vector<24x128xf32>
    %577 = vector.extract_strided_slice %499 {offsets = [1, 0], sizes = [24, 128], strides = [1, 1]} : vector<32x128xf32> to vector<24x128xf32>
    %c14_230 = arith.constant 14 : index
    %c0_231 = arith.constant 0 : index
    %578 = vector.load %arg2[%c14_230, %c0_231] : memref<100x128xf32, #tpu.memory_space<vmem>>, vector<1x128xf32>
    %579 = vector.broadcast %578 : vector<1x128xf32> to vector<24x128xf32>
    %580 = arith.mulf %577, %579 : vector<24x128xf32>
    %581 = arith.addf %564, %580 : vector<24x128xf32>
    %c19_232 = arith.constant 19 : index
    %c0_233 = arith.constant 0 : index
    %582 = vector.load %arg2[%c19_232, %c0_233] : memref<100x128xf32, #tpu.memory_space<vmem>>, vector<1x128xf32>
    %583 = vector.broadcast %582 : vector<1x128xf32> to vector<24x128xf32>
    %584 = arith.mulf %577, %583 : vector<24x128xf32>
    %585 = arith.addf %572, %584 : vector<24x128xf32>
    %586 = vector.extract_strided_slice %493 {offsets = [0, 0], sizes = [24, 128], strides = [1, 1]} : vector<32x128xf32> to vector<24x128xf32>
    %c20_234 = arith.constant 20 : index
    %c0_235 = arith.constant 0 : index
    %587 = vector.load %arg2[%c20_234, %c0_235] : memref<100x128xf32, #tpu.memory_space<vmem>>, vector<1x128xf32>
    %588 = vector.broadcast %587 : vector<1x128xf32> to vector<24x128xf32>
    %589 = arith.mulf %586, %588 : vector<24x128xf32>
    %590 = arith.addf %581, %589 : vector<24x128xf32>
    %c21_236 = arith.constant 21 : index
    %c0_237 = arith.constant 0 : index
    %591 = vector.load %arg2[%c21_236, %c0_237] : memref<100x128xf32, #tpu.memory_space<vmem>>, vector<1x128xf32>
    %592 = vector.broadcast %591 : vector<1x128xf32> to vector<24x128xf32>
    %593 = arith.mulf %586, %592 : vector<24x128xf32>
    %594 = arith.addf %568, %593 : vector<24x128xf32>
    %595 = vector.extract_strided_slice %496 {offsets = [0, 0], sizes = [24, 128], strides = [1, 1]} : vector<32x128xf32> to vector<24x128xf32>
    %c22_238 = arith.constant 22 : index
    %c0_239 = arith.constant 0 : index
    %596 = vector.load %arg2[%c22_238, %c0_239] : memref<100x128xf32, #tpu.memory_space<vmem>>, vector<1x128xf32>
    %597 = vector.broadcast %596 : vector<1x128xf32> to vector<24x128xf32>
    %598 = arith.mulf %595, %597 : vector<24x128xf32>
    %599 = arith.addf %590, %598 : vector<24x128xf32>
    %c23_240 = arith.constant 23 : index
    %c0_241 = arith.constant 0 : index
    %600 = vector.load %arg2[%c23_240, %c0_241] : memref<100x128xf32, #tpu.memory_space<vmem>>, vector<1x128xf32>
    %601 = vector.broadcast %600 : vector<1x128xf32> to vector<24x128xf32>
    %602 = arith.mulf %595, %601 : vector<24x128xf32>
    %603 = arith.addf %594, %602 : vector<24x128xf32>
    %604 = vector.extract_strided_slice %499 {offsets = [0, 0], sizes = [24, 128], strides = [1, 1]} : vector<32x128xf32> to vector<24x128xf32>
    %c24_242 = arith.constant 24 : index
    %c0_243 = arith.constant 0 : index
    %605 = vector.load %arg2[%c24_242, %c0_243] : memref<100x128xf32, #tpu.memory_space<vmem>>, vector<1x128xf32>
    %606 = vector.broadcast %605 : vector<1x128xf32> to vector<24x128xf32>
    %607 = arith.mulf %604, %606 : vector<24x128xf32>
    %608 = arith.addf %599, %607 : vector<24x128xf32>
    %c1_244 = arith.constant 1 : index
    %c1_245 = arith.constant 1 : index
    %c0_246 = arith.constant 0 : index
    %c2_247 = arith.constant 2 : index
    %609 = vector.load %arg5[%c1_244, %c1_245, %c0_246, %c2_247] : memref<2x4x32x34xf32, #tpu.memory_space<vmem>>, vector<1x1x32x32xf32>
    %610 = vector.shape_cast %609 : vector<1x1x32x32xf32> to vector<32x32xf32>
    %611 = tpu.concatenate %610, %610, %610, %610 in 1 : vector<32x32xf32>, vector<32x32xf32>, vector<32x32xf32>, vector<32x32xf32> -> vector<32x128xf32>
    %c1_248 = arith.constant 1 : index
    %c1_249 = arith.constant 1 : index
    %c0_250 = arith.constant 0 : index
    %c1_251 = arith.constant 1 : index
    %612 = vector.load %arg5[%c1_248, %c1_249, %c0_250, %c1_251] : memref<2x4x32x34xf32, #tpu.memory_space<vmem>>, vector<1x1x32x32xf32>
    %613 = vector.shape_cast %612 : vector<1x1x32x32xf32> to vector<32x32xf32>
    %614 = tpu.concatenate %613, %613, %613, %613 in 1 : vector<32x32xf32>, vector<32x32xf32>, vector<32x32xf32>, vector<32x32xf32> -> vector<32x128xf32>
    %c1_252 = arith.constant 1 : index
    %c1_253 = arith.constant 1 : index
    %c0_254 = arith.constant 0 : index
    %c0_255 = arith.constant 0 : index
    %615 = vector.load %arg5[%c1_252, %c1_253, %c0_254, %c0_255] : memref<2x4x32x34xf32, #tpu.memory_space<vmem>>, vector<1x1x32x32xf32>
    %616 = vector.shape_cast %615 : vector<1x1x32x32xf32> to vector<32x32xf32>
    %617 = tpu.concatenate %616, %616, %616, %616 in 1 : vector<32x32xf32>, vector<32x32xf32>, vector<32x32xf32>, vector<32x32xf32> -> vector<32x128xf32>
    %618 = vector.extract_strided_slice %611 {offsets = [2, 0], sizes = [24, 128], strides = [1, 1]} : vector<32x128xf32> to vector<24x128xf32>
    %c25_256 = arith.constant 25 : index
    %c0_257 = arith.constant 0 : index
    %619 = vector.load %arg2[%c25_256, %c0_257] : memref<100x128xf32, #tpu.memory_space<vmem>>, vector<1x128xf32>
    %620 = vector.broadcast %619 : vector<1x128xf32> to vector<24x128xf32>
    %621 = arith.mulf %618, %620 : vector<24x128xf32>
    %622 = arith.addf %608, %621 : vector<24x128xf32>
    %c26_258 = arith.constant 26 : index
    %c0_259 = arith.constant 0 : index
    %623 = vector.load %arg2[%c26_258, %c0_259] : memref<100x128xf32, #tpu.memory_space<vmem>>, vector<1x128xf32>
    %624 = vector.broadcast %623 : vector<1x128xf32> to vector<24x128xf32>
    %625 = arith.mulf %618, %624 : vector<24x128xf32>
    %626 = arith.addf %603, %625 : vector<24x128xf32>
    %c30_260 = arith.constant 30 : index
    %c0_261 = arith.constant 0 : index
    %627 = vector.load %arg2[%c30_260, %c0_261] : memref<100x128xf32, #tpu.memory_space<vmem>>, vector<1x128xf32>
    %628 = vector.broadcast %627 : vector<1x128xf32> to vector<24x128xf32>
    %629 = arith.mulf %618, %628 : vector<24x128xf32>
    %630 = arith.addf %585, %629 : vector<24x128xf32>
    %c31_262 = arith.constant 31 : index
    %c0_263 = arith.constant 0 : index
    %631 = vector.load %arg2[%c31_262, %c0_263] : memref<100x128xf32, #tpu.memory_space<vmem>>, vector<1x128xf32>
    %632 = vector.broadcast %631 : vector<1x128xf32> to vector<24x128xf32>
    %633 = arith.mulf %618, %632 : vector<24x128xf32>
    %634 = arith.addf %576, %633 : vector<24x128xf32>
    %635 = vector.extract_strided_slice %614 {offsets = [2, 0], sizes = [24, 128], strides = [1, 1]} : vector<32x128xf32> to vector<24x128xf32>
    %c27_264 = arith.constant 27 : index
    %c0_265 = arith.constant 0 : index
    %636 = vector.load %arg2[%c27_264, %c0_265] : memref<100x128xf32, #tpu.memory_space<vmem>>, vector<1x128xf32>
    %637 = vector.broadcast %636 : vector<1x128xf32> to vector<24x128xf32>
    %638 = arith.mulf %635, %637 : vector<24x128xf32>
    %639 = arith.addf %622, %638 : vector<24x128xf32>
    %c28_266 = arith.constant 28 : index
    %c0_267 = arith.constant 0 : index
    %640 = vector.load %arg2[%c28_266, %c0_267] : memref<100x128xf32, #tpu.memory_space<vmem>>, vector<1x128xf32>
    %641 = vector.broadcast %640 : vector<1x128xf32> to vector<24x128xf32>
    %642 = arith.mulf %635, %641 : vector<24x128xf32>
    %643 = arith.addf %626, %642 : vector<24x128xf32>
    %c32_268 = arith.constant 32 : index
    %c0_269 = arith.constant 0 : index
    %644 = vector.load %arg2[%c32_268, %c0_269] : memref<100x128xf32, #tpu.memory_space<vmem>>, vector<1x128xf32>
    %645 = vector.broadcast %644 : vector<1x128xf32> to vector<24x128xf32>
    %646 = arith.mulf %635, %645 : vector<24x128xf32>
    %647 = arith.addf %630, %646 : vector<24x128xf32>
    %c33_270 = arith.constant 33 : index
    %c0_271 = arith.constant 0 : index
    %648 = vector.load %arg2[%c33_270, %c0_271] : memref<100x128xf32, #tpu.memory_space<vmem>>, vector<1x128xf32>
    %649 = vector.broadcast %648 : vector<1x128xf32> to vector<24x128xf32>
    %650 = arith.mulf %635, %649 : vector<24x128xf32>
    %651 = arith.addf %634, %650 : vector<24x128xf32>
    %652 = vector.extract_strided_slice %617 {offsets = [2, 0], sizes = [24, 128], strides = [1, 1]} : vector<32x128xf32> to vector<24x128xf32>
    %c29_272 = arith.constant 29 : index
    %c0_273 = arith.constant 0 : index
    %653 = vector.load %arg2[%c29_272, %c0_273] : memref<100x128xf32, #tpu.memory_space<vmem>>, vector<1x128xf32>
    %654 = vector.broadcast %653 : vector<1x128xf32> to vector<24x128xf32>
    %655 = arith.mulf %652, %654 : vector<24x128xf32>
    %656 = arith.addf %639, %655 : vector<24x128xf32>
    %c34_274 = arith.constant 34 : index
    %c0_275 = arith.constant 0 : index
    %657 = vector.load %arg2[%c34_274, %c0_275] : memref<100x128xf32, #tpu.memory_space<vmem>>, vector<1x128xf32>
    %658 = vector.broadcast %657 : vector<1x128xf32> to vector<24x128xf32>
    %659 = arith.mulf %652, %658 : vector<24x128xf32>
    %660 = arith.addf %647, %659 : vector<24x128xf32>
    %661 = vector.extract_strided_slice %611 {offsets = [1, 0], sizes = [24, 128], strides = [1, 1]} : vector<32x128xf32> to vector<24x128xf32>
    %c35_276 = arith.constant 35 : index
    %c0_277 = arith.constant 0 : index
    %662 = vector.load %arg2[%c35_276, %c0_277] : memref<100x128xf32, #tpu.memory_space<vmem>>, vector<1x128xf32>
    %663 = vector.broadcast %662 : vector<1x128xf32> to vector<24x128xf32>
    %664 = arith.mulf %661, %663 : vector<24x128xf32>
    %665 = arith.addf %656, %664 : vector<24x128xf32>
    %c36_278 = arith.constant 36 : index
    %c0_279 = arith.constant 0 : index
    %666 = vector.load %arg2[%c36_278, %c0_279] : memref<100x128xf32, #tpu.memory_space<vmem>>, vector<1x128xf32>
    %667 = vector.broadcast %666 : vector<1x128xf32> to vector<24x128xf32>
    %668 = arith.mulf %661, %667 : vector<24x128xf32>
    %669 = arith.addf %643, %668 : vector<24x128xf32>
    %c40_280 = arith.constant 40 : index
    %c0_281 = arith.constant 0 : index
    %670 = vector.load %arg2[%c40_280, %c0_281] : memref<100x128xf32, #tpu.memory_space<vmem>>, vector<1x128xf32>
    %671 = vector.broadcast %670 : vector<1x128xf32> to vector<24x128xf32>
    %672 = arith.mulf %661, %671 : vector<24x128xf32>
    %673 = arith.addf %660, %672 : vector<24x128xf32>
    %c41_282 = arith.constant 41 : index
    %c0_283 = arith.constant 0 : index
    %674 = vector.load %arg2[%c41_282, %c0_283] : memref<100x128xf32, #tpu.memory_space<vmem>>, vector<1x128xf32>
    %675 = vector.broadcast %674 : vector<1x128xf32> to vector<24x128xf32>
    %676 = arith.mulf %661, %675 : vector<24x128xf32>
    %677 = arith.addf %651, %676 : vector<24x128xf32>
    %678 = vector.extract_strided_slice %614 {offsets = [1, 0], sizes = [24, 128], strides = [1, 1]} : vector<32x128xf32> to vector<24x128xf32>
    %c37_284 = arith.constant 37 : index
    %c0_285 = arith.constant 0 : index
    %679 = vector.load %arg2[%c37_284, %c0_285] : memref<100x128xf32, #tpu.memory_space<vmem>>, vector<1x128xf32>
    %680 = vector.broadcast %679 : vector<1x128xf32> to vector<24x128xf32>
    %681 = arith.mulf %678, %680 : vector<24x128xf32>
    %682 = arith.addf %665, %681 : vector<24x128xf32>
    %c38_286 = arith.constant 38 : index
    %c0_287 = arith.constant 0 : index
    %683 = vector.load %arg2[%c38_286, %c0_287] : memref<100x128xf32, #tpu.memory_space<vmem>>, vector<1x128xf32>
    %684 = vector.broadcast %683 : vector<1x128xf32> to vector<24x128xf32>
    %685 = arith.mulf %678, %684 : vector<24x128xf32>
    %686 = arith.addf %669, %685 : vector<24x128xf32>
    %c42_288 = arith.constant 42 : index
    %c0_289 = arith.constant 0 : index
    %687 = vector.load %arg2[%c42_288, %c0_289] : memref<100x128xf32, #tpu.memory_space<vmem>>, vector<1x128xf32>
    %688 = vector.broadcast %687 : vector<1x128xf32> to vector<24x128xf32>
    %689 = arith.mulf %678, %688 : vector<24x128xf32>
    %690 = arith.addf %673, %689 : vector<24x128xf32>
    %c43_290 = arith.constant 43 : index
    %c0_291 = arith.constant 0 : index
    %691 = vector.load %arg2[%c43_290, %c0_291] : memref<100x128xf32, #tpu.memory_space<vmem>>, vector<1x128xf32>
    %692 = vector.broadcast %691 : vector<1x128xf32> to vector<24x128xf32>
    %693 = arith.mulf %678, %692 : vector<24x128xf32>
    %694 = arith.addf %677, %693 : vector<24x128xf32>
    %695 = vector.extract_strided_slice %617 {offsets = [1, 0], sizes = [24, 128], strides = [1, 1]} : vector<32x128xf32> to vector<24x128xf32>
    %c39_292 = arith.constant 39 : index
    %c0_293 = arith.constant 0 : index
    %696 = vector.load %arg2[%c39_292, %c0_293] : memref<100x128xf32, #tpu.memory_space<vmem>>, vector<1x128xf32>
    %697 = vector.broadcast %696 : vector<1x128xf32> to vector<24x128xf32>
    %698 = arith.mulf %695, %697 : vector<24x128xf32>
    %699 = arith.addf %682, %698 : vector<24x128xf32>
    %c44_294 = arith.constant 44 : index
    %c0_295 = arith.constant 0 : index
    %700 = vector.load %arg2[%c44_294, %c0_295] : memref<100x128xf32, #tpu.memory_space<vmem>>, vector<1x128xf32>
    %701 = vector.broadcast %700 : vector<1x128xf32> to vector<24x128xf32>
    %702 = arith.mulf %695, %701 : vector<24x128xf32>
    %703 = arith.addf %690, %702 : vector<24x128xf32>
    %704 = vector.extract_strided_slice %611 {offsets = [0, 0], sizes = [24, 128], strides = [1, 1]} : vector<32x128xf32> to vector<24x128xf32>
    %c45_296 = arith.constant 45 : index
    %c0_297 = arith.constant 0 : index
    %705 = vector.load %arg2[%c45_296, %c0_297] : memref<100x128xf32, #tpu.memory_space<vmem>>, vector<1x128xf32>
    %706 = vector.broadcast %705 : vector<1x128xf32> to vector<24x128xf32>
    %707 = arith.mulf %704, %706 : vector<24x128xf32>
    %708 = arith.addf %699, %707 : vector<24x128xf32>
    %c46_298 = arith.constant 46 : index
    %c0_299 = arith.constant 0 : index
    %709 = vector.load %arg2[%c46_298, %c0_299] : memref<100x128xf32, #tpu.memory_space<vmem>>, vector<1x128xf32>
    %710 = vector.broadcast %709 : vector<1x128xf32> to vector<24x128xf32>
    %711 = arith.mulf %704, %710 : vector<24x128xf32>
    %712 = arith.addf %686, %711 : vector<24x128xf32>
    %713 = vector.extract_strided_slice %614 {offsets = [0, 0], sizes = [24, 128], strides = [1, 1]} : vector<32x128xf32> to vector<24x128xf32>
    %c47_300 = arith.constant 47 : index
    %c0_301 = arith.constant 0 : index
    %714 = vector.load %arg2[%c47_300, %c0_301] : memref<100x128xf32, #tpu.memory_space<vmem>>, vector<1x128xf32>
    %715 = vector.broadcast %714 : vector<1x128xf32> to vector<24x128xf32>
    %716 = arith.mulf %713, %715 : vector<24x128xf32>
    %717 = arith.addf %708, %716 : vector<24x128xf32>
    %c48_302 = arith.constant 48 : index
    %c0_303 = arith.constant 0 : index
    %718 = vector.load %arg2[%c48_302, %c0_303] : memref<100x128xf32, #tpu.memory_space<vmem>>, vector<1x128xf32>
    %719 = vector.broadcast %718 : vector<1x128xf32> to vector<24x128xf32>
    %720 = arith.mulf %713, %719 : vector<24x128xf32>
    %721 = arith.addf %712, %720 : vector<24x128xf32>
    %722 = vector.extract_strided_slice %617 {offsets = [0, 0], sizes = [24, 128], strides = [1, 1]} : vector<32x128xf32> to vector<24x128xf32>
    %c49_304 = arith.constant 49 : index
    %c0_305 = arith.constant 0 : index
    %723 = vector.load %arg2[%c49_304, %c0_305] : memref<100x128xf32, #tpu.memory_space<vmem>>, vector<1x128xf32>
    %724 = vector.broadcast %723 : vector<1x128xf32> to vector<24x128xf32>
    %725 = arith.mulf %722, %724 : vector<24x128xf32>
    %726 = arith.addf %717, %725 : vector<24x128xf32>
    %c1_306 = arith.constant 1 : index
    %c2_307 = arith.constant 2 : index
    %c0_308 = arith.constant 0 : index
    %c2_309 = arith.constant 2 : index
    %727 = vector.load %arg5[%c1_306, %c2_307, %c0_308, %c2_309] : memref<2x4x32x34xf32, #tpu.memory_space<vmem>>, vector<1x1x32x32xf32>
    %728 = vector.shape_cast %727 : vector<1x1x32x32xf32> to vector<32x32xf32>
    %729 = tpu.concatenate %728, %728, %728, %728 in 1 : vector<32x32xf32>, vector<32x32xf32>, vector<32x32xf32>, vector<32x32xf32> -> vector<32x128xf32>
    %c1_310 = arith.constant 1 : index
    %c2_311 = arith.constant 2 : index
    %c0_312 = arith.constant 0 : index
    %c1_313 = arith.constant 1 : index
    %730 = vector.load %arg5[%c1_310, %c2_311, %c0_312, %c1_313] : memref<2x4x32x34xf32, #tpu.memory_space<vmem>>, vector<1x1x32x32xf32>
    %731 = vector.shape_cast %730 : vector<1x1x32x32xf32> to vector<32x32xf32>
    %732 = tpu.concatenate %731, %731, %731, %731 in 1 : vector<32x32xf32>, vector<32x32xf32>, vector<32x32xf32>, vector<32x32xf32> -> vector<32x128xf32>
    %c1_314 = arith.constant 1 : index
    %c2_315 = arith.constant 2 : index
    %c0_316 = arith.constant 0 : index
    %c0_317 = arith.constant 0 : index
    %733 = vector.load %arg5[%c1_314, %c2_315, %c0_316, %c0_317] : memref<2x4x32x34xf32, #tpu.memory_space<vmem>>, vector<1x1x32x32xf32>
    %734 = vector.shape_cast %733 : vector<1x1x32x32xf32> to vector<32x32xf32>
    %735 = tpu.concatenate %734, %734, %734, %734 in 1 : vector<32x32xf32>, vector<32x32xf32>, vector<32x32xf32>, vector<32x32xf32> -> vector<32x128xf32>
    %736 = vector.extract_strided_slice %729 {offsets = [2, 0], sizes = [24, 128], strides = [1, 1]} : vector<32x128xf32> to vector<24x128xf32>
    %c50_318 = arith.constant 50 : index
    %c0_319 = arith.constant 0 : index
    %737 = vector.load %arg2[%c50_318, %c0_319] : memref<100x128xf32, #tpu.memory_space<vmem>>, vector<1x128xf32>
    %738 = vector.broadcast %737 : vector<1x128xf32> to vector<24x128xf32>
    %739 = arith.mulf %736, %738 : vector<24x128xf32>
    %740 = arith.addf %726, %739 : vector<24x128xf32>
    %c51_320 = arith.constant 51 : index
    %c0_321 = arith.constant 0 : index
    %741 = vector.load %arg2[%c51_320, %c0_321] : memref<100x128xf32, #tpu.memory_space<vmem>>, vector<1x128xf32>
    %742 = vector.broadcast %741 : vector<1x128xf32> to vector<24x128xf32>
    %743 = arith.mulf %736, %742 : vector<24x128xf32>
    %744 = arith.addf %721, %743 : vector<24x128xf32>
    %c55_322 = arith.constant 55 : index
    %c0_323 = arith.constant 0 : index
    %745 = vector.load %arg2[%c55_322, %c0_323] : memref<100x128xf32, #tpu.memory_space<vmem>>, vector<1x128xf32>
    %746 = vector.broadcast %745 : vector<1x128xf32> to vector<24x128xf32>
    %747 = arith.mulf %736, %746 : vector<24x128xf32>
    %748 = arith.addf %703, %747 : vector<24x128xf32>
    %c56_324 = arith.constant 56 : index
    %c0_325 = arith.constant 0 : index
    %749 = vector.load %arg2[%c56_324, %c0_325] : memref<100x128xf32, #tpu.memory_space<vmem>>, vector<1x128xf32>
    %750 = vector.broadcast %749 : vector<1x128xf32> to vector<24x128xf32>
    %751 = arith.mulf %736, %750 : vector<24x128xf32>
    %752 = arith.addf %694, %751 : vector<24x128xf32>
    %753 = vector.extract_strided_slice %732 {offsets = [2, 0], sizes = [24, 128], strides = [1, 1]} : vector<32x128xf32> to vector<24x128xf32>
    %c52_326 = arith.constant 52 : index
    %c0_327 = arith.constant 0 : index
    %754 = vector.load %arg2[%c52_326, %c0_327] : memref<100x128xf32, #tpu.memory_space<vmem>>, vector<1x128xf32>
    %755 = vector.broadcast %754 : vector<1x128xf32> to vector<24x128xf32>
    %756 = arith.mulf %753, %755 : vector<24x128xf32>
    %757 = arith.addf %740, %756 : vector<24x128xf32>
    %c53_328 = arith.constant 53 : index
    %c0_329 = arith.constant 0 : index
    %758 = vector.load %arg2[%c53_328, %c0_329] : memref<100x128xf32, #tpu.memory_space<vmem>>, vector<1x128xf32>
    %759 = vector.broadcast %758 : vector<1x128xf32> to vector<24x128xf32>
    %760 = arith.mulf %753, %759 : vector<24x128xf32>
    %761 = arith.addf %744, %760 : vector<24x128xf32>
    %c57_330 = arith.constant 57 : index
    %c0_331 = arith.constant 0 : index
    %762 = vector.load %arg2[%c57_330, %c0_331] : memref<100x128xf32, #tpu.memory_space<vmem>>, vector<1x128xf32>
    %763 = vector.broadcast %762 : vector<1x128xf32> to vector<24x128xf32>
    %764 = arith.mulf %753, %763 : vector<24x128xf32>
    %765 = arith.addf %748, %764 : vector<24x128xf32>
    %c58_332 = arith.constant 58 : index
    %c0_333 = arith.constant 0 : index
    %766 = vector.load %arg2[%c58_332, %c0_333] : memref<100x128xf32, #tpu.memory_space<vmem>>, vector<1x128xf32>
    %767 = vector.broadcast %766 : vector<1x128xf32> to vector<24x128xf32>
    %768 = arith.mulf %753, %767 : vector<24x128xf32>
    %769 = arith.addf %752, %768 : vector<24x128xf32>
    %770 = vector.extract_strided_slice %735 {offsets = [2, 0], sizes = [24, 128], strides = [1, 1]} : vector<32x128xf32> to vector<24x128xf32>
    %c54_334 = arith.constant 54 : index
    %c0_335 = arith.constant 0 : index
    %771 = vector.load %arg2[%c54_334, %c0_335] : memref<100x128xf32, #tpu.memory_space<vmem>>, vector<1x128xf32>
    %772 = vector.broadcast %771 : vector<1x128xf32> to vector<24x128xf32>
    %773 = arith.mulf %770, %772 : vector<24x128xf32>
    %774 = arith.addf %757, %773 : vector<24x128xf32>
    %c59_336 = arith.constant 59 : index
    %c0_337 = arith.constant 0 : index
    %775 = vector.load %arg2[%c59_336, %c0_337] : memref<100x128xf32, #tpu.memory_space<vmem>>, vector<1x128xf32>
    %776 = vector.broadcast %775 : vector<1x128xf32> to vector<24x128xf32>
    %777 = arith.mulf %770, %776 : vector<24x128xf32>
    %778 = arith.addf %765, %777 : vector<24x128xf32>
    %779 = vector.extract_strided_slice %729 {offsets = [1, 0], sizes = [24, 128], strides = [1, 1]} : vector<32x128xf32> to vector<24x128xf32>
    %c60_338 = arith.constant 60 : index
    %c0_339 = arith.constant 0 : index
    %780 = vector.load %arg2[%c60_338, %c0_339] : memref<100x128xf32, #tpu.memory_space<vmem>>, vector<1x128xf32>
    %781 = vector.broadcast %780 : vector<1x128xf32> to vector<24x128xf32>
    %782 = arith.mulf %779, %781 : vector<24x128xf32>
    %783 = arith.addf %774, %782 : vector<24x128xf32>
    %c61_340 = arith.constant 61 : index
    %c0_341 = arith.constant 0 : index
    %784 = vector.load %arg2[%c61_340, %c0_341] : memref<100x128xf32, #tpu.memory_space<vmem>>, vector<1x128xf32>
    %785 = vector.broadcast %784 : vector<1x128xf32> to vector<24x128xf32>
    %786 = arith.mulf %779, %785 : vector<24x128xf32>
    %787 = arith.addf %761, %786 : vector<24x128xf32>
    %c65_342 = arith.constant 65 : index
    %c0_343 = arith.constant 0 : index
    %788 = vector.load %arg2[%c65_342, %c0_343] : memref<100x128xf32, #tpu.memory_space<vmem>>, vector<1x128xf32>
    %789 = vector.broadcast %788 : vector<1x128xf32> to vector<24x128xf32>
    %790 = arith.mulf %779, %789 : vector<24x128xf32>
    %791 = arith.addf %778, %790 : vector<24x128xf32>
    %c66_344 = arith.constant 66 : index
    %c0_345 = arith.constant 0 : index
    %792 = vector.load %arg2[%c66_344, %c0_345] : memref<100x128xf32, #tpu.memory_space<vmem>>, vector<1x128xf32>
    %793 = vector.broadcast %792 : vector<1x128xf32> to vector<24x128xf32>
    %794 = arith.mulf %779, %793 : vector<24x128xf32>
    %795 = arith.addf %769, %794 : vector<24x128xf32>
    %796 = vector.extract_strided_slice %732 {offsets = [1, 0], sizes = [24, 128], strides = [1, 1]} : vector<32x128xf32> to vector<24x128xf32>
    %c62_346 = arith.constant 62 : index
    %c0_347 = arith.constant 0 : index
    %797 = vector.load %arg2[%c62_346, %c0_347] : memref<100x128xf32, #tpu.memory_space<vmem>>, vector<1x128xf32>
    %798 = vector.broadcast %797 : vector<1x128xf32> to vector<24x128xf32>
    %799 = arith.mulf %796, %798 : vector<24x128xf32>
    %800 = arith.addf %783, %799 : vector<24x128xf32>
    %c63_348 = arith.constant 63 : index
    %c0_349 = arith.constant 0 : index
    %801 = vector.load %arg2[%c63_348, %c0_349] : memref<100x128xf32, #tpu.memory_space<vmem>>, vector<1x128xf32>
    %802 = vector.broadcast %801 : vector<1x128xf32> to vector<24x128xf32>
    %803 = arith.mulf %796, %802 : vector<24x128xf32>
    %804 = arith.addf %787, %803 : vector<24x128xf32>
    %c67_350 = arith.constant 67 : index
    %c0_351 = arith.constant 0 : index
    %805 = vector.load %arg2[%c67_350, %c0_351] : memref<100x128xf32, #tpu.memory_space<vmem>>, vector<1x128xf32>
    %806 = vector.broadcast %805 : vector<1x128xf32> to vector<24x128xf32>
    %807 = arith.mulf %796, %806 : vector<24x128xf32>
    %808 = arith.addf %791, %807 : vector<24x128xf32>
    %c68_352 = arith.constant 68 : index
    %c0_353 = arith.constant 0 : index
    %809 = vector.load %arg2[%c68_352, %c0_353] : memref<100x128xf32, #tpu.memory_space<vmem>>, vector<1x128xf32>
    %810 = vector.broadcast %809 : vector<1x128xf32> to vector<24x128xf32>
    %811 = arith.mulf %796, %810 : vector<24x128xf32>
    %812 = arith.addf %795, %811 : vector<24x128xf32>
    %813 = vector.extract_strided_slice %735 {offsets = [1, 0], sizes = [24, 128], strides = [1, 1]} : vector<32x128xf32> to vector<24x128xf32>
    %c64_354 = arith.constant 64 : index
    %c0_355 = arith.constant 0 : index
    %814 = vector.load %arg2[%c64_354, %c0_355] : memref<100x128xf32, #tpu.memory_space<vmem>>, vector<1x128xf32>
    %815 = vector.broadcast %814 : vector<1x128xf32> to vector<24x128xf32>
    %816 = arith.mulf %813, %815 : vector<24x128xf32>
    %817 = arith.addf %800, %816 : vector<24x128xf32>
    %c69_356 = arith.constant 69 : index
    %c0_357 = arith.constant 0 : index
    %818 = vector.load %arg2[%c69_356, %c0_357] : memref<100x128xf32, #tpu.memory_space<vmem>>, vector<1x128xf32>
    %819 = vector.broadcast %818 : vector<1x128xf32> to vector<24x128xf32>
    %820 = arith.mulf %813, %819 : vector<24x128xf32>
    %821 = arith.addf %808, %820 : vector<24x128xf32>
    %822 = vector.extract_strided_slice %729 {offsets = [0, 0], sizes = [24, 128], strides = [1, 1]} : vector<32x128xf32> to vector<24x128xf32>
    %c70_358 = arith.constant 70 : index
    %c0_359 = arith.constant 0 : index
    %823 = vector.load %arg2[%c70_358, %c0_359] : memref<100x128xf32, #tpu.memory_space<vmem>>, vector<1x128xf32>
    %824 = vector.broadcast %823 : vector<1x128xf32> to vector<24x128xf32>
    %825 = arith.mulf %822, %824 : vector<24x128xf32>
    %826 = arith.addf %817, %825 : vector<24x128xf32>
    %c71_360 = arith.constant 71 : index
    %c0_361 = arith.constant 0 : index
    %827 = vector.load %arg2[%c71_360, %c0_361] : memref<100x128xf32, #tpu.memory_space<vmem>>, vector<1x128xf32>
    %828 = vector.broadcast %827 : vector<1x128xf32> to vector<24x128xf32>
    %829 = arith.mulf %822, %828 : vector<24x128xf32>
    %830 = arith.addf %804, %829 : vector<24x128xf32>
    %831 = vector.extract_strided_slice %732 {offsets = [0, 0], sizes = [24, 128], strides = [1, 1]} : vector<32x128xf32> to vector<24x128xf32>
    %c72_362 = arith.constant 72 : index
    %c0_363 = arith.constant 0 : index
    %832 = vector.load %arg2[%c72_362, %c0_363] : memref<100x128xf32, #tpu.memory_space<vmem>>, vector<1x128xf32>
    %833 = vector.broadcast %832 : vector<1x128xf32> to vector<24x128xf32>
    %834 = arith.mulf %831, %833 : vector<24x128xf32>
    %835 = arith.addf %826, %834 : vector<24x128xf32>
    %c73_364 = arith.constant 73 : index
    %c0_365 = arith.constant 0 : index
    %836 = vector.load %arg2[%c73_364, %c0_365] : memref<100x128xf32, #tpu.memory_space<vmem>>, vector<1x128xf32>
    %837 = vector.broadcast %836 : vector<1x128xf32> to vector<24x128xf32>
    %838 = arith.mulf %831, %837 : vector<24x128xf32>
    %839 = arith.addf %830, %838 : vector<24x128xf32>
    %840 = vector.extract_strided_slice %735 {offsets = [0, 0], sizes = [24, 128], strides = [1, 1]} : vector<32x128xf32> to vector<24x128xf32>
    %c74_366 = arith.constant 74 : index
    %c0_367 = arith.constant 0 : index
    %841 = vector.load %arg2[%c74_366, %c0_367] : memref<100x128xf32, #tpu.memory_space<vmem>>, vector<1x128xf32>
    %842 = vector.broadcast %841 : vector<1x128xf32> to vector<24x128xf32>
    %843 = arith.mulf %840, %842 : vector<24x128xf32>
    %844 = arith.addf %835, %843 : vector<24x128xf32>
    %c1_368 = arith.constant 1 : index
    %c3_369 = arith.constant 3 : index
    %c0_370 = arith.constant 0 : index
    %c2_371 = arith.constant 2 : index
    %845 = vector.load %arg5[%c1_368, %c3_369, %c0_370, %c2_371] : memref<2x4x32x34xf32, #tpu.memory_space<vmem>>, vector<1x1x32x32xf32>
    %846 = vector.shape_cast %845 : vector<1x1x32x32xf32> to vector<32x32xf32>
    %847 = tpu.concatenate %846, %846, %846, %846 in 1 : vector<32x32xf32>, vector<32x32xf32>, vector<32x32xf32>, vector<32x32xf32> -> vector<32x128xf32>
    %c1_372 = arith.constant 1 : index
    %c3_373 = arith.constant 3 : index
    %c0_374 = arith.constant 0 : index
    %c1_375 = arith.constant 1 : index
    %848 = vector.load %arg5[%c1_372, %c3_373, %c0_374, %c1_375] : memref<2x4x32x34xf32, #tpu.memory_space<vmem>>, vector<1x1x32x32xf32>
    %849 = vector.shape_cast %848 : vector<1x1x32x32xf32> to vector<32x32xf32>
    %850 = tpu.concatenate %849, %849, %849, %849 in 1 : vector<32x32xf32>, vector<32x32xf32>, vector<32x32xf32>, vector<32x32xf32> -> vector<32x128xf32>
    %c1_376 = arith.constant 1 : index
    %c3_377 = arith.constant 3 : index
    %c0_378 = arith.constant 0 : index
    %c0_379 = arith.constant 0 : index
    %851 = vector.load %arg5[%c1_376, %c3_377, %c0_378, %c0_379] : memref<2x4x32x34xf32, #tpu.memory_space<vmem>>, vector<1x1x32x32xf32>
    %852 = vector.shape_cast %851 : vector<1x1x32x32xf32> to vector<32x32xf32>
    %853 = tpu.concatenate %852, %852, %852, %852 in 1 : vector<32x32xf32>, vector<32x32xf32>, vector<32x32xf32>, vector<32x32xf32> -> vector<32x128xf32>
    %854 = vector.extract_strided_slice %847 {offsets = [2, 0], sizes = [24, 128], strides = [1, 1]} : vector<32x128xf32> to vector<24x128xf32>
    %c75_380 = arith.constant 75 : index
    %c0_381 = arith.constant 0 : index
    %855 = vector.load %arg2[%c75_380, %c0_381] : memref<100x128xf32, #tpu.memory_space<vmem>>, vector<1x128xf32>
    %856 = vector.broadcast %855 : vector<1x128xf32> to vector<24x128xf32>
    %857 = arith.mulf %854, %856 : vector<24x128xf32>
    %858 = arith.addf %844, %857 : vector<24x128xf32>
    %c76_382 = arith.constant 76 : index
    %c0_383 = arith.constant 0 : index
    %859 = vector.load %arg2[%c76_382, %c0_383] : memref<100x128xf32, #tpu.memory_space<vmem>>, vector<1x128xf32>
    %860 = vector.broadcast %859 : vector<1x128xf32> to vector<24x128xf32>
    %861 = arith.mulf %854, %860 : vector<24x128xf32>
    %862 = arith.addf %839, %861 : vector<24x128xf32>
    %c80_384 = arith.constant 80 : index
    %c0_385 = arith.constant 0 : index
    %863 = vector.load %arg2[%c80_384, %c0_385] : memref<100x128xf32, #tpu.memory_space<vmem>>, vector<1x128xf32>
    %864 = vector.broadcast %863 : vector<1x128xf32> to vector<24x128xf32>
    %865 = arith.mulf %854, %864 : vector<24x128xf32>
    %866 = arith.addf %821, %865 : vector<24x128xf32>
    %c81_386 = arith.constant 81 : index
    %c0_387 = arith.constant 0 : index
    %867 = vector.load %arg2[%c81_386, %c0_387] : memref<100x128xf32, #tpu.memory_space<vmem>>, vector<1x128xf32>
    %868 = vector.broadcast %867 : vector<1x128xf32> to vector<24x128xf32>
    %869 = arith.mulf %854, %868 : vector<24x128xf32>
    %870 = arith.addf %812, %869 : vector<24x128xf32>
    %871 = vector.extract_strided_slice %850 {offsets = [2, 0], sizes = [24, 128], strides = [1, 1]} : vector<32x128xf32> to vector<24x128xf32>
    %c77_388 = arith.constant 77 : index
    %c0_389 = arith.constant 0 : index
    %872 = vector.load %arg2[%c77_388, %c0_389] : memref<100x128xf32, #tpu.memory_space<vmem>>, vector<1x128xf32>
    %873 = vector.broadcast %872 : vector<1x128xf32> to vector<24x128xf32>
    %874 = arith.mulf %871, %873 : vector<24x128xf32>
    %875 = arith.addf %858, %874 : vector<24x128xf32>
    %c78_390 = arith.constant 78 : index
    %c0_391 = arith.constant 0 : index
    %876 = vector.load %arg2[%c78_390, %c0_391] : memref<100x128xf32, #tpu.memory_space<vmem>>, vector<1x128xf32>
    %877 = vector.broadcast %876 : vector<1x128xf32> to vector<24x128xf32>
    %878 = arith.mulf %871, %877 : vector<24x128xf32>
    %879 = arith.addf %862, %878 : vector<24x128xf32>
    %c82_392 = arith.constant 82 : index
    %c0_393 = arith.constant 0 : index
    %880 = vector.load %arg2[%c82_392, %c0_393] : memref<100x128xf32, #tpu.memory_space<vmem>>, vector<1x128xf32>
    %881 = vector.broadcast %880 : vector<1x128xf32> to vector<24x128xf32>
    %882 = arith.mulf %871, %881 : vector<24x128xf32>
    %883 = arith.addf %866, %882 : vector<24x128xf32>
    %c83_394 = arith.constant 83 : index
    %c0_395 = arith.constant 0 : index
    %884 = vector.load %arg2[%c83_394, %c0_395] : memref<100x128xf32, #tpu.memory_space<vmem>>, vector<1x128xf32>
    %885 = vector.broadcast %884 : vector<1x128xf32> to vector<24x128xf32>
    %886 = arith.mulf %871, %885 : vector<24x128xf32>
    %887 = arith.addf %870, %886 : vector<24x128xf32>
    %888 = vector.extract_strided_slice %853 {offsets = [2, 0], sizes = [24, 128], strides = [1, 1]} : vector<32x128xf32> to vector<24x128xf32>
    %c79_396 = arith.constant 79 : index
    %c0_397 = arith.constant 0 : index
    %889 = vector.load %arg2[%c79_396, %c0_397] : memref<100x128xf32, #tpu.memory_space<vmem>>, vector<1x128xf32>
    %890 = vector.broadcast %889 : vector<1x128xf32> to vector<24x128xf32>
    %891 = arith.mulf %888, %890 : vector<24x128xf32>
    %892 = arith.addf %875, %891 : vector<24x128xf32>
    %c84_398 = arith.constant 84 : index
    %c0_399 = arith.constant 0 : index
    %893 = vector.load %arg2[%c84_398, %c0_399] : memref<100x128xf32, #tpu.memory_space<vmem>>, vector<1x128xf32>
    %894 = vector.broadcast %893 : vector<1x128xf32> to vector<24x128xf32>
    %895 = arith.mulf %888, %894 : vector<24x128xf32>
    %896 = arith.addf %883, %895 : vector<24x128xf32>
    %897 = vector.extract_strided_slice %847 {offsets = [1, 0], sizes = [24, 128], strides = [1, 1]} : vector<32x128xf32> to vector<24x128xf32>
    %c85_400 = arith.constant 85 : index
    %c0_401 = arith.constant 0 : index
    %898 = vector.load %arg2[%c85_400, %c0_401] : memref<100x128xf32, #tpu.memory_space<vmem>>, vector<1x128xf32>
    %899 = vector.broadcast %898 : vector<1x128xf32> to vector<24x128xf32>
    %900 = arith.mulf %897, %899 : vector<24x128xf32>
    %901 = arith.addf %892, %900 : vector<24x128xf32>
    %c86_402 = arith.constant 86 : index
    %c0_403 = arith.constant 0 : index
    %902 = vector.load %arg2[%c86_402, %c0_403] : memref<100x128xf32, #tpu.memory_space<vmem>>, vector<1x128xf32>
    %903 = vector.broadcast %902 : vector<1x128xf32> to vector<24x128xf32>
    %904 = arith.mulf %897, %903 : vector<24x128xf32>
    %905 = arith.addf %879, %904 : vector<24x128xf32>
    %c90_404 = arith.constant 90 : index
    %c0_405 = arith.constant 0 : index
    %906 = vector.load %arg2[%c90_404, %c0_405] : memref<100x128xf32, #tpu.memory_space<vmem>>, vector<1x128xf32>
    %907 = vector.broadcast %906 : vector<1x128xf32> to vector<24x128xf32>
    %908 = arith.mulf %897, %907 : vector<24x128xf32>
    %909 = arith.addf %896, %908 : vector<24x128xf32>
    %c91_406 = arith.constant 91 : index
    %c0_407 = arith.constant 0 : index
    %910 = vector.load %arg2[%c91_406, %c0_407] : memref<100x128xf32, #tpu.memory_space<vmem>>, vector<1x128xf32>
    %911 = vector.broadcast %910 : vector<1x128xf32> to vector<24x128xf32>
    %912 = arith.mulf %897, %911 : vector<24x128xf32>
    %913 = arith.addf %887, %912 : vector<24x128xf32>
    %914 = vector.extract_strided_slice %850 {offsets = [1, 0], sizes = [24, 128], strides = [1, 1]} : vector<32x128xf32> to vector<24x128xf32>
    %c87_408 = arith.constant 87 : index
    %c0_409 = arith.constant 0 : index
    %915 = vector.load %arg2[%c87_408, %c0_409] : memref<100x128xf32, #tpu.memory_space<vmem>>, vector<1x128xf32>
    %916 = vector.broadcast %915 : vector<1x128xf32> to vector<24x128xf32>
    %917 = arith.mulf %914, %916 : vector<24x128xf32>
    %918 = arith.addf %901, %917 : vector<24x128xf32>
    %c88_410 = arith.constant 88 : index
    %c0_411 = arith.constant 0 : index
    %919 = vector.load %arg2[%c88_410, %c0_411] : memref<100x128xf32, #tpu.memory_space<vmem>>, vector<1x128xf32>
    %920 = vector.broadcast %919 : vector<1x128xf32> to vector<24x128xf32>
    %921 = arith.mulf %914, %920 : vector<24x128xf32>
    %922 = arith.addf %905, %921 : vector<24x128xf32>
    %c92_412 = arith.constant 92 : index
    %c0_413 = arith.constant 0 : index
    %923 = vector.load %arg2[%c92_412, %c0_413] : memref<100x128xf32, #tpu.memory_space<vmem>>, vector<1x128xf32>
    %924 = vector.broadcast %923 : vector<1x128xf32> to vector<24x128xf32>
    %925 = arith.mulf %914, %924 : vector<24x128xf32>
    %926 = arith.addf %909, %925 : vector<24x128xf32>
    %c93_414 = arith.constant 93 : index
    %c0_415 = arith.constant 0 : index
    %927 = vector.load %arg2[%c93_414, %c0_415] : memref<100x128xf32, #tpu.memory_space<vmem>>, vector<1x128xf32>
    %928 = vector.broadcast %927 : vector<1x128xf32> to vector<24x128xf32>
    %929 = arith.mulf %914, %928 : vector<24x128xf32>
    %930 = arith.addf %913, %929 : vector<24x128xf32>
    %931 = vector.extract_strided_slice %853 {offsets = [1, 0], sizes = [24, 128], strides = [1, 1]} : vector<32x128xf32> to vector<24x128xf32>
    %c89_416 = arith.constant 89 : index
    %c0_417 = arith.constant 0 : index
    %932 = vector.load %arg2[%c89_416, %c0_417] : memref<100x128xf32, #tpu.memory_space<vmem>>, vector<1x128xf32>
    %933 = vector.broadcast %932 : vector<1x128xf32> to vector<24x128xf32>
    %934 = arith.mulf %931, %933 : vector<24x128xf32>
    %935 = arith.addf %918, %934 : vector<24x128xf32>
    %c94_418 = arith.constant 94 : index
    %c0_419 = arith.constant 0 : index
    %936 = vector.load %arg2[%c94_418, %c0_419] : memref<100x128xf32, #tpu.memory_space<vmem>>, vector<1x128xf32>
    %937 = vector.broadcast %936 : vector<1x128xf32> to vector<24x128xf32>
    %938 = arith.mulf %931, %937 : vector<24x128xf32>
    %939 = arith.addf %926, %938 : vector<24x128xf32>
    %940 = vector.extract_strided_slice %847 {offsets = [0, 0], sizes = [24, 128], strides = [1, 1]} : vector<32x128xf32> to vector<24x128xf32>
    %c95_420 = arith.constant 95 : index
    %c0_421 = arith.constant 0 : index
    %941 = vector.load %arg2[%c95_420, %c0_421] : memref<100x128xf32, #tpu.memory_space<vmem>>, vector<1x128xf32>
    %942 = vector.broadcast %941 : vector<1x128xf32> to vector<24x128xf32>
    %943 = arith.mulf %940, %942 : vector<24x128xf32>
    %944 = arith.addf %935, %943 : vector<24x128xf32>
    %c96_422 = arith.constant 96 : index
    %c0_423 = arith.constant 0 : index
    %945 = vector.load %arg2[%c96_422, %c0_423] : memref<100x128xf32, #tpu.memory_space<vmem>>, vector<1x128xf32>
    %946 = vector.broadcast %945 : vector<1x128xf32> to vector<24x128xf32>
    %947 = arith.mulf %940, %946 : vector<24x128xf32>
    %948 = arith.addf %922, %947 : vector<24x128xf32>
    %949 = vector.extract_strided_slice %850 {offsets = [0, 0], sizes = [24, 128], strides = [1, 1]} : vector<32x128xf32> to vector<24x128xf32>
    %c97_424 = arith.constant 97 : index
    %c0_425 = arith.constant 0 : index
    %950 = vector.load %arg2[%c97_424, %c0_425] : memref<100x128xf32, #tpu.memory_space<vmem>>, vector<1x128xf32>
    %951 = vector.broadcast %950 : vector<1x128xf32> to vector<24x128xf32>
    %952 = arith.mulf %949, %951 : vector<24x128xf32>
    %953 = arith.addf %944, %952 : vector<24x128xf32>
    %c98_426 = arith.constant 98 : index
    %c0_427 = arith.constant 0 : index
    %954 = vector.load %arg2[%c98_426, %c0_427] : memref<100x128xf32, #tpu.memory_space<vmem>>, vector<1x128xf32>
    %955 = vector.broadcast %954 : vector<1x128xf32> to vector<24x128xf32>
    %956 = arith.mulf %949, %955 : vector<24x128xf32>
    %957 = arith.addf %948, %956 : vector<24x128xf32>
    %958 = vector.extract_strided_slice %853 {offsets = [0, 0], sizes = [24, 128], strides = [1, 1]} : vector<32x128xf32> to vector<24x128xf32>
    %c99_428 = arith.constant 99 : index
    %c0_429 = arith.constant 0 : index
    %959 = vector.load %arg2[%c99_428, %c0_429] : memref<100x128xf32, #tpu.memory_space<vmem>>, vector<1x128xf32>
    %960 = vector.broadcast %959 : vector<1x128xf32> to vector<24x128xf32>
    %961 = arith.mulf %958, %960 : vector<24x128xf32>
    %962 = arith.addf %953, %961 : vector<24x128xf32>
    %c1_430 = arith.constant 1 : index
    %c0_431 = arith.constant 0 : index
    %c0_432 = arith.constant 0 : index
    %c0_433 = arith.constant 0 : index
    %c0_434 = arith.constant 0 : index
    %963 = vector.load %arg4[%c1_430, %c0_431, %c0_432, %c0_433, %c0_434] : memref<2x2x2x24x128xf32, #tpu.memory_space<vmem>>, vector<1x1x1x24x128xf32>
    %964 = vector.shape_cast %963 : vector<1x1x1x24x128xf32> to vector<24x128xf32>
    %965 = vector.shape_cast %962 : vector<24x128xf32> to vector<1x1x1x24x128xf32>
    tpu.vector_store %arg4[%c1_430, %c0_431, %c0_432, %c0_433, %c0_434], %965 {strides = array<i32>} : memref<2x2x2x24x128xf32, #tpu.memory_space<vmem>>, vector<1x1x1x24x128xf32>,
    %c1_435 = arith.constant 1 : index
    %c0_436 = arith.constant 0 : index
    %c1_437 = arith.constant 1 : index
    %c0_438 = arith.constant 0 : index
    %c0_439 = arith.constant 0 : index
    %966 = vector.load %arg4[%c1_435, %c0_436, %c1_437, %c0_438, %c0_439] : memref<2x2x2x24x128xf32, #tpu.memory_space<vmem>>, vector<1x1x1x24x128xf32>
    %967 = vector.shape_cast %966 : vector<1x1x1x24x128xf32> to vector<24x128xf32>
    %968 = vector.shape_cast %957 : vector<24x128xf32> to vector<1x1x1x24x128xf32>
    tpu.vector_store %arg4[%c1_435, %c0_436, %c1_437, %c0_438, %c0_439], %968 {strides = array<i32>} : memref<2x2x2x24x128xf32, #tpu.memory_space<vmem>>, vector<1x1x1x24x128xf32>,
    %c1_440 = arith.constant 1 : index
    %c1_441 = arith.constant 1 : index
    %c0_442 = arith.constant 0 : index
    %c0_443 = arith.constant 0 : index
    %c0_444 = arith.constant 0 : index
    %969 = vector.load %arg4[%c1_440, %c1_441, %c0_442, %c0_443, %c0_444] : memref<2x2x2x24x128xf32, #tpu.memory_space<vmem>>, vector<1x1x1x24x128xf32>
    %970 = vector.shape_cast %969 : vector<1x1x1x24x128xf32> to vector<24x128xf32>
    %971 = vector.shape_cast %939 : vector<24x128xf32> to vector<1x1x1x24x128xf32>
    tpu.vector_store %arg4[%c1_440, %c1_441, %c0_442, %c0_443, %c0_444], %971 {strides = array<i32>} : memref<2x2x2x24x128xf32, #tpu.memory_space<vmem>>, vector<1x1x1x24x128xf32>,
    %c1_445 = arith.constant 1 : index
    %c1_446 = arith.constant 1 : index
    %c1_447 = arith.constant 1 : index
    %c0_448 = arith.constant 0 : index
    %c0_449 = arith.constant 0 : index
    %972 = vector.load %arg4[%c1_445, %c1_446, %c1_447, %c0_448, %c0_449] : memref<2x2x2x24x128xf32, #tpu.memory_space<vmem>>, vector<1x1x1x24x128xf32>
    %973 = vector.shape_cast %972 : vector<1x1x1x24x128xf32> to vector<24x128xf32>
    %974 = vector.shape_cast %930 : vector<24x128xf32> to vector<1x1x1x24x128xf32>
    tpu.vector_store %arg4[%c1_445, %c1_446, %c1_447, %c0_448, %c0_449], %974 {strides = array<i32>} : memref<2x2x2x24x128xf32, #tpu.memory_space<vmem>>, vector<1x1x1x24x128xf32>,
    return
  }
  func.func @transform_0(%arg0: i32) -> (i32, i32, i32, i32) {
    %c0_i32 = arith.constant 0 : i32
    %c0_i32_0 = arith.constant 0 : i32
    %c0_i32_1 = arith.constant 0 : i32
    %c0_i32_2 = arith.constant 0 : i32
    return %arg0, %c0_i32, %c0_i32_0, %c0_i32_1 : i32, i32, i32, i32
  }
  func.func @transform_1(%arg0: i32) -> (i32, i32) {
    %c0_i32 = arith.constant 0 : i32
    %c0_i32_0 = arith.constant 0 : i32
    %c0_i32_1 = arith.constant 0 : i32
    return %c0_i32, %c0_i32_0 : i32, i32
  }
  func.func @transform_2(%arg0: i32) -> (i32, i32) {
    %c0_i32 = arith.constant 0 : i32
    %c0_i32_0 = arith.constant 0 : i32
    %c0_i32_1 = arith.constant 0 : i32
    return %c0_i32, %c0_i32_0 : i32, i32
  }
  func.func @transform_3(%arg0: i32) -> (i32, i32, i32, i32, i32) {
    %c0_i32 = arith.constant 0 : i32
    %c0_i32_0 = arith.constant 0 : i32
    %c0_i32_1 = arith.constant 0 : i32
    %c0_i32_2 = arith.constant 0 : i32
    %c0_i32_3 = arith.constant 0 : i32
    return %arg0, %c0_i32, %c0_i32_0, %c0_i32_1, %c0_i32_2 : i32, i32, i32, i32, i32
  }
}

</mosaic_0001>

<bundles_post_ra>
// kernel: tpu_custom_call.1
= control target key start
LH: loop header
LB: loop body
LE: loop exit
PB: predicated region body
PF: predicated region fallthrough
CT: control target
= control target key end

     0   :  { %8 = vsyncpa [#allocation4], 0  ;;  %s13504_s0 = inlined_call_operand.hbm [shape: f32[2,4,16,16], index: 0, kind: input, shape index: {}]   ;;  %s13505_s1 = inlined_call_operand.hbm [shape: f32[100,128], index: 1, kind: input, shape index: {}]   ;;  %s13506_s2 = inlined_call_operand.vmem [shape: f32[1,128], index: 2, kind: input, shape index: {}]   ;;  %s13507_s3 = inlined_call_operand.hbm [shape: f32[2,2,2,24,128], index: 3, kind: output, shape index: {}]  }
   0x1   :  { %9 = vsyncpa [#allocation7], 0 }
   0x2   :  { %10 = vsyncpa [#allocation5], 0  ;;  %s6217_s12 = smov [#allocation3]   ;;  %s6145_s16 = scalar_lea.hbm %s13504_s0, 2048 }
   0x3   :  { %s16_s13 = sshll.u32 %s6217_s12, 4  ;;  %p6146_p0 = scmp.ne.s32.totalorder %s13504_s0, %s6145_s16  ;;  %s17_s13 = int_to_ptr.vmem [resolvable:$true] %s16_s13 }
   0x4   :  { %p6149_p1 = scmp.lt.u32.totalorder %s6145_s16, %s13504_s0 }
   0x6   :  { %p6151_p2 = pnand %p6149_p1, %p6146_p0 }
   0x8   :  { %6154 = shalt.err (!%p6151_p2)
}
   0x9   :  { %s6155_s21 = scalar_lea.vmem %s17_s13, 2048  ;;  %p6160_p4 = scmp.lt.s32.totalorder %s17_s13, %s17_s13 }
   0xa   :  { %p6156_p3 = scmp.ne.s32.totalorder %s17_s13, %s6155_s21  ;;  %p6161_p5 = scmp.lt.s32.totalorder %s6155_s21, %s6155_s21 }
   0xc   :  { %p6162_p6 = por %p6161_p5, %p6160_p4 }
   0xe   :  { %p6163_p7 = pnand %p6162_p6, %p6156_p3 }
  0x10   :  { %6166 = shalt.err (!%p6163_p7)
}
  0x11   :  { %s6218_s22 = smov 128   ;;  %s6219_s23 = smov 8  }
  0x12   :  { %22 = dma.hbm_to_vmem [thread:$0]  %s13504_s0, 2048, %s17_s13, [#allocation4], %s6218_s22, %s6218_s22, %s6219_s23  }
  0x13   :  { %s6220_s26 = smov [#allocation6]   ;;  %s6167_s30 = scalar_lea.hbm %s13505_s1, 1664 }
  0x14   :  { %s28_s27 = sshll.u32 %s6220_s26, 4  ;;  %p6168_p8 = scmp.ne.s32.totalorder %s13505_s1, %s6167_s30  ;;  %s29_s27 = int_to_ptr.vmem [resolvable:$true] %s28_s27 }
  0x15   :  { %p6171_p9 = scmp.lt.u32.totalorder %s6167_s30, %s13505_s1 }
  0x17   :  { %p6173_p10 = pnand %p6171_p9, %p6168_p8 }
  0x19   :  { %6176 = shalt.err (!%p6173_p10)
}
  0x1a   :  { %s6177_s8 = scalar_lea.vmem %s29_s27, 1664  ;;  %p6182_p12 = scmp.lt.s32.totalorder %s29_s27, %s29_s27 }
  0x1b   :  { %p6178_p11 = scmp.ne.s32.totalorder %s29_s27, %s6177_s8  ;;  %p6183_p13 = scmp.lt.s32.totalorder %s6177_s8, %s6177_s8 }
  0x1d   :  { %p6184_p0 = por %p6183_p13, %p6182_p12 }
  0x1f   :  { %p6185_p1 = pnand %p6184_p0, %p6178_p11 }
  0x21   :  { %6188 = shalt.err (!%p6185_p1)
}
  0x22   :  { %34 = dma.hbm_to_vmem [thread:$0]  %s13505_s1, 1664, %s29_s27, [#allocation7], %s6218_s22, %s6218_s22, %s6219_s23  }
  0x23   :  { %6211 = dma.done.wait [#allocation4], 2048  }
  0x24   :  { %6212 = vsyncadd [#allocation4], 4294965248 }
  0x25   :  { %6213 = dma.done.wait [#allocation7], 1664  }
  0x26   :  { %6214 = vsyncadd [#allocation7], 4294965632  ;;  %vm43_vm0 = vcmask 277504   ;;  %v6221_v0 = vmov 0.0   ;;  %v76_v1 = vld [vmem:[#allocation3] sm:$0xff]  ;;  %v78_v2 = vld [vmem:[#allocation3 + $0x10] sm:$0xff] }
  0x27   :  { %47 = vst.msk [vmem:[#allocation2 + $0x18] sm:$0xff] %vm43_vm0, %v6221_v0  ;;  %44 = vst.msk [vmem:[#allocation2] sm:$0xff] %vm43_vm0, %v6221_v0  ;;  %s6222_s1 = smov 2   ;;  %v77_v3 = vld [vmem:[#allocation3 + $0x8] sm:$0xff]  ;;  %v79_v4 = vld [vmem:[#allocation3 + $0x18] sm:$0xff]  ;;  %s6223_s10 = smov 126  }
  0x28   :  { %45 = vst.msk [vmem:[#allocation2 + $0x8] sm:$0xff] %vm43_vm0, %v6221_v0  ;;  %46 = vst.msk [vmem:[#allocation2 + $0x10] sm:$0xff] %vm43_vm0, %v6221_v0  ;;  %108 = vrot.lane.b32.xlu0 %v76_v1, %s6222_s1  ;;  %112 = vrot.lane.b32.xlu1 %v78_v2, %s6222_s1  ;;  %v81_v5 = vld [vmem:[#allocation3 + $0x28] sm:$0xff]  ;;  %v80_v6 = vld [vmem:[#allocation3 + $0x20] sm:$0xff]  ;;  %s6224_s11 = smov 30   ;;  %s6225_s12 = smov 62  }
  0x29   :  { %48 = vst.msk [vmem:[#allocation2 + $0x20] sm:$0xff] %vm43_vm0, %v6221_v0  ;;  %49 = vst.msk [vmem:[#allocation2 + $0x28] sm:$0xff] %vm43_vm0, %v6221_v0  ;;  %v83_v7 = vld [vmem:[#allocation3 + $0x38] sm:$0xff]  ;;  %v82_v8 = vld [vmem:[#allocation3 + $0x30] sm:$0xff]  ;;  %s6226_s13 = smov 94   ;;  %s6227_s14 = smov 127  }
  0x2a   :  { %50 = vst.msk [vmem:[#allocation2 + $0x30] sm:$0xff] %vm43_vm0, %v6221_v0  ;;  %51 = vst.msk [vmem:[#allocation2 + $0x38] sm:$0xff] %vm43_vm0, %v6221_v0  ;;  %v85_v9 = vld [vmem:[#allocation3 + $0x48] sm:$0xff]  ;;  %v84_v10 = vld [vmem:[#allocation3 + $0x40] sm:$0xff]  ;;  %s6228_s15 = smov 31   ;;  %s6229_s16 = smov 63  }
  0x2b   :  { %52 = vst.msk [vmem:[#allocation2 + $0x40] sm:$0xff] %vm43_vm0, %v6221_v0  ;;  %53 = vst.msk [vmem:[#allocation2 + $0x48] sm:$0xff] %vm43_vm0, %v6221_v0  ;;  %v87_v11 = vld [vmem:[#allocation3 + $0x58] sm:$0xff]  ;;  %v86_v12 = vld [vmem:[#allocation3 + $0x50] sm:$0xff]  ;;  %s6230_s17 = smov 95   ;;  %s6231_s18 = smov 32  }
  0x2c   :  { %54 = vst.msk [vmem:[#allocation2 + $0x50] sm:$0xff] %vm43_vm0, %v6221_v0  ;;  %55 = vst.msk [vmem:[#allocation2 + $0x58] sm:$0xff] %vm43_vm0, %v6221_v0  ;;  %110 = vrot.lane.b32.xlu0 %v77_v3, %s6222_s1  ;;  %114 = vrot.lane.b32.xlu1 %v79_v4, %s6222_s1  ;;  %v89_v13 = vld [vmem:[#allocation3 + $0x68] sm:$0xff]  ;;  %v88_v14 = vld [vmem:[#allocation3 + $0x60] sm:$0xff]  ;;  %s6232_s19 = smov 64   ;;  %s6233_s20 = smov 96  }
  0x2d   :  { %56 = vst.msk [vmem:[#allocation2 + $0x60] sm:$0xff] %vm43_vm0, %v6221_v0  ;;  %57 = vst.msk [vmem:[#allocation2 + $0x68] sm:$0xff] %vm43_vm0, %v6221_v0  ;;  %v91_v15 = vld [vmem:[#allocation3 + $0x78] sm:$0xff]  ;;  %v90_v16 = vld [vmem:[#allocation3 + $0x70] sm:$0xff]  ;;  %vm156_vm1 = vcmask 146448   ;;  %vm236_vm2 = vcmask 261120  }
  0x2e   :  { %58 = vst.msk [vmem:[#allocation2 + $0x70] sm:$0xff] %vm43_vm0, %v6221_v0  ;;  %59 = vst.msk [vmem:[#allocation2 + $0x78] sm:$0xff] %vm43_vm0, %v6221_v0  ;;  %v6317_v17 = vld [vmem:[#allocation2 + $0x18] sm:$0xff]  ;;  %vm241_vm3 = vcmask 523264   ;;  %vm246_vm4 = vcmask 785408   ;;  %vm781_vm5 = vcmask 1041408  }
  0x2f   :  { %60 = vst.msk [vmem:[#allocation2 + $0x80] sm:$0xff] %vm43_vm0, %v6221_v0  ;;  %61 = vst.msk [vmem:[#allocation2 + $0x88] sm:$0xff] %vm43_vm0, %v6221_v0  ;;  %vm502_vm6 = vcmask 1040384  }
  0x30   :  { %62 = vst.msk [vmem:[#allocation2 + $0x90] sm:$0xff] %vm43_vm0, %v6221_v0  ;;  %63 = vst.msk [vmem:[#allocation2 + $0x98] sm:$0xff] %vm43_vm0, %v6221_v0  ;;  %118 = vrot.lane.b32.xlu1 %v81_v5, %s6222_s1  ;;  %116 = vrot.lane.b32.xlu0 %v80_v6, %s6222_s1 }
  0x31   :  { %64 = vst.msk [vmem:[#allocation2 + $0xa0] sm:$0xff] %vm43_vm0, %v6221_v0  ;;  %65 = vst.msk [vmem:[#allocation2 + $0xa8] sm:$0xff] %vm43_vm0, %v6221_v0  ;;  %v6341_v18 = vld [vmem:[#allocation2 + $0x38] sm:$0xff] }
  0x32   :  { %66 = vst.msk [vmem:[#allocation2 + $0xb0] sm:$0xff] %vm43_vm0, %v6221_v0  ;;  %67 = vst.msk [vmem:[#allocation2 + $0xb8] sm:$0xff] %vm43_vm0, %v6221_v0 }
  0x33   :  { %68 = vst.msk [vmem:[#allocation2 + $0xc0] sm:$0xff] %vm43_vm0, %v6221_v0  ;;  %69 = vst.msk [vmem:[#allocation2 + $0xc8] sm:$0xff] %vm43_vm0, %v6221_v0  ;;  %v6538_v63 = vld [vmem:[#allocation2 + $0x58] sm:$0xff] }
  0x34   :  { %70 = vst.msk [vmem:[#allocation2 + $0xd0] sm:$0xff] %vm43_vm0, %v6221_v0  ;;  %71 = vst.msk [vmem:[#allocation2 + $0xd8] sm:$0xff] %vm43_vm0, %v6221_v0  ;;  %122 = vrot.lane.b32.xlu1 %v83_v7, %s6222_s1  ;;  %120 = vrot.lane.b32.xlu0 %v82_v8, %s6222_s1 }
  0x35   :  { %72 = vst.msk [vmem:[#allocation2 + $0xe0] sm:$0xff] %vm43_vm0, %v6221_v0  ;;  %73 = vst.msk [vmem:[#allocation2 + $0xe8] sm:$0xff] %vm43_vm0, %v6221_v0 }
  0x36   :  { %74 = vst.msk [vmem:[#allocation2 + $0xf0] sm:$0xff] %vm43_vm0, %v6221_v0  ;;  %75 = vst.msk [vmem:[#allocation2 + $0xf8] sm:$0xff] %vm43_vm0, %v6221_v0 }
  0x38   :  { %126 = vrot.lane.b32.xlu1 %v85_v9, %s6222_s1  ;;  %124 = vrot.lane.b32.xlu0 %v84_v10, %s6222_s1 }
  0x3c   :  { %130 = vrot.lane.b32.xlu1 %v87_v11, %s6222_s1  ;;  %128 = vrot.lane.b32.xlu0 %v86_v12, %s6222_s1 }
  0x40   :  { %134 = vrot.lane.b32.xlu1 %v89_v13, %s6222_s1  ;;  %132 = vrot.lane.b32.xlu0 %v88_v14, %s6222_s1  ;;  %v6584_v13 = vld [vmem:[#allocation6 + $0x1] ss:$0 sm:$0xff]  ;;  %v6586_v14 = vld [vmem:[#allocation6 + $0x6] ss:$0 sm:$0xff] }
  0x44   :  { %138 = vrot.lane.b32.xlu1 %v91_v15, %s6222_s1  ;;  %136 = vrot.lane.b32.xlu0 %v90_v16, %s6222_s1  ;;  %v6590_v16 = vld [vmem:[#allocation6 + $0xa] ss:$0 sm:$0xff] }
  0x48   :  { %194 = vrot.lane.b32.xlu1 %v6317_v17, %s6223_s10 }
  0x4c   :  { %206 = vrot.lane.b32.xlu1 %v6317_v17, %s6224_s11 }
  0x50   :  { %218 = vrot.lane.b32.xlu1 %v6317_v17, %s6225_s12 }
  0x54   :  { %230 = vrot.lane.b32.xlu1 %v6317_v17, %s6226_s13 }
  0x58   :  { %257 = vrot.lane.b32.xlu1 %v6317_v17, %s6227_s14 }
  0x5c   :  { %269 = vrot.lane.b32.xlu1 %v6317_v17, %s6228_s15 }
  0x60   :  { %281 = vrot.lane.b32.xlu1 %v6317_v17, %s6229_s16 }
  0x64   :  { %293 = vrot.lane.b32.xlu1 %v6317_v17, %s6230_s17 }
  0x68   :  { %317 = vrot.lane.b32.xlu1 %v6317_v17, %s6231_s18 }
  0x6c   :  { %329 = vrot.lane.b32.xlu1 %v6317_v17, %s6232_s19 }
  0x70   :  { %341 = vrot.lane.b32.xlu1 %v6317_v17, %s6233_s20 }
  0x74   :  { %906 = vrot.lane.b32.xlu1 %v6341_v18, %s6223_s10 }
  0x9a   :  { %v109_v19 = vpop.permute.xlu0 %108  ;;  %v113_v20 = vpop.permute.xlu1 %112 }
  0x9b   :  { %157 = vst.msk [vmem:[#allocation2 + $0x2] sm:$0xff] %vm156_vm1, %v109_v19  ;;  %159 = vst.msk [vmem:[#allocation2 + $0x22] sm:$0xff] %vm156_vm1, %v113_v20  ;;  %v6598_v20 = vld [vmem:[#allocation6] ss:$0 sm:$0xff] }
  0x9e   :  { %v111_v21 = vpop.permute.xlu0 %110  ;;  %v115_v22 = vpop.permute.xlu1 %114 }
  0x9f   :  { %158 = vst.msk [vmem:[#allocation2 + $0xa] sm:$0xff] %vm156_vm1, %v111_v21  ;;  %160 = vst.msk [vmem:[#allocation2 + $0x2a] sm:$0xff] %vm156_vm1, %v115_v22  ;;  %v6602_v21 = vld [vmem:[#allocation6 + $0xf] ss:$0 sm:$0xff] }
  0xa2   :  { %v6349_v23 = vld [vmem:[#allocation2] sm:$0xff]  ;;  %v119_v24 = vpop.permute.xlu1 %118  ;;  %v117_v25 = vpop.permute.xlu0 %116 }
  0xa3   :  { %13909 = vst [vmem:[#allocation12_spill] sm:$0xff] %v6349_v23  ;;  %188 = vrot.lane.b32.xlu0 %v6349_v23, %s6223_s10  ;;  %162 = vst.msk [vmem:[#allocation2 + $0x4a] sm:$0xff] %vm156_vm1, %v119_v24  ;;  %v6461_v46 = vld [vmem:[#allocation2 + $0x20] sm:$0xff] }
  0xa4   :  { %161 = vst.msk [vmem:[#allocation2 + $0x42] sm:$0xff] %vm156_vm1, %v117_v25  ;;  %v6606_v25 = vld [vmem:[#allocation6 + $0x5] ss:$0 sm:$0xff] }
  0xa6   :  { %v6355_v26 = vld [vmem:[#allocation2 + $0x8] sm:$0xff]  ;;  %v6357_v27 = vld [vmem:[#allocation2 + $0x10] sm:$0xff]  ;;  %v123_v28 = vpop.permute.xlu1 %122  ;;  %v121_v29 = vpop.permute.xlu0 %120 }
  0xa7   :  { %13910 = vst [vmem:[#allocation13_spill] sm:$0xff] %v6357_v27  ;;  %190 = vrot.lane.b32.xlu1 %v6355_v26, %s6223_s10  ;;  %192 = vrot.lane.b32.xlu0 %v6357_v27, %s6223_s10  ;;  %164 = vst.msk [vmem:[#allocation2 + $0x6a] sm:$0xff] %vm156_vm1, %v123_v28  ;;  %v893_v38 = vld [vmem:[#allocation2 + $0x28] sm:$0xff]  ;;  %v6469_v48 = vld [vmem:[#allocation2 + $0x30] sm:$0xff] }
  0xa8   :  { %163 = vst.msk [vmem:[#allocation2 + $0x62] sm:$0xff] %vm156_vm1, %v121_v29 }
  0xaa   :  { %v127_v30 = vpop.permute.xlu1 %126  ;;  %v125_v31 = vpop.permute.xlu0 %124 }
  0xab   :  { %202 = vrot.lane.b32.xlu1 %v6355_v26, %s6224_s11  ;;  %200 = vrot.lane.b32.xlu0 %v6349_v23, %s6224_s11  ;;  %166 = vst.msk [vmem:[#allocation2 + $0x8a] sm:$0xff] %vm156_vm1, %v127_v30  ;;  %165 = vst.msk [vmem:[#allocation2 + $0x82] sm:$0xff] %vm156_vm1, %v125_v31  ;;  %v6532_v62 = vld [vmem:[#allocation2 + $0x48] sm:$0xff]  ;;  %v6615_v30 = vld [vmem:[%s13506_s2] ss:$0 sm:$0xff] }
  0xac   :  { %v6617_v31 = vld [vmem:[#allocation6 + $0x10] ss:$0 sm:$0xff] }
  0xae   :  { %v131_v32 = vpop.permute.xlu1 %130  ;;  %v129_v33 = vpop.permute.xlu0 %128 }
  0xaf   :  { %214 = vrot.lane.b32.xlu1 %v6355_v26, %s6225_s12  ;;  %204 = vrot.lane.b32.xlu0 %v6357_v27, %s6224_s11  ;;  %168 = vst.msk [vmem:[#allocation2 + $0xaa] sm:$0xff] %vm156_vm1, %v131_v32  ;;  %167 = vst.msk [vmem:[#allocation2 + $0xa2] sm:$0xff] %vm156_vm1, %v129_v33 }
  0xb2   :  { %v135_v34 = vpop.permute.xlu1 %134  ;;  %v133_v35 = vpop.permute.xlu0 %132 }
  0xb3   :  { %226 = vrot.lane.b32.xlu1 %v6355_v26, %s6226_s13  ;;  %212 = vrot.lane.b32.xlu0 %v6349_v23, %s6225_s12  ;;  %170 = vst.msk [vmem:[#allocation2 + $0xca] sm:$0xff] %vm156_vm1, %v135_v34  ;;  %169 = vst.msk [vmem:[#allocation2 + $0xc2] sm:$0xff] %vm156_vm1, %v133_v35  ;;  %v6628_v35 = vld [vmem:[#allocation6 + $0x3] ss:$0 sm:$0xff] }
  0xb6   :  { %v139_v36 = vpop.permute.xlu1 %138  ;;  %v137_v37 = vpop.permute.xlu0 %136 }
  0xb7   :  { %253 = vrot.lane.b32.xlu1 %v6355_v26, %s6227_s14  ;;  %216 = vrot.lane.b32.xlu0 %v6357_v27, %s6225_s12  ;;  %172 = vst.msk [vmem:[#allocation2 + $0xea] sm:$0xff] %vm156_vm1, %v139_v36  ;;  %171 = vst.msk [vmem:[#allocation2 + $0xe2] sm:$0xff] %vm156_vm1, %v137_v37  ;;  %v6630_v36 = vld [vmem:[#allocation6 + $0x8] ss:$0 sm:$0xff] }
  0xba   :  { %v6413_v39 = vpop.permute.xlu1 %194 }
  0xbb   :  { %265 = vrot.lane.b32.xlu1 %v6355_v26, %s6228_s15  ;;  %224 = vrot.lane.b32.xlu0 %v6349_v23, %s6226_s13 }
  0xbe   :  { %v6421_v40 = vpop.permute.xlu1 %206 }
  0xbf   :  { %277 = vrot.lane.b32.xlu1 %v6355_v26, %s6229_s16  ;;  %228 = vrot.lane.b32.xlu0 %v6357_v27, %s6226_s13  ;;  %v240_v6 = vsel %vm236_vm2, %v6413_v39, %v6421_v40  ;;  %v6640_v40 = vld [vmem:[#allocation6 + $0xc] ss:$0 sm:$0xff] }
  0xc0   :  { %13918 = vst [vmem:[#allocation21_spill] sm:$0xff] %v6640_v40 }
  0xc2   :  { %v6427_v41 = vpop.permute.xlu1 %218 }
  0xc3   :  { %289 = vrot.lane.b32.xlu1 %v6355_v26, %s6230_s17  ;;  %251 = vrot.lane.b32.xlu0 %v6349_v23, %s6227_s14  ;;  %v245_v9 = vsel %vm241_vm3, %v240_v6, %v6427_v41  ;;  %v6642_v41 = vld [vmem:[#allocation6 + $0xd] ss:$0 sm:$0xff] }
  0xc6   :  { %v6436_v42 = vpop.permute.xlu1 %230 }
  0xc7   :  { %313 = vrot.lane.b32.xlu1 %v6355_v26, %s6231_s18  ;;  %255 = vrot.lane.b32.xlu0 %v6357_v27, %s6227_s14  ;;  %v250_v15 = vsel %vm246_vm4, %v245_v9, %v6436_v42  ;;  %v6645_v42 = vld [vmem:[#allocation6 + $0x2] ss:$0 sm:$0xff] }
  0xc8   :  { %v380_v22 = vmul.f32 %v6584_v13, %v250_v15  ;;  %v406_v24 = vmul.f32 %v6586_v14, %v250_v15  ;;  %v6620_v32 = vmul.f32 %v6590_v16, %v250_v15  ;;  %v6638_v39 = vmul.f32 %v6602_v21, %v250_v15  ;;  %13919 = vst [vmem:[#allocation22_spill] sm:$0xff] %v6645_v42 }
  0xca   :  { %v6441_v43 = vpop.permute.xlu1 %257  ;;  %13916 = vst [vmem:[#allocation19_spill] sm:$0xff] %v6620_v32  ;;  %13917 = vst [vmem:[#allocation20_spill] sm:$0xff] %v6638_v39  ;;  %v6682_v32 = vld [vmem:[#allocation6 + $0x4] ss:$0 sm:$0xff] }
  0xcb   :  { %325 = vrot.lane.b32.xlu1 %v6355_v26, %s6232_s19  ;;  %263 = vrot.lane.b32.xlu0 %v6349_v23, %s6228_s15 }
  0xce   :  { %v6450_v44 = vpop.permute.xlu1 %269 }
  0xcf   :  { %337 = vrot.lane.b32.xlu1 %v6355_v26, %s6233_s20  ;;  %267 = vrot.lane.b32.xlu0 %v6357_v27, %s6228_s15  ;;  %v302_v10 = vsel %vm236_vm2, %v6441_v43, %v6450_v44  ;;  %v384_v43 = vadd.f32 %v6615_v30, %v380_v22  ;;  %v410_v44 = vadd.f32 %v6615_v30, %v406_v24  ;;  %v6668_v24 = vld [vmem:[#allocation6 + $0x12] ss:$0 sm:$0xff] }
  0xd0   :  { %13925 = vst [vmem:[#allocation28_spill] sm:$0xff] %v6668_v24 }
  0xd2   :  { %v6456_v45 = vpop.permute.xlu1 %281 }
  0xd3   :  { %902 = vrot.lane.b32.xlu1 %v893_v38, %s6223_s10  ;;  %275 = vrot.lane.b32.xlu0 %v6349_v23, %s6229_s16  ;;  %v306_v19 = vsel %vm241_vm3, %v302_v10, %v6456_v45  ;;  %v6652_v45 = vmul.f32 %v6617_v31, %v250_v15 }
  0xd5   :  { %13920 = vst [vmem:[#allocation23_spill] sm:$0xff] %v6652_v45 }
  0xd6   :  { %v6467_v47 = vpop.permute.xlu1 %293 }
  0xd7   :  { %914 = vrot.lane.b32.xlu1 %v893_v38, %s6224_s11  ;;  %279 = vrot.lane.b32.xlu0 %v6357_v27, %s6229_s16  ;;  %v310_v37 = vsel %vm246_vm4, %v306_v19, %v6467_v47 }
  0xd8   :  { %v432_v22 = vmul.f32 %v6628_v35, %v310_v37  ;;  %v419_v10 = vmul.f32 %v6645_v42, %v310_v37 }
  0xda   :  { %v6474_v49 = vpop.permute.xlu1 %317 }
  0xdb   :  { %918 = vrot.lane.b32.xlu1 %v6341_v18, %s6224_s11  ;;  %287 = vrot.lane.b32.xlu0 %v6349_v23, %s6230_s17  ;;  %v350_v34 = vsel %vm236_vm2, %v6317_v17, %v6474_v49  ;;  %v393_v17 = vmul.f32 %v6606_v25, %v250_v15  ;;  %v6656_v49 = vld [vmem:[#allocation6 + $0x7] ss:$0 sm:$0xff] }
  0xdc   :  { %13921 = vst [vmem:[#allocation24_spill] sm:$0xff] %v6656_v49 }
  0xdd   :  { %v397_v19 = vadd.f32 %v6615_v30, %v393_v17 }
  0xde   :  { %v6483_v50 = vpop.permute.xlu1 %329 }
  0xdf   :  { %926 = vrot.lane.b32.xlu1 %v893_v38, %s6225_s12  ;;  %291 = vrot.lane.b32.xlu0 %v6357_v27, %s6230_s17  ;;  %v354_v47 = vsel %vm241_vm3, %v350_v34, %v6483_v50  ;;  %v6671_v50 = vmul.f32 %v6640_v40, %v310_v37  ;;  %v6674_v34 = vmul.f32 %v6642_v41, %v310_v37 }
  0xe1   :  { %13926 = vst [vmem:[#allocation29_spill] sm:$0xff] %v6671_v50  ;;  %13927 = vst [vmem:[#allocation30_spill] sm:$0xff] %v6674_v34 }
  0xe2   :  { %v6489_v51 = vpop.permute.xlu1 %341 }
  0xe3   :  { %930 = vrot.lane.b32.xlu1 %v6341_v18, %s6225_s12  ;;  %311 = vrot.lane.b32.xlu0 %v6349_v23, %s6231_s18 }
  0xe6   :  { %v6498_v52 = vpop.permute.xlu1 %906 }
  0xe7   :  { %938 = vrot.lane.b32.xlu1 %v893_v38, %s6226_s13  ;;  %315 = vrot.lane.b32.xlu0 %v6357_v27, %s6231_s18  ;;  %13911 = vst [vmem:[#allocation14_spill] sm:$0xff] %v6498_v52  ;;  %v445_v52 = vmul.f32 %v6656_v49, %v310_v37 }
  0xeb   :  { %942 = vrot.lane.b32.xlu1 %v6341_v18, %s6226_s13  ;;  %323 = vrot.lane.b32.xlu0 %v6349_v23, %s6232_s19 }
  0xef   :  { %962 = vrot.lane.b32.xlu1 %v893_v38, %s6227_s14  ;;  %327 = vrot.lane.b32.xlu0 %v6357_v27, %s6232_s19 }
  0xf3   :  { %966 = vrot.lane.b32.xlu1 %v6341_v18, %s6227_s14  ;;  %335 = vrot.lane.b32.xlu0 %v6349_v23, %s6233_s20 }
  0xf7   :  { %974 = vrot.lane.b32.xlu1 %v893_v38, %s6228_s15  ;;  %339 = vrot.lane.b32.xlu0 %v6357_v27, %s6233_s20  ;;  %v6664_v27 = vld [vmem:[#allocation6 + $0x11] ss:$0 sm:$0xff] }
  0xf8   :  { %13924 = vst [vmem:[#allocation27_spill] sm:$0xff] %v6664_v27 }
  0xfb   :  { %978 = vrot.lane.b32.xlu1 %v6341_v18, %s6228_s15  ;;  %900 = vrot.lane.b32.xlu0 %v6461_v46, %s6223_s10 }
  0xff   :  { %986 = vrot.lane.b32.xlu1 %v893_v38, %s6229_s16  ;;  %904 = vrot.lane.b32.xlu0 %v6469_v48, %s6223_s10 }
 0x103   :  { %990 = vrot.lane.b32.xlu1 %v6341_v18, %s6229_s16  ;;  %912 = vrot.lane.b32.xlu0 %v6461_v46, %s6224_s11 }
 0x107   :  { %998 = vrot.lane.b32.xlu1 %v893_v38, %s6230_s17  ;;  %916 = vrot.lane.b32.xlu0 %v6469_v48, %s6224_s11 }
 0x10b   :  { %1002 = vrot.lane.b32.xlu1 %v6341_v18, %s6230_s17  ;;  %924 = vrot.lane.b32.xlu0 %v6461_v46, %s6225_s12 }
 0x10f   :  { %1022 = vrot.lane.b32.xlu1 %v893_v38, %s6231_s18  ;;  %928 = vrot.lane.b32.xlu0 %v6469_v48, %s6225_s12 }
 0x113   :  { %1026 = vrot.lane.b32.xlu1 %v6341_v18, %s6231_s18  ;;  %936 = vrot.lane.b32.xlu0 %v6461_v46, %s6226_s13 }
 0x115   :  { %v6500_v53 = vpop.permute.xlu0 %188 }
 0x117   :  { %1034 = vrot.lane.b32.xlu1 %v893_v38, %s6232_s19  ;;  %940 = vrot.lane.b32.xlu0 %v6469_v48, %s6226_s13 }
 0x119   :  { %v6505_v54 = vpop.permute.xlu1 %190  ;;  %v6507_v55 = vpop.permute.xlu0 %192 }
 0x11b   :  { %1038 = vrot.lane.b32.xlu1 %v6341_v18, %s6232_s19  ;;  %960 = vrot.lane.b32.xlu0 %v6461_v46, %s6227_s14 }
 0x11d   :  { %v6513_v56 = vpop.permute.xlu1 %202  ;;  %v6515_v57 = vpop.permute.xlu0 %200 }
 0x11f   :  { %1046 = vrot.lane.b32.xlu1 %v893_v38, %s6233_s20  ;;  %964 = vrot.lane.b32.xlu0 %v6469_v48, %s6227_s14  ;;  %v367_v38 = vmul.f32 %v6598_v20, %v250_v15 }
 0x121   :  { %v6520_v58 = vpop.permute.xlu1 %214  ;;  %v6522_v59 = vpop.permute.xlu0 %204  ;;  %v371_v23 = vadd.f32 %v6615_v30, %v367_v38  ;;  %v238_v38 = vsel %vm236_vm2, %v6505_v54, %v6513_v56  ;;  %v6708_v56 = vadd.f32 %v432_v22, %v384_v43  ;;  %v449_v43 = vadd.f32 %v445_v52, %v397_v19 }
 0x123   :  { %1050 = vrot.lane.b32.xlu1 %v6341_v18, %s6233_s20  ;;  %972 = vrot.lane.b32.xlu0 %v6461_v46, %s6228_s15  ;;  %v6592_v18 = vld [vmem:[#allocation6 + $0xb] ss:$0 sm:$0xff]  ;;  %v423_v45 = vadd.f32 %v419_v10, %v371_v23  ;;  %v237_v10 = vsel %vm236_vm2, %v6500_v53, %v6515_v57 }
 0x124   :  { %v6623_v33 = vmul.f32 %v6592_v18, %v250_v15  ;;  %v458_v15 = vmul.f32 %v6630_v36, %v310_v37 }
 0x125   :  { %v6528_v60 = vpop.permute.xlu1 %226  ;;  %v6530_v61 = vpop.permute.xlu0 %212 }
 0x126   :  { %v6710_v40 = vadd.f32 %v458_v15, %v410_v44  ;;  %v242_v53 = vsel %vm241_vm3, %v237_v10, %v6530_v61 }
 0x127   :  { %1609 = vrot.lane.b32.xlu1 %v6532_v62, %s6223_s10  ;;  %976 = vrot.lane.b32.xlu0 %v6469_v48, %s6228_s15 }
 0x129   :  { %v6540_v0 = vpop.permute.xlu1 %253  ;;  %v6542_v1 = vpop.permute.xlu0 %216 }
 0x12b   :  { %1613 = vrot.lane.b32.xlu1 %v6538_v63, %s6223_s10  ;;  %984 = vrot.lane.b32.xlu0 %v6461_v46, %s6229_s16 }
 0x12d   :  { %v6548_v2 = vpop.permute.xlu1 %265  ;;  %v6550_v3 = vpop.permute.xlu0 %224 }
 0x12f   :  { %1621 = vrot.lane.b32.xlu1 %v6532_v62, %s6224_s11  ;;  %988 = vrot.lane.b32.xlu0 %v6469_v48, %s6229_s16 }
 0x131   :  { %v6556_v4 = vpop.permute.xlu1 %277  ;;  %v6558_v5 = vpop.permute.xlu0 %228 }
 0x133   :  { %1625 = vrot.lane.b32.xlu1 %v6538_v63, %s6224_s11  ;;  %996 = vrot.lane.b32.xlu0 %v6461_v46, %s6230_s17 }
 0x135   :  { %v6567_v7 = vpop.permute.xlu1 %289  ;;  %v6569_v8 = vpop.permute.xlu0 %251 }
 0x136   :  { %13912 = vst [vmem:[#allocation15_spill] sm:$0xff] %v6569_v8  ;;  %v6696_v8 = vmul.f32 %v6664_v27, %v310_v37  ;;  %v6759_v27 = vsel %vm246_vm4, %v242_v53, %v6550_v3 }
 0x137   :  { %1633 = vrot.lane.b32.xlu1 %v6532_v62, %s6225_s12  ;;  %1000 = vrot.lane.b32.xlu0 %v6469_v48, %s6230_s17  ;;  %v6800_v34 = vmul.f32 %v6592_v18, %v6759_v27  ;;  %v6804_v57 = vmul.f32 %v6617_v31, %v6759_v27 }
 0x138   :  { %13928 = vst [vmem:[#allocation31_spill] sm:$0xff] %v6696_v8 }
 0x139   :  { %v6580_v11 = vpop.permute.xlu1 %313  ;;  %v6582_v12 = vpop.permute.xlu0 %255  ;;  %13940 = vst [vmem:[#allocation43_spill] sm:$0xff] %v6800_v34  ;;  %13941 = vst [vmem:[#allocation44_spill] sm:$0xff] %v6804_v57 }
 0x13a   :  { %13913 = vst [vmem:[#allocation16_spill] sm:$0xff] %v6582_v12  ;;  %v6684_v12 = vld [vmem:[#allocation6 + $0x9] ss:$0 sm:$0xff] }
 0x13b   :  { %1637 = vrot.lane.b32.xlu1 %v6538_v63, %s6225_s12  ;;  %1020 = vrot.lane.b32.xlu0 %v6461_v46, %s6231_s18 }
 0x13d   :  { %v6608_v28 = vpop.permute.xlu1 %325  ;;  %v6610_v29 = vpop.permute.xlu0 %263 }
 0x13e   :  { %13914 = vst [vmem:[#allocation17_spill] sm:$0xff] %v6608_v28  ;;  %13915 = vst [vmem:[#allocation18_spill] sm:$0xff] %v6610_v29  ;;  %v6698_v29 = vld [vmem:[#allocation6 + $0xe] ss:$0 sm:$0xff]  ;;  %v6700_v28 = vld [vmem:[#allocation6 + $0x13] ss:$0 sm:$0xff] }
 0x13f   :  { %1645 = vrot.lane.b32.xlu1 %v6532_v62, %s6226_s13  ;;  %1024 = vrot.lane.b32.xlu0 %v6469_v48, %s6231_s18  ;;  %13929 = vst [vmem:[#allocation32_spill] sm:$0xff] %v6700_v28 }
 0x141   :  { %v6658_v6 = vpop.permute.xlu1 %337  ;;  %v6660_v9 = vpop.permute.xlu0 %267 }
 0x142   :  { %13922 = vst [vmem:[#allocation25_spill] sm:$0xff] %v6658_v6  ;;  %13923 = vst [vmem:[#allocation26_spill] sm:$0xff] %v6660_v9  ;;  %v358_v9 = vsel %vm246_vm4, %v354_v47, %v6489_v51  ;;  %v243_v51 = vsel %vm241_vm3, %v238_v38, %v6520_v58  ;;  %v6713_v6 = vmul.f32 %v6668_v24, %v310_v37  ;;  %v6720_v38 = vld [vmem:[#allocation6 + $0x15] ss:$0 sm:$0xff] }
 0x143   :  { %1649 = vrot.lane.b32.xlu1 %v6538_v63, %s6226_s13  ;;  %1032 = vrot.lane.b32.xlu0 %v6461_v46, %s6232_s19  ;;  %v248_v17 = vsel %vm246_vm4, %v243_v51, %v6528_v60  ;;  %v471_v58 = vmul.f32 %v6682_v32, %v358_v9  ;;  %v484_v44 = vmul.f32 %v6684_v12, %v358_v9 }
 0x144   :  { %13931 = vst [vmem:[#allocation34_spill] sm:$0xff] %v6713_v6  ;;  %v6726_v37 = vmul.f32 %v6698_v29, %v358_v9  ;;  %v6729_v60 = vmul.f32 %v6700_v28, %v358_v9  ;;  %v378_v22 = vmul.f32 %v6584_v13, %v248_v17  ;;  %v404_v52 = vmul.f32 %v6586_v14, %v248_v17 }
 0x145   :  { %v6704_v47 = vpop.permute.xlu1 %902  ;;  %v6706_v54 = vpop.permute.xlu0 %275  ;;  %v6744_v9 = vmul.f32 %v6592_v18, %v248_v17  ;;  %v6747_v51 = vmul.f32 %v6617_v31, %v248_v17  ;;  %v6750_v23 = vmul.f32 %v6720_v38, %v248_v17  ;;  %v6755_v39 = vadd.f32 %v471_v58, %v423_v45 }
 0x146   :  { %13930 = vst [vmem:[#allocation33_spill] sm:$0xff] %v6704_v47  ;;  %13932 = vst [vmem:[#allocation35_spill] sm:$0xff] %v6726_v37  ;;  %v365_v8 = vmul.f32 %v6598_v20, %v248_v17  ;;  %v6764_v50 = vadd.f32 %v484_v44, %v449_v43  ;;  %v239_v45 = vsel %vm236_vm2, %v6507_v55, %v6522_v59  ;;  %v6787_v55 = vld [vmem:[#allocation6 + $0x14] ss:$0 sm:$0xff] }
 0x147   :  { %1669 = vrot.lane.b32.xlu1 %v6532_v62, %s6227_s14  ;;  %13933 = vst [vmem:[#allocation36_spill] sm:$0xff] %v6729_v60  ;;  %1036 = vrot.lane.b32.xlu0 %v6469_v48, %s6232_s19  ;;  %13935 = vst [vmem:[#allocation38_spill] sm:$0xff] %v6755_v39  ;;  %v6774_v3 = vadd.f32 %v6615_v30, %v378_v22  ;;  %v6777_v58 = vadd.f32 %v6615_v30, %v404_v52 }
 0x148   :  { %13936 = vst [vmem:[#allocation39_spill] sm:$0xff] %v6764_v50  ;;  %v391_v43 = vmul.f32 %v6606_v25, %v248_v17  ;;  %v6781_v44 = vmul.f32 %v6590_v16, %v248_v17  ;;  %v6794_v52 = vmul.f32 %v6720_v38, %v6759_v27  ;;  %v244_v61 = vsel %vm241_vm3, %v239_v45, %v6542_v1 }
 0x149   :  { %v6739_v19 = vpop.permute.xlu1 %914  ;;  %v6741_v15 = vpop.permute.xlu0 %279  ;;  %v6807_v59 = vadd.f32 %v6615_v30, %v365_v8  ;;  %v6816_v1 = vmul.f32 %v6602_v21, %v248_v17  ;;  %v6820_v45 = vmul.f32 %v6590_v16, %v6759_v27  ;;  %v6825_v8 = vmul.f32 %v6787_v55, %v248_v17 }
 0x14a   :  { %13934 = vst [vmem:[#allocation37_spill] sm:$0xff] %v6739_v19  ;;  %13937 = vst [vmem:[#allocation40_spill] sm:$0xff] %v6781_v44  ;;  %v300_v22 = vsel %vm236_vm2, %v6540_v0, %v6548_v2  ;;  %v395_v60 = vadd.f32 %v6615_v30, %v391_v43  ;;  %v6845_v0 = vmul.f32 %v6602_v21, %v6759_v27  ;;  %v13948_v19 = vrot.slane %v6750_v23, 6 }
 0x14b   :  { %1673 = vrot.lane.b32.xlu1 %v6538_v63, %s6227_s14  ;;  %1044 = vrot.lane.b32.xlu0 %v6461_v46, %s6233_s20  ;;  %13939 = vst [vmem:[#allocation42_spill] sm:$0xff] %v6794_v52  ;;  %v6813_v46 = vsel %vm246_vm4, %v244_v61, %v6558_v5  ;;  %13942 = vst [vmem:[#allocation45_spill] sm:$0xff] %v6820_v45  ;;  %v377_v5 = vmul.f32 %v6584_v13, %v6759_v27 }
 0x14c   :  { %v403_v61 = vmul.f32 %v6586_v14, %v6759_v27  ;;  %v304_v17 = vsel %vm241_vm3, %v300_v22, %v6556_v4  ;;  %13944 = vst [vmem:[#allocation47_spill] sm:$0xff] %v6845_v0  ;;  %v525_v43 = vmul.f32 %v6592_v18, %v6813_v46  ;;  %v6857_v4 = vld [vmem:[#allocation2 + $0x40] sm:$0xff]  ;;  %v364_v47 = vmul.f32 %v6598_v20, %v6759_v27 }
 0x14d   :  { %v6783_v10 = vpop.permute.xlu1 %918  ;;  %v6785_v53 = vpop.permute.xlu0 %287  ;;  %v379_v2 = vmul.f32 %v6584_v13, %v6813_v46  ;;  %v581_v22 = vmul.f32 %v6617_v31, %v6813_v46  ;;  %v13949_v18 = vrot.slane %v6794_v52, 6  ;;  %v13953_v52 = vrot.slane %v6747_v51, 7 }
 0x14e   :  { %13938 = vst [vmem:[#allocation41_spill] sm:$0xff] %v6783_v10  ;;  %v534_v50 = vrot.slane %v525_v43, 7 }
 0x14f   :  { %1681 = vrot.lane.b32.xlu1 %v6532_v62, %s6228_s15  ;;  %1048 = vrot.lane.b32.xlu0 %v6469_v48, %s6233_s20 }
 0x151   :  { %v6835_v37 = vpop.permute.xlu1 %926  ;;  %v6837_v6 = vpop.permute.xlu0 %291 }
 0x152   :  { %13943 = vst [vmem:[#allocation46_spill] sm:$0xff] %v6835_v37  ;;  %v6853_v37 = vsel %vm246_vm4, %v304_v17, %v6567_v7  ;;  %v6867_v7 = vadd.f32 %v6615_v30, %v377_v5  ;;  %v6870_v17 = vadd.f32 %v6615_v30, %v403_v61  ;;  %v6885_v5 = vsel %vm781_vm5, %v13949_v18, %v13948_v19 }
 0x153   :  { %1685 = vrot.lane.b32.xlu1 %v6538_v63, %s6228_s15  ;;  %1607 = vrot.lane.b32.xlu0 %v6857_v4, %s6223_s10  ;;  %13950 = vst [vmem:[#allocation51_spill] sm:$0xff] %v6885_v5  ;;  %v405_v61 = vmul.f32 %v6586_v14, %v6813_v46  ;;  %v430_v13 = vmul.f32 %v6628_v35, %v6853_v37  ;;  %v13954_v19 = vrot.slane %v6804_v57, 7  ;;  %v6906_v5 = vld [vmem:[#allocation2 + $0x50] sm:$0xff] }
 0x154   :  { %13945 = vst [vmem:[#allocation48_spill] sm:$0xff] %v6870_v17  ;;  %v456_v31 = vmul.f32 %v6630_v36, %v6853_v37  ;;  %v6910_v43 = vmul.f32 %v6642_v41, %v6853_v37  ;;  %v6927_v57 = vld [vmem:[#allocation6 + $0x17] ss:$0 sm:$0xff]  ;;  %v590_v17 = vrot.slane %v581_v22, 7  ;;  %v6948_v22 = vadd.f32 %v6615_v30, %v364_v47 }
 0x155   :  { %v6876_v10 = vpop.permute.xlu1 %930  ;;  %v6878_v48 = vpop.permute.xlu0 %311  ;;  %v589_v18 = vsel %vm502_vm6, %v13954_v19, %v13953_v52  ;;  %v13955_v52 = vrot.slane %v6781_v44, 7  ;;  %v13956_v19 = vrot.slane %v6820_v45, 7  ;;  %v434_v45 = vadd.f32 %v430_v13, %v6774_v3 }
 0x156   :  { %13946 = vst [vmem:[#allocation49_spill] sm:$0xff] %v6876_v10  ;;  %13947 = vst [vmem:[#allocation50_spill] sm:$0xff] %v6878_v48  ;;  %v13951_v10 = vrot.slane %v6744_v9, 7  ;;  %v13952_v48 = vrot.slane %v6800_v34, 7  ;;  %v6930_v34 = vadd.f32 %v6615_v30, %v379_v2  ;;  %v460_v2 = vadd.f32 %v456_v31, %v6777_v58 }
 0x157   :  { %1693 = vrot.lane.b32.xlu1 %v6532_v62, %s6229_s16  ;;  %v6923_v14 = vsel %vm502_vm6, %v13956_v19, %v13955_v52  ;;  %1611 = vrot.lane.b32.xlu0 %v6906_v5, %s6223_s10  ;;  %v6940_v52 = vmul.f32 %v6720_v38, %v6813_v46  ;;  %v6943_v19 = vadd.f32 %v6615_v30, %v405_v61  ;;  %v13962_v38 = vrot.slane %v6744_v9, 7 }
 0x158   :  { %v533_v39 = vsel %vm502_vm6, %v13952_v48, %v13951_v10  ;;  %v6914_v10 = vmul.f32 %v6668_v24, %v6853_v37  ;;  %v417_v48 = vmul.f32 %v6645_v42, %v6853_v37  ;;  %13957 = vst [vmem:[#allocation52_spill] sm:$0xff] %v6930_v34  ;;  %v443_v24 = vmul.f32 %v6656_v49, %v6853_v37 }
 0x159   :  { %v6934_v42 = vpop.permute.xlu1 %938  ;;  %v6936_v44 = vpop.permute.xlu0 %315  ;;  %v13960_v49 = vrot.slane %v6816_v1, 7  ;;  %v6960_v34 = vsel %vm502_vm6, %v13962_v38, %v534_v50  ;;  %v6966_v3 = vmul.f32 %v6927_v57, %v6853_v37  ;;  %v13963_v47 = vrot.slane %v6623_v33, 7  ;;  %v13965_v38 = vld [vmem:[#allocation23_spill] sm:$0xff] }
 0x15a   :  { %13958 = vst [vmem:[#allocation53_spill] sm:$0xff] %v6934_v42  ;;  %13959 = vst [vmem:[#allocation54_spill] sm:$0xff] %v6936_v44  ;;  %v13961_v42 = vrot.slane %v6845_v0, 7  ;;  %v421_v9 = vadd.f32 %v417_v48, %v6807_v59  ;;  %v447_v13 = vadd.f32 %v443_v24, %v395_v60  ;;  %v13964_v31 = vrot.slane %v6747_v51, 7  ;;  %v13976_v0 = vld [vmem:[#allocation25_spill] sm:$0xff] }
 0x15b   :  { %1697 = vrot.lane.b32.xlu1 %v6538_v63, %s6229_s16  ;;  %v537_v58 = vsel %vm502_vm6, %v534_v50, %v13963_v47  ;;  %1619 = vrot.lane.b32.xlu0 %v6857_v4, %s6224_s11  ;;  %v13966_v47 = vrot.slane %v13965_v38, 7  ;;  %v6994_v59 = vadd.f32 %v533_v39, %v434_v45  ;;  %v6996_v24 = vadd.f32 %v589_v18, %v460_v2  ;;  %v13969_v39 = vld [vmem:[#allocation27_spill] sm:$0xff]  ;;  %v13972_v18 = vld [vmem:[#allocation17_spill] sm:$0xff] }
 0x15c   :  { %v6955_v44 = vsel %vm502_vm6, %v13961_v42, %v13960_v49  ;;  %v348_v49 = vsel %vm236_vm2, %v6355_v26, %v6580_v11  ;;  %v6982_v33 = vsel %vm502_vm6, %v13964_v31, %v590_v17  ;;  %v6992_v11 = vld [vmem:[#allocation6 + $0x16] ss:$0 sm:$0xff]  ;;  %v6999_v60 = vadd.f32 %v537_v58, %v6708_v56  ;;  %v13973_v58 = vld [vmem:[#allocation18_spill] sm:$0xff]  ;;  %v13974_v38 = vld [vmem:[#allocation15_spill] sm:$0xff] }
 0x15d   :  { %v6984_v50 = vpop.permute.xlu1 %942  ;;  %v593_v42 = vsel %vm502_vm6, %v590_v17, %v13966_v47  ;;  %v6990_v26 = vpop.permute.xlu0 %323  ;;  %13967 = vst [vmem:[#allocation23_spill] sm:$0xff] %v6992_v11  ;;  %v390_v51 = vmul.f32 %v6606_v25, %v6759_v27  ;;  %v13968_v17 = vld [vmem:[#allocation21_spill] sm:$0xff]  ;;  %v7012_v45 = vmul.f32 %v13969_v39, %v6853_v37  ;;  %v7016_v56 = vmul.f32 %v6787_v55, %v6759_v27 }
 0x15e   :  { %v7008_v31 = vmul.f32 %v13968_v17, %v6853_v37  ;;  %v352_v2 = vsel %vm241_vm3, %v348_v49, %v13972_v18  ;;  %v299_v47 = vsel %vm236_vm2, %v13974_v38, %v13973_v58  ;;  %v7024_v48 = vadd.f32 %v593_v42, %v6710_v40 }
 0x15f   :  { %1705 = vrot.lane.b32.xlu1 %v6532_v62, %s6230_s17  ;;  %13970 = vst [vmem:[#allocation21_spill] sm:$0xff] %v7012_v45  ;;  %13971 = vst [vmem:[#allocation27_spill] sm:$0xff] %v7016_v56  ;;  %1623 = vrot.lane.b32.xlu0 %v6906_v5, %s6224_s11  ;;  %v7030_v61 = vmul.f32 %v6992_v11, %v6853_v37  ;;  %v356_v27 = vsel %vm246_vm4, %v352_v2, %v13976_v0  ;;  %v13977_v18 = vrot.slane %v6940_v52, 6 }
 0x160   :  { %v303_v49 = vsel %vm241_vm3, %v299_v47, %v6706_v54  ;;  %v13978_v58 = vrot.slane %v6750_v23, 6  ;;  %v496_v37 = vmul.f32 %v6590_v16, %v6813_v46  ;;  %v7054_v54 = vadd.f32 %v6615_v30, %v390_v51  ;;  %v7067_v51 = vld [vmem:[#allocation6 + $0x18] ss:$0 sm:$0xff] }
 0x161   :  { %13975 = vst [vmem:[#allocation17_spill] sm:$0xff] %v7030_v61  ;;  %v7043_v42 = vpop.permute.xlu1 %962  ;;  %v7045_v38 = vpop.permute.xlu0 %327  ;;  %v7051_v0 = vsel %vm246_vm4, %v303_v49, %v6785_v53  ;;  %v366_v23 = vmul.f32 %v6598_v20, %v6813_v46  ;;  %v553_v2 = vmul.f32 %v6602_v21, %v6813_v46  ;;  %v392_v53 = vmul.f32 %v6606_v25, %v6813_v46  ;;  %v13983_v21 = vld [vmem:[#allocation16_spill] sm:$0xff] }
 0x162   :  { %v7041_v40 = vsel %vm781_vm5, %v13978_v58, %v13977_v18  ;;  %13979 = vst [vmem:[#allocation18_spill] sm:$0xff] %v7043_v42  ;;  %13980 = vst [vmem:[#allocation15_spill] sm:$0xff] %v7054_v54  ;;  %v469_v49 = vmul.f32 %v6682_v32, %v356_v27  ;;  %v482_v20 = vmul.f32 %v6684_v12, %v356_v27  ;;  %v13982_v58 = vld [vmem:[#allocation26_spill] sm:$0xff]  ;;  %v506_v54 = vrot.slane %v496_v37, 7 }
 0x163   :  { %1709 = vrot.lane.b32.xlu1 %v6538_v63, %s6230_s17  ;;  %13981 = vst [vmem:[#allocation25_spill] sm:$0xff] %v7067_v51  ;;  %v301_v42 = vsel %vm236_vm2, %v13983_v21, %v13982_v58  ;;  %1631 = vrot.lane.b32.xlu0 %v6857_v4, %s6225_s12  ;;  %v7078_v47 = vmul.f32 %v6698_v29, %v356_v27  ;;  %v562_v16 = vrot.slane %v553_v2, 7 }
 0x164   :  { %v7081_v25 = vmul.f32 %v6700_v28, %v356_v27  ;;  %v429_v18 = vmul.f32 %v6628_v35, %v7051_v0  ;;  %v305_v58 = vsel %vm241_vm3, %v301_v42, %v6741_v15  ;;  %v7092_v21 = vadd.f32 %v6615_v30, %v366_v23 }
 0x165   :  { %v7085_v45 = vpop.permute.xlu1 %966  ;;  %v7087_v11 = vpop.permute.xlu0 %335  ;;  %v7096_v61 = vmul.f32 %v6787_v55, %v6813_v46  ;;  %v7099_v28 = vmul.f32 %v7067_v51, %v356_v27  ;;  %v7105_v37 = vsel %vm246_vm4, %v305_v58, %v6837_v6  ;;  %v7110_v15 = vadd.f32 %v6615_v30, %v392_v53  ;;  %v13992_v53 = vld [vmem:[#allocation19_spill] sm:$0xff] }
 0x166   :  { %13984 = vst [vmem:[#allocation26_spill] sm:$0xff] %v7081_v25  ;;  %13985 = vst [vmem:[#allocation16_spill] sm:$0xff] %v7085_v45  ;;  %v635_v45 = vmul.f32 %v6642_v41, %v7051_v0  ;;  %v473_v42 = vadd.f32 %v469_v49, %v421_v9  ;;  %v486_v23 = vadd.f32 %v482_v20, %v447_v13  ;;  %v13988_v46 = vrot.slane %v6825_v8, 6 }
 0x167   :  { %13986 = vst [vmem:[#allocation55_spill] sm:$0xff] %v7096_v61  ;;  %13987 = vst [vmem:[#allocation56_spill] sm:$0xff] %v7099_v28  ;;  %1729 = vrot.lane.b32.xlu1 %v6532_v62, %s6231_s18  ;;  %v455_v55 = vmul.f32 %v6630_v36, %v7051_v0  ;;  %v13989_v27 = vrot.slane %v7016_v56, 6  ;;  %1635 = vrot.lane.b32.xlu0 %v6906_v5, %s6225_s12  ;;  %v433_v9 = vadd.f32 %v429_v18, %v6867_v7 }
 0x168   :  { %v13993_v49 = vrot.slane %v13992_v53, 7  ;;  %v431_v56 = vmul.f32 %v6628_v35, %v7105_v37  ;;  %v637_v53 = vmul.f32 %v6642_v41, %v7105_v37  ;;  %v7152_v35 = vadd.f32 %v6923_v14, %v473_v42  ;;  %v14003_v41 = vld [vmem:[#allocation43_spill] sm:$0xff] }
 0x169   :  { %v7119_v2 = vsel %vm781_vm5, %v13989_v27, %v13988_v46  ;;  %v7126_v13 = vpop.permute.xlu1 %974  ;;  %v7131_v58 = vpop.permute.xlu0 %339  ;;  %v13994_v46 = vld [vmem:[#allocation28_spill] sm:$0xff]  ;;  %v14005_v14 = vrot.slane %v6816_v1, 7  ;;  %v14014_v28 = vrot.slane %v7096_v61, 6  ;;  %v14015_v1 = vrot.slane %v6825_v8, 6 }
 0x16a   :  { %13990 = vst [vmem:[#allocation57_spill] sm:$0xff] %v7119_v2  ;;  %13991 = vst [vmem:[#allocation58_spill] sm:$0xff] %v7126_v13  ;;  %v509_v20 = vsel %vm502_vm6, %v506_v54, %v13993_v49  ;;  %v691_v27 = vmul.f32 %v13994_v46, %v7051_v0  ;;  %v13995_v2 = vld [vmem:[#allocation20_spill] sm:$0xff]  ;;  %v643_v13 = vrot.slane %v635_v45, 7  ;;  %v14001_v45 = vld [vmem:[#allocation38_spill] sm:$0xff] }
 0x16b   :  { %v13996_v30 = vrot.slane %v13995_v2, 7  ;;  %v13997_v49 = vld [vmem:[#allocation40_spill] sm:$0xff]  ;;  %1733 = vrot.lane.b32.xlu1 %v6538_v63, %s6231_s18  ;;  %v7155_v2 = vadd.f32 %v6955_v44, %v486_v23  ;;  %v7159_v6 = vadd.f32 %v509_v20, %v14001_v45  ;;  %1643 = vrot.lane.b32.xlu0 %v6857_v4, %s6226_s13  ;;  %v7172_v44 = vsel %vm502_vm6, %v14005_v14, %v562_v16  ;;  %v14012_v45 = vld [vmem:[#allocation33_spill] sm:$0xff] }
 0x16c   :  { %v13998_v25 = vrot.slane %v13997_v49, 7  ;;  %v7167_v49 = vmul.f32 %v13994_v46, %v7105_v37  ;;  %14006 = vst [vmem:[#allocation20_spill] sm:$0xff] %v7172_v44  ;;  %v14017_v14 = vld [vmem:[#allocation41_spill] sm:$0xff]  ;;  %v14028_v44 = vld [vmem:[#allocation12_spill] sm:$0xff] }
 0x16d   :  { %v565_v7 = vsel %vm502_vm6, %v562_v16, %v13996_v30  ;;  %13999 = vst [vmem:[#allocation19_spill] sm:$0xff] %v7155_v2  ;;  %v14000_v30 = vld [vmem:[#allocation48_spill] sm:$0xff]  ;;  %14002 = vst [vmem:[#allocation28_spill] sm:$0xff] %v7159_v6  ;;  %v7174_v42 = vpop.permute.xlu1 %978  ;;  %v7176_v23 = vpop.permute.xlu0 %900  ;;  %v7190_v16 = vsel %vm781_vm5, %v14015_v1, %v14014_v28  ;;  %v7206_v28 = vmul.f32 %v6927_v57, %v7051_v0  ;;  %v14027_v2 = vld [vmem:[#allocation50_spill] sm:$0xff] }
 0x16e   :  { %v7147_v51 = vsel %vm502_vm6, %v13998_v25, %v506_v54  ;;  %v459_v18 = vadd.f32 %v455_v55, %v14000_v30  ;;  %v14004_v54 = vrot.slane %v14003_v41, 7  ;;  %14007 = vst [vmem:[#allocation40_spill] sm:$0xff] %v7174_v42  ;;  %14008 = vst [vmem:[#allocation48_spill] sm:$0xff] %v7176_v23  ;;  %v14009_v55 = vld [vmem:[#allocation39_spill] sm:$0xff]  ;;  %v14011_v30 = vld [vmem:[#allocation37_spill] sm:$0xff]  ;;  %v699_v41 = vrot.slane %v691_v27, 7 }
 0x16f   :  { %v7179_v20 = vadd.f32 %v565_v7, %v14009_v55  ;;  %14016 = vst [vmem:[#allocation43_spill] sm:$0xff] %v7190_v16  ;;  %v14018_v42 = vld [vmem:[#allocation14_spill] sm:$0xff]  ;;  %v14019_v7 = vrot.slane %v6910_v43, 7  ;;  %v457_v27 = vmul.f32 %v6630_v36, %v7105_v37  ;;  %1741 = vrot.lane.b32.xlu1 %v6532_v62, %s6232_s19  ;;  %v14023_v1 = vld [vmem:[#allocation24_spill] sm:$0xff]  ;;  %1647 = vrot.lane.b32.xlu0 %v6906_v5, %s6226_s13 }
 0x170   :  { %v542_v25 = vadd.f32 %v14004_v54, %v433_v9  ;;  %v949_v9 = vsel %vm236_vm2, %v14012_v45, %v14011_v30  ;;  %v14013_v54 = vld [vmem:[#allocation52_spill] sm:$0xff]  ;;  %v951_v23 = vsel %vm236_vm2, %v14018_v42, %v14017_v14  ;;  %v646_v30 = vrot.slane %v637_v53, 7  ;;  %v14022_v42 = vld [vmem:[#allocation22_spill] sm:$0xff] }
 0x171   :  { %14010 = vst [vmem:[#allocation38_spill] sm:$0xff] %v7179_v20  ;;  %v435_v46 = vadd.f32 %v431_v56, %v14013_v54  ;;  %v645_v55 = vsel %vm502_vm6, %v643_v13, %v14019_v7  ;;  %v14020_v56 = vld [vmem:[#allocation44_spill] sm:$0xff]  ;;  %v416_v54 = vmul.f32 %v14022_v42, %v7051_v0  ;;  %v7212_v14 = vmul.f32 %v14023_v1, %v7051_v0  ;;  %v14024_v53 = vld [vmem:[#allocation46_spill] sm:$0xff]  ;;  %v7225_v20 = vpop.permute.xlu0 %904 }
 0x172   :  { %v14021_v8 = vrot.slane %v14020_v56, 7  ;;  %v654_v36 = vadd.f32 %v643_v13, %v542_v25  ;;  %v953_v7 = vsel %vm241_vm3, %v949_v9, %v14024_v53  ;;  %v7221_v56 = vmul.f32 %v13968_v17, %v7051_v0  ;;  %14026 = vst [vmem:[#allocation37_spill] sm:$0xff] %v7225_v20  ;;  %v14031_v6 = vld [vmem:[#allocation30_spill] sm:$0xff] }
 0x173   :  { %v655_v16 = vadd.f32 %v645_v55, %v6994_v59  ;;  %v544_v61 = vadd.f32 %v6960_v34, %v435_v46  ;;  %v347_v13 = vsel %vm236_vm2, %v14028_v44, %v14027_v2  ;;  %v14029_v25 = vrot.slane %v6914_v10, 7  ;;  %1745 = vrot.lane.b32.xlu1 %v6538_v63, %s6232_s19  ;;  %1667 = vrot.lane.b32.xlu0 %v6857_v4, %s6227_s14 }
 0x174   :  { %v598_v45 = vadd.f32 %v14021_v8, %v459_v18  ;;  %v7223_v8 = vpop.permute.xlu1 %986  ;;  %v461_v53 = vadd.f32 %v457_v27, %v6943_v19  ;;  %v14030_v18 = vrot.slane %v6910_v43, 7  ;;  %v14032_v20 = vrot.slane %v14031_v6, 7  ;;  %v14034_v6 = vld [vmem:[#allocation42_spill] sm:$0xff] }
 0x175   :  { %14025 = vst [vmem:[#allocation39_spill] sm:$0xff] %v7223_v8  ;;  %v701_v9 = vsel %vm502_vm6, %v699_v41, %v14029_v25  ;;  %v351_v34 = vsel %vm241_vm3, %v347_v13, %v6990_v26  ;;  %v13551_v44 = vrot.slane %v7206_v28, 6  ;;  %v420_v19 = vadd.f32 %v416_v54, %v6948_v22  ;;  %v14036_v26 = vld [vmem:[#allocation49_spill] sm:$0xff]  ;;  %v14037_v27 = vld [vmem:[#allocation34_spill] sm:$0xff] }
 0x176   :  { %v647_v8 = vsel %vm502_vm6, %v14030_v18, %v646_v30  ;;  %v649_v59 = vsel %vm502_vm6, %v646_v30, %v14032_v20  ;;  %v7246_v2 = vadd.f32 %v699_v41, %v598_v45  ;;  %v7252_v43 = vsel %vm246_vm4, %v351_v34, %v7087_v11  ;;  %v7262_v41 = vld [vmem:[#allocation6 + $0x2e] ss:$0 sm:$0xff]  ;;  %v7273_v18 = vpop.permute.xlu0 %912  ;;  %v14040_v13 = vld [vmem:[#allocation53_spill] sm:$0xff] }
 0x177   :  { %v14035_v20 = vrot.slane %v14034_v6, 6  ;;  %v955_v55 = vsel %vm241_vm3, %v951_v23, %v14036_v26  ;;  %v14038_v30 = vrot.slane %v14037_v27, 7  ;;  %v14039_v22 = vrot.slane %v7167_v49, 7  ;;  %v7279_v23 = vld [vmem:[#allocation6 + $0x1f] ss:$0 sm:$0xff]  ;;  %1753 = vrot.lane.b32.xlu1 %v6532_v62, %s6233_s20  ;;  %1671 = vrot.lane.b32.xlu0 %v6906_v5, %s6227_s14 }
 0x178   :  { %14033 = vst [vmem:[#allocation33_spill] sm:$0xff] %v7246_v2  ;;  %v850_v11 = vmul.f32 %v6927_v57, %v7105_v37  ;;  %v7271_v54 = vpop.permute.xlu1 %990  ;;  %v7277_v25 = vsel %vm246_vm4, %v953_v7, %v14040_v13  ;;  %14041 = vst [vmem:[#allocation52_spill] sm:$0xff] %v7279_v23  ;;  %v657_v34 = vadd.f32 %v649_v59, %v6999_v60  ;;  %v14042_v26 = vld [vmem:[#allocation54_spill] sm:$0xff]  ;;  %v14043_v57 = vld [vmem:[#allocation13_spill] sm:$0xff] }
 0x179   :  { %v7258_v46 = vadd.f32 %v14035_v20, %v654_v36  ;;  %v705_v45 = vsel %vm502_vm6, %v14039_v22, %v14038_v30  ;;  %v656_v36 = vadd.f32 %v647_v8, %v544_v61  ;;  %v711_v6 = vadd.f32 %v701_v9, %v6996_v24  ;;  %v7289_v30 = vld [vmem:[#allocation6 + $0x24] ss:$0 sm:$0xff]  ;;  %v7306_v9 = vld [vmem:[#allocation6 + $0x29] ss:$0 sm:$0xff] }
 0x17a   :  { %v7284_v20 = vadd.f32 %v6982_v33, %v461_v53  ;;  %v349_v27 = vsel %vm236_vm2, %v14043_v57, %v14042_v26  ;;  %v14044_v61 = vld [vmem:[#allocation51_spill] sm:$0xff]  ;;  %v468_v7 = vmul.f32 %v6682_v32, %v7252_v43  ;;  %v7298_v24 = vmul.f32 %v7262_v41, %v7277_v25  ;;  %v7300_v33 = vld [vmem:[#allocation6 + $0x1a] ss:$0 sm:$0xff]  ;;  %v7326_v26 = vpop.permute.xlu0 %916 }
 0x17b   :  { %v816_v8 = vadd.f32 %v14044_v61, %v655_v16  ;;  %14046 = vst [vmem:[#allocation14_spill] sm:$0xff] %v7300_v33  ;;  %v7304_v60 = vmul.f32 %v7289_v30, %v7277_v25  ;;  %v713_v16 = vadd.f32 %v705_v45, %v7024_v48  ;;  %v14048_v53 = vrot.slane %v6966_v3, 6  ;;  %1757 = vrot.lane.b32.xlu1 %v6538_v63, %s6233_s20 }
 0x17c   :  { %14045 = vst [vmem:[#allocation41_spill] sm:$0xff] %v7298_v24  ;;  %v1113_v59 = vmul.f32 %v7279_v23, %v7277_v25  ;;  %v7320_v22 = vmul.f32 %v7306_v9, %v7277_v25  ;;  %v857_v13 = vrot.slane %v850_v11, 6  ;;  %v353_v48 = vsel %vm241_vm3, %v349_v27, %v7045_v38  ;;  %v7324_v45 = vpop.permute.xlu1 %998  ;;  %1679 = vrot.lane.b32.xlu0 %v6857_v4, %s6228_s15 }
 0x17d   :  { %14047 = vst [vmem:[#allocation44_spill] sm:$0xff] %v7304_v60  ;;  %v856_v62 = vsel %vm781_vm5, %v13551_v44, %v14048_v53  ;;  %v817_v57 = vadd.f32 %v7041_v40, %v656_v36  ;;  %v14050_v61 = vrot.slane %v6940_v52, 6  ;;  %v7333_v44 = vmul.f32 %v6698_v29, %v7252_v43  ;;  %v14058_v36 = vld [vmem:[#allocation23_spill] sm:$0xff]  ;;  %v14060_v60 = vld [vmem:[#allocation32_spill] sm:$0xff] }
 0x17e   :  { %14049 = vst [vmem:[#allocation22_spill] sm:$0xff] %v7320_v22  ;;  %v7337_v2 = vsel %vm246_vm4, %v353_v48, %v7131_v58  ;;  %v1087_v38 = vmul.f32 %v7300_v33, %v7277_v25  ;;  %v7343_v11 = vsel %vm246_vm4, %v955_v55, %v6984_v50  ;;  %v472_v27 = vadd.f32 %v468_v7, %v420_v19  ;;  %v7364_v48 = vpop.permute.xlu0 %924 }
 0x17f   :  { %v818_v53 = vadd.f32 %v14050_v61, %v657_v34  ;;  %v418_v52 = vmul.f32 %v14022_v42, %v7105_v37  ;;  %v864_v58 = vadd.f32 %v856_v62, %v816_v8  ;;  %v615_v34 = vrot.slane %v7221_v56, 7 }
 0x180   :  { %v14051_v19 = vrot.slane %v6966_v3, 6  ;;  %v7358_v42 = vadd.f32 %v1113_v59, %v711_v6  ;;  %v470_v63 = vmul.f32 %v6682_v32, %v7337_v2  ;;  %v7362_v7 = vpop.permute.xlu1 %1002  ;;  %v1089_v62 = vmul.f32 %v7300_v33, %v7343_v11  ;;  %v7371_v3 = vld [vmem:[#allocation2 + $0x68] sm:$0xff]  ;;  %v14053_v6 = vld [vmem:[#allocation45_spill] sm:$0xff]  ;;  %1683 = vrot.lane.b32.xlu0 %v6906_v5, %s6228_s15 }
 0x181   :  { %v866_v56 = vadd.f32 %v857_v13, %v818_v53  ;;  %v727_v61 = vrot.slane %v7333_v44, 7  ;;  %v14054_v59 = vrot.slane %v14053_v6, 7  ;;  %v422_v32 = vadd.f32 %v418_v52, %v7092_v21  ;;  %2316 = vrot.lane.b32.xlu1 %v7371_v3, %s6223_s10 }
 0x182   :  { %v858_v55 = vsel %vm781_vm5, %v14051_v19, %v857_v13  ;;  %v7373_v19 = vadd.f32 %v1087_v38, %v864_v58  ;;  %v609_v50 = vmul.f32 %v13968_v17, %v7105_v37  ;;  %v1115_v13 = vmul.f32 %v7279_v23, %v7343_v11  ;;  %v7397_v17 = vld [vmem:[#allocation2 + $0x78] sm:$0xff]  ;;  %v7409_v6 = vpop.permute.xlu0 %928 }
 0x183   :  { %v7366_v8 = vadd.f32 %v858_v55, %v817_v57  ;;  %v514_v40 = vadd.f32 %v14054_v59, %v472_v27  ;;  %v7386_v44 = vmul.f32 %v7289_v30, %v7343_v11  ;;  %v14056_v57 = vrot.slane %v7008_v31, 7  ;;  %v14057_v59 = vld [vmem:[#allocation15_spill] sm:$0xff] }
 0x184   :  { %v7393_v21 = vmul.f32 %v13969_v39, %v7051_v0  ;;  %v7401_v38 = vmul.f32 %v7306_v9, %v7343_v11  ;;  %v481_v27 = vmul.f32 %v6684_v12, %v7252_v43  ;;  %v474_v52 = vadd.f32 %v470_v63, %v422_v32  ;;  %v7407_v55 = vpop.permute.xlu1 %1022  ;;  %1691 = vrot.lane.b32.xlu0 %v6857_v4, %s6229_s16 }
 0x185   :  { %14052 = vst [vmem:[#allocation24_spill] sm:$0xff] %v7366_v8  ;;  %14055 = vst [vmem:[#allocation46_spill] sm:$0xff] %v7386_v44  ;;  %v617_v53 = vsel %vm502_vm6, %v615_v34, %v14056_v57  ;;  %v721_v58 = vmul.f32 %v6698_v29, %v7337_v2  ;;  %v446_v57 = vadd.f32 %v7212_v14, %v14057_v59  ;;  %v14059_v24 = vrot.slane %v7078_v47, 7  ;;  %v14071_v44 = vld [vmem:[#allocation35_spill] sm:$0xff] }
 0x186   :  { %v7415_v8 = vmul.f32 %v14058_v36, %v7051_v0  ;;  %v444_v63 = vmul.f32 %v14023_v1, %v7105_v37  ;;  %v627_v29 = vadd.f32 %v617_v53, %v7152_v35  ;;  %v626_v32 = vadd.f32 %v615_v34, %v514_v40  ;;  %2320 = vrot.lane.b32.xlu1 %v7397_v17, %s6223_s10  ;;  %v7441_v59 = vpop.permute.xlu0 %936 }
 0x187   :  { %v729_v22 = vsel %vm502_vm6, %v727_v61, %v14059_v24  ;;  %v7425_v23 = vmul.f32 %v14060_v60, %v7252_v43  ;;  %v618_v33 = vrot.slane %v609_v50, 7  ;;  %v7429_v0 = vadd.f32 %v1089_v62, %v866_v56 }
 0x188   :  { %v7431_v14 = vadd.f32 %v1115_v13, %v713_v16  ;;  %v671_v24 = vrot.slane %v7393_v21, 7  ;;  %v483_v1 = vmul.f32 %v6684_v12, %v7337_v2  ;;  %v485_v35 = vadd.f32 %v481_v27, %v446_v57  ;;  %v7439_v53 = vpop.permute.xlu1 %1026  ;;  %v14063_v27 = vld [vmem:[#allocation29_spill] sm:$0xff]  ;;  %1695 = vrot.lane.b32.xlu0 %v6906_v5, %s6229_s16 }
 0x189   :  { %v739_v40 = vadd.f32 %v729_v22, %v627_v29  ;;  %v516_v34 = vadd.f32 %v7147_v51, %v474_v52  ;;  %v730_v50 = vrot.slane %v721_v58, 7  ;;  %14061 = vst [vmem:[#allocation50_spill] sm:$0xff] %v7439_v53  ;;  %v830_v56 = vrot.slane %v7415_v8, 6  ;;  %v14062_v51 = vld [vmem:[#allocation25_spill] sm:$0xff] }
 0x18a   :  { %v448_v62 = vadd.f32 %v444_v63, %v7110_v15  ;;  %v7448_v12 = vmul.f32 %v13969_v39, %v7105_v37  ;;  %v738_v13 = vadd.f32 %v727_v61, %v626_v32  ;;  %v755_v22 = vrot.slane %v7425_v23, 7  ;;  %2328 = vrot.lane.b32.xlu1 %v7371_v3, %s6224_s11  ;;  %v14065_v8 = vld [vmem:[#allocation21_spill] sm:$0xff]  ;;  %v14068_v63 = vld [vmem:[#allocation47_spill] sm:$0xff] }
 0x18b   :  { %v872_v21 = vmul.f32 %v14062_v51, %v7252_v43  ;;  %v14064_v52 = vrot.slane %v14063_v27, 7  ;;  %v14066_v57 = vrot.slane %v14065_v8, 7  ;;  %v14067_v39 = vrot.slane %v7008_v31, 7  ;;  %v14070_v27 = vld [vmem:[#allocation57_spill] sm:$0xff] }
 0x18c   :  { %v7466_v23 = vmul.f32 %v14058_v36, %v7105_v37  ;;  %v487_v43 = vadd.f32 %v483_v1, %v448_v62  ;;  %v14069_v29 = vrot.slane %v14068_v63, 7  ;;  %v7476_v53 = vpop.permute.xlu1 %1034  ;;  %v14075_v37 = vld [vmem:[#allocation17_spill] sm:$0xff]  ;;  %v14077_v62 = vld [vmem:[#allocation28_spill] sm:$0xff]  ;;  %1703 = vrot.lane.b32.xlu0 %v6857_v4, %s6230_s17 }
 0x18d   :  { %v621_v58 = vsel %vm502_vm6, %v618_v33, %v14064_v52  ;;  %v673_v15 = vsel %vm502_vm6, %v671_v24, %v14066_v57  ;;  %v619_v61 = vsel %vm502_vm6, %v14067_v39, %v618_v33  ;;  %v792_v52 = vadd.f32 %v14070_v27, %v739_v40  ;;  %14073 = vst [vmem:[#allocation12_spill] sm:$0xff] %v7476_v53  ;;  %v7478_v33 = vpop.permute.xlu0 %940  ;;  %v14078_v40 = vld [vmem:[#allocation26_spill] sm:$0xff] }
 0x18e   :  { %v570_v32 = vadd.f32 %v14069_v29, %v485_v35  ;;  %v628_v16 = vadd.f32 %v619_v61, %v516_v34  ;;  %v14072_v57 = vrot.slane %v14071_v44, 7  ;;  %14074 = vst [vmem:[#allocation30_spill] sm:$0xff] %v7478_v33  ;;  %v14076_v36 = vrot.slane %v14075_v37, 6  ;;  %v14080_v61 = vld [vmem:[#allocation27_spill] sm:$0xff]  ;;  %2332 = vrot.lane.b32.xlu1 %v7397_v17, %s6224_s11 }
 0x18f   :  { %v629_v39 = vadd.f32 %v621_v58, %v14077_v62  ;;  %v749_v35 = vmul.f32 %v14060_v60, %v7337_v2  ;;  %v14079_v34 = vrot.slane %v14078_v40, 7  ;;  %v14081_v29 = vrot.slane %v14080_v61, 6 }
 0x190   :  { %v733_v31 = vsel %vm502_vm6, %v730_v50, %v14072_v57  ;;  %v832_v1 = vsel %vm781_vm5, %v830_v56, %v14076_v36  ;;  %v878_v57 = vrot.slane %v872_v21, 6  ;;  %v7494_v53 = vmul.f32 %v14062_v51, %v7337_v2  ;;  %v14082_v36 = vld [vmem:[#allocation20_spill] sm:$0xff]  ;;  %1707 = vrot.lane.b32.xlu0 %v6906_v5, %s6230_s17 }
 0x191   :  { %v757_v44 = vsel %vm502_vm6, %v755_v22, %v14079_v34  ;;  %v791_v27 = vadd.f32 %v14081_v29, %v738_v13  ;;  %v833_v58 = vrot.slane %v7466_v23, 6  ;;  %v572_v62 = vadd.f32 %v14082_v36, %v487_v43  ;;  %v14084_v13 = vld [vmem:[#allocation19_spill] sm:$0xff]  ;;  %v7506_v29 = vpop.permute.xlu1 %1038  ;;  %v7508_v33 = vpop.permute.xlu0 %960  ;;  %v14085_v43 = vld [vmem:[#allocation58_spill] sm:$0xff] }
 0x192   :  { %v14083_v60 = vrot.slane %v7078_v47, 7  ;;  %v741_v34 = vadd.f32 %v733_v31, %v629_v39  ;;  %v683_v21 = vadd.f32 %v673_v15, %v14084_v13  ;;  %v682_v61 = vadd.f32 %v671_v24, %v570_v32  ;;  %v14086_v36 = vld [vmem:[#allocation18_spill] sm:$0xff]  ;;  %2340 = vrot.lane.b32.xlu1 %v7371_v3, %s6225_s12 }
 0x193   :  { %v840_v2 = vadd.f32 %v832_v1, %v792_v52  ;;  %v1009_v47 = vsel %vm236_vm2, %v14086_v36, %v14085_v43  ;;  %v14088_v31 = vrot.slane %v14065_v8, 7  ;;  %v758_v15 = vrot.slane %v749_v35, 7  ;;  %v14092_v8 = vld [vmem:[#allocation55_spill] sm:$0xff] }
 0x194   :  { %v731_v63 = vsel %vm502_vm6, %v14083_v60, %v730_v50  ;;  %v14087_v50 = vrot.slane %v7448_v12, 7  ;;  %v767_v24 = vadd.f32 %v757_v44, %v683_v21  ;;  %v839_v32 = vadd.f32 %v830_v56, %v791_v27  ;;  %v14096_v27 = vld [vmem:[#allocation43_spill] sm:$0xff]  ;;  %1727 = vrot.lane.b32.xlu0 %v6857_v4, %s6231_s18 }
 0x195   :  { %v740_v51 = vadd.f32 %v731_v63, %v628_v16  ;;  %v14089_v16 = vld [vmem:[#allocation56_spill] sm:$0xff]  ;;  %v881_v63 = vrot.slane %v7494_v53, 6  ;;  %v14091_v60 = vrot.slane %v14075_v37, 6  ;;  %v14093_v36 = vrot.slane %v14092_v8, 6 }
 0x196   :  { %v675_v39 = vsel %vm502_vm6, %v14088_v31, %v14087_v50  ;;  %v14090_v52 = vrot.slane %v14089_v16, 6  ;;  %v14094_v56 = vrot.slane %v7206_v28, 6  ;;  %v7537_v53 = vadd.f32 %v755_v22, %v682_v61  ;;  %v14097_v37 = vld [vmem:[#allocation40_spill] sm:$0xff]  ;;  %2344 = vrot.lane.b32.xlu1 %v7397_v17, %s6225_s12 }
 0x197   :  { %v834_v13 = vsel %vm781_vm5, %v14091_v60, %v833_v58  ;;  %v684_v43 = vadd.f32 %v675_v39, %v572_v62  ;;  %v794_v50 = vadd.f32 %v14093_v36, %v741_v34  ;;  %v793_v21 = vadd.f32 %v14096_v27, %v740_v51  ;;  %v14098_v31 = vld [vmem:[#allocation16_spill] sm:$0xff]  ;;  %v7543_v39 = vld [vmem:[#allocation6 + $0x1e] ss:$0 sm:$0xff]  ;;  %v7545_v34 = vpop.permute.xlu1 %1046  ;;  %v14102_v60 = vld [vmem:[#allocation39_spill] sm:$0xff] }
 0x198   :  { %v880_v1 = vsel %vm781_vm5, %v878_v57, %v14090_v52  ;;  %v7533_v35 = vadd.f32 %v14094_v56, %v7258_v46  ;;  %14095 = vst [vmem:[#allocation42_spill] sm:$0xff] %v7537_v53  ;;  %v1011_v62 = vsel %vm236_vm2, %v14098_v31, %v14097_v37  ;;  %14099 = vst [vmem:[#allocation49_spill] sm:$0xff] %v7543_v39  ;;  %v7547_v52 = vpop.permute.xlu0 %964  ;;  %v14101_v28 = vrot.slane %v14078_v40, 7  ;;  %v14106_v36 = vld [vmem:[#allocation36_spill] sm:$0xff]  ;;  %v7577_v37 = vld [vmem:[#allocation6 + $0x19] ss:$0 sm:$0xff] }
 0x199   :  { %v888_v44 = vadd.f32 %v880_v1, %v840_v2  ;;  %14100 = vst [vmem:[#allocation34_spill] sm:$0xff] %v7547_v52  ;;  %v1013_v22 = vsel %vm241_vm3, %v1009_v47, %v14102_v60  ;;  %v14103_v61 = vrot.slane %v7167_v49, 7  ;;  %v14104_v2 = vrot.slane %v6914_v10, 7  ;;  %v7575_v10 = vld [vmem:[#allocation6 + $0x26] ss:$0 sm:$0xff]  ;;  %1731 = vrot.lane.b32.xlu0 %v6906_v5, %s6231_s18 }
 0x19a   :  { %v759_v46 = vsel %vm502_vm6, %v14101_v28, %v758_v15  ;;  %v1100_v1 = vmul.f32 %v7543_v39, %v7277_v25  ;;  %v7561_v8 = vadd.f32 %v878_v57, %v839_v32  ;;  %v14107_v56 = vrot.slane %v14106_v36, 7  ;;  %v7587_v31 = vld [vmem:[#allocation6 + $0x2b] ss:$0 sm:$0xff]  ;;  %v7591_v28 = vld [vmem:[#allocation6 + $0x23] ss:$0 sm:$0xff]  ;;  %2352 = vrot.lane.b32.xlu1 %v7371_v3, %s6226_s13 }
 0x19b   :  { %v703_v51 = vsel %vm502_vm6, %v14104_v2, %v14103_v61  ;;  %v14108_v27 = vrot.slane %v14089_v16, 6  ;;  %v7573_v49 = vsel %vm246_vm4, %v1013_v22, %v7324_v45  ;;  %v7581_v57 = vadd.f32 %v759_v46, %v684_v43  ;;  %v7585_v16 = vld [vmem:[#allocation6 + $0x1c] ss:$0 sm:$0xff]  ;;  %14111 = vst [vmem:[#allocation51_spill] sm:$0xff] %v7587_v31  ;;  %v14112_v43 = vld [vmem:[#allocation48_spill] sm:$0xff]  ;;  %v7609_v22 = vpop.permute.xlu1 %1050 }
 0x19c   :  { %14105 = vst [vmem:[#allocation53_spill] sm:$0xff] %v7561_v8  ;;  %v7566_v40 = vsel %vm502_vm6, %v758_v15, %v14107_v56  ;;  %14109 = vst [vmem:[#allocation54_spill] sm:$0xff] %v7573_v49  ;;  %v842_v32 = vadd.f32 %v833_v58, %v794_v50  ;;  %v1015_v15 = vsel %vm241_vm3, %v1011_v62, %v7271_v54  ;;  %v7598_v50 = vld [vmem:[#allocation6 + $0x21] ss:$0 sm:$0xff]  ;;  %v7607_v46 = vld [vmem:[#allocation6 + $0x28] ss:$0 sm:$0xff]  ;;  %v7611_v61 = vpop.permute.xlu0 %972 }
 0x19d   :  { %v882_v47 = vsel %vm781_vm5, %v14108_v27, %v881_v63  ;;  %14110 = vst [vmem:[#allocation13_spill] sm:$0xff] %v7581_v57  ;;  %v1074_v45 = vmul.f32 %v7577_v37, %v7277_v25  ;;  %v841_v60 = vadd.f32 %v834_v13, %v793_v21  ;;  %v948_v58 = vsel %vm236_vm2, %v14112_v43, %v7273_v18  ;;  %v7617_v18 = vld [vmem:[#allocation6 + $0x1b] ss:$0 sm:$0xff]  ;;  %v7619_v21 = vld [vmem:[#allocation6 + $0x20] ss:$0 sm:$0xff] }
 0x19e   :  { %14113 = vst [vmem:[#allocation45_spill] sm:$0xff] %v7598_v50  ;;  %v7601_v54 = vadd.f32 %v703_v51, %v7284_v20  ;;  %v7605_v62 = vmul.f32 %v7591_v28, %v7277_v25  ;;  %v7615_v13 = vmul.f32 %v7575_v10, %v7573_v49  ;;  %14115 = vst [vmem:[#allocation23_spill] sm:$0xff] %v7617_v18  ;;  %2356 = vrot.lane.b32.xlu1 %v7397_v17, %s6226_s13 }
 0x19f   :  { %14116 = vst [vmem:[#allocation32_spill] sm:$0xff] %v7619_v21  ;;  %v7623_v20 = vmul.f32 %v7607_v46, %v7277_v25  ;;  %v1078_v2 = vadd.f32 %v1074_v45, %v888_v44  ;;  %v1104_v51 = vadd.f32 %v1100_v1, %v767_v24  ;;  %v1139_v36 = vmul.f32 %v7585_v16, %v7573_v49  ;;  %v14118_v44 = vld [vmem:[#allocation37_spill] sm:$0xff] }
 0x1a0   :  { %14114 = vst [vmem:[#allocation15_spill] sm:$0xff] %v7615_v13  ;;  %v7629_v56 = vmul.f32 %v7587_v31, %v7573_v49  ;;  %v1019_v27 = vsel %vm246_vm4, %v1015_v15, %v7362_v7  ;;  %v1076_v43 = vmul.f32 %v7577_v37, %v7343_v11  ;;  %v890_v23 = vadd.f32 %v881_v63, %v842_v32  ;;  %v7650_v15 = vld [vmem:[#allocation6 + $0x25] ss:$0 sm:$0xff] }
 0x1a1   :  { %v950_v24 = vsel %vm236_vm2, %v14118_v44, %v7326_v26  ;;  %v1165_v1 = vmul.f32 %v7598_v50, %v7573_v49  ;;  %v7644_v45 = vmul.f32 %v7543_v39, %v7343_v11  ;;  %v7648_v7 = vadd.f32 %v882_v47, %v841_v60  ;;  %14120 = vst [vmem:[#allocation21_spill] sm:$0xff] %v7650_v15  ;;  %v7657_v44 = vpop.permute.xlu1 %1609  ;;  %v7665_v60 = vpop.permute.xlu0 %976 }
 0x1a2   :  { %14117 = vst [vmem:[#allocation25_spill] sm:$0xff] %v7629_v56  ;;  %v1126_v63 = vmul.f32 %v7617_v18, %v7573_v49  ;;  %v1152_v26 = vmul.f32 %v7619_v21, %v7573_v49  ;;  %14121 = vst [vmem:[#allocation47_spill] sm:$0xff] %v7657_v44  ;;  %v1141_v53 = vmul.f32 %v7585_v16, %v1019_v27  ;;  %1739 = vrot.lane.b32.xlu0 %v6857_v4, %s6232_s19 }
 0x1a3   :  { %14119 = vst [vmem:[#allocation29_spill] sm:$0xff] %v7648_v7  ;;  %v1167_v8 = vmul.f32 %v7598_v50, %v1019_v27  ;;  %v7663_v47 = vmul.f32 %v7650_v15, %v1019_v27  ;;  %v7667_v7 = vld [vmem:[#allocation6 + $0x2a] ss:$0 sm:$0xff]  ;;  %v7671_v39 = vadd.f32 %v1139_v36, %v7373_v19  ;;  %v7674_v32 = vmul.f32 %v7575_v10, %v1019_v27 }
 0x1a4   :  { %14123 = vst [vmem:[#allocation35_spill] sm:$0xff] %v7667_v7  ;;  %v952_v57 = vsel %vm241_vm3, %v948_v58, %v7364_v48  ;;  %v7681_v44 = vadd.f32 %v1165_v1, %v7358_v42  ;;  %v7684_v13 = vmul.f32 %v7667_v7, %v1019_v27  ;;  %v7687_v52 = vmul.f32 %v7587_v31, %v1019_v27 }
 0x1a5   :  { %14122 = vst [vmem:[#allocation57_spill] sm:$0xff] %v7663_v47  ;;  %14124 = vst [vmem:[#allocation17_spill] sm:$0xff] %v7674_v32  ;;  %v7691_v19 = vsel %vm246_vm4, %v952_v57, %v7441_v59  ;;  %v7696_v58 = vadd.f32 %v1126_v63, %v1078_v2  ;;  %v7698_v36 = vadd.f32 %v1152_v26, %v1104_v51  ;;  %v7701_v1 = vpop.permute.xlu1 %1613  ;;  %v14128_v57 = vld [vmem:[#allocation31_spill] sm:$0xff]  ;;  %v14130_v48 = vrot.slane %v7448_v12, 7  ;;  %v7715_v51 = vpop.permute.xlu0 %984  ;;  %v7717_v63 = vld [vmem:[#allocation6 + $0x30] ss:$0 sm:$0xff] }
 0x1a6   :  { %14125 = vst [vmem:[#allocation28_spill] sm:$0xff] %v7684_v13  ;;  %14126 = vst [vmem:[#allocation26_spill] sm:$0xff] %v7687_v52  ;;  %v1128_v42 = vmul.f32 %v7617_v18, %v1019_v27  ;;  %v7704_v56 = vadd.f32 %v1141_v53, %v7429_v0  ;;  %v7707_v31 = vadd.f32 %v1167_v8, %v7431_v14  ;;  %v14129_v50 = vrot.slane %v14128_v57, 7  ;;  %v14133_v59 = vld [vmem:[#allocation38_spill] sm:$0xff]  ;;  %v14140_v52 = vld [vmem:[#allocation52_spill] sm:$0xff] }
 0x1a7   :  { %14127 = vst [vmem:[#allocation27_spill] sm:$0xff] %v7701_v1  ;;  %14131 = vst [vmem:[#allocation20_spill] sm:$0xff] %v7717_v63  ;;  %v7722_v0 = vmul.f32 %v7289_v30, %v7691_v19  ;;  %v7726_v14 = vmul.f32 %v7591_v28, %v7343_v11  ;;  %v7730_v53 = vmul.f32 %v7607_v46, %v7343_v11  ;;  %2376 = vrot.lane.b32.xlu1 %v7371_v3, %s6227_s14  ;;  %v6117_v8 = vld [vmem:[#allocation2 + $0x38] sm:$0xff] }
 0x1a8   :  { %v677_v2 = vsel %vm502_vm6, %v14130_v48, %v14129_v50  ;;  %v6116_v50 = vld [vmem:[#allocation2 + $0x28] sm:$0xff]  ;;  %v954_v57 = vsel %vm241_vm3, %v950_v24, %v7409_v6  ;;  %1743 = vrot.lane.b32.xlu0 %v6906_v5, %s6232_s19  ;;  %v7743_v11 = vmul.f32 %v7619_v21, %v1019_v27  ;;  %v1080_v47 = vadd.f32 %v1076_v43, %v890_v23  ;;  %v14137_v24 = vld [vmem:[#allocation30_spill] sm:$0xff] }
 0x1a9   :  { %14132 = vst [vmem:[#allocation19_spill] sm:$0xff] %v7722_v0  ;;  %v1057_v48 = vsel %vm236_vm2, %v6116_v50, %v7407_v55  ;;  %v685_v26 = vadd.f32 %v677_v2, %v14133_v59  ;;  %v7746_v32 = vpop.permute.xlu1 %1621  ;;  %v7750_v12 = vmul.f32 %v7717_v63, %v7573_v49  ;;  %v7754_v55 = vmul.f32 %v7306_v9, %v7691_v19  ;;  %v7764_v59 = vpop.permute.xlu0 %988  ;;  %v7770_v43 = vld [vmem:[#allocation6 + $0x2d] ss:$0 sm:$0xff]  ;;  %v14142_v13 = vld [vmem:[#allocation50_spill] sm:$0xff] }
 0x1aa   :  { %14134 = vst [vmem:[#allocation58_spill] sm:$0xff] %v7746_v32  ;;  %v7758_v6 = vmul.f32 %v7262_v41, %v7691_v19  ;;  %v7762_v27 = vsel %vm246_vm4, %v954_v57, %v14137_v24  ;;  %v7768_v23 = vmul.f32 %v7650_v15, %v7573_v49  ;;  %v7775_v50 = vmul.f32 %v7591_v28, %v7691_v19  ;;  %v14139_v57 = vld [vmem:[#allocation14_spill] sm:$0xff] }
 0x1ab   :  { %14135 = vst [vmem:[#allocation18_spill] sm:$0xff] %v7754_v55  ;;  %2380 = vrot.lane.b32.xlu1 %v7397_v17, %s6227_s14  ;;  %v1086_v24 = vmul.f32 %v14139_v57, %v7691_v19  ;;  %v1112_v15 = vmul.f32 %v14140_v52, %v7691_v19  ;;  %v769_v21 = vadd.f32 %v7566_v40, %v685_v26 }
 0x1ac   :  { %14136 = vst [vmem:[#allocation56_spill] sm:$0xff] %v7758_v6  ;;  %14138 = vst [vmem:[#allocation55_spill] sm:$0xff] %v7775_v50  ;;  %1751 = vrot.lane.b32.xlu0 %v6857_v4, %s6233_s20  ;;  %v7790_v2 = vmul.f32 %v7667_v7, %v7573_v49  ;;  %v1059_v18 = vsel %vm236_vm2, %v6117_v8, %v14142_v13  ;;  %v1233_v63 = vmul.f32 %v7289_v30, %v7762_v27  ;;  %v14145_v7 = vld [vmem:[#allocation44_spill] sm:$0xff] }
 0x1ad   :  { %v7798_v1 = vmul.f32 %v7607_v46, %v7691_v19  ;;  %v7800_v32 = vpop.permute.xlu1 %1625  ;;  %v7804_v4 = vmul.f32 %v7770_v43, %v7277_v25  ;;  %v1289_v13 = vmul.f32 %v7306_v9, %v7762_v27  ;;  %v7810_v8 = vadd.f32 %v1128_v42, %v1080_v47  ;;  %v7812_v30 = vpop.permute.xlu0 %996  ;;  %v14148_v47 = vld [vmem:[#allocation33_spill] sm:$0xff] }
 0x1ae   :  { %14141 = vst [vmem:[#allocation43_spill] sm:$0xff] %v7790_v2  ;;  %14144 = vst [vmem:[#allocation16_spill] sm:$0xff] %v7800_v32  ;;  %v14146_v49 = vrot.slane %v14145_v7, 7  ;;  %v14147_v2 = vrot.slane %v7722_v0, 7  ;;  %v1088_v25 = vmul.f32 %v14139_v57, %v7762_v27  ;;  %v1114_v40 = vmul.f32 %v14140_v52, %v7762_v27  ;;  %v14150_v0 = vld [vmem:[#allocation12_spill] sm:$0xff] }
 0x1af   :  { %14143 = vst [vmem:[#allocation40_spill] sm:$0xff] %v7798_v1  ;;  %2388 = vrot.lane.b32.xlu1 %v7371_v3, %s6228_s15  ;;  %v7827_v9 = vadd.f32 %v1086_v24, %v7533_v35  ;;  %v7830_v42 = vadd.f32 %v1112_v15, %v14148_v47  ;;  %v1242_v52 = vrot.slane %v1233_v63, 7  ;;  %v7837_v57 = vld [vmem:[#allocation6 + $0x1d] ss:$0 sm:$0xff]  ;;  %v7844_v15 = vmul.f32 %v7591_v28, %v7762_v27  ;;  %v14156_v28 = vld [vmem:[#allocation41_spill] sm:$0xff] }
 0x1b0   :  { %v1241_v32 = vsel %vm502_vm6, %v14147_v2, %v14146_v49  ;;  %v1061_v49 = vsel %vm241_vm3, %v1057_v48, %v14150_v0  ;;  %v1106_v2 = vadd.f32 %v7644_v45, %v769_v21  ;;  %1755 = vrot.lane.b32.xlu0 %v6906_v5, %s6233_s20  ;;  %v14153_v21 = vld [vmem:[#allocation22_spill] sm:$0xff]  ;;  %v14155_v5 = vrot.slane %v7754_v55, 7 }
 0x1b1   :  { %14149 = vst [vmem:[#allocation39_spill] sm:$0xff] %v7830_v42  ;;  %v1065_v26 = vsel %vm246_vm4, %v1061_v49, %v7545_v34  ;;  %v7846_v24 = vpop.permute.xlu1 %1633  ;;  %v7849_v0 = vadd.f32 %v1241_v32, %v7671_v39  ;;  %v14154_v45 = vrot.slane %v14153_v21, 7  ;;  %v1298_v48 = vrot.slane %v1289_v13, 7  ;;  %v7860_v47 = vpop.permute.xlu0 %1000  ;;  %v14160_v32 = vld [vmem:[#allocation24_spill] sm:$0xff]  ;;  %v7875_v13 = vld [vmem:[#allocation6 + $0x22] ss:$0 sm:$0xff] }
 0x1b2   :  { %14151 = vst [vmem:[#allocation36_spill] sm:$0xff] %v7846_v24  ;;  %v7858_v34 = vmul.f32 %v7607_v46, %v7762_v27  ;;  %v14157_v49 = vrot.slane %v14156_v28, 6  ;;  %v14158_v35 = vrot.slane %v7758_v6, 6  ;;  %v7873_v24 = vadd.f32 %v1114_v40, %v7601_v54  ;;  %v7884_v6 = vld [vmem:[#allocation2 + $0x60] sm:$0xff]  ;;  %v7890_v54 = vld [vmem:[#allocation6 + $0x2c] ss:$0 sm:$0xff] }
 0x1b3   :  { %14152 = vst [vmem:[#allocation48_spill] sm:$0xff] %v7849_v0  ;;  %v1297_v63 = vsel %vm502_vm6, %v14155_v5, %v14154_v45  ;;  %v7870_v0 = vadd.f32 %v1088_v25, %v14160_v32  ;;  %v14163_v46 = vrot.slane %v7605_v62, 7  ;;  %v14164_v45 = vrot.slane %v7775_v50, 7  ;;  %2392 = vrot.lane.b32.xlu1 %v7397_v17, %s6228_s15  ;;  %14165 = vst [vmem:[#allocation30_spill] sm:$0xff] %v7890_v54 }
 0x1b4   :  { %v7867_v39 = vsel %vm781_vm5, %v14158_v35, %v14157_v49  ;;  %14162 = vst [vmem:[#allocation38_spill] sm:$0xff] %v7873_v24  ;;  %v1063_v25 = vsel %vm241_vm3, %v1059_v18, %v7506_v29  ;;  %v7888_v35 = vld [vmem:[#allocation6 + $0x27] ss:$0 sm:$0xff]  ;;  %v1178_v40 = vmul.f32 %v7837_v57, %v1065_v26  ;;  %v1158_v49 = vadd.f32 %v7743_v11, %v1106_v2  ;;  %v14169_v2 = vld [vmem:[#allocation46_spill] sm:$0xff] }
 0x1b5   :  { %14159 = vst [vmem:[#allocation37_spill] sm:$0xff] %v7867_v39  ;;  %14161 = vst [vmem:[#allocation31_spill] sm:$0xff] %v7870_v0  ;;  %v1213_v5 = vsel %vm502_vm6, %v14164_v45, %v14163_v46  ;;  %2314 = vrot.lane.b32.xlu0 %v7884_v6, %s6223_s10  ;;  %v7898_v32 = vmul.f32 %v7262_v41, %v7762_v27  ;;  %v7900_v46 = vld [vmem:[#allocation6 + $0x31] ss:$0 sm:$0xff]  ;;  %v14167_v45 = vrot.slane %v7623_v20, 7  ;;  %v14168_v29 = vrot.slane %v7798_v1, 7  ;;  %v7908_v39 = vpop.permute.xlu1 %1637 }
 0x1b6   :  { %14166 = vst [vmem:[#allocation14_spill] sm:$0xff] %v7900_v46  ;;  %v14170_v24 = vrot.slane %v14169_v2, 7  ;;  %v1191_v41 = vmul.f32 %v7875_v13, %v1065_v26  ;;  %v14171_v42 = vrot.slane %v14145_v7, 7  ;;  %v7927_v11 = vmul.f32 %v7888_v35, %v1065_v26 }
 0x1b7   :  { %v1269_v18 = vsel %vm502_vm6, %v14168_v29, %v14167_v45  ;;  %v7921_v45 = vpop.permute.xlu0 %1020  ;;  %v14172_v29 = vrot.slane %v7401_v38, 7  ;;  %v1067_v2 = vsel %vm246_vm4, %v1063_v25, %v7609_v22  ;;  %v14174_v7 = vrot.slane %v14153_v21, 7  ;;  %2400 = vrot.lane.b32.xlu1 %v7371_v3, %s6229_s16  ;;  %v7941_v38 = vld [vmem:[#allocation2 + $0x70] sm:$0xff] }
 0x1b8   :  { %v1245_v55 = vsel %vm502_vm6, %v1242_v52, %v14170_v24  ;;  %v7919_v1 = vsel %vm502_vm6, %v14171_v42, %v1242_v52  ;;  %v7930_v24 = vmul.f32 %v7890_v54, %v1065_v26  ;;  %v1182_v52 = vadd.f32 %v1178_v40, %v7696_v58 }
 0x1b9   :  { %v1301_v50 = vsel %vm502_vm6, %v1298_v48, %v14172_v29  ;;  %v7937_v42 = vsel %vm502_vm6, %v14174_v7, %v1298_v48  ;;  %v7945_v29 = vmul.f32 %v7900_v46, %v1065_v26  ;;  %2318 = vrot.lane.b32.xlu0 %v7941_v38, %s6223_s10  ;;  %v7950_v22 = vadd.f32 %v1245_v55, %v7704_v56  ;;  %v7958_v0 = vpop.permute.xlu1 %1645  ;;  %v14194_v46 = vld [vmem:[#allocation54_spill] sm:$0xff] }
 0x1ba   :  { %14173 = vst [vmem:[#allocation52_spill] sm:$0xff] %v7930_v24  ;;  %v14176_v48 = vrot.slane %v7726_v14, 7  ;;  %v14177_v25 = vrot.slane %v7844_v15, 7  ;;  %v7961_v58 = vadd.f32 %v1297_v63, %v7681_v44  ;;  %v7964_v26 = vadd.f32 %v1301_v50, %v7707_v31 }
 0x1bb   :  { %14175 = vst [vmem:[#allocation50_spill] sm:$0xff] %v7945_v29  ;;  %v1073_v56 = vmul.f32 %v7577_v37, %v7691_v19  ;;  %v1195_v55 = vadd.f32 %v1191_v41, %v7698_v36  ;;  %v1180_v40 = vmul.f32 %v7837_v57, %v1067_v2  ;;  %v14178_v14 = vrot.slane %v7730_v53, 7  ;;  %v7978_v63 = vpop.permute.xlu0 %1024  ;;  %2404 = vrot.lane.b32.xlu1 %v7397_v17, %s6229_s16 }
 0x1bc   :  { %v1217_v7 = vsel %vm502_vm6, %v14177_v25, %v14176_v48  ;;  %v14179_v21 = vrot.slane %v7858_v34, 7  ;;  %v1008_v44 = vsel %vm236_vm2, %v7508_v33, %v7611_v61  ;;  %v1193_v36 = vmul.f32 %v7875_v13, %v1067_v2 }
 0x1bd   :  { %v1012_v41 = vsel %vm241_vm3, %v1008_v44, %v7715_v51  ;;  %v7987_v53 = vadd.f32 %v1213_v5, %v1182_v52  ;;  %2326 = vrot.lane.b32.xlu0 %v7884_v6, %s6224_s11  ;;  %v14180_v61 = vrot.slane %v7898_v32, 6  ;;  %v14181_v25 = vrot.slane %v14156_v28, 6  ;;  %v8009_v52 = vpop.permute.xlu1 %1649 }
 0x1be   :  { %v1273_v48 = vsel %vm502_vm6, %v14179_v21, %v14178_v14  ;;  %v7992_v33 = vsel %vm246_vm4, %v1012_v41, %v7812_v30  ;;  %v8004_v14 = vmul.f32 %v7888_v35, %v1067_v2  ;;  %v8007_v5 = vmul.f32 %v7890_v54, %v1067_v2  ;;  %v14184_v30 = vld [vmem:[#allocation49_spill] sm:$0xff] }
 0x1bf   :  { %v8001_v51 = vsel %vm781_vm5, %v14181_v25, %v14180_v61  ;;  %v1099_v44 = vmul.f32 %v14184_v30, %v7691_v19  ;;  %v8015_v41 = vmul.f32 %v7770_v43, %v7691_v19  ;;  %v8017_v21 = vadd.f32 %v1269_v18, %v1195_v55  ;;  %v14187_v61 = vld [vmem:[#allocation34_spill] sm:$0xff]  ;;  %v8023_v50 = vpop.permute.xlu0 %1032  ;;  %v14188_v2 = vld [vmem:[#allocation53_spill] sm:$0xff]  ;;  %2412 = vrot.lane.b32.xlu1 %v7371_v3, %s6230_s17 }
 0x1c0   :  { %14182 = vst [vmem:[#allocation44_spill] sm:$0xff] %v8004_v14  ;;  %14183 = vst [vmem:[#allocation33_spill] sm:$0xff] %v8007_v5  ;;  %v1184_v28 = vadd.f32 %v1180_v40, %v7810_v8  ;;  %v1010_v25 = vsel %vm236_vm2, %v14187_v61, %v7665_v60  ;;  %v8026_v31 = vadd.f32 %v1073_v56, %v14188_v2  ;;  %v8034_v8 = vld [vmem:[#allocation6 + $0x2f] ss:$0 sm:$0xff]  ;;  %v14192_v61 = vld [vmem:[#allocation42_spill] sm:$0xff]  ;;  %v1490_v55 = vrot.slane %v7804_v4, 6 }
 0x1c1   :  { %14185 = vst [vmem:[#allocation12_spill] sm:$0xff] %v8015_v41  ;;  %14186 = vst [vmem:[#allocation22_spill] sm:$0xff] %v8017_v21  ;;  %v1197_v29 = vadd.f32 %v1193_v36, %v1158_v49  ;;  %v1014_v24 = vsel %vm241_vm3, %v1010_v25, %v7764_v59  ;;  %v1138_v19 = vmul.f32 %v7585_v16, %v7992_v33  ;;  %2330 = vrot.lane.b32.xlu0 %v7941_v38, %s6224_s11  ;;  %v14231_v56 = vld [vmem:[#allocation48_spill] sm:$0xff] }
 0x1c2   :  { %v8038_v60 = vmul.f32 %v7770_v43, %v7762_v27  ;;  %v1343_v18 = vmul.f32 %v7575_v10, %v7992_v33  ;;  %v8044_v49 = vsel %vm246_vm4, %v1014_v24, %v7860_v47  ;;  %v8052_v43 = vpop.permute.xlu1 %1669  ;;  %v8055_v25 = vadd.f32 %v1099_v44, %v14192_v61  ;;  %v14193_v47 = vld [vmem:[#allocation45_spill] sm:$0xff] }
 0x1c3   :  { %14191 = vst [vmem:[#allocation24_spill] sm:$0xff] %v8052_v43  ;;  %v1164_v24 = vmul.f32 %v14193_v47, %v7992_v33  ;;  %v8060_v21 = vpop.permute.xlu0 %1036  ;;  %v8064_v59 = vmul.f32 %v8034_v8, %v14194_v46  ;;  %v1075_v40 = vmul.f32 %v7577_v37, %v7762_v27  ;;  %v1101_v36 = vmul.f32 %v14184_v30, %v7762_v27  ;;  %v14197_v37 = vld [vmem:[#allocation51_spill] sm:$0xff] }
 0x1c4   :  { %14189 = vst [vmem:[#allocation41_spill] sm:$0xff] %v8038_v60  ;;  %v1142_v44 = vadd.f32 %v1138_v19, %v7827_v9  ;;  %v1140_v61 = vmul.f32 %v7585_v16, %v8044_v49  ;;  %2416 = vrot.lane.b32.xlu1 %v7397_v17, %s6230_s17  ;;  %v8077_v46 = vadd.f32 %v1217_v7, %v1184_v28  ;;  %v1351_v5 = vrot.slane %v1343_v18, 7 }
 0x1c5   :  { %14195 = vst [vmem:[#allocation46_spill] sm:$0xff] %v8064_v59  ;;  %v1399_v43 = vmul.f32 %v14197_v37, %v7992_v33  ;;  %v1345_v27 = vmul.f32 %v7575_v10, %v8044_v49  ;;  %2338 = vrot.lane.b32.xlu0 %v7884_v6, %s6225_s12  ;;  %v8085_v16 = vadd.f32 %v1273_v48, %v1197_v29  ;;  %v14200_v4 = vrot.slane %v8015_v41, 6  ;;  %v14208_v48 = vld [vmem:[#allocation39_spill] sm:$0xff] }
 0x1c6   :  { %14196 = vst [vmem:[#allocation49_spill] sm:$0xff] %v8077_v46  ;;  %v8087_v9 = vpop.permute.xlu1 %1673  ;;  %v14202_v7 = vrot.slane %v7844_v15, 7  ;;  %v14203_v28 = vrot.slane %v7605_v62, 7  ;;  %v14205_v10 = vrot.slane %v7858_v34, 7  ;;  %v14206_v18 = vrot.slane %v7623_v20, 7  ;;  %v14210_v15 = vld [vmem:[#allocation13_spill] sm:$0xff] }
 0x1c7   :  { %14198 = vst [vmem:[#allocation34_spill] sm:$0xff] %v8085_v16  ;;  %14199 = vst [vmem:[#allocation53_spill] sm:$0xff] %v8087_v9  ;;  %v8092_v30 = vsel %vm781_vm5, %v14200_v4, %v1490_v55  ;;  %v1168_v2 = vadd.f32 %v1164_v24, %v14208_v48  ;;  %v1045_v4 = vpop.permute.xlu0 %1044  ;;  %v14209_v9 = vld [vmem:[#allocation29_spill] sm:$0xff]  ;;  %v8114_v62 = vadd.f32 %v1101_v36, %v14210_v15  ;;  %v14214_v34 = vld [vmem:[#allocation31_spill] sm:$0xff]  ;;  %v14215_v24 = vrot.slane %v8038_v60, 6 }
 0x1c8   :  { %14201 = vst [vmem:[#allocation42_spill] sm:$0xff] %v8092_v30  ;;  %v8099_v19 = vsel %vm502_vm6, %v14203_v28, %v14202_v7  ;;  %v8106_v29 = vsel %vm502_vm6, %v14206_v18, %v14205_v10  ;;  %v8111_v41 = vadd.f32 %v1075_v40, %v14209_v9  ;;  %v14212_v7 = vld [vmem:[#allocation19_spill] sm:$0xff]  ;;  %v1144_v14 = vadd.f32 %v1140_v61, %v14214_v34  ;;  %v14223_v34 = vld [vmem:[#allocation20_spill] sm:$0xff] }
 0x1c9   :  { %14204 = vst [vmem:[#allocation45_spill] sm:$0xff] %v8099_v19  ;;  %14207 = vst [vmem:[#allocation54_spill] sm:$0xff] %v8106_v29  ;;  %v14213_v28 = vrot.slane %v14212_v7, 7  ;;  %v8121_v20 = vmul.f32 %v14197_v37, %v8044_v49  ;;  %2436 = vrot.lane.b32.xlu1 %v7371_v3, %s6231_s18  ;;  %v8128_v40 = vsel %vm781_vm5, %v1490_v55, %v14215_v24  ;;  %v14217_v9 = vld [vmem:[#allocation15_spill] sm:$0xff]  ;;  %v1407_v18 = vrot.slane %v1399_v43, 7  ;;  %v14219_v37 = vld [vmem:[#allocation58_spill] sm:$0xff] }
 0x1ca   :  { %14211 = vst [vmem:[#allocation51_spill] sm:$0xff] %v8114_v62  ;;  %14216 = vst [vmem:[#allocation39_spill] sm:$0xff] %v8128_v40  ;;  %v14218_v36 = vrot.slane %v14217_v9, 7  ;;  %v1354_v61 = vrot.slane %v1345_v27, 7  ;;  %2342 = vrot.lane.b32.xlu0 %v7941_v38, %s6225_s12  ;;  %v14220_v48 = vld [vmem:[#allocation47_spill] sm:$0xff]  ;;  %v14221_v7 = vld [vmem:[#allocation16_spill] sm:$0xff]  ;;  %v8145_v24 = vmul.f32 %v14223_v34, %v7992_v33 }
 0x1cb   :  { %v1250_v46 = vadd.f32 %v14213_v28, %v1142_v44  ;;  %v1166_v44 = vmul.f32 %v14193_v47, %v8044_v49  ;;  %v1656_v15 = vsel %vm236_vm2, %v14220_v48, %v14219_v37  ;;  %v14222_v28 = vld [vmem:[#allocation27_spill] sm:$0xff]  ;;  %v8149_v47 = vpop.permute.xlu1 %1681  ;;  %v14226_v27 = vld [vmem:[#allocation18_spill] sm:$0xff]  ;;  %v14228_v60 = vld [vmem:[#allocation36_spill] sm:$0xff]  ;;  %v1049_v59 = vpop.permute.xlu0 %1048 }
 0x1cc   :  { %v1353_v10 = vsel %vm502_vm6, %v1351_v5, %v14218_v36  ;;  %v1658_v55 = vsel %vm236_vm2, %v14222_v28, %v14221_v7  ;;  %v14224_v43 = vld [vmem:[#allocation23_spill] sm:$0xff]  ;;  %14225 = vst [vmem:[#allocation29_spill] sm:$0xff] %v8149_v47  ;;  %v14227_v16 = vrot.slane %v14226_v27, 7  ;;  %v1660_v29 = vsel %vm241_vm3, %v1656_v15, %v14228_v60  ;;  %v14229_v37 = vld [vmem:[#allocation32_spill] sm:$0xff]  ;;  %v14230_v7 = vld [vmem:[#allocation21_spill] sm:$0xff] }
 0x1cd   :  { %v1125_v36 = vmul.f32 %v14224_v43, %v7992_v33  ;;  %v8157_v48 = vmul.f32 %v14229_v37, %v7992_v33  ;;  %v8161_v28 = vmul.f32 %v14230_v7, %v7992_v33  ;;  %v1362_v30 = vadd.f32 %v1351_v5, %v1250_v46  ;;  %2440 = vrot.lane.b32.xlu1 %v7397_v17, %s6231_s18  ;;  %v14232_v60 = vld [vmem:[#allocation38_spill] sm:$0xff]  ;;  %v6118_v19 = vld [vmem:[#allocation2 + $0x20] sm:$0xff]  ;;  %v14234_v5 = vld [vmem:[#allocation25_spill] sm:$0xff] }
 0x1ce   :  { %v1306_v40 = vadd.f32 %v14227_v16, %v1168_v2  ;;  %v1363_v62 = vadd.f32 %v1353_v10, %v14231_v56  ;;  %v1252_v47 = vadd.f32 %v7919_v1, %v1144_v14  ;;  %v1170_v2 = vadd.f32 %v1166_v44, %v14232_v60  ;;  %2350 = vrot.lane.b32.xlu0 %v7884_v6, %s6226_s13  ;;  %v8179_v1 = vld [vmem:[#allocation6 + $0x47] ss:$0 sm:$0xff]  ;;  %v8197_v27 = vld [vmem:[#allocation6 + $0x33] ss:$0 sm:$0xff]  ;;  %v8213_v60 = vld [vmem:[#allocation6 + $0x42] ss:$0 sm:$0xff] }
 0x1cf   :  { %v14233_v16 = vrot.slane %v14217_v9, 7  ;;  %v1056_v54 = vsel %vm236_vm2, %v6118_v19, %v7921_v45  ;;  %v14235_v46 = vrot.slane %v14234_v5, 7  ;;  %14236 = vst [vmem:[#allocation13_spill] sm:$0xff] %v8179_v1  ;;  %v8183_v14 = vsel %vm246_vm4, %v1660_v29, %v7958_v0  ;;  %v14238_v9 = vld [vmem:[#allocation17_spill] sm:$0xff]  ;;  %v8191_v19 = vpop.permute.xlu1 %1685  ;;  %14241 = vst [vmem:[#allocation15_spill] sm:$0xff] %v8197_v27 }
 0x1d0   :  { %14237 = vst [vmem:[#allocation19_spill] sm:$0xff] %v8183_v14  ;;  %v14239_v10 = vrot.slane %v14238_v9, 7  ;;  %v1060_v45 = vsel %vm241_vm3, %v1056_v54, %v8023_v50  ;;  %v8199_v0 = vld [vmem:[#allocation6 + $0x3d] ss:$0 sm:$0xff]  ;;  %v1129_v29 = vadd.f32 %v1125_v36, %v8026_v31  ;;  %v8205_v9 = vpop.permute.xlu0 %1607  ;;  %14246 = vst [vmem:[#allocation16_spill] sm:$0xff] %v8213_v60  ;;  %v8224_v36 = vadd.f32 %v7937_v42, %v1170_v2 }
 0x1d1   :  { %v1355_v15 = vsel %vm502_vm6, %v14233_v16, %v1354_v61  ;;  %v1409_v56 = vsel %vm502_vm6, %v1407_v18, %v14235_v46  ;;  %v8193_v16 = vadd.f32 %v1407_v18, %v1306_v40  ;;  %v1662_v46 = vsel %vm241_vm3, %v1658_v55, %v7908_v39  ;;  %14242 = vst [vmem:[#allocation58_spill] sm:$0xff] %v8199_v0  ;;  %v8211_v18 = vld [vmem:[#allocation6 + $0x38] ss:$0 sm:$0xff] }
 0x1d2   :  { %v1357_v44 = vsel %vm502_vm6, %v1354_v61, %v14239_v10  ;;  %v8203_v61 = vsel %vm246_vm4, %v1060_v45, %v1045_v4  ;;  %v14243_v10 = vld [vmem:[#allocation56_spill] sm:$0xff]  ;;  %v1364_v40 = vadd.f32 %v1355_v15, %v1252_v47  ;;  %14245 = vst [vmem:[#allocation47_spill] sm:$0xff] %v8211_v18  ;;  %v14247_v39 = vld [vmem:[#allocation26_spill] sm:$0xff]  ;;  %v1419_v4 = vadd.f32 %v1409_v56, %v7961_v58  ;;  %v14251_v15 = vld [vmem:[#allocation37_spill] sm:$0xff] }
 0x1d3   :  { %14240 = vst [vmem:[#allocation31_spill] sm:$0xff] %v8193_v16  ;;  %v14244_v54 = vrot.slane %v14243_v10, 6  ;;  %v14248_v55 = vrot.slane %v14247_v39, 7  ;;  %v14249_v16 = vrot.slane %v8121_v20, 7  ;;  %2448 = vrot.lane.b32.xlu1 %v7371_v3, %s6232_s19  ;;  %v1365_v47 = vadd.f32 %v1357_v44, %v7950_v22  ;;  %2354 = vrot.lane.b32.xlu0 %v7941_v38, %s6226_s13  ;;  %v8244_v22 = vpop.permute.xlu1 %1693 }
 0x1d4   :  { %v1523_v45 = vadd.f32 %v14251_v15, %v1363_v62  ;;  %v1794_v56 = vmul.f32 %v8197_v27, %v8183_v14  ;;  %v8240_v42 = vmul.f32 %v8199_v0, %v8183_v14  ;;  %v1177_v2 = vmul.f32 %v7837_v57, %v8203_v61 }
 0x1d5   :  { %v8209_v50 = vadd.f32 %v14244_v54, %v1362_v30  ;;  %v1413_v31 = vsel %vm502_vm6, %v14249_v16, %v14248_v55  ;;  %v8228_v30 = vmul.f32 %v8179_v1, %v8183_v14  ;;  %v6119_v16 = vld [vmem:[#allocation2 + $0x30] sm:$0xff]  ;;  %v1820_v62 = vmul.f32 %v8211_v18, %v8183_v14  ;;  %v8255_v54 = vpop.permute.xlu0 %1611 }
 0x1d6   :  { %v1058_v58 = vsel %vm236_vm2, %v6119_v16, %v7978_v63  ;;  %14252 = vst [vmem:[#allocation20_spill] sm:$0xff] %v8240_v42  ;;  %v8250_v44 = vmul.f32 %v8213_v60, %v8183_v14  ;;  %v1421_v63 = vadd.f32 %v1413_v31, %v7964_v26  ;;  %v1557_v10 = vmul.f32 %v14223_v34, %v8044_v49 }
 0x1d7   :  { %14250 = vst [vmem:[#allocation27_spill] sm:$0xff] %v8228_v30  ;;  %v1524_v39 = vadd.f32 %v8001_v51, %v1364_v40  ;;  %v8260_v55 = vsel %vm246_vm4, %v1662_v46, %v8009_v52  ;;  %v1062_v15 = vsel %vm241_vm3, %v1058_v58, %v8060_v21  ;;  %v8266_v16 = vmul.f32 %v7888_v35, %v8203_v61 }
 0x1d8   :  { %14253 = vst [vmem:[#allocation23_spill] sm:$0xff] %v8250_v44  ;;  %14254 = vst [vmem:[#allocation18_spill] sm:$0xff] %v8260_v55  ;;  %2452 = vrot.lane.b32.xlu1 %v7397_v17, %s6232_s19  ;;  %v14255_v34 = vrot.slane %v7898_v32, 6  ;;  %v14256_v51 = vrot.slane %v7750_v12, 6  ;;  %v14257_v52 = vrot.slane %v8145_v24, 6  ;;  %v8279_v21 = vsel %vm246_vm4, %v1062_v15, %v1049_v59  ;;  %2374 = vrot.lane.b32.xlu0 %v7884_v6, %s6227_s14 }
 0x1d9   :  { %v1323_v58 = vrot.slane %v8161_v28, 7  ;;  %v1181_v26 = vadd.f32 %v1177_v2, %v1129_v29  ;;  %v1127_v32 = vmul.f32 %v14224_v43, %v8044_v49  ;;  %v1564_v30 = vrot.slane %v1557_v10, 6  ;;  %v8294_v15 = vpop.permute.xlu0 %1619 }
 0x1da   :  { %v1525_v31 = vadd.f32 %v14255_v34, %v1365_v47  ;;  %v1563_v46 = vsel %vm781_vm5, %v14257_v52, %v14256_v51  ;;  %v8287_v47 = vpop.permute.xlu1 %1697  ;;  %v8292_v59 = vmul.f32 %v8197_v27, %v8260_v55  ;;  %v1822_v52 = vmul.f32 %v8211_v18, %v8260_v55 }
 0x1db   :  { %v1571_v51 = vadd.f32 %v1563_v46, %v1523_v45  ;;  %v8298_v28 = vadd.f32 %v1820_v62, %v1419_v4  ;;  %v1435_v29 = vrot.slane %v8266_v16, 7  ;;  %v1179_v43 = vmul.f32 %v7837_v57, %v8279_v21  ;;  %v14261_v16 = vld [vmem:[#allocation55_spill] sm:$0xff] }
 0x1dc   :  { %2460 = vrot.lane.b32.xlu1 %v7371_v3, %s6233_s20  ;;  %v8309_v2 = vmul.f32 %v8199_v0, %v8260_v55  ;;  %v8313_v10 = vmul.f32 %v8213_v60, %v8260_v55  ;;  %v1317_v4 = vmul.f32 %v14230_v7, %v8044_v49  ;;  %2378 = vrot.lane.b32.xlu0 %v7941_v38, %s6227_s14  ;;  %v14259_v57 = vrot.slane %v7768_v23, 7  ;;  %v14279_v60 = vld [vmem:[#allocation44_spill] sm:$0xff] }
 0x1dd   :  { %v8305_v45 = vadd.f32 %v1794_v56, %v1571_v51  ;;  %v14260_v56 = vld [vmem:[#allocation35_spill] sm:$0xff]  ;;  %v14262_v46 = vrot.slane %v14261_v16, 7  ;;  %v1131_v34 = vadd.f32 %v1127_v32, %v8111_v41  ;;  %v14263_v7 = vrot.slane %v7750_v12, 6  ;;  %v8342_v27 = vpop.permute.xlu0 %1623 }
 0x1de   :  { %14258 = vst [vmem:[#allocation36_spill] sm:$0xff] %v8309_v2  ;;  %v1325_v3 = vsel %vm502_vm6, %v1323_v58, %v14259_v57  ;;  %v8324_v62 = vmul.f32 %v14260_v56, %v7992_v33  ;;  %v8329_v40 = vpop.permute.xlu1 %1705  ;;  %v8334_v42 = vadd.f32 %v1564_v30, %v1525_v31  ;;  %v1190_v57 = vmul.f32 %v7875_v13, %v8203_v61  ;;  %v14278_v2 = vld [vmem:[#allocation42_spill] sm:$0xff] }
 0x1df   :  { %v1222_v51 = vadd.f32 %v14262_v46, %v1181_v26  ;;  %v1565_v44 = vsel %vm781_vm5, %v14263_v7, %v1564_v30  ;;  %v8340_v18 = vmul.f32 %v7888_v35, %v8279_v21  ;;  %v8344_v26 = vadd.f32 %v1822_v52, %v1421_v63  ;;  %v14269_v7 = vld [vmem:[#allocation51_spill] sm:$0xff] }
 0x1e0   :  { %v8348_v41 = vmul.f32 %v8034_v8, %v7992_v33  ;;  %v14264_v12 = vrot.slane %v7927_v11, 7  ;;  %v1183_v31 = vadd.f32 %v1179_v43, %v1131_v34  ;;  %2464 = vrot.lane.b32.xlu1 %v7397_v17, %s6233_s20  ;;  %v1155_v35 = vadd.f32 %v8157_v48, %v8055_v25  ;;  %2386 = vrot.lane.b32.xlu0 %v7884_v6, %s6228_s15  ;;  %v14266_v43 = vld [vmem:[#allocation30_spill] sm:$0xff] }
 0x1e1   :  { %v1335_v32 = vadd.f32 %v1325_v3, %v7987_v53  ;;  %v1153_v63 = vmul.f32 %v14229_v37, %v8044_v49  ;;  %v1326_v52 = vrot.slane %v1317_v4, 7  ;;  %v8362_v33 = vadd.f32 %v1565_v44, %v1524_v39  ;;  %v8374_v4 = vpop.permute.xlu0 %1631  ;;  %v8376_v44 = vld [vmem:[#allocation2 + $0x88] sm:$0xff] }
 0x1e2   :  { %v1437_v30 = vsel %vm502_vm6, %v1435_v29, %v14264_v12  ;;  %v1379_v16 = vrot.slane %v8324_v62, 7  ;;  %v1334_v34 = vadd.f32 %v1323_v58, %v1222_v51  ;;  %v8367_v17 = vmul.f32 %v14266_v43, %v8203_v61  ;;  %v8369_v46 = vpop.permute.xlu1 %1709  ;;  %v14267_v62 = vld [vmem:[#allocation45_spill] sm:$0xff] }
 0x1e3   :  { %14265 = vst [vmem:[#allocation32_spill] sm:$0xff] %v8362_v33  ;;  %v1194_v25 = vadd.f32 %v1190_v57, %v1155_v35  ;;  %v1447_v53 = vadd.f32 %v1437_v30, %v1335_v32  ;;  %v1192_v37 = vmul.f32 %v7875_v13, %v8279_v21  ;;  %v1438_v48 = vrot.slane %v8340_v18, 7  ;;  %v14268_v13 = vld [vmem:[#allocation14_spill] sm:$0xff]  ;;  %v14270_v12 = vld [vmem:[#allocation57_spill] sm:$0xff] }
 0x1e4   :  { %v1537_v58 = vrot.slane %v8348_v41, 6  ;;  %v8382_v3 = vmul.f32 %v14260_v56, %v8044_v49  ;;  %v1224_v51 = vadd.f32 %v14267_v62, %v1183_v31  ;;  %3042 = vrot.lane.b32.xlu1 %v8376_v44, %s6223_s10  ;;  %v8389_v18 = vmul.f32 %v14268_v13, %v8203_v61  ;;  %2390 = vrot.lane.b32.xlu0 %v7941_v38, %s6228_s15  ;;  %v8401_v56 = vld [vmem:[#allocation2 + $0x98] sm:$0xff]  ;;  %v14272_v31 = vld [vmem:[#allocation43_spill] sm:$0xff] }
 0x1e5   :  { %v1157_v57 = vadd.f32 %v1153_v63, %v14269_v7  ;;  %v14271_v30 = vrot.slane %v14270_v12, 7  ;;  %v8397_v41 = vmul.f32 %v8034_v8, %v8044_v49  ;;  %v14273_v32 = vrot.slane %v14272_v31, 7  ;;  %v14276_v8 = vld [vmem:[#allocation40_spill] sm:$0xff] }
 0x1e6   :  { %v1446_v62 = vadd.f32 %v1435_v29, %v1334_v34  ;;  %v1463_v63 = vrot.slane %v8367_v17, 7  ;;  %v14274_v7 = vrot.slane %v7768_v23, 7  ;;  %v14277_v49 = vrot.slane %v14276_v8, 7  ;;  %v14282_v29 = vld [vmem:[#allocation46_spill] sm:$0xff]  ;;  %v14284_v17 = vld [vmem:[#allocation49_spill] sm:$0xff] }
 0x1e7   :  { %v1329_v35 = vsel %vm502_vm6, %v1326_v52, %v14271_v30  ;;  %v1381_v61 = vsel %vm502_vm6, %v1379_v16, %v14273_v32  ;;  %v8410_v30 = vpop.permute.xlu1 %1729  ;;  %v1499_v33 = vadd.f32 %v14278_v2, %v1447_v53  ;;  %v1196_v1 = vadd.f32 %v1192_v37, %v1157_v57  ;;  %v8418_v32 = vpop.permute.xlu0 %1635  ;;  %v14285_v2 = vld [vmem:[#allocation22_spill] sm:$0xff]  ;;  %v14286_v37 = vld [vmem:[#allocation52_spill] sm:$0xff] }
 0x1e8   :  { %v1327_v12 = vsel %vm502_vm6, %v14274_v7, %v1326_v52  ;;  %14275 = vst [vmem:[#allocation21_spill] sm:$0xff] %v8410_v30  ;;  %v1278_v39 = vadd.f32 %v14277_v49, %v1194_v25  ;;  %v14280_v0 = vrot.slane %v14279_v60, 7  ;;  %14281 = vst [vmem:[#allocation48_spill] sm:$0xff] %v8418_v32  ;;  %v14283_v34 = vrot.slane %v14282_v29, 6  ;;  %3046 = vrot.lane.b32.xlu1 %v8401_v56, %s6223_s10 }
 0x1e9   :  { %v1337_v52 = vadd.f32 %v1329_v35, %v14284_v17  ;;  %v1336_v7 = vadd.f32 %v1327_v12, %v1224_v51  ;;  %v1457_v8 = vmul.f32 %v14266_v43, %v8279_v21  ;;  %v1391_v25 = vadd.f32 %v1381_v61, %v14285_v2  ;;  %2398 = vrot.lane.b32.xlu0 %v7884_v6, %s6229_s16  ;;  %v14288_v35 = vld [vmem:[#allocation12_spill] sm:$0xff] }
 0x1ea   :  { %v1441_v55 = vsel %vm502_vm6, %v1438_v48, %v14280_v0  ;;  %v1539_v23 = vsel %vm781_vm5, %v1537_v58, %v14283_v34  ;;  %v1585_v60 = vrot.slane %v8389_v18, 6  ;;  %v1540_v53 = vrot.slane %v8397_v41, 6  ;;  %v14290_v41 = vld [vmem:[#allocation54_spill] sm:$0xff] }
 0x1eb   :  { %v14287_v57 = vrot.slane %v14286_v37, 7  ;;  %v14289_v43 = vrot.slane %v14288_v35, 6  ;;  %v1449_v49 = vadd.f32 %v1441_v55, %v1337_v52  ;;  %v8441_v61 = vmul.f32 %v14268_v13, %v8279_v21  ;;  %v8443_v18 = vpop.permute.xlu1 %1733  ;;  %v8449_v30 = vpop.permute.xlu0 %1643 }
 0x1ec   :  { %v1390_v34 = vadd.f32 %v1379_v16, %v1278_v39  ;;  %v1547_v17 = vadd.f32 %v1539_v23, %v1499_v33  ;;  %v1280_v2 = vadd.f32 %v14290_v41, %v1196_v1  ;;  %v14291_v0 = vrot.slane %v7927_v11, 7  ;;  %3054 = vrot.lane.b32.xlu1 %v8376_v44, %s6224_s11  ;;  %v14292_v16 = vld [vmem:[#allocation50_spill] sm:$0xff]  ;;  %v14294_v39 = vld [vmem:[#allocation29_spill] sm:$0xff] }
 0x1ed   :  { %v1465_v51 = vsel %vm502_vm6, %v1463_v63, %v14287_v57  ;;  %v1498_v12 = vadd.f32 %v14289_v43, %v1446_v62  ;;  %v8453_v62 = vadd.f32 %v8292_v59, %v8334_v42  ;;  %v1466_v13 = vrot.slane %v1457_v8, 7  ;;  %2402 = vrot.lane.b32.xlu0 %v7941_v38, %s6229_s16  ;;  %v14300_v57 = vld [vmem:[#allocation53_spill] sm:$0xff]  ;;  %v8479_v43 = vld [vmem:[#allocation6 + $0x3c] ss:$0 sm:$0xff] }
 0x1ee   :  { %v1439_v32 = vsel %vm502_vm6, %v14291_v0, %v1438_v48  ;;  %v1475_v33 = vadd.f32 %v1465_v51, %v1391_v25  ;;  %v14293_v1 = vrot.slane %v14292_v16, 6  ;;  %v14295_v48 = vld [vmem:[#allocation24_spill] sm:$0xff]  ;;  %v14296_v52 = vrot.slane %v8382_v3, 7 }
 0x1ef   :  { %v1448_v21 = vadd.f32 %v1439_v32, %v1336_v7  ;;  %v1716_v23 = vsel %vm236_vm2, %v14295_v48, %v14294_v39  ;;  %v14297_v42 = vrot.slane %v14272_v31, 7  ;;  %v1546_v32 = vadd.f32 %v1537_v58, %v1498_v12  ;;  %v14298_v7 = vld [vmem:[#allocation41_spill] sm:$0xff]  ;;  %v8477_v35 = vpop.permute.xlu1 %1741  ;;  %v8486_v39 = vpop.permute.xlu0 %1647 }
 0x1f0   :  { %v1587_v11 = vsel %vm781_vm5, %v1585_v60, %v14293_v1  ;;  %v14299_v8 = vrot.slane %v14298_v7, 6  ;;  %v1588_v0 = vrot.slane %v8441_v61, 6  ;;  %v1718_v51 = vsel %vm236_vm2, %v14300_v57, %v8191_v19  ;;  %v14304_v48 = vld [vmem:[#allocation33_spill] sm:$0xff]  ;;  %3058 = vrot.lane.b32.xlu1 %v8401_v56, %s6224_s11  ;;  %v8536_v57 = vld [vmem:[#allocation6 + $0x41] ss:$0 sm:$0xff] }
 0x1f1   :  { %v1383_v59 = vsel %vm502_vm6, %v14297_v42, %v14296_v52  ;;  %v8481_v31 = vadd.f32 %v1463_v63, %v1390_v34  ;;  %v1595_v41 = vadd.f32 %v1587_v11, %v1547_v17  ;;  %v14302_v1 = vrot.slane %v14282_v29, 6  ;;  %v14306_v42 = vld [vmem:[#allocation39_spill] sm:$0xff]  ;;  %v8501_v29 = vld [vmem:[#allocation6 + $0x32] ss:$0 sm:$0xff]  ;;  %v8503_v17 = vld [vmem:[#allocation6 + $0x37] ss:$0 sm:$0xff]  ;;  %2410 = vrot.lane.b32.xlu0 %v7884_v6, %s6230_s17 }
 0x1f2   :  { %v1501_v25 = vadd.f32 %v14299_v8, %v1449_v49  ;;  %v1392_v12 = vadd.f32 %v1383_v59, %v1280_v2  ;;  %v14303_v49 = vrot.slane %v14286_v37, 7  ;;  %v14305_v19 = vrot.slane %v14304_v48, 7 }
 0x1f3   :  { %14301 = vst [vmem:[#allocation38_spill] sm:$0xff] %v8481_v31  ;;  %v1541_v58 = vsel %vm781_vm5, %v14302_v1, %v1540_v53  ;;  %v1500_v63 = vadd.f32 %v14306_v42, %v1448_v21  ;;  %v1720_v34 = vsel %vm241_vm3, %v1716_v23, %v8244_v22  ;;  %v1722_v37 = vsel %vm241_vm3, %v1718_v51, %v8287_v47  ;;  %v8534_v8 = vpop.permute.xlu1 %1745 }
 0x1f4   :  { %v1467_v61 = vsel %vm502_vm6, %v14303_v49, %v1466_v13  ;;  %v8494_v52 = vsel %vm502_vm6, %v1466_v13, %v14305_v19  ;;  %v8509_v2 = vsel %vm246_vm4, %v1720_v34, %v8329_v40  ;;  %v8511_v13 = vld [vmem:[#allocation6 + $0x35] ss:$0 sm:$0xff]  ;;  %v14307_v21 = vrot.slane %v8121_v20, 7  ;;  %3066 = vrot.lane.b32.xlu1 %v8376_v44, %s6225_s12  ;;  %v8566_v49 = vld [vmem:[#allocation6 + $0x34] ss:$0 sm:$0xff] }
 0x1f5   :  { %v14308_v22 = vrot.slane %v14234_v5, 7  ;;  %v8522_v23 = vmul.f32 %v8479_v43, %v8183_v14  ;;  %v8524_v47 = vadd.f32 %v1585_v60, %v1546_v32  ;;  %v1549_v59 = vadd.f32 %v1540_v53, %v1501_v25  ;;  %v8543_v53 = vld [vmem:[#allocation6 + $0x3f] ss:$0 sm:$0xff]  ;;  %v8547_v32 = vpop.permute.xlu0 %1667  ;;  %14316 = vst [vmem:[#allocation35_spill] sm:$0xff] %v8566_v49  ;;  %2414 = vrot.lane.b32.xlu0 %v7941_v38, %s6230_s17  ;;  %v8586_v34 = vld [vmem:[#allocation6 + $0x39] ss:$0 sm:$0xff] }
 0x1f6   :  { %v14310_v40 = vrot.slane %v14292_v16, 6  ;;  %v14311_v20 = vrot.slane %v8145_v24, 6  ;;  %v8538_v51 = vadd.f32 %v1467_v61, %v1392_v12  ;;  %v1655_v60 = vsel %vm236_vm2, %v8205_v9, %v8294_v15  ;;  %14313 = vst [vmem:[#allocation56_spill] sm:$0xff] %v8543_v53  ;;  %v8545_v16 = vld [vmem:[#allocation6 + $0x44] ss:$0 sm:$0xff]  ;;  %14319 = vst [vmem:[#allocation45_spill] sm:$0xff] %v8586_v34 }
 0x1f7   :  { %v1411_v11 = vsel %vm502_vm6, %v14308_v22, %v14307_v21  ;;  %14309 = vst [vmem:[#allocation25_spill] sm:$0xff] %v8524_v47  ;;  %14314 = vst [vmem:[#allocation26_spill] sm:$0xff] %v8545_v16  ;;  %v1781_v24 = vmul.f32 %v8501_v29, %v8183_v14  ;;  %v1548_v25 = vadd.f32 %v1541_v58, %v1500_v63  ;;  %v8555_v12 = vld [vmem:[#allocation6 + $0x3a] ss:$0 sm:$0xff] }
 0x1f8   :  { %v1589_v7 = vsel %vm781_vm5, %v14310_v40, %v1588_v0  ;;  %v8532_v5 = vadd.f32 %v14311_v20, %v8209_v50  ;;  %14312 = vst [vmem:[#allocation17_spill] sm:$0xff] %v8538_v51  ;;  %v1807_v50 = vmul.f32 %v8503_v17, %v8183_v14  ;;  %v1846_v1 = vmul.f32 %v8511_v13, %v8509_v2  ;;  %v14327_v58 = vld [vmem:[#allocation18_spill] sm:$0xff] }
 0x1f9   :  { %14315 = vst [vmem:[#allocation37_spill] sm:$0xff] %v8555_v12  ;;  %v8559_v9 = vsel %vm246_vm4, %v1722_v37, %v8369_v46  ;;  %v8562_v15 = vadd.f32 %v1411_v11, %v8224_v36  ;;  %v8573_v61 = vmul.f32 %v8536_v57, %v8183_v14  ;;  %v1785_v48 = vadd.f32 %v1781_v24, %v1595_v41  ;;  %v8588_v37 = vpop.permute.xlu1 %1753  ;;  %v8600_v21 = vpop.permute.xlu0 %1671  ;;  %v8604_v11 = vld [vmem:[#allocation6 + $0x43] ss:$0 sm:$0xff] }
 0x1fa   :  { %v1811_v46 = vadd.f32 %v1807_v50, %v1475_v33  ;;  %v1597_v19 = vadd.f32 %v1588_v0, %v1549_v59  ;;  %v1657_v36 = vsel %vm236_vm2, %v8255_v54, %v8342_v27  ;;  %v8580_v42 = vmul.f32 %v8543_v53, %v8509_v2  ;;  %v8592_v0 = vld [vmem:[#allocation6 + $0x3e] ss:$0 sm:$0xff]  ;;  %14322 = vst [vmem:[#allocation57_spill] sm:$0xff] %v8604_v11  ;;  %v14353_v14 = vld [vmem:[#allocation31_spill] sm:$0xff] }
 0x1fb   :  { %v8584_v63 = vmul.f32 %v8545_v16, %v8509_v2  ;;  %v1872_v33 = vmul.f32 %v8555_v12, %v8509_v2  ;;  %14320 = vst [vmem:[#allocation14_spill] sm:$0xff] %v8592_v0  ;;  %v1848_v27 = vmul.f32 %v8511_v13, %v8559_v9  ;;  %v1874_v54 = vmul.f32 %v8555_v12, %v8559_v9 }
 0x1fc   :  { %14317 = vst [vmem:[#allocation55_spill] sm:$0xff] %v8580_v42  ;;  %v1833_v41 = vmul.f32 %v8566_v49, %v8509_v2  ;;  %v8602_v22 = vadd.f32 %v1589_v7, %v1548_v25  ;;  %v8607_v59 = vadd.f32 %v1846_v1, %v8305_v45  ;;  %v8611_v40 = vmul.f32 %v8592_v0, %v8559_v9  ;;  %v14328_v42 = vld [vmem:[#allocation28_spill] sm:$0xff] }
 0x1fd   :  { %14318 = vst [vmem:[#allocation30_spill] sm:$0xff] %v8584_v63  ;;  %v8615_v20 = vmul.f32 %v8543_v53, %v8559_v9  ;;  %3070 = vrot.lane.b32.xlu1 %v8401_v56, %s6225_s12  ;;  %v8621_v7 = vmul.f32 %v8604_v11, %v8559_v9  ;;  %v8625_v24 = vmul.f32 %v8545_v16, %v8559_v9  ;;  %v8640_v51 = vpop.permute.xlu1 %1757  ;;  %v8653_v1 = vpop.permute.xlu0 %1679 }
 0x1fe   :  { %14321 = vst [vmem:[#allocation51_spill] sm:$0xff] %v8602_v22  ;;  %14323 = vst [vmem:[#allocation43_spill] sm:$0xff] %v8611_v40  ;;  %v1659_v45 = vsel %vm241_vm3, %v1655_v60, %v8374_v4  ;;  %v1859_v50 = vmul.f32 %v8586_v34, %v8509_v2  ;;  %2434 = vrot.lane.b32.xlu0 %v7884_v6, %s6231_s18  ;;  %v8643_v4 = vadd.f32 %v1848_v27, %v8453_v62 }
 0x1ff   :  { %14324 = vst [vmem:[#allocation40_spill] sm:$0xff] %v8615_v20  ;;  %14325 = vst [vmem:[#allocation42_spill] sm:$0xff] %v8621_v7  ;;  %v8637_v55 = vsel %vm246_vm4, %v1659_v45, %v8449_v30  ;;  %v8646_v60 = vadd.f32 %v1872_v33, %v8298_v28  ;;  %v8649_v22 = vadd.f32 %v1874_v54, %v8344_v26  ;;  %v14329_v62 = vrot.slane %v14328_v42, 7  ;;  %v6120_v33 = vld [vmem:[#allocation2 + $0x48] sm:$0xff]  ;;  %v14331_v54 = vld [vmem:[#allocation21_spill] sm:$0xff] }
 0x200   :  { %14326 = vst [vmem:[#allocation44_spill] sm:$0xff] %v8625_v24  ;;  %v8651_v25 = vadd.f32 %v1833_v41, %v1785_v48  ;;  %v1783_v63 = vmul.f32 %v8501_v29, %v14327_v58  ;;  %v14330_v27 = vrot.slane %v8382_v3, 7  ;;  %v1764_v41 = vsel %vm236_vm2, %v6120_v33, %v14331_v54  ;;  %v14332_v30 = vld [vmem:[#allocation58_spill] sm:$0xff]  ;;  %v8676_v3 = vld [vmem:[#allocation6 + $0x49] ss:$0 sm:$0xff] }
 0x201   :  { %3078 = vrot.lane.b32.xlu1 %v8376_v44, %s6226_s13  ;;  %v8672_v45 = vmul.f32 %v14332_v30, %v8637_v55  ;;  %14334 = vst [vmem:[#allocation49_spill] sm:$0xff] %v8676_v3  ;;  %v14335_v42 = vld [vmem:[#allocation48_spill] sm:$0xff]  ;;  %v1809_v26 = vmul.f32 %v8503_v17, %v14327_v58  ;;  %v8686_v33 = vmul.f32 %v8479_v43, %v14327_v58  ;;  %v8688_v54 = vpop.permute.xlu1 %2316 }
 0x202   :  { %v1385_v28 = vsel %vm502_vm6, %v14330_v27, %v14329_v62  ;;  %2438 = vrot.lane.b32.xlu0 %v7941_v38, %s6231_s18  ;;  %v1661_v62 = vsel %vm241_vm3, %v1657_v36, %v14335_v42  ;;  %v8680_v27 = vadd.f32 %v1859_v50, %v1811_v46  ;;  %14336 = vst [vmem:[#allocation22_spill] sm:$0xff] %v8688_v54  ;;  %v14337_v48 = vld [vmem:[#allocation16_spill] sm:$0xff]  ;;  %v14338_v36 = vld [vmem:[#allocation34_spill] sm:$0xff]  ;;  %v8701_v42 = vpop.permute.xlu0 %1683 }
 0x203   :  { %14333 = vst [vmem:[#allocation46_spill] sm:$0xff] %v8672_v45  ;;  %v8692_v7 = vmul.f32 %v14337_v48, %v8637_v55  ;;  %v1835_v40 = vmul.f32 %v8566_v49, %v8559_v9  ;;  %v8698_v46 = vmul.f32 %v8536_v57, %v14327_v58  ;;  %v1393_v50 = vadd.f32 %v1385_v28, %v14338_v36  ;;  %v14340_v28 = vld [vmem:[#allocation13_spill] sm:$0xff] }
 0x204   :  { %v8705_v24 = vsel %vm246_vm4, %v1661_v62, %v8486_v39  ;;  %v1861_v20 = vmul.f32 %v8586_v34, %v8559_v9  ;;  %v1787_v54 = vadd.f32 %v1783_v63, %v1597_v19  ;;  %v8713_v49 = vmul.f32 %v8676_v3, %v8509_v2  ;;  %v6121_v19 = vld [vmem:[#allocation2 + $0x58] sm:$0xff]  ;;  %v14342_v62 = vld [vmem:[#allocation15_spill] sm:$0xff] }
 0x205   :  { %3082 = vrot.lane.b32.xlu1 %v8401_v56, %s6226_s13  ;;  %v8718_v36 = vmul.f32 %v14340_v28, %v8637_v55  ;;  %v1477_v39 = vadd.f32 %v8494_v52, %v1393_v50  ;;  %v8725_v9 = vmul.f32 %v8592_v0, %v8509_v2  ;;  %v1766_v63 = vsel %vm236_vm2, %v6121_v19, %v8443_v18  ;;  %v8736_v50 = vpop.permute.xlu1 %2320  ;;  %v14345_v3 = vld [vmem:[#allocation47_spill] sm:$0xff] }
 0x206   :  { %14339 = vst [vmem:[#allocation52_spill] sm:$0xff] %v8713_v49  ;;  %2446 = vrot.lane.b32.xlu0 %v7884_v6, %s6232_s19  ;;  %v1793_v58 = vmul.f32 %v14342_v62, %v8637_v55  ;;  %v8733_v34 = vmul.f32 %v8479_v43, %v8637_v55  ;;  %14344 = vst [vmem:[#allocation50_spill] sm:$0xff] %v8736_v50  ;;  %v1819_v16 = vmul.f32 %v14345_v3, %v8637_v55  ;;  %v8744_v19 = vpop.permute.xlu0 %1691 }
 0x207   :  { %14341 = vst [vmem:[#allocation12_spill] sm:$0xff] %v8718_v36  ;;  %v1940_v31 = vmul.f32 %v14332_v30, %v8705_v24  ;;  %v8748_v47 = vmul.f32 %v8536_v57, %v8637_v55  ;;  %v8750_v53 = vadd.f32 %v1835_v40, %v1787_v54  ;;  %v8757_v0 = vmul.f32 %v8604_v11, %v8509_v2  ;;  %v14348_v30 = vld [vmem:[#allocation20_spill] sm:$0xff] }
 0x208   :  { %14343 = vst [vmem:[#allocation54_spill] sm:$0xff] %v8733_v34  ;;  %v14349_v50 = vrot.slane %v14348_v30, 7  ;;  %v14350_v18 = vrot.slane %v8672_v45, 7  ;;  %v1795_v40 = vmul.f32 %v14342_v62, %v8705_v24  ;;  %v1813_v54 = vadd.f32 %v1809_v26, %v1477_v39  ;;  %v14354_v26 = vld [vmem:[#allocation23_spill] sm:$0xff] }
 0x209   :  { %14346 = vst [vmem:[#allocation29_spill] sm:$0xff] %v8748_v47  ;;  %3102 = vrot.lane.b32.xlu1 %v8376_v44, %s6227_s14  ;;  %14347 = vst [vmem:[#allocation24_spill] sm:$0xff] %v8757_v0  ;;  %v8770_v52 = vadd.f32 %v1793_v58, %v8532_v5  ;;  %v1821_v11 = vmul.f32 %v14345_v3, %v8705_v24  ;;  %v1996_v49 = vmul.f32 %v14337_v48, %v8705_v24 }
 0x20a   :  { %v1948_v12 = vsel %vm502_vm6, %v14350_v18, %v14349_v50  ;;  %2450 = vrot.lane.b32.xlu0 %v7941_v38, %s6232_s19  ;;  %v8777_v18 = vpop.permute.xlu1 %2328  ;;  %v8780_v45 = vadd.f32 %v1819_v16, %v14353_v14  ;;  %v14355_v39 = vrot.slane %v14354_v26, 7  ;;  %v14356_v62 = vrot.slane %v8692_v7, 7  ;;  %v8794_v50 = vld [vmem:[#allocation6 + $0x36] ss:$0 sm:$0xff] }
 0x20b   :  { %14351 = vst [vmem:[#allocation41_spill] sm:$0xff] %v8770_v52  ;;  %14352 = vst [vmem:[#allocation53_spill] sm:$0xff] %v8777_v18  ;;  %v1768_v58 = vsel %vm241_vm3, %v1764_v41, %v8477_v35  ;;  %v1949_v3 = vrot.slane %v1940_v31, 7  ;;  %v8789_v52 = vpop.permute.xlu0 %1695  ;;  %v8792_v48 = vadd.f32 %v1948_v12, %v8607_v59  ;;  %v8796_v18 = vld [vmem:[#allocation6 + $0x3b] ss:$0 sm:$0xff]  ;;  %v8802_v16 = vmul.f32 %v8479_v43, %v8705_v24  ;;  %v14358_v31 = vld [vmem:[#allocation27_spill] sm:$0xff] }
 0x20c   :  { %v2004_v5 = vsel %vm502_vm6, %v14356_v62, %v14355_v39  ;;  %v1772_v14 = vsel %vm246_vm4, %v1768_v58, %v8588_v37  ;;  %v8806_v35 = vmul.f32 %v8536_v57, %v8705_v24  ;;  %v14359_v12 = vrot.slane %v14358_v31, 6  ;;  %v14362_v39 = vld [vmem:[#allocation32_spill] sm:$0xff] }
 0x20d   :  { %14357 = vst [vmem:[#allocation33_spill] sm:$0xff] %v8792_v48  ;;  %3106 = vrot.lane.b32.xlu1 %v8401_v56, %s6227_s14  ;;  %v14360_v59 = vrot.slane %v8718_v36, 6  ;;  %v8818_v37 = vadd.f32 %v1795_v40, %v14362_v39  ;;  %v1770_v43 = vsel %vm241_vm3, %v1766_v63, %v8534_v8  ;;  %v8826_v57 = vadd.f32 %v1821_v11, %v8562_v15  ;;  %v8828_v48 = vld [vmem:[#allocation6 + $0x40] ss:$0 sm:$0xff]  ;;  %v8830_v36 = vld [vmem:[#allocation6 + $0x45] ss:$0 sm:$0xff] }
 0x20e   :  { %2458 = vrot.lane.b32.xlu0 %v7884_v6, %s6233_s20  ;;  %v2005_v58 = vrot.slane %v1996_v49, 7  ;;  %v14365_v40 = vrot.slane %v8733_v34, 7  ;;  %v1865_v8 = vadd.f32 %v1861_v20, %v1813_v54  ;;  %v8837_v63 = vpop.permute.xlu1 %2332  ;;  %v8839_v39 = vld [vmem:[#allocation6 + $0x4a] ss:$0 sm:$0xff]  ;;  %v1885_v6 = vmul.f32 %v8794_v50, %v1772_v14 }
 0x20f   :  { %v8815_v41 = vsel %vm781_vm5, %v14360_v59, %v14359_v12  ;;  %14363 = vst [vmem:[#allocation18_spill] sm:$0xff] %v8826_v57  ;;  %v14364_v12 = vrot.slane %v8522_v23, 7  ;;  %14366 = vst [vmem:[#allocation28_spill] sm:$0xff] %v8839_v39  ;;  %v1898_v15 = vmul.f32 %v8796_v18, %v1772_v14  ;;  %v1704_v49 = vpop.permute.xlu0 %1703  ;;  %v14367_v11 = vld [vmem:[#allocation36_spill] sm:$0xff]  ;;  %v8847_v57 = vadd.f32 %v2004_v5, %v8646_v60 }
 0x210   :  { %14361 = vst [vmem:[#allocation39_spill] sm:$0xff] %v8815_v41  ;;  %v14368_v62 = vrot.slane %v14367_v11, 7  ;;  %v14369_v11 = vrot.slane %v8573_v61, 7  ;;  %v8865_v5 = vmul.f32 %v8828_v48, %v1772_v14  ;;  %v8878_v54 = vmul.f32 %v8839_v39, %v1772_v14 }
 0x211   :  { %v1920_v59 = vsel %vm502_vm6, %v14365_v40, %v14364_v12  ;;  %v1774_v12 = vsel %vm246_vm4, %v1770_v43, %v8640_v51  ;;  %3114 = vrot.lane.b32.xlu1 %v8376_v44, %s6228_s15  ;;  %v8857_v40 = vmul.f32 %v14340_v28, %v8705_v24  ;;  %v8868_v51 = vmul.f32 %v8830_v36, %v1772_v14 }
 0x212   :  { %v1952_v41 = vsel %vm502_vm6, %v1949_v3, %v14368_v62  ;;  %v14370_v62 = vrot.slane %v8748_v47, 7  ;;  %2462 = vrot.lane.b32.xlu0 %v7941_v38, %s6233_s20  ;;  %v14372_v43 = vrot.slane %v14348_v30, 7  ;;  %14373 = vst [vmem:[#allocation58_spill] sm:$0xff] %v8878_v54  ;;  %v8880_v20 = vpop.permute.xlu1 %2340  ;;  %v14375_v38 = vrot.slane %v8313_v10, 7  ;;  %v14394_v54 = vld [vmem:[#allocation38_spill] sm:$0xff] }
 0x213   :  { %14371 = vst [vmem:[#allocation21_spill] sm:$0xff] %v8868_v51  ;;  %v8888_v47 = vadd.f32 %v1952_v41, %v8643_v4  ;;  %v1887_v14 = vmul.f32 %v8794_v50, %v1774_v12  ;;  %v1900_v39 = vmul.f32 %v8796_v18, %v1774_v12  ;;  %v1708_v34 = vpop.permute.xlu0 %1707  ;;  %v14378_v41 = vrot.slane %v8698_v46, 7 }
 0x214   :  { %v1976_v60 = vsel %vm502_vm6, %v14370_v62, %v14369_v11  ;;  %v8875_v28 = vsel %vm502_vm6, %v14372_v43, %v1949_v3  ;;  %v14374_v11 = vrot.slane %v14354_v26, 7  ;;  %v2008_v30 = vsel %vm502_vm6, %v2005_v58, %v14375_v38 }
 0x215   :  { %v1889_v3 = vadd.f32 %v1885_v6, %v8651_v25  ;;  %v1902_v43 = vadd.f32 %v1898_v15, %v8680_v27  ;;  %v14376_v26 = vrot.slane %v8686_v33, 7  ;;  %v14379_v10 = vrot.slane %v8806_v35, 7  ;;  %3118 = vrot.lane.b32.xlu1 %v8401_v56, %s6228_s15  ;;  %v8912_v27 = vld [vmem:[#allocation2 + $0x80] sm:$0xff] }
 0x216   :  { %v8885_v62 = vsel %vm502_vm6, %v14374_v11, %v2005_v58  ;;  %v14377_v11 = vrot.slane %v8802_v16, 7  ;;  %v1715_v25 = vsel %vm236_vm2, %v8547_v32, %v8653_v1  ;;  %v13660_v33 = vrot.slane %v8857_v40, 6  ;;  %3040 = vrot.lane.b32.xlu0 %v8912_v27, %s6223_s10 }
 0x217   :  { %v1980_v58 = vsel %vm502_vm6, %v14379_v10, %v14378_v41  ;;  %v8918_v46 = vmul.f32 %v8828_v48, %v1774_v12  ;;  %v1719_v38 = vsel %vm241_vm3, %v1715_v25, %v8744_v19  ;;  %v8926_v1 = vmul.f32 %v8830_v36, %v1774_v12  ;;  %v8941_v6 = vpop.permute.xlu0 %1727 }
 0x218   :  { %v1924_v4 = vsel %vm502_vm6, %v14377_v11, %v14376_v26  ;;  %v8929_v26 = vsel %vm246_vm4, %v1719_v38, %v1704_v49  ;;  %v8931_v11 = vpop.permute.xlu1 %2344  ;;  %v8934_v41 = vadd.f32 %v2008_v30, %v8649_v22  ;;  %v8936_v10 = vadd.f32 %v1920_v59, %v1889_v3  ;;  %v8948_v49 = vld [vmem:[#allocation2 + $0x90] sm:$0xff]  ;;  %v8971_v30 = vld [vmem:[#allocation6 + $0x48] ss:$0 sm:$0xff] }
 0x219   :  { %14380 = vst [vmem:[#allocation48_spill] sm:$0xff] %v8918_v46  ;;  %14381 = vst [vmem:[#allocation16_spill] sm:$0xff] %v8926_v1  ;;  %v8938_v15 = vadd.f32 %v1976_v60, %v1902_v43  ;;  %v1891_v19 = vadd.f32 %v1887_v14, %v8750_v53  ;;  %v1904_v25 = vadd.f32 %v1900_v39, %v1865_v8  ;;  %3126 = vrot.lane.b32.xlu1 %v8376_v44, %s6229_s16  ;;  %v5968_v39 = vld [vmem:[#allocation6 + $0x46] ss:$0 sm:$0xff]  ;;  %v14390_v3 = vld [vmem:[#allocation56_spill] sm:$0xff] }
 0x21a   :  { %v1717_v12 = vsel %vm236_vm2, %v8600_v21, %v8701_v42  ;;  %v14383_v22 = vrot.slane %v14358_v31, 6  ;;  %v1780_v53 = vmul.f32 %v8501_v29, %v8637_v55  ;;  %v1806_v8 = vmul.f32 %v8503_v17, %v8637_v55  ;;  %3044 = vrot.lane.b32.xlu0 %v8948_v49, %s6223_s10 }
 0x21b   :  { %14382 = vst [vmem:[#allocation34_spill] sm:$0xff] %v8938_v15  ;;  %v1721_v42 = vsel %vm241_vm3, %v1717_v12, %v8789_v52  ;;  %v1845_v60 = vmul.f32 %v8511_v13, %v8929_v26  ;;  %v8969_v31 = vmul.f32 %v5968_v39, %v8637_v55  ;;  %v8981_v12 = vadd.f32 %v1924_v4, %v1891_v19  ;;  %v8985_v32 = vpop.permute.xlu0 %1731  ;;  %v14387_v55 = vld [vmem:[#allocation19_spill] sm:$0xff]  ;;  %v14392_v19 = vld [vmem:[#allocation41_spill] sm:$0xff] }
 0x21c   :  { %v8955_v59 = vsel %vm781_vm5, %v14383_v22, %v13660_v33  ;;  %v8975_v43 = vsel %vm246_vm4, %v1721_v42, %v1708_v34  ;;  %v8977_v14 = vpop.permute.xlu1 %2352  ;;  %v8983_v22 = vadd.f32 %v1980_v58, %v1904_v25  ;;  %v2191_v21 = vmul.f32 %v5968_v39, %v14387_v55  ;;  %v14389_v34 = vld [vmem:[#allocation37_spill] sm:$0xff]  ;;  %v14397_v55 = vld [vmem:[#allocation26_spill] sm:$0xff] }
 0x21d   :  { %14384 = vst [vmem:[#allocation13_spill] sm:$0xff] %v8969_v31  ;;  %14385 = vst [vmem:[#allocation15_spill] sm:$0xff] %v8981_v12  ;;  %v8989_v33 = vmul.f32 %v5968_v39, %v8705_v24  ;;  %v1871_v42 = vmul.f32 %v14389_v34, %v8929_v26  ;;  %v2050_v1 = vmul.f32 %v14390_v3, %v8929_v26  ;;  %3130 = vrot.lane.b32.xlu1 %v8401_v56, %s6229_s16  ;;  %v9112_v12 = vld [vmem:[#allocation6 + $0x60] ss:$0 sm:$0xff] }
 0x21e   :  { %14386 = vst [vmem:[#allocation47_spill] sm:$0xff] %v8983_v22  ;;  %v8999_v4 = vmul.f32 %v8971_v30, %v8509_v2  ;;  %v1782_v58 = vmul.f32 %v8501_v29, %v8705_v24  ;;  %v1849_v25 = vadd.f32 %v1845_v60, %v14392_v19  ;;  %v1847_v39 = vmul.f32 %v8511_v13, %v8975_v43  ;;  %v14393_v22 = vld [vmem:[#allocation25_spill] sm:$0xff] }
 0x21f   :  { %14388 = vst [vmem:[#allocation20_spill] sm:$0xff] %v8989_v33  ;;  %3052 = vrot.lane.b32.xlu0 %v8912_v27, %s6224_s11  ;;  %v1808_v38 = vmul.f32 %v8503_v17, %v8705_v24  ;;  %v2052_v2 = vmul.f32 %v14390_v3, %v8975_v43  ;;  %v1784_v29 = vadd.f32 %v1780_v53, %v14393_v22  ;;  %v14395_v13 = vrot.slane %v8802_v16, 7  ;;  %v1740_v24 = vpop.permute.xlu0 %1739  ;;  %v14401_v22 = vld [vmem:[#allocation51_spill] sm:$0xff] }
 0x220   :  { %14391 = vst [vmem:[#allocation31_spill] sm:$0xff] %v8999_v4  ;;  %v9013_v52 = vpop.permute.xlu1 %2356  ;;  %v9017_v60 = vadd.f32 %v1806_v8, %v14394_v54  ;;  %v14396_v19 = vrot.slane %v8522_v23, 7  ;;  %v2106_v17 = vmul.f32 %v14397_v55, %v8929_v26  ;;  %v2197_v15 = vrot.slane %v2191_v21, 6  ;;  %v14402_v21 = vld [vmem:[#allocation46_spill] sm:$0xff]  ;;  %14423 = vst [vmem:[#allocation37_spill] sm:$0xff] %v9112_v12 }
 0x221   :  { %v14398_v3 = vrot.slane %v8806_v35, 7  ;;  %v14399_v46 = vrot.slane %v8573_v61, 7  ;;  %v13670_v54 = vrot.slane %v8989_v33, 6  ;;  %v1875_v16 = vadd.f32 %v1871_v42, %v8780_v45  ;;  %3138 = vrot.lane.b32.xlu1 %v8376_v44, %s6230_s17 }
 0x222   :  { %v9024_v51 = vsel %vm502_vm6, %v14396_v19, %v14395_v13  ;;  %v2058_v23 = vrot.slane %v2050_v1, 7  ;;  %v9041_v13 = vadd.f32 %v1782_v58, %v14401_v22  ;;  %v14403_v35 = vrot.slane %v14402_v21, 7  ;;  %v14406_v1 = vld [vmem:[#allocation17_spill] sm:$0xff] }
 0x223   :  { %v9033_v53 = vsel %vm502_vm6, %v14399_v46, %v14398_v3  ;;  %v1851_v61 = vadd.f32 %v1847_v39, %v8818_v37  ;;  %3056 = vrot.lane.b32.xlu0 %v8948_v49, %s6224_s11  ;;  %v14404_v46 = vrot.slane %v8969_v31, 6  ;;  %v9054_v42 = vadd.f32 %v1808_v38, %v14406_v1  ;;  %v14407_v37 = vld [vmem:[#allocation49_spill] sm:$0xff]  ;;  %v14411_v38 = vld [vmem:[#allocation50_spill] sm:$0xff]  ;;  %v14414_v31 = vld [vmem:[#allocation55_spill] sm:$0xff] }
 0x224   :  { %14400 = vst [vmem:[#allocation23_spill] sm:$0xff] %v9033_v53  ;;  %v1957_v19 = vadd.f32 %v14403_v35, %v1849_v25  ;;  %v1873_v58 = vmul.f32 %v14389_v34, %v8975_v43  ;;  %v2061_v3 = vrot.slane %v2052_v2, 7  ;;  %v9060_v25 = vmul.f32 %v14397_v55, %v8975_v43  ;;  %v9066_v22 = vpop.permute.xlu1 %2376  ;;  %v14409_v21 = vld [vmem:[#allocation53_spill] sm:$0xff]  ;;  %v14410_v35 = vld [vmem:[#allocation22_spill] sm:$0xff]  ;;  %v1744_v2 = vpop.permute.xlu0 %1743 }
 0x225   :  { %v9051_v45 = vsel %vm781_vm5, %v14404_v46, %v2197_v15  ;;  %v9064_v39 = vmul.f32 %v14407_v37, %v8929_v26  ;;  %14408 = vst [vmem:[#allocation32_spill] sm:$0xff] %v9066_v22  ;;  %v2363_v46 = vsel %vm236_vm2, %v14410_v35, %v14409_v21  ;;  %v2365_v1 = vsel %vm236_vm2, %v14411_v38, %v8837_v63  ;;  %v14416_v21 = vld [vmem:[#allocation35_spill] sm:$0xff] }
 0x226   :  { %14405 = vst [vmem:[#allocation27_spill] sm:$0xff] %v9051_v45  ;;  %v2114_v34 = vrot.slane %v2106_v17, 7  ;;  %v9077_v55 = vsel %vm781_vm5, %v2197_v15, %v13670_v54  ;;  %v14413_v8 = vrot.slane %v8692_v7, 7  ;;  %v14415_v22 = vrot.slane %v14414_v31, 7  ;;  %3142 = vrot.lane.b32.xlu1 %v8401_v56, %s6230_s17  ;;  %v14417_v17 = vld [vmem:[#allocation45_spill] sm:$0xff] }
 0x227   :  { %14412 = vst [vmem:[#allocation36_spill] sm:$0xff] %v9077_v55  ;;  %v1832_v63 = vmul.f32 %v14416_v21, %v8929_v26  ;;  %v9090_v35 = vmul.f32 %v14417_v17, %v8929_v26  ;;  %v2069_v38 = vadd.f32 %v2058_v23, %v1957_v19  ;;  %v2367_v15 = vsel %vm241_vm3, %v2363_v46, %v8880_v20  ;;  %v6122_v46 = vld [vmem:[#allocation2 + $0x40] sm:$0xff] }
 0x228   :  { %v2013_v53 = vadd.f32 %v14413_v8, %v1875_v16  ;;  %v2060_v4 = vsel %vm502_vm6, %v2058_v23, %v14415_v22  ;;  %v1959_v7 = vadd.f32 %v8875_v28, %v1851_v61  ;;  %3064 = vrot.lane.b32.xlu0 %v8912_v27, %s6225_s12  ;;  %v14418_v16 = vld [vmem:[#allocation14_spill] sm:$0xff]  ;;  %v14420_v55 = vrot.slane %v14414_v31, 7  ;;  %v9107_v20 = vpop.permute.xlu1 %2380  ;;  %v14422_v28 = vld [vmem:[#allocation33_spill] sm:$0xff]  ;;  %v1752_v23 = vpop.permute.xlu0 %1751 }
 0x229   :  { %v9099_v8 = vmul.f32 %v14418_v16, %v8929_v26  ;;  %v14419_v22 = vld [vmem:[#allocation18_spill] sm:$0xff]  ;;  %14421 = vst [vmem:[#allocation19_spill] sm:$0xff] %v9107_v20  ;;  %v2070_v61 = vadd.f32 %v2060_v4, %v14422_v28  ;;  %v1763_v45 = vsel %vm236_vm2, %v6122_v46, %v8941_v6  ;;  %v9123_v20 = vld [vmem:[#allocation6 + $0x56] ss:$0 sm:$0xff]  ;;  %v14428_v4 = vld [vmem:[#allocation40_spill] sm:$0xff]  ;;  %v1836_v46 = vadd.f32 %v1832_v63, %v1784_v29 }
 0x22a   :  { %v1877_v54 = vadd.f32 %v1873_v58, %v14419_v22  ;;  %v2062_v33 = vsel %vm502_vm6, %v14420_v55, %v2061_v3  ;;  %v9116_v58 = vsel %vm246_vm4, %v2367_v15, %v8977_v14  ;;  %v14425_v31 = vld [vmem:[#allocation30_spill] sm:$0xff]  ;;  %v9121_v19 = vadd.f32 %v2114_v34, %v2013_v53  ;;  %3162 = vrot.lane.b32.xlu1 %v8376_v44, %s6231_s18  ;;  %v14430_v14 = vld [vmem:[#allocation12_spill] sm:$0xff] }
 0x22b   :  { %14424 = vst [vmem:[#allocation56_spill] sm:$0xff] %v9116_v58  ;;  %v14426_v55 = vrot.slane %v14425_v31, 7  ;;  %v14429_v28 = vrot.slane %v14428_v4, 7  ;;  %v1767_v6 = vsel %vm241_vm3, %v1763_v45, %v1740_v24  ;;  %v14431_v15 = vrot.slane %v14430_v14, 6 }
 0x22c   :  { %14427 = vst [vmem:[#allocation41_spill] sm:$0xff] %v9121_v19  ;;  %v2369_v53 = vsel %vm241_vm3, %v2365_v1, %v8931_v11  ;;  %v9139_v19 = vld [vmem:[#allocation6 + $0x51] ss:$0 sm:$0xff]  ;;  %3068 = vrot.lane.b32.xlu0 %v8948_v49, %s6225_s12  ;;  %v9147_v29 = vadd.f32 %v8885_v62, %v1877_v54  ;;  %v9151_v24 = vmul.f32 %v9112_v12, %v9116_v58  ;;  %v14435_v11 = vld [vmem:[#allocation44_spill] sm:$0xff]  ;;  %v14437_v1 = vrot.slane %v9060_v25, 7  ;;  %v1756_v14 = vpop.permute.xlu0 %1755 }
 0x22d   :  { %v2116_v22 = vsel %vm502_vm6, %v2114_v34, %v14426_v55  ;;  %v2064_v0 = vsel %vm502_vm6, %v2061_v3, %v14429_v28  ;;  %v9133_v31 = vadd.f32 %v14431_v15, %v2069_v38  ;;  %v2071_v55 = vadd.f32 %v2062_v33, %v1959_v7  ;;  %v9137_v34 = vld [vmem:[#allocation6 + $0x4c] ss:$0 sm:$0xff]  ;;  %14433 = vst [vmem:[#allocation38_spill] sm:$0xff] %v9139_v19  ;;  %v9153_v33 = vld [vmem:[#allocation6 + $0x5b] ss:$0 sm:$0xff]  ;;  %v9161_v7 = vpop.permute.xlu1 %2388  ;;  %v14439_v28 = vld [vmem:[#allocation39_spill] sm:$0xff] }
 0x22e   :  { %14432 = vst [vmem:[#allocation25_spill] sm:$0xff] %v9137_v34  ;;  %v9142_v3 = vsel %vm246_vm4, %v1767_v6, %v1752_v23  ;;  %14434 = vst [vmem:[#allocation26_spill] sm:$0xff] %v9151_v24  ;;  %v14436_v45 = vrot.slane %v14435_v11, 7  ;;  %v2126_v38 = vadd.f32 %v2116_v22, %v8847_v57  ;;  %v6123_v23 = vld [vmem:[#allocation2 + $0x50] sm:$0xff]  ;;  %v9167_v54 = vmul.f32 %v9123_v20, %v9116_v58 }
 0x22f   :  { %v1765_v62 = vsel %vm236_vm2, %v6123_v23, %v8985_v32  ;;  %v2072_v4 = vadd.f32 %v2064_v0, %v8888_v47  ;;  %v2230_v6 = vadd.f32 %v14439_v28, %v2070_v61  ;;  %v2501_v15 = vmul.f32 %v9137_v34, %v9116_v58  ;;  %3166 = vrot.lane.b32.xlu1 %v8401_v56, %s6231_s18 }
 0x230   :  { %v2120_v63 = vsel %vm502_vm6, %v14437_v1, %v14436_v45  ;;  %14438 = vst [vmem:[#allocation51_spill] sm:$0xff] %v9167_v54  ;;  %v2527_v57 = vmul.f32 %v9139_v19, %v9116_v58  ;;  %v2264_v22 = vmul.f32 %v14407_v37, %v8975_v43  ;;  %v1884_v32 = vmul.f32 %v8794_v50, %v9142_v3  ;;  %v9214_v37 = vpop.permute.xlu0 %2314 }
 0x231   :  { %v9183_v47 = vmul.f32 %v9153_v33, %v9116_v58  ;;  %v2128_v0 = vadd.f32 %v2120_v63, %v8934_v41  ;;  %v2231_v61 = vadd.f32 %v8955_v59, %v2071_v55  ;;  %v1769_v11 = vsel %vm241_vm3, %v1765_v62, %v1744_v2  ;;  %3076 = vrot.lane.b32.xlu0 %v8912_v27, %s6226_s13  ;;  %v9202_v41 = vpop.permute.xlu1 %2392  ;;  %v14442_v63 = vld [vmem:[#allocation52_spill] sm:$0xff] }
 0x232   :  { %v9193_v45 = vsel %vm246_vm4, %v2369_v53, %v9013_v52  ;;  %v9197_v1 = vmul.f32 %v8828_v48, %v9142_v3  ;;  %v9200_v23 = vsel %vm246_vm4, %v1769_v11, %v1756_v14  ;;  %v14441_v2 = vrot.slane %v8857_v40, 6  ;;  %v14448_v40 = vld [vmem:[#allocation54_spill] sm:$0xff] }
 0x233   :  { %14440 = vst [vmem:[#allocation46_spill] sm:$0xff] %v9183_v47  ;;  %v14443_v62 = vrot.slane %v14442_v63, 6  ;;  %v14444_v28 = vrot.slane %v9064_v39, 6  ;;  %v1834_v53 = vmul.f32 %v14416_v21, %v8975_v43  ;;  %v2271_v14 = vrot.slane %v2264_v22, 6  ;;  %3174 = vrot.lane.b32.xlu1 %v8376_v44, %s6232_s19 }
 0x234   :  { %v2232_v55 = vadd.f32 %v14441_v2, %v2072_v4  ;;  %v2030_v24 = vrot.slane %v9099_v8, 7  ;;  %v1888_v12 = vadd.f32 %v1884_v32, %v1836_v46  ;;  %v9222_v4 = vmul.f32 %v9137_v34, %v9193_v45 }
 0x235   :  { %v2270_v52 = vsel %vm781_vm5, %v14444_v28, %v14443_v62  ;;  %v2024_v2 = vmul.f32 %v14418_v16, %v8975_v43  ;;  %v1886_v21 = vmul.f32 %v8794_v50, %v9200_v23  ;;  %3080 = vrot.lane.b32.xlu0 %v8948_v49, %s6226_s13  ;;  %v2529_v46 = vmul.f32 %v9139_v19, %v9193_v45  ;;  %v9237_v32 = vpop.permute.xlu1 %2400 }
 0x236   :  { %v2278_v11 = vadd.f32 %v2270_v52, %v2230_v6  ;;  %v9234_v6 = vadd.f32 %v2527_v57, %v2126_v38  ;;  %v2142_v22 = vrot.slane %v9197_v1, 7  ;;  %v9241_v16 = vmul.f32 %v9123_v20, %v9193_v45  ;;  %v9252_v38 = vpop.permute.xlu0 %2318 }
 0x237   :  { %v9245_v50 = vmul.f32 %v9153_v33, %v9193_v45  ;;  %v1838_v28 = vadd.f32 %v1834_v53, %v9041_v13  ;;  %v14446_v57 = vrot.slane %v14442_v63, 6  ;;  %v14447_v52 = vrot.slane %v8725_v9, 7  ;;  %3178 = vrot.lane.b32.xlu1 %v8401_v56, %s6232_s19 }
 0x238   :  { %v9230_v8 = vadd.f32 %v2501_v15, %v2278_v11  ;;  %v14445_v15 = vld [vmem:[#allocation57_spill] sm:$0xff]  ;;  %v14449_v59 = vrot.slane %v14448_v40, 7  ;;  %v9264_v54 = vmul.f32 %v8828_v48, %v9200_v23  ;;  %v9268_v13 = vadd.f32 %v2271_v14, %v2232_v55 }
 0x239   :  { %v9249_v62 = vmul.f32 %v14445_v15, %v8929_v26  ;;  %v2272_v1 = vsel %vm781_vm5, %v14446_v57, %v2271_v14  ;;  %v2032_v11 = vsel %vm502_vm6, %v2030_v24, %v14447_v52  ;;  %v1897_v63 = vmul.f32 %v8796_v18, %v9142_v3  ;;  %3100 = vrot.lane.b32.xlu0 %v8912_v27, %s6227_s14  ;;  %v9285_v14 = vpop.permute.xlu1 %2404 }
 0x23a   :  { %v1929_v47 = vadd.f32 %v14449_v59, %v1888_v12  ;;  %v2033_v53 = vrot.slane %v2024_v2, 7  ;;  %v1890_v57 = vadd.f32 %v1886_v21, %v1838_v28  ;;  %v9274_v52 = vadd.f32 %v2529_v46, %v2128_v0  ;;  %v9295_v21 = vpop.permute.xlu0 %2326 }
 0x23b   :  { %v9278_v12 = vmul.f32 %v8971_v30, %v8929_v26  ;;  %v14450_v48 = vrot.slane %v8865_v5, 7  ;;  %v1860_v55 = vmul.f32 %v14417_v17, %v8975_v43  ;;  %v1862_v40 = vadd.f32 %v9090_v35, %v9017_v60  ;;  %3186 = vrot.lane.b32.xlu1 %v8376_v44, %s6233_s20  ;;  %v14452_v35 = vld [vmem:[#allocation43_spill] sm:$0xff] }
 0x23c   :  { %v2042_v2 = vadd.f32 %v2032_v11, %v8936_v10  ;;  %v2086_v0 = vrot.slane %v9249_v62, 7  ;;  %v9293_v26 = vmul.f32 %v8830_v36, %v9142_v3  ;;  %v9297_v46 = vadd.f32 %v2272_v1, %v2231_v61  ;;  %v14454_v61 = vld [vmem:[#allocation24_spill] sm:$0xff] }
 0x23d   :  { %v2144_v59 = vsel %vm502_vm6, %v2142_v22, %v14450_v48  ;;  %v2041_v28 = vadd.f32 %v2030_v24, %v1929_v47  ;;  %v1899_v17 = vmul.f32 %v8796_v18, %v9200_v23  ;;  %v2145_v48 = vrot.slane %v9264_v54, 7  ;;  %3104 = vrot.lane.b32.xlu0 %v8948_v49, %s6227_s14  ;;  %v9320_v47 = vpop.permute.xlu1 %2412 }
 0x23e   :  { %14451 = vst [vmem:[#allocation17_spill] sm:$0xff] %v9297_v46  ;;  %v1901_v10 = vadd.f32 %v1897_v63, %v1862_v40  ;;  %v2154_v60 = vadd.f32 %v2144_v59, %v2042_v2  ;;  %v14453_v62 = vrot.slane %v14452_v35, 7  ;;  %v1931_v19 = vadd.f32 %v9024_v51, %v1890_v57  ;;  %v14456_v57 = vld [vmem:[#allocation28_spill] sm:$0xff]  ;;  %v9333_v59 = vpop.permute.xlu0 %2330  ;;  %v14463_v46 = vld [vmem:[#allocation27_spill] sm:$0xff] }
 0x23f   :  { %v2244_v24 = vrot.slane %v9278_v12, 6  ;;  %v1864_v18 = vadd.f32 %v1860_v55, %v9054_v42  ;;  %v9314_v54 = vmul.f32 %v14445_v15, %v8975_v43  ;;  %v9318_v44 = vmul.f32 %v8971_v30, %v8975_v43  ;;  %v14458_v43 = vld [vmem:[#allocation15_spill] sm:$0xff]  ;;  %v14459_v2 = vld [vmem:[#allocation48_spill] sm:$0xff]  ;;  %3190 = vrot.lane.b32.xlu1 %v8401_v56, %s6233_s20 }
 0x240   :  { %v2036_v11 = vsel %vm502_vm6, %v2033_v53, %v14453_v62  ;;  %v14455_v1 = vrot.slane %v14454_v61, 7  ;;  %v2170_v63 = vrot.slane %v9293_v26, 7  ;;  %v9328_v12 = vmul.f32 %v14456_v57, %v9142_v3  ;;  %v14461_v26 = vld [vmem:[#allocation29_spill] sm:$0xff] }
 0x241   :  { %v14457_v42 = vrot.slane %v8725_v9, 7  ;;  %v2153_v30 = vadd.f32 %v2142_v22, %v2041_v28  ;;  %v2044_v55 = vadd.f32 %v2036_v11, %v14458_v43  ;;  %v1903_v40 = vadd.f32 %v1899_v17, %v1864_v18  ;;  %3112 = vrot.lane.b32.xlu0 %v8912_v27, %s6228_s15  ;;  %v14464_v28 = vld [vmem:[#allocation34_spill] sm:$0xff]  ;;  %v14465_v11 = vld [vmem:[#allocation31_spill] sm:$0xff]  ;;  %v14467_v43 = vld [vmem:[#allocation21_spill] sm:$0xff] }
 0x242   :  { %v2088_v51 = vsel %vm502_vm6, %v2086_v0, %v14455_v1  ;;  %v14460_v35 = vrot.slane %v14459_v2, 7  ;;  %v14462_v3 = vrot.slane %v14461_v26, 7  ;;  %v2206_v9 = vadd.f32 %v14463_v46, %v2154_v60  ;;  %v14469_v26 = vld [vmem:[#allocation13_spill] sm:$0xff] }
 0x243   :  { %v2034_v15 = vsel %vm502_vm6, %v14457_v42, %v2033_v53  ;;  %v2164_v53 = vmul.f32 %v8830_v36, %v9200_v23  ;;  %v2098_v17 = vadd.f32 %v2088_v51, %v14464_v28  ;;  %v14466_v18 = vrot.slane %v14465_v11, 6  ;;  %v9364_v51 = vld [vmem:[#allocation2 + $0xa8] sm:$0xff] }
 0x244   :  { %v2148_v62 = vsel %vm502_vm6, %v2145_v48, %v14460_v35  ;;  %v1985_v1 = vadd.f32 %v14462_v3, %v1901_v10  ;;  %v2043_v34 = vadd.f32 %v2034_v15, %v1931_v19  ;;  %v13686_v42 = vrot.slane %v9314_v54, 7  ;;  %v9354_v10 = vpop.permute.xlu1 %2416  ;;  %v9362_v15 = vpop.permute.xlu0 %2338  ;;  %3749 = vrot.lane.b32.xlu1 %v9364_v51, %s6223_s10 }
 0x245   :  { %v2246_v56 = vsel %vm781_vm5, %v2244_v24, %v14466_v18  ;;  %v2292_v19 = vrot.slane %v9328_v12, 6  ;;  %v2247_v46 = vrot.slane %v9318_v44, 6  ;;  %v2156_v36 = vadd.f32 %v2148_v62, %v2044_v55  ;;  %v14471_v18 = vld [vmem:[#allocation23_spill] sm:$0xff]  ;;  %3116 = vrot.lane.b32.xlu0 %v8948_v49, %s6228_s15 }
 0x246   :  { %v9360_v60 = vmul.f32 %v14456_v57, %v9200_v23  ;;  %v14468_v2 = vrot.slane %v14467_v43, 7  ;;  %v14470_v3 = vrot.slane %v14469_v26, 6  ;;  %v1987_v12 = vadd.f32 %v14471_v18, %v1903_v40 }
 0x247   :  { %v14472_v44 = vrot.slane %v8865_v5, 7  ;;  %v2097_v23 = vadd.f32 %v2086_v0, %v1985_v1  ;;  %v2254_v57 = vadd.f32 %v2246_v56, %v2206_v9  ;;  %v2173_v22 = vrot.slane %v2164_v53, 7  ;;  %v14475_v53 = vld [vmem:[#allocation58_spill] sm:$0xff] }
 0x248   :  { %v2172_v35 = vsel %vm502_vm6, %v2170_v63, %v14468_v2  ;;  %v2205_v28 = vadd.f32 %v14470_v3, %v2153_v30  ;;  %v9379_v2 = vld [vmem:[#allocation2 + $0xb8] sm:$0xff]  ;;  %v9383_v30 = vadd.f32 %v9222_v4, %v9268_v13  ;;  %v9394_v1 = vpop.permute.xlu1 %2436  ;;  %v14476_v56 = vrot.slane %v14475_v53, 6  ;;  %v14477_v13 = vld [vmem:[#allocation20_spill] sm:$0xff] }
 0x249   :  { %v2146_v55 = vsel %vm502_vm6, %v14472_v44, %v2145_v48  ;;  %v14473_v48 = vld [vmem:[#allocation32_spill] sm:$0xff]  ;;  %v2182_v9 = vadd.f32 %v2172_v35, %v2098_v17  ;;  %v14478_v26 = vrot.slane %v14477_v13, 6  ;;  %v2295_v18 = vrot.slane %v9360_v60, 6  ;;  %v9402_v44 = vpop.permute.xlu0 %2342  ;;  %v14480_v17 = vld [vmem:[#allocation19_spill] sm:$0xff]  ;;  %3753 = vrot.lane.b32.xlu1 %v9379_v2, %s6223_s10  ;;  %3124 = vrot.lane.b32.xlu0 %v8912_v27, %s6229_s16 }
 0x24a   :  { %v2155_v62 = vadd.f32 %v2146_v55, %v2043_v34  ;;  %v2423_v40 = vsel %vm236_vm2, %v14473_v48, %v9161_v7  ;;  %v14474_v34 = vrot.slane %v14454_v61, 7  ;;  %v2294_v4 = vsel %vm781_vm5, %v2292_v19, %v14476_v56  ;;  %v9404_v7 = vld [vmem:[#allocation6 + $0x55] ss:$0 sm:$0xff] }
 0x24b   :  { %v2208_v3 = vadd.f32 %v14478_v26, %v2156_v36  ;;  %v2253_v55 = vadd.f32 %v2244_v24, %v2205_v28  ;;  %v14479_v61 = vrot.slane %v14465_v11, 6  ;;  %v2425_v35 = vsel %vm236_vm2, %v14480_v17, %v9202_v41  ;;  %v14483_v24 = vld [vmem:[#allocation36_spill] sm:$0xff]  ;;  %v9438_v26 = vld [vmem:[#allocation6 + $0x50] ss:$0 sm:$0xff] }
 0x24c   :  { %v2090_v0 = vsel %vm502_vm6, %v14474_v34, %v13686_v42  ;;  %v9414_v36 = vadd.f32 %v2170_v63, %v2097_v23  ;;  %v2302_v60 = vadd.f32 %v2294_v4, %v2254_v57  ;;  %v14482_v56 = vrot.slane %v14467_v43, 7  ;;  %v14484_v11 = vld [vmem:[#allocation16_spill] sm:$0xff]  ;;  %v9429_v63 = vpop.permute.xlu1 %2440  ;;  %v14487_v43 = vld [vmem:[#allocation30_spill] sm:$0xff]  ;;  %14490 = vst [vmem:[#allocation22_spill] sm:$0xff] %v9438_v26 }
 0x24d   :  { %v2248_v48 = vsel %vm781_vm5, %v14479_v61, %v2247_v46  ;;  %v2099_v34 = vadd.f32 %v2090_v0, %v1987_v12  ;;  %v2207_v28 = vadd.f32 %v14483_v24, %v2155_v62  ;;  %v14485_v12 = vrot.slane %v14484_v11, 7  ;;  %v9436_v62 = vld [vmem:[#allocation6 + $0x4b] ss:$0 sm:$0xff]  ;;  %v2351_v24 = vpop.permute.xlu0 %2350  ;;  %v9455_v11 = vld [vmem:[#allocation6 + $0x5a] ss:$0 sm:$0xff]  ;;  %3761 = vrot.lane.b32.xlu1 %v9364_v51, %s6224_s11  ;;  %3128 = vrot.lane.b32.xlu0 %v8948_v49, %s6229_s16 }
 0x24e   :  { %14481 = vst [vmem:[#allocation49_spill] sm:$0xff] %v9414_v36  ;;  %v2174_v13 = vsel %vm502_vm6, %v14482_v56, %v2173_v22  ;;  %v2427_v41 = vsel %vm241_vm3, %v2423_v40, %v9237_v32  ;;  %v14486_v23 = vrot.slane %v9060_v25, 7  ;;  %v14488_v57 = vrot.slane %v14487_v43, 7  ;;  %14489 = vst [vmem:[#allocation53_spill] sm:$0xff] %v9436_v62  ;;  %v9449_v40 = vld [vmem:[#allocation6 + $0x62] ss:$0 sm:$0xff] }
 0x24f   :  { %v9425_v0 = vsel %vm502_vm6, %v2173_v22, %v14485_v12  ;;  %v9442_v61 = vmul.f32 %v9404_v7, %v9116_v58  ;;  %v2256_v22 = vadd.f32 %v2247_v46, %v2208_v3  ;;  %v14492_v17 = vrot.slane %v14475_v53, 6  ;;  %14493 = vst [vmem:[#allocation55_spill] sm:$0xff] %v9449_v40  ;;  %v9464_v53 = vld [vmem:[#allocation6 + $0x58] ss:$0 sm:$0xff] }
 0x250   :  { %v2118_v4 = vsel %vm502_vm6, %v14488_v57, %v14486_v23  ;;  %v2429_v25 = vsel %vm241_vm3, %v2425_v35, %v9285_v14  ;;  %v9453_v56 = vsel %vm246_vm4, %v2427_v41, %v9320_v47  ;;  %v9457_v12 = vadd.f32 %v2292_v19, %v2253_v55  ;;  %v9473_v35 = vld [vmem:[#allocation6 + $0x4e] ss:$0 sm:$0xff]  ;;  %v9475_v19 = vld [vmem:[#allocation6 + $0x53] ss:$0 sm:$0xff]  ;;  %v9477_v55 = vld [vmem:[#allocation6 + $0x5d] ss:$0 sm:$0xff] }
 0x251   :  { %14491 = vst [vmem:[#allocation50_spill] sm:$0xff] %v9442_v61  ;;  %v2296_v32 = vsel %vm781_vm5, %v14492_v17, %v2295_v18  ;;  %14494 = vst [vmem:[#allocation35_spill] sm:$0xff] %v9453_v56  ;;  %v9459_v23 = vadd.f32 %v2174_v13, %v2099_v34  ;;  %v2362_v46 = vsel %vm236_vm2, %v9214_v37, %v9295_v21  ;;  %v14497_v14 = vrot.slane %v9064_v39, 6  ;;  %v9494_v34 = vpop.permute.xlu1 %2448  ;;  %v2355_v43 = vpop.permute.xlu0 %2354 }
 0x252   :  { %14495 = vst [vmem:[#allocation45_spill] sm:$0xff] %v9457_v12  ;;  %v2255_v47 = vadd.f32 %v2248_v48, %v2207_v28  ;;  %v9482_v37 = vadd.f32 %v2118_v4, %v9147_v29  ;;  %v2488_v39 = vmul.f32 %v9436_v62, %v9116_v58  ;;  %v9490_v21 = vmul.f32 %v9449_v40, %v9453_v56 }
 0x253   :  { %14496 = vst [vmem:[#allocation14_spill] sm:$0xff] %v9459_v23  ;;  %v9469_v3 = vadd.f32 %v14497_v14, %v9133_v31  ;;  %v2514_v31 = vmul.f32 %v9438_v26, %v9116_v58  ;;  %v2433_v48 = vsel %vm246_vm4, %v2429_v25, %v9354_v10  ;;  %v9499_v29 = vmul.f32 %v9455_v11, %v9116_v58  ;;  %v9514_v14 = vld [vmem:[#allocation6 + $0x57] ss:$0 sm:$0xff] }
 0x254   :  { %14498 = vst [vmem:[#allocation18_spill] sm:$0xff] %v9490_v21  ;;  %v9501_v28 = vadd.f32 %v2295_v18, %v2256_v22  ;;  %v9505_v41 = vmul.f32 %v9464_v53, %v9453_v56  ;;  %v2492_v57 = vadd.f32 %v2488_v39, %v2302_v60  ;;  %v2364_v10 = vsel %vm236_vm2, %v9252_v38, %v9333_v59  ;;  %v9524_v60 = vld [vmem:[#allocation6 + $0x52] ss:$0 sm:$0xff]  ;;  %v9528_v59 = vld [vmem:[#allocation6 + $0x5c] ss:$0 sm:$0xff] }
 0x255   :  { %v2518_v4 = vadd.f32 %v2514_v31, %v2182_v9  ;;  %v2553_v17 = vmul.f32 %v9473_v35, %v9453_v56  ;;  %v2579_v25 = vmul.f32 %v9475_v19, %v9453_v56  ;;  %14500 = vst [vmem:[#allocation40_spill] sm:$0xff] %v9514_v14  ;;  %v9518_v18 = vmul.f32 %v9477_v55, %v9453_v56  ;;  %v9522_v9 = vld [vmem:[#allocation6 + $0x4d] ss:$0 sm:$0xff]  ;;  %v9547_v42 = vpop.permute.xlu1 %2452  ;;  %v9552_v36 = vpop.permute.xlu0 %2374 }
 0x256   :  { %14499 = vst [vmem:[#allocation33_spill] sm:$0xff] %v9505_v41  ;;  %3765 = vrot.lane.b32.xlu1 %v9379_v2, %s6224_s11  ;;  %14502 = vst [vmem:[#allocation44_spill] sm:$0xff] %v9522_v9  ;;  %v9526_v38 = vadd.f32 %v2296_v32, %v2255_v47  ;;  %v2555_v22 = vmul.f32 %v9473_v35, %v2433_v48  ;;  %v2581_v39 = vmul.f32 %v9475_v19, %v2433_v48 }
 0x257   :  { %14501 = vst [vmem:[#allocation12_spill] sm:$0xff] %v9518_v18  ;;  %14503 = vst [vmem:[#allocation39_spill] sm:$0xff] %v9524_v60  ;;  %v9533_v31 = vmul.f32 %v9514_v14, %v2433_v48  ;;  %3136 = vrot.lane.b32.xlu0 %v8912_v27, %s6230_s17  ;;  %v9539_v13 = vmul.f32 %v9464_v53, %v2433_v48  ;;  %v9542_v32 = vmul.f32 %v9528_v59, %v2433_v48 }
 0x258   :  { %14504 = vst [vmem:[#allocation52_spill] sm:$0xff] %v9526_v38  ;;  %14505 = vst [vmem:[#allocation57_spill] sm:$0xff] %v9528_v59  ;;  %v9545_v47 = vmul.f32 %v9477_v55, %v2433_v48  ;;  %v2366_v38 = vsel %vm241_vm3, %v2362_v46, %v9362_v15  ;;  %v2540_v5 = vmul.f32 %v9522_v9, %v9453_v56 }
 0x259   :  { %14506 = vst [vmem:[#allocation54_spill] sm:$0xff] %v9533_v31  ;;  %14507 = vst [vmem:[#allocation43_spill] sm:$0xff] %v9539_v13  ;;  %v2566_v12 = vmul.f32 %v9524_v60, %v9453_v56  ;;  %v9560_v21 = vadd.f32 %v2553_v17, %v9230_v8  ;;  %v9563_v40 = vadd.f32 %v2579_v25, %v9234_v6  ;;  %v2461_v25 = vpop.permute.xlu1 %2460  ;;  %v9595_v58 = vpop.permute.xlu0 %2378  ;;  %v14527_v13 = vld [vmem:[#allocation46_spill] sm:$0xff] }
 0x25a   :  { %14508 = vst [vmem:[#allocation24_spill] sm:$0xff] %v9542_v32  ;;  %14509 = vst [vmem:[#allocation28_spill] sm:$0xff] %v9545_v47  ;;  %v9566_v23 = vsel %vm246_vm4, %v2366_v38, %v2351_v24  ;;  %3773 = vrot.lane.b32.xlu1 %v9364_v51, %s6225_s12  ;;  %v9571_v15 = vadd.f32 %v2555_v22, %v9383_v30  ;;  %v9574_v46 = vadd.f32 %v2581_v39, %v9274_v52  ;;  %v6124_v38 = vld [vmem:[#allocation2 + $0x68] sm:$0xff]  ;;  %v6125_v32 = vld [vmem:[#allocation2 + $0x78] sm:$0xff] }
 0x25b   :  { %14510 = vst [vmem:[#allocation15_spill] sm:$0xff] %v9566_v23  ;;  %3140 = vrot.lane.b32.xlu0 %v8948_v49, %s6230_s17  ;;  %v2490_v30 = vmul.f32 %v9436_v62, %v9193_v45  ;;  %v2471_v52 = vsel %vm236_vm2, %v6124_v38, %v9394_v1  ;;  %v9589_v22 = vmul.f32 %v9123_v20, %v9566_v23  ;;  %v14528_v18 = vrot.slane %v14527_v13, 7  ;;  %v14535_v13 = vld [vmem:[#allocation17_spill] sm:$0xff] }
 0x25c   :  { %v9593_v39 = vmul.f32 %v9153_v33, %v9566_v23  ;;  %v9599_v24 = vmul.f32 %v9404_v7, %v9193_v45  ;;  %v2368_v17 = vsel %vm241_vm3, %v2364_v10, %v9402_v44  ;;  %v9603_v6 = vadd.f32 %v2540_v5, %v2492_v57 }
 0x25d   :  { %v9605_v1 = vadd.f32 %v2566_v12, %v2518_v4  ;;  %v9611_v38 = vmul.f32 %v9455_v11, %v9193_v45  ;;  %v9617_v8 = vmul.f32 %v9438_v26, %v9193_v45  ;;  %v2542_v44 = vmul.f32 %v9522_v9, %v2433_v48  ;;  %v14511_v12 = vld [vmem:[#allocation42_spill] sm:$0xff]  ;;  %v9633_v45 = vpop.permute.xlu1 %2464 }
 0x25e   :  { %3777 = vrot.lane.b32.xlu1 %v9379_v2, %s6225_s12  ;;  %v9621_v5 = vmul.f32 %v9524_v60, %v2433_v48  ;;  %v14512_v57 = vrot.slane %v14511_v12, 7  ;;  %v14513_v4 = vrot.slane %v9314_v54, 7  ;;  %v2473_v31 = vsel %vm236_vm2, %v6125_v32, %v9429_v63  ;;  %v14518_v32 = vld [vmem:[#allocation25_spill] sm:$0xff]  ;;  %v14521_v12 = vld [vmem:[#allocation38_spill] sm:$0xff] }
 0x25f   :  { %3160 = vrot.lane.b32.xlu0 %v8912_v27, %s6231_s18  ;;  %v9631_v62 = vsel %vm246_vm4, %v2368_v17, %v2355_v43  ;;  %v2494_v9 = vadd.f32 %v2490_v30, %v9501_v28  ;;  %v9638_v48 = vmul.f32 %v9514_v14, %v9453_v56  ;;  %v9647_v43 = vpop.permute.xlu0 %2386  ;;  %v2500_v17 = vmul.f32 %v14518_v32, %v9566_v23  ;;  %v14519_v30 = vld [vmem:[#allocation47_spill] sm:$0xff] }
 0x260   :  { %v2092_v10 = vsel %vm502_vm6, %v14513_v4, %v14512_v57  ;;  %14514 = vst [vmem:[#allocation48_spill] sm:$0xff] %v9631_v62  ;;  %v14516_v57 = vld [vmem:[#allocation37_spill] sm:$0xff]  ;;  %v9657_v54 = vmul.f32 %v9528_v59, %v9453_v56  ;;  %v2526_v14 = vmul.f32 %v14521_v12, %v9566_v23  ;;  %v9663_v63 = vmul.f32 %v9123_v20, %v9631_v62  ;;  %v14524_v56 = vld [vmem:[#allocation51_spill] sm:$0xff] }
 0x261   :  { %14515 = vst [vmem:[#allocation29_spill] sm:$0xff] %v9638_v48  ;;  %v9644_v4 = vmul.f32 %v14516_v57, %v9566_v23  ;;  %v2100_v60 = vadd.f32 %v2092_v10, %v14519_v30  ;;  %v9667_v26 = vmul.f32 %v9404_v7, %v9566_v23  ;;  %v9669_v28 = vadd.f32 %v2542_v44, %v2494_v9  ;;  %v9682_v59 = vpop.permute.xlu1 %3042  ;;  %v9709_v48 = vld [vmem:[#allocation6 + $0x54] ss:$0 sm:$0xff] }
 0x262   :  { %3785 = vrot.lane.b32.xlu1 %v9364_v51, %s6226_s13  ;;  %14520 = vst [vmem:[#allocation34_spill] sm:$0xff] %v9657_v54  ;;  %v9675_v10 = vmul.f32 %v9153_v33, %v9631_v62  ;;  %v9679_v30 = vmul.f32 %v9455_v11, %v9566_v23  ;;  %14523 = vst [vmem:[#allocation21_spill] sm:$0xff] %v9682_v59  ;;  %v14525_v9 = vrot.slane %v14524_v56, 7  ;;  %v14526_v44 = vrot.slane %v9589_v22, 7 }
 0x263   :  { %14517 = vst [vmem:[#allocation27_spill] sm:$0xff] %v9644_v4  ;;  %14522 = vst [vmem:[#allocation31_spill] sm:$0xff] %v9667_v26  ;;  %3164 = vrot.lane.b32.xlu0 %v8948_v49, %s6231_s18  ;;  %v2184_v20 = vadd.f32 %v9425_v0, %v2100_v60  ;;  %v14529_v33 = vrot.slane %v9593_v39, 7  ;;  %v13718_v23 = vrot.slane %v9644_v4, 6  ;;  %v2475_v0 = vsel %vm241_vm3, %v2471_v52, %v9494_v34  ;;  %v9698_v60 = vpop.permute.xlu0 %2390  ;;  %v14530_v34 = vld [vmem:[#allocation41_spill] sm:$0xff] }
 0x264   :  { %v2655_v47 = vsel %vm502_vm6, %v14526_v44, %v14525_v9  ;;  %v9701_v54 = vadd.f32 %v2500_v17, %v9469_v3  ;;  %v2502_v59 = vmul.f32 %v14518_v32, %v9631_v62  ;;  %v2528_v9 = vmul.f32 %v14521_v12, %v9631_v62  ;;  %v9707_v44 = vld [vmem:[#allocation6 + $0x4f] ss:$0 sm:$0xff] }
 0x265   :  { %v2711_v41 = vsel %vm502_vm6, %v14529_v33, %v14528_v18  ;;  %v2479_v18 = vsel %vm246_vm4, %v2475_v0, %v2461_v25  ;;  %v9715_v52 = vadd.f32 %v2526_v14, %v14530_v34  ;;  %v2656_v3 = vrot.slane %v9663_v63, 7  ;;  %v9732_v33 = vld [vmem:[#allocation6 + $0x59] ss:$0 sm:$0xff] }
 0x266   :  { %3789 = vrot.lane.b32.xlu1 %v9379_v2, %s6226_s13  ;;  %v9720_v32 = vmul.f32 %v14516_v57, %v9631_v62  ;;  %v9726_v17 = vadd.f32 %v2655_v47, %v9560_v21  ;;  %v9729_v25 = vadd.f32 %v2711_v41, %v9563_v40  ;;  %v9736_v63 = vmul.f32 %v9404_v7, %v9631_v62  ;;  %v9738_v57 = vpop.permute.xlu1 %3046  ;;  %v14533_v0 = vld [vmem:[#allocation26_spill] sm:$0xff]  ;;  %v9749_v40 = vld [vmem:[#allocation6 + $0x63] ss:$0 sm:$0xff] }
 0x267   :  { %3172 = vrot.lane.b32.xlu0 %v8912_v27, %s6232_s19  ;;  %14532 = vst [vmem:[#allocation23_spill] sm:$0xff] %v9738_v57  ;;  %v14534_v34 = vrot.slane %v14533_v0, 6  ;;  %v9747_v47 = vld [vmem:[#allocation6 + $0x5e] ss:$0 sm:$0xff]  ;;  %v2592_v41 = vmul.f32 %v9707_v44, %v2479_v18  ;;  %v2605_v14 = vmul.f32 %v9709_v48, %v2479_v18  ;;  %v2399_v12 = vpop.permute.xlu0 %2398  ;;  %v9755_v57 = vadd.f32 %v2502_v59, %v14535_v13 }
 0x268   :  { %14531 = vst [vmem:[#allocation13_spill] sm:$0xff] %v9729_v25  ;;  %v9758_v25 = vadd.f32 %v2528_v9, %v9482_v37  ;;  %v14537_v4 = vrot.slane %v9241_v16, 7  ;;  %v14538_v59 = vrot.slane %v9442_v61, 7  ;;  %v14539_v37 = vrot.slane %v9667_v26, 7 }
 0x269   :  { %v9745_v21 = vsel %vm781_vm5, %v13718_v23, %v14534_v34  ;;  %v2477_v34 = vsel %vm241_vm3, %v2473_v31, %v9547_v42  ;;  %v9764_v23 = vmul.f32 %v9455_v11, %v9631_v62  ;;  %v9778_v42 = vmul.f32 %v9732_v33, %v2479_v18 }
 0x26a   :  { %14536 = vst [vmem:[#allocation32_spill] sm:$0xff] %v9758_v25  ;;  %3809 = vrot.lane.b32.xlu1 %v9364_v51, %s6227_s14  ;;  %v2659_v7 = vsel %vm502_vm6, %v2656_v3, %v14537_v4  ;;  %v2627_v9 = vsel %vm502_vm6, %v14539_v37, %v14538_v59  ;;  %v14540_v11 = vrot.slane %v9245_v50, 7  ;;  %v14541_v16 = vrot.slane %v9675_v10, 7  ;;  %v9794_v37 = vpop.permute.xlu1 %3054 }
 0x26b   :  { %3176 = vrot.lane.b32.xlu0 %v8948_v49, %s6232_s19  ;;  %v9788_v4 = vmul.f32 %v9747_v47, %v2479_v18  ;;  %v9791_v13 = vmul.f32 %v9749_v40, %v2479_v18  ;;  %14542 = vst [vmem:[#allocation58_spill] sm:$0xff] %v9794_v37  ;;  %v2596_v26 = vadd.f32 %v2592_v41, %v9603_v6  ;;  %v14543_v50 = vrot.slane %v9499_v29, 7  ;;  %v2403_v25 = vpop.permute.xlu0 %2402 }
 0x26c   :  { %v2715_v31 = vsel %vm502_vm6, %v14541_v16, %v14540_v11  ;;  %v2609_v61 = vadd.f32 %v2605_v14, %v9605_v1  ;;  %v14544_v62 = vrot.slane %v9679_v30, 7  ;;  %v2520_v16 = vadd.f32 %v9617_v8, %v2184_v20 }
 0x26d   :  { %v9805_v18 = vadd.f32 %v2659_v7, %v9571_v15  ;;  %v2481_v59 = vsel %vm246_vm4, %v2477_v34, %v9633_v45  ;;  %v2684_v37 = vrot.slane %v9764_v23, 7  ;;  %v14545_v6 = vrot.slane %v14524_v56, 7 }
 0x26e   :  { %v2683_v11 = vsel %vm502_vm6, %v14544_v62, %v14543_v50  ;;  %3813 = vrot.lane.b32.xlu1 %v9379_v2, %s6227_s14  ;;  %v9818_v62 = vadd.f32 %v2715_v31, %v9574_v46  ;;  %v14546_v8 = vrot.slane %v9720_v32, 6  ;;  %v14547_v15 = vrot.slane %v14533_v0, 6  ;;  %v9843_v34 = vpop.permute.xlu1 %3058 }
 0x26f   :  { %v9815_v1 = vsel %vm502_vm6, %v14545_v6, %v2656_v3  ;;  %v2572_v14 = vadd.f32 %v9621_v5, %v2520_v16  ;;  %3184 = vrot.lane.b32.xlu0 %v8912_v27, %s6233_s20  ;;  %v14548_v46 = vrot.slane %v9599_v24, 7  ;;  %v14549_v41 = vrot.slane %v9736_v63, 7  ;;  %v2411_v24 = vpop.permute.xlu0 %2410 }
 0x270   :  { %v9825_v20 = vsel %vm781_vm5, %v14547_v15, %v14546_v8  ;;  %v2422_v7 = vsel %vm236_vm2, %v9552_v36, %v9647_v43  ;;  %v9845_v5 = vadd.f32 %v2627_v9, %v2596_v26  ;;  %v9847_v27 = vadd.f32 %v2683_v11, %v2609_v61  ;;  %v14551_v11 = vld [vmem:[#allocation55_spill] sm:$0xff] }
 0x271   :  { %v9838_v0 = vsel %vm502_vm6, %v14549_v41, %v14548_v46  ;;  %v2594_v31 = vmul.f32 %v9707_v44, %v2481_v59  ;;  %v2426_v50 = vsel %vm241_vm3, %v2422_v7, %v2399_v12  ;;  %v2607_v16 = vmul.f32 %v9709_v48, %v2481_v59 }
 0x272   :  { %v14550_v6 = vrot.slane %v9611_v38, 7  ;;  %v2424_v36 = vsel %vm236_vm2, %v9595_v58, %v9698_v60  ;;  %v9863_v26 = vsel %vm246_vm4, %v2426_v50, %v2411_v24  ;;  %3821 = vrot.lane.b32.xlu1 %v9364_v51, %s6228_s15  ;;  %v9878_v58 = vmul.f32 %v9732_v33, %v2481_v59  ;;  %v9886_v46 = vpop.permute.xlu1 %3066 }
 0x273   :  { %v2552_v61 = vmul.f32 %v9473_v35, %v9863_v26  ;;  %v2578_v38 = vmul.f32 %v9475_v19, %v9863_v26  ;;  %v2757_v43 = vmul.f32 %v9464_v53, %v9863_v26  ;;  %v2813_v12 = vmul.f32 %v9477_v55, %v9863_v26  ;;  %3188 = vrot.lane.b32.xlu0 %v8948_v49, %s6233_s20  ;;  %v2415_v49 = vpop.permute.xlu0 %2414 }
 0x274   :  { %v9857_v8 = vsel %vm502_vm6, %v2684_v37, %v14550_v6  ;;  %v9881_v60 = vmul.f32 %v9747_v47, %v2481_v59  ;;  %v2428_v9 = vsel %vm241_vm3, %v2424_v36, %v2403_v25  ;;  %v2969_v15 = vmul.f32 %v14551_v11, %v9863_v26  ;;  %v9900_v36 = vld [vmem:[#allocation2 + $0xa0] sm:$0xff] }
 0x275   :  { %v2556_v41 = vadd.f32 %v2552_v61, %v9701_v54  ;;  %v2582_v7 = vadd.f32 %v2578_v38, %v9715_v52  ;;  %v2765_v50 = vrot.slane %v2757_v43, 7  ;;  %v2821_v24 = vrot.slane %v2813_v12, 7  ;;  %v14554_v43 = vld [vmem:[#allocation33_spill] sm:$0xff] }
 0x276   :  { %v9891_v6 = vadd.f32 %v2594_v31, %v9669_v28  ;;  %v9893_v3 = vadd.f32 %v2607_v16, %v2572_v14  ;;  %v2975_v59 = vrot.slane %v2969_v15, 6  ;;  %v9896_v25 = vsel %vm246_vm4, %v2428_v9, %v2415_v49  ;;  %3825 = vrot.lane.b32.xlu1 %v9379_v2, %s6228_s15  ;;  %v14556_v31 = vld [vmem:[#allocation12_spill] sm:$0xff]  ;;  %v14558_v15 = vld [vmem:[#allocation13_spill] sm:$0xff] }
 0x277   :  { %v14552_v54 = vrot.slane %v9589_v22, 7  ;;  %v14553_v61 = vrot.slane %v9593_v39, 7  ;;  %v14555_v28 = vrot.slane %v14554_v43, 7  ;;  %v14557_v16 = vrot.slane %v14556_v31, 7  ;;  %3747 = vrot.lane.b32.xlu0 %v9900_v36, %s6223_s10 }
 0x278   :  { %v14559_v22 = vrot.slane %v9675_v10, 7  ;;  %v2580_v56 = vmul.f32 %v9475_v19, %v9896_v25  ;;  %v9939_v19 = vld [vmem:[#allocation2 + $0xb0] sm:$0xff] }
 0x279   :  { %v2664_v52 = vadd.f32 %v14552_v54, %v2556_v41  ;;  %v2720_v38 = vadd.f32 %v14553_v61, %v2582_v7  ;;  %v2767_v14 = vsel %vm502_vm6, %v2765_v50, %v14555_v28  ;;  %v2823_v12 = vsel %vm502_vm6, %v2821_v24, %v14557_v16  ;;  %v14560_v41 = vld [vmem:[#allocation46_spill] sm:$0xff]  ;;  %v9923_v61 = vpop.permute.xlu1 %3070 }
 0x27a   :  { %v2777_v9 = vadd.f32 %v2767_v14, %v9726_v17  ;;  %v2833_v49 = vadd.f32 %v2823_v12, %v14558_v15  ;;  %v14561_v39 = vrot.slane %v14560_v41, 7  ;;  %v2554_v54 = vmul.f32 %v9473_v35, %v9896_v25  ;;  %14562 = vst [vmem:[#allocation20_spill] sm:$0xff] %v9923_v61  ;;  %v9929_v14 = vpop.permute.xlu0 %2434  ;;  %3833 = vrot.lane.b32.xlu1 %v9364_v51, %s6229_s16 }
 0x27b   :  { %v2776_v28 = vadd.f32 %v2765_v50, %v2664_v52  ;;  %v2832_v16 = vadd.f32 %v2821_v24, %v2720_v38  ;;  %v2759_v17 = vmul.f32 %v9464_v53, %v9896_v25  ;;  %v2815_v35 = vmul.f32 %v9477_v55, %v9896_v25  ;;  %v14563_v24 = vld [vmem:[#allocation27_spill] sm:$0xff]  ;;  %v14565_v38 = vld [vmem:[#allocation18_spill] sm:$0xff]  ;;  %3751 = vrot.lane.b32.xlu0 %v9939_v19, %s6223_s10 }
 0x27c   :  { %v2713_v7 = vsel %vm502_vm6, %v14561_v39, %v14559_v22  ;;  %v2937_v10 = vadd.f32 %v9745_v21, %v2777_v9  ;;  %3028 = vst [vmem:[#allocation8 + $0x4e] sm:$0xff] %v2833_v49  ;;  %v2558_v12 = vadd.f32 %v2554_v54, %v9755_v57  ;;  %v2971_v50 = vmul.f32 %v14551_v11, %v9896_v25  ;;  %v14567_v57 = vld [vmem:[#allocation32_spill] sm:$0xff] }
 0x27d   :  { %v14564_v53 = vrot.slane %v14563_v24, 6  ;;  %v14566_v15 = vrot.slane %v14565_v38, 6  ;;  %3027 = vst [vmem:[#allocation8 + $0x46] sm:$0xfc] %v2832_v16  ;;  %v2584_v9 = vadd.f32 %v2580_v56, %v14567_v57  ;;  %v2768_v49 = vrot.slane %v2759_v17, 7  ;;  %v9950_v39 = vpop.permute.xlu1 %3078  ;;  %v14570_v16 = vld [vmem:[#allocation43_spill] sm:$0xff] }
 0x27e   :  { %v2666_v11 = vadd.f32 %v9815_v1, %v2558_v12  ;;  %v2824_v22 = vrot.slane %v2815_v35, 7  ;;  %v2978_v41 = vrot.slane %v2971_v50, 6  ;;  %14568 = vst [vmem:[#allocation19_spill] sm:$0xff] %v9950_v39  ;;  %v14569_v24 = vrot.slane %v14554_v43, 7  ;;  %v9958_v17 = vpop.permute.xlu0 %2438  ;;  %3837 = vrot.lane.b32.xlu1 %v9379_v2, %s6229_s16  ;;  %v5993_v50 = vld [vmem:[#allocation6 + $0x5f] ss:$0 sm:$0xff] }
 0x27f   :  { %v2936_v52 = vadd.f32 %v14564_v53, %v2776_v28  ;;  %v2977_v21 = vsel %vm781_vm5, %v2975_v59, %v14566_v15  ;;  %v2722_v28 = vadd.f32 %v2713_v7, %v2584_v9  ;;  %v14571_v15 = vrot.slane %v14570_v16, 7  ;;  %3759 = vrot.lane.b32.xlu0 %v9900_v36, %s6224_s11  ;;  %v14576_v57 = vld [vmem:[#allocation53_spill] sm:$0xff] }
 0x280   :  { %v2985_v55 = vadd.f32 %v2977_v21, %v2937_v10  ;;  %v2769_v53 = vsel %vm502_vm6, %v14569_v24, %v2768_v49  ;;  %v14572_v12 = vrot.slane %v14556_v31, 7  ;;  %v14579_v24 = vrot.slane %v14565_v38, 6  ;;  %v14583_v38 = vld [vmem:[#allocation35_spill] sm:$0xff] }
 0x281   :  { %v2984_v54 = vadd.f32 %v2975_v59, %v2936_v52  ;;  %v2771_v56 = vsel %vm502_vm6, %v2768_v49, %v14571_v15  ;;  %v2778_v10 = vadd.f32 %v2769_v53, %v2666_v11  ;;  %v14573_v59 = vld [vmem:[#allocation28_spill] sm:$0xff]  ;;  %v9977_v49 = vld [vmem:[#allocation6 + $0x61] ss:$0 sm:$0xff]  ;;  %v14580_v15 = vld [vmem:[#allocation22_spill] sm:$0xff] }
 0x282   :  { %3018 = vst [vmem:[#allocation8 + $0x1e] sm:$0xff] %v2985_v55  ;;  %v2779_v1 = vadd.f32 %v2771_v56, %v9805_v18  ;;  %v2825_v35 = vsel %vm502_vm6, %v14572_v12, %v2824_v22  ;;  %v14574_v7 = vrot.slane %v14573_v59, 7  ;;  %v14575_v18 = vld [vmem:[#allocation15_spill] sm:$0xff]  ;;  %v2979_v53 = vsel %vm781_vm5, %v14579_v24, %v2978_v41  ;;  %v2447_v16 = vpop.permute.xlu0 %2446  ;;  %v14581_v12 = vld [vmem:[#allocation40_spill] sm:$0xff]  ;;  %3845 = vrot.lane.b32.xlu1 %v9364_v51, %s6230_s17 }
 0x283   :  { %3017 = vst [vmem:[#allocation8 + $0x16] sm:$0xfc] %v2984_v54  ;;  %v2834_v52 = vadd.f32 %v2825_v35, %v2722_v28  ;;  %v2487_v31 = vmul.f32 %v14576_v57, %v14575_v18  ;;  %v9975_v9 = vmul.f32 %v5993_v50, %v14575_v18  ;;  %v14577_v54 = vrot.slane %v9720_v32, 6  ;;  %v9984_v28 = vpop.permute.xlu1 %3082  ;;  %3763 = vrot.lane.b32.xlu0 %v9939_v19, %s6224_s11 }
 0x284   :  { %v2827_v43 = vsel %vm502_vm6, %v2824_v22, %v14574_v7  ;;  %v2938_v22 = vadd.f32 %v9825_v20, %v2778_v10  ;;  %14578 = vst [vmem:[#allocation36_spill] sm:$0xff] %v9984_v28  ;;  %v2513_v56 = vmul.f32 %v14580_v15, %v14575_v18  ;;  %v9993_v35 = vmul.f32 %v14581_v12, %v9863_v26  ;;  %v14582_v20 = vld [vmem:[#allocation56_spill] sm:$0xff] }
 0x285   :  { %v2835_v21 = vadd.f32 %v2827_v43, %v9818_v62  ;;  %v2939_v62 = vadd.f32 %v14577_v54, %v2779_v1  ;;  %3029 = vst [vmem:[#allocation8 + $0x56] sm:$0xff] %v2834_v52  ;;  %v9996_v10 = vmul.f32 %v5993_v50, %v14582_v20  ;;  %v10002_v59 = vmul.f32 %v9977_v49, %v14583_v38  ;;  %v14584_v7 = vld [vmem:[#allocation48_spill] sm:$0xff]  ;;  %v14589_v38 = vld [vmem:[#allocation49_spill] sm:$0xff] }
 0x286   :  { %v2986_v32 = vadd.f32 %v2979_v53, %v2938_v22  ;;  %v2489_v43 = vmul.f32 %v14576_v57, %v14584_v7  ;;  %v10008_v52 = vadd.f32 %v9838_v0, %v9891_v6  ;;  %v2515_v22 = vmul.f32 %v14580_v15, %v14584_v7  ;;  %v14587_v0 = vld [vmem:[#allocation45_spill] sm:$0xff]  ;;  %v2451_v20 = vpop.permute.xlu0 %2450  ;;  %v14590_v15 = vld [vmem:[#allocation39_spill] sm:$0xff]  ;;  %3849 = vrot.lane.b32.xlu1 %v9379_v2, %s6230_s17 }
 0x287   :  { %3030 = vst [vmem:[#allocation8 + $0x5e] sm:$0x3] %v2835_v21  ;;  %v2987_v1 = vadd.f32 %v2978_v41, %v2939_v62  ;;  %v14585_v21 = vld [vmem:[#allocation34_spill] sm:$0xff]  ;;  %v2903_v41 = vrot.slane %v9975_v9, 6  ;;  %v10018_v54 = vadd.f32 %v9857_v8, %v9893_v3  ;;  %v10020_v57 = vpop.permute.xlu1 %3102  ;;  %v2491_v6 = vadd.f32 %v2487_v31, %v14587_v0  ;;  %v14588_v62 = vld [vmem:[#allocation44_spill] sm:$0xff]  ;;  %3771 = vrot.lane.b32.xlu0 %v9900_v36, %s6225_s12  ;;  %v14596_v31 = vld [vmem:[#allocation29_spill] sm:$0xff] }
 0x288   :  { %3019 = vst [vmem:[#allocation8 + $0x26] sm:$0xff] %v2986_v32  ;;  %14586 = vst [vmem:[#allocation16_spill] sm:$0xff] %v10020_v57  ;;  %v2539_v24 = vmul.f32 %v14588_v62, %v9863_v26  ;;  %v10026_v53 = vmul.f32 %v5993_v50, %v14584_v7  ;;  %v2517_v11 = vadd.f32 %v2513_v56, %v14589_v38  ;;  %v2737_v3 = vrot.slane %v9993_v35, 7  ;;  %v14591_v32 = vld [vmem:[#allocation52_spill] sm:$0xff]  ;;  %v14593_v7 = vld [vmem:[#allocation50_spill] sm:$0xff] }
 0x289   :  { %3020 = vst [vmem:[#allocation8 + $0x2e] sm:$0x3] %v2987_v1  ;;  %v2565_v55 = vmul.f32 %v14590_v15, %v9863_v26  ;;  %v13724_v8 = vrot.slane %v9996_v10, 6  ;;  %v2493_v1 = vadd.f32 %v2489_v43, %v14591_v32  ;;  %v14592_v50 = vrot.slane %v9736_v63, 7  ;;  %v14598_v63 = vld [vmem:[#allocation57_spill] sm:$0xff]  ;;  %v14601_v57 = vld [vmem:[#allocation31_spill] sm:$0xff] }
 0x28a   :  { %v14594_v0 = vrot.slane %v14593_v7, 7  ;;  %v14595_v35 = vrot.slane %v9499_v29, 7  ;;  %v14597_v45 = vrot.slane %v14596_v31, 7  ;;  %v2785_v32 = vmul.f32 %v14598_v63, %v9863_v26  ;;  %v14599_v29 = vld [vmem:[#allocation14_spill] sm:$0xff]  ;;  %3869 = vrot.lane.b32.xlu1 %v9364_v51, %s6231_s18 }
 0x28b   :  { %v2905_v23 = vsel %vm781_vm5, %v2903_v41, %v13724_v8  ;;  %v2543_v18 = vadd.f32 %v2539_v24, %v2491_v6  ;;  %v2569_v39 = vadd.f32 %v2565_v55, %v2517_v11  ;;  %v2731_v6 = vmul.f32 %v14581_v12, %v9896_v25  ;;  %3775 = vrot.lane.b32.xlu0 %v9939_v19, %s6225_s12 }
 0x28c   :  { %v10042_v56 = vsel %vm502_vm6, %v14594_v0, %v14592_v50  ;;  %v10049_v38 = vsel %vm502_vm6, %v14595_v35, %v2684_v37  ;;  %v2739_v43 = vsel %vm502_vm6, %v2737_v3, %v14597_v45  ;;  %v2519_v50 = vadd.f32 %v2515_v22, %v14599_v29  ;;  %v6126_v37 = vld [vmem:[#allocation2 + $0x60] sm:$0xff]  ;;  %v6127_v0 = vld [vmem:[#allocation2 + $0x70] sm:$0xff]  ;;  %v10068_v45 = vpop.permute.xlu1 %3106  ;;  %v2459_v29 = vpop.permute.xlu0 %2458 }
 0x28d   :  { %v2470_v7 = vsel %vm236_vm2, %v6126_v37, %v9929_v14  ;;  %v2472_v35 = vsel %vm236_vm2, %v6127_v0, %v9958_v17  ;;  %v2793_v61 = vrot.slane %v2785_v32, 7  ;;  %v10074_v22 = vmul.f32 %v9977_v49, %v9863_v26 }
 0x28e   :  { %v2474_v28 = vsel %vm241_vm3, %v2470_v7, %v2447_v16  ;;  %v2476_v14 = vsel %vm241_vm3, %v2472_v35, %v2451_v20  ;;  %v2749_v37 = vadd.f32 %v2739_v43, %v9845_v5  ;;  %v2541_v26 = vmul.f32 %v14588_v62, %v9896_v25  ;;  %3873 = vrot.lane.b32.xlu1 %v9379_v2, %s6231_s18 }
 0x28f   :  { %v2478_v17 = vsel %vm246_vm4, %v2474_v28, %v2459_v29  ;;  %v10091_v5 = vmul.f32 %v14598_v63, %v9896_v25  ;;  %v14600_v28 = vrot.slane %v14585_v21, 7  ;;  %v2951_v32 = vrot.slane %v10074_v22, 6  ;;  %3783 = vrot.lane.b32.xlu0 %v9900_v36, %s6226_s13 }
 0x290   :  { %v2591_v55 = vmul.f32 %v9707_v44, %v2478_v17  ;;  %v2604_v11 = vmul.f32 %v9709_v48, %v2478_v17  ;;  %v2841_v12 = vmul.f32 %v9732_v33, %v2478_v17  ;;  %v2869_v24 = vmul.f32 %v9747_v47, %v2478_v17  ;;  %v10101_v43 = vpop.permute.xlu1 %3114  ;;  %v2463_v0 = vpop.permute.xlu0 %2462 }
 0x291   :  { %v2795_v16 = vsel %vm502_vm6, %v2793_v61, %v14600_v28  ;;  %v10099_v20 = vmul.f32 %v9749_v40, %v2478_v17  ;;  %v2567_v63 = vmul.f32 %v14590_v15, %v9896_v25  ;;  %v2740_v28 = vrot.slane %v2731_v6, 7 }
 0x292   :  { %v2595_v62 = vadd.f32 %v2591_v55, %v2543_v18  ;;  %v2608_v7 = vadd.f32 %v2604_v11, %v2569_v39  ;;  %v2849_v35 = vrot.slane %v2841_v12, 7  ;;  %v2877_v29 = vrot.slane %v2869_v24, 7  ;;  %3881 = vrot.lane.b32.xlu1 %v9364_v51, %s6232_s19 }
 0x293   :  { %v10108_v8 = vmul.f32 %v9977_v49, %v9896_v25  ;;  %v2805_v17 = vadd.f32 %v2795_v16, %v9847_v27  ;;  %v14602_v22 = vrot.slane %v14601_v57, 7  ;;  %v14603_v39 = vrot.slane %v9679_v30, 7  ;;  %3787 = vrot.lane.b32.xlu0 %v9939_v19, %s6226_s13 }
 0x294   :  { %v2545_v15 = vadd.f32 %v2541_v26, %v2493_v1  ;;  %v14604_v6 = vrot.slane %v9778_v42, 7  ;;  %v14605_v49 = vrot.slane %v9788_v4, 7  ;;  %v2999_v27 = vrot.slane %v10099_v20, 6  ;;  %v10127_v16 = vpop.permute.xlu1 %3118  ;;  %v10129_v24 = vpop.permute.xlu0 %3040 }
 0x295   :  { %v2636_v18 = vadd.f32 %v14602_v22, %v2595_v62  ;;  %v2692_v55 = vadd.f32 %v14603_v39, %v2608_v7  ;;  %v2796_v57 = vrot.slane %v10091_v5, 7  ;;  %v14606_v62 = vrot.slane %v10002_v59, 6  ;;  %v14608_v5 = vld [vmem:[#allocation54_spill] sm:$0xff] }
 0x296   :  { %v2851_v25 = vsel %vm502_vm6, %v2849_v35, %v14604_v6  ;;  %v2879_v11 = vsel %vm502_vm6, %v2877_v29, %v14605_v49  ;;  %v2571_v22 = vadd.f32 %v2567_v63, %v2519_v50  ;;  %v14607_v39 = vrot.slane %v14596_v31, 7  ;;  %3885 = vrot.lane.b32.xlu1 %v9379_v2, %s6232_s19 }
 0x297   :  { %v2748_v30 = vadd.f32 %v2737_v3, %v2636_v18  ;;  %v2804_v12 = vadd.f32 %v2793_v61, %v2692_v55  ;;  %v2861_v1 = vadd.f32 %v2851_v25, %v2749_v37  ;;  %v2889_v26 = vadd.f32 %v2879_v11, %v2805_v17  ;;  %v14611_v55 = vld [vmem:[#allocation24_spill] sm:$0xff]  ;;  %3807 = vrot.lane.b32.xlu0 %v9900_v36, %s6227_s14 }
 0x298   :  { %v2953_v7 = vsel %vm781_vm5, %v2951_v32, %v14606_v62  ;;  %v2741_v6 = vsel %vm502_vm6, %v14607_v39, %v2740_v28  ;;  %v2480_v20 = vsel %vm246_vm4, %v2476_v14, %v2463_v0  ;;  %v14609_v17 = vrot.slane %v14608_v5, 7  ;;  %v10149_v0 = vpop.permute.xlu1 %3126 }
 0x299   :  { %v2860_v3 = vadd.f32 %v2849_v35, %v2748_v30  ;;  %v2888_v61 = vadd.f32 %v2877_v29, %v2804_v12  ;;  %v2913_v37 = vadd.f32 %v2905_v23, %v2861_v1  ;;  %3023 = vst [vmem:[#allocation8 + $0x36] sm:$0xff] %v2889_v26  ;;  %v2593_v31 = vmul.f32 %v9707_v44, %v2480_v20 }
 0x29a   :  { %v2743_v18 = vsel %vm502_vm6, %v2740_v28, %v14609_v17  ;;  %v2606_v50 = vmul.f32 %v9709_v48, %v2480_v20  ;;  %v2843_v14 = vmul.f32 %v9732_v33, %v2480_v20  ;;  %v2871_v63 = vmul.f32 %v9747_v47, %v2480_v20  ;;  %v10159_v48 = vpop.permute.xlu0 %3044  ;;  %3893 = vrot.lane.b32.xlu1 %v9364_v51, %s6233_s20 }
 0x29b   :  { %v2912_v23 = vadd.f32 %v2903_v41, %v2860_v3  ;;  %v2961_v35 = vadd.f32 %v2953_v7, %v2913_v37  ;;  %v14610_v29 = vrot.slane %v9791_v13, 6  ;;  %3022 = vst [vmem:[#allocation8 + $0x2e] sm:$0xfc] %v2888_v61  ;;  %v14612_v25 = vrot.slane %v14611_v55, 7  ;;  %3811 = vrot.lane.b32.xlu0 %v9939_v19, %s6227_s14 }
 0x29c   :  { %v2597_v33 = vadd.f32 %v2593_v31, %v2545_v15  ;;  %v2610_v49 = vadd.f32 %v2606_v50, %v2571_v22  ;;  %v2852_v47 = vrot.slane %v2843_v14, 7  ;;  %v2880_v11 = vrot.slane %v2871_v63, 7  ;;  %v10175_v22 = vpop.permute.xlu1 %3130 }
 0x29d   :  { %v3001_v28 = vsel %vm781_vm5, %v2999_v27, %v14610_v29  ;;  %v2799_v44 = vsel %vm502_vm6, %v2796_v57, %v14612_v25  ;;  %v2960_v9 = vadd.f32 %v2951_v32, %v2912_v23  ;;  %v2751_v30 = vadd.f32 %v2743_v18, %v10008_v52  ;;  %v10219_v25 = vld [vmem:[#allocation2 + $0xc8] sm:$0xff] }
 0x29e   :  { %v3009_v41 = vadd.f32 %v3001_v28, %v2961_v35  ;;  %v14613_v12 = vrot.slane %v14585_v21, 7  ;;  %v2807_v26 = vadd.f32 %v2799_v44, %v10018_v54  ;;  %v2638_v15 = vadd.f32 %v10042_v56, %v2597_v33  ;;  %v10181_v54 = vpop.permute.xlu0 %3052  ;;  %3897 = vrot.lane.b32.xlu1 %v9379_v2, %s6233_s20 }
 0x29f   :  { %v2694_v62 = vadd.f32 %v10049_v38, %v2610_v49  ;;  %v14614_v7 = vrot.slane %v9878_v58, 7  ;;  %v3008_v52 = vadd.f32 %v2999_v27, %v2960_v9  ;;  %v2995_v3 = vmul.f32 %v9749_v40, %v2480_v20  ;;  %3819 = vrot.lane.b32.xlu0 %v9900_v36, %s6228_s15  ;;  %v14622_v49 = vld [vmem:[#allocation23_spill] sm:$0xff]  ;;  %v14623_v9 = vld [vmem:[#allocation58_spill] sm:$0xff] }
 0x2a0   :  { %v2797_v1 = vsel %vm502_vm6, %v14613_v12, %v2796_v57  ;;  %3013 = vst [vmem:[#allocation8 + $0x6] sm:$0xff] %v3009_v41  ;;  %v14615_v57 = vrot.slane %v9881_v60, 7  ;;  %v2750_v56 = vadd.f32 %v2741_v6, %v2638_v15  ;;  %v2954_v58 = vrot.slane %v10108_v8, 6  ;;  %v10196_v51 = vpop.permute.xlu1 %3138  ;;  %v14624_v41 = vld [vmem:[#allocation21_spill] sm:$0xff] }
 0x2a1   :  { %v2855_v32 = vsel %vm502_vm6, %v2852_v47, %v14614_v7  ;;  %v2806_v61 = vadd.f32 %v2797_v1, %v2694_v62  ;;  %3012 = vst [vmem:[#allocation8 - $0x2] sm:$0xfc] %v3008_v52  ;;  %v14616_v27 = vrot.slane %v9778_v42, 7  ;;  %v14617_v60 = vrot.slane %v9788_v4, 7  ;;  %v14625_v1 = vld [vmem:[#allocation20_spill] sm:$0xff]  ;;  %v14626_v62 = vld [vmem:[#allocation19_spill] sm:$0xff] }
 0x2a2   :  { %v2863_v21 = vadd.f32 %v2855_v32, %v2751_v30  ;;  %v2883_v39 = vsel %vm502_vm6, %v2880_v11, %v14615_v57  ;;  %v14618_v40 = vrot.slane %v10026_v53, 6  ;;  %v14620_v42 = vrot.slane %v9996_v10, 6  ;;  %v10203_v50 = vpop.permute.xlu0 %3056  ;;  %4456 = vrot.lane.b32.xlu1 %v10219_v25, %s6223_s10  ;;  %v10261_v32 = vld [vmem:[#allocation6 + $0x1] ss:$0 sm:$0xff]  ;;  %v10267_v57 = vld [vmem:[#allocation6 + $0xb] ss:$0 sm:$0xff] }
 0x2a3   :  { %v2891_v38 = vadd.f32 %v2883_v39, %v2807_v26  ;;  %v2853_v37 = vsel %vm502_vm6, %v14616_v27, %v2852_v47  ;;  %v2881_v5 = vsel %vm502_vm6, %v14617_v60, %v2880_v11  ;;  %v3002_v31 = vrot.slane %v2995_v3, 6  ;;  %3823 = vrot.lane.b32.xlu0 %v9939_v19, %s6228_s15  ;;  %v14628_v39 = vld [vmem:[#allocation36_spill] sm:$0xff] }
 0x2a4   :  { %v2915_v20 = vadd.f32 %v14618_v40, %v2863_v21  ;;  %v2862_v6 = vadd.f32 %v2853_v37, %v2750_v56  ;;  %v2890_v17 = vadd.f32 %v2881_v5, %v2806_v61  ;;  %v14619_v8 = vmov %v14618_v40  ;;  %v10212_v53 = vpop.permute.xlu1 %3142  ;;  %v10265_v21 = vld [vmem:[#allocation6 + $0x6] ss:$0 sm:$0xff]  ;;  %v10302_v40 = vld [vmem:[#allocation6] ss:$0 sm:$0xff] }
 0x2a5   :  { %3025 = vst [vmem:[#allocation8 + $0x46] sm:$0x3] %v2891_v38  ;;  %v2907_v18 = vsel %vm781_vm5, %v14620_v42, %v14619_v8  ;;  %v14621_v63 = vrot.slane %v10002_v59, 6  ;;  %v3003_v28 = vsel %vm781_vm5, %v14610_v29, %v3002_v31  ;;  %v10225_v59 = vld [vmem:[#allocation2 + $0xd8] sm:$0xff]  ;;  %v3091_v47 = vsel %vm236_vm2, %v14622_v49, %v9843_v34  ;;  %v10255_v34 = vld [vmem:[#allocation6 + $0x15] ss:$0 sm:$0xff] }
 0x2a6   :  { %v2963_v4 = vadd.f32 %v2954_v58, %v2915_v20  ;;  %v2914_v14 = vadd.f32 %v2907_v18, %v2862_v6  ;;  %3024 = vst [vmem:[#allocation8 + $0x3e] sm:$0xff] %v2890_v17  ;;  %v10217_v55 = vpop.permute.xlu0 %3064  ;;  %4460 = vrot.lane.b32.xlu1 %v10225_v59, %s6223_s10  ;;  %v3089_v30 = vsel %vm236_vm2, %v14624_v41, %v14623_v9  ;;  %v14632_v17 = vld [vmem:[#allocation16_spill] sm:$0xff]  ;;  %v10323_v18 = vld [vmem:[#allocation6 + $0x3] ss:$0 sm:$0xff] }
 0x2a7   :  { %v2955_v23 = vsel %vm781_vm5, %v14621_v63, %v2954_v58  ;;  %3831 = vrot.lane.b32.xlu0 %v9900_v36, %s6229_s16  ;;  %v3093_v12 = vsel %vm241_vm3, %v3089_v30, %v9886_v46  ;;  %v3095_v26 = vsel %vm241_vm3, %v3091_v47, %v14625_v1  ;;  %v10269_v46 = vld [vmem:[#allocation6 + $0x10] ss:$0 sm:$0xff]  ;;  %v3151_v38 = vsel %vm236_vm2, %v10068_v45, %v10127_v16  ;;  %v10338_v63 = vld [vmem:[#allocation6 + $0x5] ss:$0 sm:$0xff]  ;;  %v10353_v49 = vld [vmem:[#allocation6 + $0xd] ss:$0 sm:$0xff] }
 0x2a8   :  { %v3011_v35 = vadd.f32 %v3002_v31, %v2963_v4  ;;  %v2962_v10 = vadd.f32 %v2955_v23, %v2914_v14  ;;  %v10227_v44 = vpop.permute.xlu1 %3162  ;;  %v10259_v7 = vsel %vm246_vm4, %v3093_v12, %v14626_v62  ;;  %v10275_v3 = vsel %vm246_vm4, %v3095_v26, %v14628_v39  ;;  %14633 = vst [vmem:[#allocation47_spill] sm:$0xff] %v10323_v18  ;;  %v10331_v31 = vld [vmem:[%s13506_s2] ss:$0 sm:$0xff]  ;;  %v10340_v23 = vld [vmem:[#allocation6 + $0xa] ss:$0 sm:$0xff]  ;;  %s6234_s2 = smov [#allocation8]  }
 0x2a9   :  { %14627 = vst [vmem:[#allocation30_spill] sm:$0xff] %v10259_v7  ;;  %v10281_v56 = vmul.f32 %v10255_v34, %v10259_v7  ;;  %v3227_v61 = vmul.f32 %v10261_v32, %v10259_v7  ;;  %v3253_v27 = vmul.f32 %v10265_v21, %v10259_v7  ;;  %v10294_v37 = vmul.f32 %v10267_v57, %v10259_v7  ;;  %v10360_v12 = vld [vmem:[#allocation6 + $0x12] ss:$0 sm:$0xff]  ;;  %s5884_s27 = sshll.u32 %s6234_s2, 4  ;;  %s5885_s27 = int_to_ptr.vmem [resolvable:$true] %s5884_s27 }
 0x2aa   :  { %3015 = vst [vmem:[#allocation8 + $0x16] sm:$0x3] %v3011_v35  ;;  %v3010_v2 = vadd.f32 %v3003_v28, %v2962_v10  ;;  %v10229_v13 = vpop.permute.xlu0 %3068  ;;  %4468 = vrot.lane.b32.xlu1 %v10219_v25, %s6224_s11  ;;  %v10298_v60 = vmul.f32 %v10269_v46, %v10259_v7  ;;  %v3229_v45 = vmul.f32 %v10261_v32, %v10275_v3  ;;  %14635 = vst [vmem:[#allocation51_spill] sm:$0xff] %v10353_v49  ;;  %s6189_s28 = scalar_lea.vmem %s5885_s27, 3072  ;;  %p6194_p3 = scmp.lt.s32.totalorder %s5885_s27, %s5885_s27 }
 0x2ab   :  { %3835 = vrot.lane.b32.xlu0 %v9939_v19, %s6229_s16  ;;  %v3255_v16 = vmul.f32 %v10265_v21, %v10275_v3  ;;  %v10310_v20 = vmul.f32 %v10267_v57, %v10275_v3  ;;  %v10316_v6 = vmul.f32 %v10269_v46, %v10275_v3  ;;  %v3149_v8 = vsel %vm236_vm2, %v14632_v17, %v10101_v43  ;;  %v10397_v17 = vld [vmem:[#allocation6 + $0xc] ss:$0 sm:$0xff]  ;;  %p6190_p2 = scmp.ne.s32.totalorder %s5885_s27, %s6189_s28  ;;  %p6195_p4 = scmp.lt.s32.totalorder %s6189_s28, %s6189_s28 }
 0x2ac   :  { %3014 = vst [vmem:[#allocation8 + $0xe] sm:$0xff] %v3010_v2  ;;  %v10235_v33 = vpop.permute.xlu1 %3166  ;;  %v3155_v42 = vsel %vm241_vm3, %v3151_v38, %v10175_v22  ;;  %v3231_v14 = vadd.f32 %v10331_v31, %v3227_v61  ;;  %v3153_v43 = vsel %vm241_vm3, %v3149_v8, %v10149_v0  ;;  %v3214_v22 = vmul.f32 %v10302_v40, %v10259_v7  ;;  %v10351_v0 = vld [vmem:[#allocation6 + $0x8] ss:$0 sm:$0xff]  ;;  %v10376_v61 = vld [vmem:[#allocation6 + $0x2] ss:$0 sm:$0xff] }
 0x2ad   :  { %14630 = vst [vmem:[#allocation37_spill] sm:$0xff] %v10310_v20  ;;  %14631 = vst [vmem:[#allocation25_spill] sm:$0xff] %v10316_v6  ;;  %v3257_v10 = vadd.f32 %v10331_v31, %v3253_v27  ;;  %v10349_v2 = vsel %vm246_vm4, %v3153_v43, %v10196_v51  ;;  %v3233_v9 = vadd.f32 %v10331_v31, %v3229_v45  ;;  %v10366_v51 = vld [vmem:[#allocation6 + $0xf] ss:$0 sm:$0xff]  ;;  %v10393_v45 = vld [vmem:[#allocation6 + $0x7] ss:$0 sm:$0xff]  ;;  %p6196_p5 = por %p6195_p4, %p6194_p3 }
 0x2ae   :  { %v10240_v11 = vpop.permute.xlu0 %3076  ;;  %4472 = vrot.lane.b32.xlu1 %v10225_v59, %s6224_s11  ;;  %14634 = vst [vmem:[#allocation38_spill] sm:$0xff] %v10351_v0  ;;  %v3259_v41 = vadd.f32 %v10331_v31, %v3255_v16  ;;  %14637 = vst [vmem:[#allocation26_spill] sm:$0xff] %v10360_v12  ;;  %v10364_v1 = vsel %vm246_vm4, %v3155_v42, %v10212_v53  ;;  %v3088_v62 = vsel %vm236_vm2, %v10129_v24, %v10181_v54  ;;  %v10399_v8 = vld [vmem:[#allocation6 + $0x11] ss:$0 sm:$0xff] }
 0x2af   :  { %3843 = vrot.lane.b32.xlu0 %v9900_v36, %s6230_s17  ;;  %v3240_v39 = vmul.f32 %v10338_v63, %v10259_v7  ;;  %14638 = vst [vmem:[#allocation17_spill] sm:$0xff] %v10376_v61  ;;  %v10380_v53 = vmul.f32 %v10340_v23, %v10259_v7  ;;  %v3279_v38 = vmul.f32 %v10323_v18, %v10349_v2  ;;  %14640 = vst [vmem:[#allocation33_spill] sm:$0xff] %v10393_v45  ;;  %p6197_p6 = pnand %p6196_p5, %p6190_p2 }
 0x2b0   :  { %v10253_v15 = vpop.permute.xlu1 %3174  ;;  %v3305_v27 = vmul.f32 %v10351_v0, %v10349_v2  ;;  %v10390_v24 = vmul.f32 %v10353_v49, %v10349_v2  ;;  %v3218_v54 = vadd.f32 %v10331_v31, %v3214_v22  ;;  %14642 = vst [vmem:[#allocation13_spill] sm:$0xff] %v10397_v17  ;;  %14643 = vst [vmem:[#allocation46_spill] sm:$0xff] %v10399_v8 }
 0x2b1   :  { %v10403_v42 = vmul.f32 %v10360_v12, %v10349_v2  ;;  %v3281_v43 = vmul.f32 %v10323_v18, %v10364_v1  ;;  %v3307_v26 = vmul.f32 %v10351_v0, %v10364_v1  ;;  %v10411_v22 = vmul.f32 %v10366_v51, %v10259_v7 }
 0x2b2   :  { %v10263_v52 = vpop.permute.xlu0 %3080  ;;  %4480 = vrot.lane.b32.xlu1 %v10219_v25, %s6225_s12  ;;  %14639 = vst [vmem:[#allocation55_spill] sm:$0xff] %v10390_v24  ;;  %v10417_v4 = vmul.f32 %v10397_v17, %v10364_v1  ;;  %v10421_v28 = vmul.f32 %v10353_v49, %v10364_v1  ;;  %v10425_v29 = vmul.f32 %v10399_v8, %v10364_v1 }
 0x2b3   :  { %3847 = vrot.lane.b32.xlu0 %v9939_v19, %s6230_s17  ;;  %14644 = vst [vmem:[#allocation27_spill] sm:$0xff] %v10403_v42  ;;  %v3266_v0 = vmul.f32 %v10376_v61, %v10349_v2  ;;  %v3090_v7 = vsel %vm236_vm2, %v10159_v48, %v10203_v50  ;;  %v10436_v18 = vmul.f32 %v10360_v12, %v10364_v1 }
 0x2b4   :  { %v10288_v58 = vpop.permute.xlu1 %3178  ;;  %14646 = vst [vmem:[#allocation32_spill] sm:$0xff] %v10417_v4  ;;  %14647 = vst [vmem:[#allocation43_spill] sm:$0xff] %v10421_v28  ;;  %v3244_v49 = vadd.f32 %v10331_v31, %v3240_v39  ;;  %v10443_v6 = vadd.f32 %v3279_v38, %v3231_v14  ;;  %v3092_v48 = vsel %vm241_vm3, %v3088_v62, %v10217_v55  ;;  %v6130_v38 = vld [vmem:[#allocation2 + $0x98] sm:$0xff] }
 0x2b5   :  { %14648 = vst [vmem:[#allocation28_spill] sm:$0xff] %v10425_v29  ;;  %14649 = vst [vmem:[#allocation15_spill] sm:$0xff] %v10436_v18  ;;  %v10453_v39 = vadd.f32 %v3281_v43, %v3233_v9  ;;  %v10459_v20 = vsel %vm246_vm4, %v3092_v48, %v10240_v11  ;;  %v10466_v62 = vadd.f32 %v3266_v0, %v3218_v54  ;;  %v10479_v43 = vld [vmem:[#allocation6 + $0x17] ss:$0 sm:$0xff] }
 0x2b6   :  { %v10300_v5 = vpop.permute.xlu0 %3100  ;;  %4484 = vrot.lane.b32.xlu1 %v10225_v59, %s6225_s12  ;;  %14650 = vst [vmem:[#allocation53_spill] sm:$0xff] %v10479_v43  ;;  %v10483_v0 = vmul.f32 %v10267_v57, %v10459_v20  ;;  %v3216_v48 = vmul.f32 %v10302_v40, %v10275_v3  ;;  %v10511_v9 = vmul.f32 %v10393_v45, %v10364_v1 }
 0x2b7   :  { %14629 = vst [vmem:[#allocation42_spill] sm:$0xff] %v10300_v5  ;;  %3867 = vrot.lane.b32.xlu0 %v9900_v36, %s6231_s18  ;;  %v10445_v5 = vadd.f32 %v3305_v27, %v3257_v10  ;;  %v10507_v10 = vmul.f32 %v10269_v46, %v10459_v20  ;;  %v3199_v12 = vsel %vm236_vm2, %v6130_v38, %v10235_v33 }
 0x2b8   :  { %v10342_v35 = vpop.permute.xlu1 %3186  ;;  %v3220_v38 = vadd.f32 %v10331_v31, %v3216_v48  ;;  %v3226_v4 = vmul.f32 %v10261_v32, %v10459_v20  ;;  %v3252_v18 = vmul.f32 %v10265_v21, %v10459_v20 }
 0x2b9   :  { %14652 = vst [vmem:[#allocation40_spill] sm:$0xff] %v10507_v10 }
 0x2ba   :  { %v10355_v47 = vpop.permute.xlu0 %3104  ;;  %4492 = vrot.lane.b32.xlu1 %v10219_v25, %s6226_s13 }
 0x2bb   :  { %14636 = vst [vmem:[#allocation41_spill] sm:$0xff] %v10355_v47  ;;  %v3292_v47 = vmul.f32 %v10393_v45, %v10349_v2  ;;  %3871 = vrot.lane.b32.xlu0 %v9939_v19, %s6231_s18 }
 0x2bc   :  { %v10395_v16 = vpop.permute.xlu1 %3190 }
 0x2bd   :  { %14641 = vst [vmem:[#allocation12_spill] sm:$0xff] %v10395_v16  ;;  %v10455_v16 = vadd.f32 %v3307_v26, %v3259_v41  ;;  %v6129_v41 = vld [vmem:[#allocation2 + $0x88] sm:$0xff]  ;;  %v3094_v26 = vsel %vm241_vm3, %v3090_v7, %v10229_v13  ;;  %v10475_v27 = vadd.f32 %v3292_v47, %v3244_v49  ;;  %v3268_v47 = vmul.f32 %v10376_v61, %v10364_v1 }
 0x2be   :  { %v10413_v30 = vpop.permute.xlu0 %3112  ;;  %4496 = vrot.lane.b32.xlu1 %v10225_v59, %s6226_s13  ;;  %v3197_v11 = vsel %vm236_vm2, %v6129_v41, %v10227_v44  ;;  %v3242_v44 = vmul.f32 %v10338_v63, %v10275_v3  ;;  %v10494_v7 = vsel %vm246_vm4, %v3094_v26, %v10263_v52  ;;  %v10501_v41 = vmul.f32 %v10340_v23, %v10275_v3 }
 0x2bf   :  { %14645 = vst [vmem:[#allocation18_spill] sm:$0xff] %v10413_v30  ;;  %3879 = vrot.lane.b32.xlu0 %v9900_v36, %s6232_s19  ;;  %v10515_v52 = vmul.f32 %v10366_v51, %v10275_v3  ;;  %v10521_v26 = vmul.f32 %v10479_v43, %v10349_v2  ;;  %v10527_v30 = vmul.f32 %v10255_v34, %v10459_v20  ;;  %v14657_v49 = vrot.slane %v10294_v37, 7  ;;  %v10670_v43 = vld [vmem:[#allocation2 + $0xc0] sm:$0xff] }
 0x2c0   :  { %v10450_v50 = vpop.permute.xlu1 %3749  ;;  %v10531_v1 = vmul.f32 %v10340_v23, %v10459_v20  ;;  %v10537_v3 = vmul.f32 %v10397_v17, %v10349_v2  ;;  %v10542_v33 = vmul.f32 %v10267_v57, %v10494_v7  ;;  %v3246_v54 = vadd.f32 %v10331_v31, %v3242_v44 }
 0x2c1   :  { %14653 = vst [vmem:[#allocation56_spill] sm:$0xff] %v10521_v26  ;;  %14654 = vst [vmem:[#allocation35_spill] sm:$0xff] %v10527_v30  ;;  %v10557_v57 = vmul.f32 %v10399_v8, %v10349_v2  ;;  %v10562_v44 = vmul.f32 %v10366_v51, %v10459_v20  ;;  %v10571_v45 = vmul.f32 %v10269_v46, %v10494_v7  ;;  %v14658_v61 = vrot.slane %v10483_v0, 7  ;;  %v10609_v26 = vld [vmem:[#allocation6 + $0x4] ss:$0 sm:$0xff] }
 0x2c2   :  { %v10461_v14 = vpop.permute.xlu0 %3116  ;;  %4516 = vrot.lane.b32.xlu1 %v10219_v25, %s6227_s14  ;;  %14655 = vst [vmem:[#allocation48_spill] sm:$0xff] %v10531_v1  ;;  %v10574_v48 = vadd.f32 %v3268_v47, %v3220_v38  ;;  %v3228_v17 = vmul.f32 %v10261_v32, %v10494_v7  ;;  %v3254_v46 = vmul.f32 %v10265_v21, %v10494_v7  ;;  %v3382_v28 = vrot.slane %v10542_v33, 7 }
 0x2c3   :  { %3883 = vrot.lane.b32.xlu0 %v9939_v19, %s6232_s19  ;;  %14656 = vst [vmem:[#allocation34_spill] sm:$0xff] %v10562_v44  ;;  %v3381_v24 = vsel %vm502_vm6, %v14658_v61, %v14657_v49  ;;  %v10591_v47 = vadd.f32 %v10331_v31, %v3226_v4  ;;  %v3201_v38 = vsel %vm241_vm3, %v3197_v11, %v10253_v15  ;;  %v14659_v21 = vrot.slane %v10298_v60, 7 }
 0x2c4   :  { %v10490_v13 = vpop.permute.xlu1 %3753  ;;  %v10600_v61 = vmul.f32 %v10340_v23, %v10494_v7  ;;  %v14660_v49 = vrot.slane %v10507_v10, 7  ;;  %v3203_v4 = vsel %vm241_vm3, %v3199_v12, %v10288_v58  ;;  %14661 = vst [vmem:[#allocation45_spill] sm:$0xff] %v10609_v26  ;;  %v3205_v15 = vsel %vm246_vm4, %v3201_v38, %v10342_v35 }
 0x2c5   :  { %14651 = vst [vmem:[#allocation22_spill] sm:$0xff] %v10490_v13  ;;  %v10619_v11 = vadd.f32 %v3381_v24, %v10443_v6  ;;  %v3438_v12 = vrot.slane %v10571_v45, 7  ;;  %v10631_v35 = vmul.f32 %v10366_v51, %v10494_v7  ;;  %v10636_v38 = vadd.f32 %v10331_v31, %v3228_v17  ;;  %v10641_v24 = vld [vmem:[#allocation6 + $0xe] ss:$0 sm:$0xff]  ;;  %v14672_v51 = vld [vmem:[#allocation37_spill] sm:$0xff] }
 0x2c6   :  { %v10503_v55 = vpop.permute.xlu0 %3124  ;;  %4520 = vrot.lane.b32.xlu1 %v10225_v59, %s6227_s14  ;;  %v3437_v33 = vsel %vm502_vm6, %v14660_v49, %v14659_v21  ;;  %v14664_v21 = vrot.slane %v10281_v56, 6  ;;  %v14665_v49 = vrot.slane %v10527_v30, 6  ;;  %v10639_v6 = vadd.f32 %v10331_v31, %v3254_v46  ;;  %14668 = vst [vmem:[#allocation50_spill] sm:$0xff] %v10641_v24  ;;  %v10653_v30 = vld [vmem:[#allocation6 + $0x13] ss:$0 sm:$0xff] }
 0x2c7   :  { %3891 = vrot.lane.b32.xlu0 %v9900_v36, %s6233_s20  ;;  %v10594_v36 = vadd.f32 %v10331_v31, %v3252_v18  ;;  %v10611_v18 = vld [vmem:[#allocation6 + $0x9] ss:$0 sm:$0xff]  ;;  %14663 = vst [vmem:[#allocation49_spill] sm:$0xff] %v10619_v11  ;;  %v10655_v17 = vld [vmem:[#allocation6 + $0x18] ss:$0 sm:$0xff]  ;;  %v3318_v46 = vmul.f32 %v10609_v26, %v3205_v15  ;;  %v10673_v13 = vadd.f32 %v3437_v33, %v10445_v5 }
 0x2c8   :  { %v10546_v29 = vpop.permute.xlu1 %3761  ;;  %14662 = vst [vmem:[#allocation44_spill] sm:$0xff] %v10611_v18  ;;  %v10626_v58 = vsel %vm781_vm5, %v14665_v49, %v14664_v21  ;;  %14667 = vst [vmem:[#allocation52_spill] sm:$0xff] %v10639_v6  ;;  %v14669_v21 = vrot.slane %v10380_v53, 7  ;;  %v14670_v49 = vrot.slane %v10531_v1, 7  ;;  %v3331_v11 = vmul.f32 %v10611_v18, %v3205_v15  ;;  %v14675_v6 = vld [vmem:[#allocation12_spill] sm:$0xff] }
 0x2c9   :  { %14666 = vst [vmem:[#allocation39_spill] sm:$0xff] %v10626_v58  ;;  %v14673_v58 = vrot.slane %v14672_v51, 7  ;;  %14674 = vst [vmem:[#allocation57_spill] sm:$0xff] %v10655_v17  ;;  %v3207_v10 = vsel %vm246_vm4, %v3203_v4, %v14675_v6  ;;  %v14677_v51 = vrot.slane %v10562_v44, 7  ;;  %v10677_v4 = vmul.f32 %v10255_v34, %v10494_v7 }
 0x2ca   :  { %v10553_v42 = vpop.permute.xlu0 %3128  ;;  %4528 = vrot.lane.b32.xlu1 %v10219_v25, %s6228_s15  ;;  %v3353_v45 = vsel %vm502_vm6, %v14670_v49, %v14669_v21  ;;  %v14676_v49 = vrot.slane %v10411_v22, 7  ;;  %v10680_v6 = vmul.f32 %v10641_v24, %v3205_v15  ;;  %v10696_v34 = vmul.f32 %v10653_v30, %v3205_v15 }
 0x2cb   :  { %3895 = vrot.lane.b32.xlu0 %v9939_v19, %s6233_s20  ;;  %v3385_v19 = vsel %vm502_vm6, %v3382_v28, %v14673_v58  ;;  %v10699_v5 = vmul.f32 %v10655_v17, %v3205_v15  ;;  %v3320_v33 = vmul.f32 %v10609_v26, %v3207_v10  ;;  %v14683_v1 = vrot.slane %v10501_v41, 7 }
 0x2cc   :  { %v10588_v8 = vpop.permute.xlu1 %3765  ;;  %v3409_v58 = vsel %vm502_vm6, %v14677_v51, %v14676_v49  ;;  %v14678_v49 = vrot.slane %v10294_v37, 7  ;;  %14681 = vst [vmem:[#allocation31_spill] sm:$0xff] %v10696_v34  ;;  %v14684_v44 = vrot.slane %v10600_v61, 7  ;;  %v10718_v26 = vmul.f32 %v10641_v24, %v3207_v10 }
 0x2cd   :  { %14682 = vst [vmem:[#allocation54_spill] sm:$0xff] %v10699_v5 }
 0x2ce   :  { %v3137_v32 = vpop.permute.xlu0 %3136  ;;  %4532 = vrot.lane.b32.xlu1 %v10225_v59, %s6228_s15  ;;  %v3357_v15 = vsel %vm502_vm6, %v14684_v44, %v14683_v1  ;;  %14685 = vst [vmem:[#allocation24_spill] sm:$0xff] %v10718_v26  ;;  %v13768_v1 = vrot.slane %v10677_v4, 6 }
 0x2cf   :  { %4454 = vrot.lane.b32.xlu0 %v10670_v43, %s6223_s10 }
 0x2d0   :  { %v10648_v23 = vpop.permute.xlu1 %3773 }
 0x2d1   :  { %14671 = vst [vmem:[#allocation29_spill] sm:$0xff] %v10648_v23  ;;  %v3298_v23 = vadd.f32 %v10511_v9, %v3246_v54  ;;  %v10686_v9 = vsel %vm502_vm6, %v14678_v49, %v3382_v28  ;;  %v14679_v54 = vrot.slane %v10298_v60, 7  ;;  %v10705_v28 = vadd.f32 %v3385_v19, %v10453_v39  ;;  %v14687_v39 = vld [vmem:[#allocation42_spill] sm:$0xff] }
 0x2d2   :  { %v3141_v21 = vpop.permute.xlu0 %3140  ;;  %v3322_v60 = vadd.f32 %v3318_v46, %v10466_v62  ;;  %v3335_v49 = vadd.f32 %v3331_v11, %v10475_v27  ;;  %4540 = vrot.lane.b32.xlu1 %v10219_v25, %s6229_s16  ;;  %v10725_v62 = vld [vmem:[#allocation2 + $0xd0] sm:$0xff]  ;;  %v14690_v46 = vrot.slane %v10515_v52, 7 }
 0x2d3   :  { %v10691_v51 = vsel %vm502_vm6, %v14679_v54, %v3438_v12  ;;  %v3333_v54 = vmul.f32 %v10611_v18, %v3207_v10  ;;  %v14688_v27 = vld [vmem:[#allocation25_spill] sm:$0xff]  ;;  %v14691_v18 = vrot.slane %v10631_v35, 7  ;;  %4458 = vrot.lane.b32.xlu0 %v10725_v62, %s6223_s10 }
 0x2d4   :  { %14680 = vst [vmem:[#allocation14_spill] sm:$0xff] %v10691_v51  ;;  %v10702_v37 = vpop.permute.xlu1 %3777  ;;  %v14686_v51 = vld [vmem:[#allocation18_spill] sm:$0xff]  ;;  %v14689_v41 = vrot.slane %v14688_v27, 7 }
 0x2d5   :  { %v3148_v19 = vsel %vm236_vm2, %v14687_v39, %v14686_v51  ;;  %v3413_v24 = vsel %vm502_vm6, %v14691_v18, %v14690_v46  ;;  %v10738_v51 = vmul.f32 %v10653_v30, %v3207_v10  ;;  %v10752_v18 = vadd.f32 %v3353_v45, %v3322_v60 }
 0x2d6   :  { %v10715_v17 = vpop.permute.xlu0 %3160  ;;  %v3441_v11 = vsel %vm502_vm6, %v3438_v12, %v14689_v41  ;;  %v3152_v39 = vsel %vm241_vm3, %v3148_v19, %v10503_v55  ;;  %v3324_v41 = vadd.f32 %v3320_v33, %v10574_v48  ;;  %v10754_v10 = vadd.f32 %v3409_v58, %v3335_v49  ;;  %4544 = vrot.lane.b32.xlu1 %v10225_v59, %s6229_s16  ;;  %v14695_v33 = vld [vmem:[#allocation41_spill] sm:$0xff]  ;;  %v14696_v49 = vld [vmem:[#allocation47_spill] sm:$0xff] }
 0x2d7   :  { %14692 = vst [vmem:[#allocation23_spill] sm:$0xff] %v10738_v51  ;;  %v10748_v52 = vsel %vm246_vm4, %v3152_v39, %v3137_v32  ;;  %v3337_v46 = vadd.f32 %v3333_v54, %v3298_v23  ;;  %v10759_v19 = vadd.f32 %v3441_v11, %v10455_v16  ;;  %v14694_v48 = vrot.slane %v10281_v56, 6  ;;  %v6018_v16 = vld [vmem:[#allocation6 + $0x14] ss:$0 sm:$0xff]  ;;  %4466 = vrot.lane.b32.xlu0 %v10670_v43, %s6224_s11  ;;  %v10786_v11 = vld [vmem:[#allocation6 + $0x16] ss:$0 sm:$0xff] }
 0x2d8   :  { %v10750_v44 = vpop.permute.xlu1 %3785  ;;  %14693 = vst [vmem:[#allocation58_spill] sm:$0xff] %v10754_v10  ;;  %v3213_v23 = vmul.f32 %v10302_v40, %v10459_v20  ;;  %v3239_v45 = vmul.f32 %v10338_v63, %v10459_v20  ;;  %v3150_v60 = vsel %vm236_vm2, %v14695_v33, %v10461_v14  ;;  %v3278_v54 = vmul.f32 %v14696_v49, %v10748_v52 }
 0x2d9   :  { %v10769_v32 = vsel %vm781_vm5, %v14694_v48, %v13768_v1  ;;  %v10784_v56 = vmul.f32 %v6018_v16, %v10459_v20  ;;  %v10788_v39 = vadd.f32 %v3357_v15, %v3324_v41  ;;  %v3154_v48 = vsel %vm241_vm3, %v3150_v60, %v10553_v42  ;;  %v14700_v1 = vld [vmem:[#allocation30_spill] sm:$0xff]  ;;  %v14702_v41 = vld [vmem:[#allocation51_spill] sm:$0xff] }
 0x2da   :  { %v10756_v55 = vpop.permute.xlu0 %3164  ;;  %v10796_v27 = vadd.f32 %v3413_v24, %v3337_v46  ;;  %v10799_v12 = vsel %vm246_vm4, %v3154_v48, %v3141_v21  ;;  %v3624_v51 = vmul.f32 %v6018_v16, %v14700_v1  ;;  %v10803_v15 = vmul.f32 %v6018_v16, %v10494_v7  ;;  %4552 = vrot.lane.b32.xlu1 %v10219_v25, %s6230_s17  ;;  %v14704_v46 = vld [vmem:[#allocation38_spill] sm:$0xff] }
 0x2db   :  { %14697 = vst [vmem:[#allocation21_spill] sm:$0xff] %v10784_v56  ;;  %14698 = vst [vmem:[#allocation20_spill] sm:$0xff] %v10788_v39  ;;  %v3483_v42 = vmul.f32 %v14702_v41, %v10748_v52  ;;  %v10811_v60 = vmul.f32 %v10786_v11, %v10349_v2  ;;  %v3215_v24 = vmul.f32 %v10302_v40, %v10494_v7  ;;  %4470 = vrot.lane.b32.xlu0 %v10725_v62, %s6224_s11  ;;  %v14705_v2 = vld [vmem:[#allocation26_spill] sm:$0xff] }
 0x2dc   :  { %v10792_v58 = vpop.permute.xlu1 %3789  ;;  %14699 = vst [vmem:[#allocation19_spill] sm:$0xff] %v10796_v27  ;;  %14701 = vst [vmem:[#allocation36_spill] sm:$0xff] %v10803_v15  ;;  %v3241_v21 = vmul.f32 %v10338_v63, %v10494_v7  ;;  %v3282_v1 = vadd.f32 %v3278_v54, %v10591_v47  ;;  %v3304_v16 = vmul.f32 %v14704_v46, %v10748_v52  ;;  %v14707_v7 = vrot.slane %v10600_v61, 7 }
 0x2dd   :  { %14703 = vst [vmem:[#allocation16_spill] sm:$0xff] %v10811_v60  ;;  %v3217_v48 = vadd.f32 %v10331_v31, %v3213_v23  ;;  %v3539_v14 = vmul.f32 %v14705_v2, %v10748_v52  ;;  %v3280_v40 = vmul.f32 %v14696_v49, %v10799_v12  ;;  %v10831_v63 = vadd.f32 %v10331_v31, %v3239_v45 }
 0x2de   :  { %v3173_v20 = vpop.permute.xlu0 %3172  ;;  %v14708_v47 = vrot.slane %v10380_v53, 7  ;;  %v3485_v23 = vmul.f32 %v14702_v41, %v10799_v12  ;;  %v3630_v5 = vrot.slane %v3624_v51, 6  ;;  %v14709_v49 = vrot.slane %v10631_v35, 7  ;;  %4556 = vrot.lane.b32.xlu1 %v10225_v59, %s6230_s17 }
 0x2df   :  { %v13774_v61 = vrot.slane %v10803_v15, 6  ;;  %v3491_v34 = vrot.slane %v3483_v42, 7  ;;  %v10856_v41 = vadd.f32 %v10331_v31, %v3215_v24  ;;  %v10859_v51 = vadd.f32 %v10331_v31, %v3241_v21  ;;  %4478 = vrot.lane.b32.xlu0 %v10670_v43, %s6225_s12  ;;  %v14726_v15 = vld [vmem:[#allocation52_spill] sm:$0xff] }
 0x2e0   :  { %v10828_v27 = vpop.permute.xlu1 %3809  ;;  %v10838_v54 = vsel %vm502_vm6, %v14708_v47, %v14707_v7  ;;  %v3308_v35 = vadd.f32 %v3304_v16, %v10594_v36  ;;  %v3306_v7 = vmul.f32 %v14704_v46, %v10799_v12  ;;  %v14713_v42 = vrot.slane %v10784_v56, 6  ;;  %v14727_v56 = vld [vmem:[#allocation27_spill] sm:$0xff] }
 0x2e1   :  { %14706 = vst [vmem:[#allocation37_spill] sm:$0xff] %v10828_v27  ;;  %v14710_v27 = vrot.slane %v10411_v22, 7  ;;  %v14712_v22 = vrot.slane %v10483_v0, 7  ;;  %v3796_v31 = vsel %vm236_vm2, %v10450_v50, %v10546_v29  ;;  %v3547_v24 = vrot.slane %v3539_v14, 7  ;;  %v14719_v50 = vld [vmem:[#allocation55_spill] sm:$0xff] }
 0x2e2   :  { %v10842_v33 = vpop.permute.xlu0 %3176  ;;  %v10871_v47 = vsel %vm781_vm5, %v14713_v42, %v3630_v5  ;;  %v3284_v36 = vadd.f32 %v3280_v40, %v10636_v38  ;;  %v10879_v0 = vmul.f32 %v14705_v2, %v10799_v12  ;;  %v3494_v16 = vrot.slane %v3485_v23, 7  ;;  %v14721_v2 = vld [vmem:[#allocation17_spill] sm:$0xff]  ;;  %4576 = vrot.lane.b32.xlu1 %v10219_v25, %s6231_s18 }
 0x2e3   :  { %v10849_v45 = vsel %vm502_vm6, %v14710_v27, %v14709_v49  ;;  %v3390_v27 = vadd.f32 %v14712_v22, %v3282_v1  ;;  %14714 = vst [vmem:[#allocation18_spill] sm:$0xff] %v10871_v47  ;;  %v14716_v1 = vld [vmem:[#allocation22_spill] sm:$0xff]  ;;  %v14717_v49 = vld [vmem:[#allocation53_spill] sm:$0xff]  ;;  %v10893_v29 = vsel %vm781_vm5, %v3630_v5, %v13774_v61  ;;  %v14720_v38 = vrot.slane %v14719_v50, 7  ;;  %v14724_v5 = vld [vmem:[#allocation40_spill] sm:$0xff]  ;;  %4482 = vrot.lane.b32.xlu0 %v10725_v62, %s6225_s12 }
 0x2e4   :  { %14711 = vst [vmem:[#allocation12_spill] sm:$0xff] %v10849_v45  ;;  %v10881_v21 = vpop.permute.xlu1 %3813  ;;  %v3798_v46 = vsel %vm236_vm2, %v14716_v1, %v10588_v8  ;;  %v10888_v22 = vmul.f32 %v14717_v49, %v10748_v52  ;;  %14718 = vst [vmem:[#allocation25_spill] sm:$0xff] %v10893_v29  ;;  %v3265_v40 = vmul.f32 %v14721_v2, %v10748_v52  ;;  %v14722_v8 = vld [vmem:[#allocation33_spill] sm:$0xff]  ;;  %v14725_v61 = vrot.slane %v14724_v5, 7  ;;  %v6131_v45 = vld [vmem:[#allocation2 + $0x80] sm:$0xff] }
 0x2e5   :  { %14715 = vst [vmem:[#allocation42_spill] sm:$0xff] %v10881_v21  ;;  %v3493_v14 = vsel %vm502_vm6, %v3491_v34, %v14720_v38  ;;  %v10902_v23 = vmul.f32 %v14722_v8, %v10748_v52  ;;  %v14723_v1 = vld [vmem:[#allocation13_spill] sm:$0xff]  ;;  %v3502_v21 = vadd.f32 %v3491_v34, %v3390_v27  ;;  %v3310_v38 = vadd.f32 %v3306_v7, %v14726_v15 }
 0x2e6   :  { %v3185_v42 = vpop.permute.xlu0 %3184  ;;  %v10906_v53 = vmul.f32 %v14723_v1, %v10748_v52  ;;  %v3446_v29 = vadd.f32 %v14725_v61, %v3308_v35  ;;  %v3196_v10 = vsel %vm236_vm2, %v6131_v45, %v10715_v17  ;;  %v3392_v39 = vadd.f32 %v10686_v9, %v3284_v36  ;;  %v14729_v15 = vld [vmem:[#allocation49_spill] sm:$0xff]  ;;  %4580 = vrot.lane.b32.xlu1 %v10225_v59, %s6231_s18 }
 0x2e7   :  { %v14728_v60 = vrot.slane %v14727_v56, 7  ;;  %v13780_v47 = vrot.slane %v10879_v0, 7  ;;  %v3200_v61 = vsel %vm241_vm3, %v3196_v10, %v3173_v20  ;;  %v3503_v35 = vadd.f32 %v3493_v14, %v14729_v15  ;;  %v14730_v27 = vld [vmem:[#allocation29_spill] sm:$0xff]  ;;  %v14734_v20 = vld [vmem:[#allocation43_spill] sm:$0xff]  ;;  %4490 = vrot.lane.b32.xlu0 %v10670_v43, %s6226_s13 }
 0x2e8   :  { %v10923_v34 = vpop.permute.xlu1 %3821  ;;  %v3800_v17 = vsel %vm241_vm3, %v3796_v31, %v14730_v27  ;;  %v14731_v45 = vrot.slane %v14719_v50, 7  ;;  %v10932_v9 = vsel %vm246_vm4, %v3200_v61, %v3185_v42  ;;  %v14735_v5 = vrot.slane %v14734_v20, 7  ;;  %v14737_v42 = vld [vmem:[#allocation35_spill] sm:$0xff] }
 0x2e9   :  { %v3549_v26 = vsel %vm502_vm6, %v3547_v24, %v14728_v60  ;;  %v10934_v60 = vld [vmem:[#allocation6 + $0x2e] ss:$0 sm:$0xff]  ;;  %v10938_v10 = vsel %vm246_vm4, %v3800_v17, %v10750_v44  ;;  %v3269_v15 = vadd.f32 %v3265_v40, %v3217_v48  ;;  %v10946_v50 = vadd.f32 %v3547_v24, %v3446_v29  ;;  %v10954_v17 = vld [vmem:[#allocation6 + $0x1a] ss:$0 sm:$0xff]  ;;  %v14743_v20 = vld [vmem:[#allocation15_spill] sm:$0xff] }
 0x2ea   :  { %v3495_v7 = vsel %vm502_vm6, %v14731_v45, %v3494_v16  ;;  %v3189_v36 = vpop.permute.xlu0 %3188  ;;  %14732 = vst [vmem:[#allocation41_spill] sm:$0xff] %v10934_v60  ;;  %14733 = vst [vmem:[#allocation47_spill] sm:$0xff] %v10938_v10  ;;  %v3497_v14 = vsel %vm502_vm6, %v3494_v16, %v14735_v5  ;;  %v14738_v61 = vrot.slane %v14737_v42, 6  ;;  %v3802_v44 = vsel %vm241_vm3, %v3798_v46, %v10702_v37  ;;  %v10956_v45 = vld [vmem:[#allocation6 + $0x1f] ss:$0 sm:$0xff]  ;;  %v14745_v46 = vld [vmem:[#allocation45_spill] sm:$0xff] }
 0x2eb   :  { %14736 = vst [vmem:[#allocation30_spill] sm:$0xff] %v10946_v50  ;;  %14739 = vst [vmem:[#allocation51_spill] sm:$0xff] %v10954_v17  ;;  %v10958_v16 = vld [vmem:[#allocation6 + $0x24] ss:$0 sm:$0xff]  ;;  %v3559_v48 = vadd.f32 %v3549_v26, %v10673_v13  ;;  %v14741_v24 = vld [vmem:[#allocation14_spill] sm:$0xff]  ;;  %v3504_v40 = vadd.f32 %v3495_v7, %v3392_v39  ;;  %v14744_v5 = vrot.slane %v14743_v20, 7  ;;  %v3317_v42 = vmul.f32 %v14745_v46, %v10932_v9 }
 0x2ec   :  { %v10950_v27 = vadd.f32 %v14738_v61, %v3502_v21  ;;  %14740 = vst [vmem:[#allocation38_spill] sm:$0xff] %v10956_v45  ;;  %v10964_v29 = vadd.f32 %v14741_v24, %v3310_v38  ;;  %v10966_v21 = vld [vmem:[#allocation6 + $0x29] ss:$0 sm:$0xff]  ;;  %v10975_v61 = vpop.permute.xlu1 %3825  ;;  %v10979_v13 = vmul.f32 %v10934_v60, %v10938_v10  ;;  %v6132_v26 = vld [vmem:[#allocation2 + $0x90] sm:$0xff]  ;;  %v3505_v38 = vadd.f32 %v3497_v14, %v10705_v28  ;;  %v14747_v7 = vld [vmem:[#allocation39_spill] sm:$0xff] }
 0x2ed   :  { %v3553_v37 = vsel %vm502_vm6, %v13780_v47, %v14744_v5  ;;  %v3198_v39 = vsel %vm236_vm2, %v6132_v26, %v10756_v55  ;;  %v3663_v24 = vadd.f32 %v14747_v7, %v3503_v35  ;;  %v3934_v5 = vmul.f32 %v10954_v17, %v10938_v10  ;;  %4588 = vrot.lane.b32.xlu1 %v10219_v25, %s6232_s19  ;;  %v14751_v14 = vld [vmem:[#allocation50_spill] sm:$0xff] }
 0x2ee   :  { %14742 = vst [vmem:[#allocation26_spill] sm:$0xff] %v10964_v29  ;;  %14746 = vst [vmem:[#allocation22_spill] sm:$0xff] %v10979_v13  ;;  %v10985_v20 = vpop.permute.xlu0 %3747  ;;  %v3960_v47 = vmul.f32 %v10956_v45, %v10938_v10  ;;  %v10993_v31 = vmul.f32 %v10958_v16, %v10938_v10  ;;  %v3697_v50 = vmul.f32 %v14717_v49, %v10799_v12  ;;  %4494 = vrot.lane.b32.xlu0 %v10725_v62, %s6226_s13 }
 0x2ef   :  { %14748 = vst [vmem:[#allocation53_spill] sm:$0xff] %v10985_v20  ;;  %v11001_v28 = vmul.f32 %v10966_v21, %v10938_v10  ;;  %v3561_v55 = vadd.f32 %v3553_v37, %v10759_v19  ;;  %v3202_v35 = vsel %vm241_vm3, %v3198_v39, %v10842_v33  ;;  %v11008_v26 = vmul.f32 %v14751_v14, %v10932_v9  ;;  %v14752_v37 = vld [vmem:[#allocation56_spill] sm:$0xff] }
 0x2f0   :  { %14749 = vst [vmem:[#allocation55_spill] sm:$0xff] %v10993_v31  ;;  %v3664_v49 = vadd.f32 %v10769_v32, %v3504_v40  ;;  %v11015_v7 = vsel %vm246_vm4, %v3802_v44, %v10792_v58  ;;  %v3321_v60 = vadd.f32 %v3317_v42, %v3269_v15  ;;  %v11018_v29 = vsel %vm246_vm4, %v3202_v35, %v3189_v36  ;;  %v11020_v19 = vpop.permute.xlu1 %3833 }
 0x2f1   :  { %14750 = vst [vmem:[#allocation17_spill] sm:$0xff] %v11001_v28  ;;  %v14753_v39 = vrot.slane %v14752_v37, 6  ;;  %v14754_v20 = vrot.slane %v10888_v22, 6  ;;  %v3463_v32 = vrot.slane %v10906_v53, 7  ;;  %v3267_v58 = vmul.f32 %v14721_v2, %v10799_v12  ;;  %4592 = vrot.lane.b32.xlu1 %v10225_v59, %s6232_s19 }
 0x2f2   :  { %v11031_v44 = vpop.permute.xlu0 %3751  ;;  %v14755_v15 = vrot.slane %v10677_v4, 6  ;;  %v3704_v42 = vrot.slane %v3697_v50, 6  ;;  %v11041_v53 = vmul.f32 %v10954_v17, %v11015_v7  ;;  %v3575_v2 = vrot.slane %v11008_v26, 7  ;;  %4514 = vrot.lane.b32.xlu0 %v10670_v43, %s6227_s14 }
 0x2f3   :  { %v3703_v56 = vsel %vm781_vm5, %v14754_v20, %v14753_v39  ;;  %v3319_v20 = vmul.f32 %v14745_v46, %v11018_v29  ;;  %v11052_v50 = vadd.f32 %v3960_v47, %v3559_v48  ;;  %v14758_v26 = vrot.slane %v10537_v3, 7  ;;  %v14759_v46 = vld [vmem:[#allocation46_spill] sm:$0xff] }
 0x2f4   :  { %v3665_v40 = vadd.f32 %v14755_v15, %v3505_v38  ;;  %v3711_v35 = vadd.f32 %v3703_v56, %v3663_v24  ;;  %v3962_v56 = vmul.f32 %v10956_v45, %v11015_v7  ;;  %v14756_v38 = vld [vmem:[#allocation48_spill] sm:$0xff]  ;;  %v11056_v15 = vpop.permute.xlu1 %3837  ;;  %v11063_v36 = vmul.f32 %v14759_v46, %v10748_v52 }
 0x2f5   :  { %v14757_v24 = vrot.slane %v14756_v38, 7  ;;  %v3465_v33 = vsel %vm502_vm6, %v3463_v32, %v14758_v26  ;;  %v14760_v48 = vrot.slane %v14752_v37, 6  ;;  %v11075_v38 = vmul.f32 %v10958_v16, %v11015_v7  ;;  %v14762_v26 = vld [vmem:[#allocation44_spill] sm:$0xff]  ;;  %4600 = vrot.lane.b32.xlu1 %v10219_v25, %s6233_s20 }
 0x2f6   :  { %v11048_v4 = vadd.f32 %v3934_v5, %v3711_v35  ;;  %v3271_v5 = vadd.f32 %v3267_v58, %v10856_v41  ;;  %v3457_v35 = vmul.f32 %v14723_v1, %v10799_v12  ;;  %v11068_v47 = vpop.permute.xlu0 %3759  ;;  %v3330_v41 = vmul.f32 %v14762_v26, %v10932_v9  ;;  %4518 = vrot.lane.b32.xlu0 %v10725_v62, %s6227_s14 }
 0x2f7   :  { %v3362_v39 = vadd.f32 %v14757_v24, %v3321_v60  ;;  %v3705_v60 = vsel %vm781_vm5, %v14760_v48, %v3704_v42  ;;  %14761 = vst [vmem:[#allocation33_spill] sm:$0xff] %v11075_v38  ;;  %v11079_v24 = vmul.f32 %v10966_v21, %v11015_v7  ;;  %v3295_v1 = vadd.f32 %v10902_v23, %v10831_v63 }
 0x2f8   :  { %v14763_v37 = vrot.slane %v10680_v6, 7  ;;  %v3323_v48 = vadd.f32 %v3319_v20, %v3271_v5  ;;  %v3569_v13 = vmul.f32 %v14751_v14, %v11018_v29  ;;  %v3475_v28 = vadd.f32 %v3465_v33, %v10752_v18  ;;  %v11101_v23 = vpop.permute.xlu1 %3845 }
 0x2f9   :  { %v11097_v31 = vmul.f32 %v10786_v11, %v10748_v52  ;;  %v3474_v25 = vadd.f32 %v3463_v32, %v3362_v39  ;;  %v3293_v63 = vmul.f32 %v14722_v8, %v10799_v12  ;;  %v11103_v20 = vadd.f32 %v3962_v56, %v3561_v55  ;;  %4604 = vrot.lane.b32.xlu1 %v10225_v59, %s6233_s20 }
 0x2fa   :  { %v3577_v58 = vsel %vm502_vm6, %v3575_v2, %v14763_v37  ;;  %v3713_v37 = vadd.f32 %v3704_v42, %v3665_v40  ;;  %v3519_v14 = vrot.slane %v11063_v36, 7  ;;  %v3466_v5 = vrot.slane %v3457_v35, 7  ;;  %v11106_v45 = vpop.permute.xlu0 %3763  ;;  %4526 = vrot.lane.b32.xlu0 %v10670_v43, %s6228_s15  ;;  %v14766_v35 = vld [vmem:[#allocation32_spill] sm:$0xff] }
 0x2fb   :  { %v11108_v17 = vadd.f32 %v3705_v60, %v3664_v49  ;;  %v3334_v18 = vadd.f32 %v3330_v41, %v3295_v1  ;;  %v3587_v33 = vadd.f32 %v3577_v58, %v3475_v28  ;;  %v3595_v52 = vmul.f32 %v10653_v30, %v10932_v9 }
 0x2fc   :  { %v3332_v55 = vmul.f32 %v14762_v26, %v11018_v29  ;;  %v3364_v32 = vadd.f32 %v10838_v54, %v3323_v48  ;;  %v3578_v36 = vrot.slane %v3569_v13, 7  ;;  %v3677_v49 = vrot.slane %v11097_v31, 6  ;;  %v11126_v59 = vpop.permute.xlu1 %3849  ;;  %v14765_v54 = vld [vmem:[#allocation57_spill] sm:$0xff]  ;;  %v14768_v26 = vld [vmem:[#allocation34_spill] sm:$0xff] }
 0x2fd   :  { %v3586_v28 = vadd.f32 %v3575_v2, %v3474_v25  ;;  %v3297_v40 = vadd.f32 %v3293_v63, %v10859_v51  ;;  %v11124_v42 = vmul.f32 %v14759_v46, %v10799_v12  ;;  %v14764_v56 = vrot.slane %v10557_v57, 7  ;;  %v11142_v46 = vld [vmem:[#allocation2 + $0xe8] sm:$0xff]  ;;  %v14770_v48 = vld [vmem:[#allocation18_spill] sm:$0xff] }
 0x2fe   :  { %v3719_v13 = vmul.f32 %v14765_v54, %v10932_v9  ;;  %v14767_v60 = vrot.slane %v14766_v35, 7  ;;  %v11138_v51 = vmul.f32 %v10786_v11, %v10799_v12  ;;  %v11140_v2 = vpop.permute.xlu0 %3771  ;;  %v14769_v41 = vrot.slane %v14768_v26, 7  ;;  %5163 = vrot.lane.b32.xlu1 %v11142_v46, %s6223_s10  ;;  %v14772_v11 = vld [vmem:[#allocation24_spill] sm:$0xff]  ;;  %4530 = vrot.lane.b32.xlu0 %v10725_v62, %s6228_s15 }
 0x2ff   :  { %v3521_v39 = vsel %vm502_vm6, %v3519_v14, %v14764_v56  ;;  %v3603_v58 = vrot.slane %v3595_v52, 7  ;;  %v3639_v25 = vadd.f32 %v14770_v48, %v3587_v33  ;;  %v14771_v9 = vrot.slane %v10537_v3, 7  ;;  %v14774_v3 = vld [vmem:[#allocation16_spill] sm:$0xff]  ;;  %v14776_v52 = vld [vmem:[#allocation21_spill] sm:$0xff] }
 0x300   :  { %v3469_v31 = vsel %vm502_vm6, %v3466_v5, %v14767_v60  ;;  %v3418_v1 = vadd.f32 %v14769_v41, %v3334_v18  ;;  %v3336_v56 = vadd.f32 %v3332_v55, %v3297_v40  ;;  %v14773_v35 = vrot.slane %v14772_v11, 7  ;;  %v11159_v18 = vld [vmem:[#allocation2 + $0xf8] sm:$0xff] }
 0x301   :  { %v3467_v63 = vsel %vm502_vm6, %v14771_v9, %v3466_v5  ;;  %v3597_v26 = vmul.f32 %v10653_v30, %v11018_v29  ;;  %v14775_v33 = vrot.slane %v14774_v3, 6  ;;  %v14777_v41 = vrot.slane %v14776_v52, 6  ;;  %v11171_v9 = vpop.permute.xlu1 %3869  ;;  %v14779_v30 = vld [vmem:[#allocation58_spill] sm:$0xff]  ;;  %v14780_v52 = vld [vmem:[#allocation31_spill] sm:$0xff] }
 0x302   :  { %v3476_v12 = vadd.f32 %v3467_v63, %v3364_v32  ;;  %v3581_v60 = vsel %vm502_vm6, %v3578_v36, %v14773_v35  ;;  %v14778_v32 = vld [vmem:[#allocation20_spill] sm:$0xff]  ;;  %v11169_v48 = vmul.f32 %v14765_v54, %v11018_v29  ;;  %v3531_v63 = vadd.f32 %v3521_v39, %v14779_v30  ;;  %v11176_v38 = vpop.permute.xlu0 %3775  ;;  %5167 = vrot.lane.b32.xlu1 %v11159_v18, %s6223_s10 }
 0x303   :  { %v3679_v5 = vsel %vm781_vm5, %v3677_v49, %v14775_v33  ;;  %v3638_v55 = vadd.f32 %v14777_v41, %v3586_v28  ;;  %v3477_v40 = vadd.f32 %v3469_v31, %v14778_v32  ;;  %v3725_v11 = vrot.slane %v3719_v13, 6  ;;  %v14783_v13 = vld [vmem:[#allocation12_spill] sm:$0xff]  ;;  %4538 = vrot.lane.b32.xlu0 %v10670_v43, %s6229_s16 }
 0x304   :  { %v13794_v35 = vrot.slane %v11124_v42, 7  ;;  %v3680_v8 = vrot.slane %v11138_v51, 6  ;;  %v3530_v33 = vadd.f32 %v3519_v14, %v3418_v1  ;;  %v14781_v28 = vrot.slane %v14780_v52, 7 }
 0x305   :  { %v14782_v41 = vrot.slane %v10680_v6, 7  ;;  %v3589_v54 = vadd.f32 %v3581_v60, %v3477_v40  ;;  %v3687_v39 = vadd.f32 %v3679_v5, %v3639_v25  ;;  %v3420_v32 = vadd.f32 %v14783_v13, %v3336_v56  ;;  %v3874_v60 = vpop.permute.xlu1 %3873  ;;  %v14786_v56 = vld [vmem:[#allocation37_spill] sm:$0xff] }
 0x306   :  { %v3605_v31 = vsel %vm502_vm6, %v3603_v58, %v14781_v28  ;;  %v3606_v51 = vrot.slane %v3597_v26, 7  ;;  %v11190_v14 = vadd.f32 %v11041_v53, %v3713_v37  ;;  %v3686_v6 = vadd.f32 %v3677_v49, %v3638_v55  ;;  %v14784_v28 = vld [vmem:[#allocation54_spill] sm:$0xff]  ;;  %v11205_v26 = vpop.permute.xlu0 %3783  ;;  %v11207_v49 = vld [vmem:[#allocation6 + $0x23] ss:$0 sm:$0xff]  ;;  %5175 = vrot.lane.b32.xlu1 %v11142_v46, %s6224_s11 }
 0x307   :  { %v3579_v29 = vsel %vm502_vm6, %v14782_v41, %v3578_v36  ;;  %v3728_v36 = vrot.slane %v11169_v48, 6  ;;  %v3615_v40 = vadd.f32 %v3605_v31, %v3531_v63  ;;  %v14785_v41 = vrot.slane %v14784_v28, 6  ;;  %v14790_v63 = vld [vmem:[#allocation36_spill] sm:$0xff]  ;;  %4542 = vrot.lane.b32.xlu0 %v10725_v62, %s6229_s16 }
 0x308   :  { %v3588_v30 = vadd.f32 %v3579_v29, %v3476_v12  ;;  %v3856_v12 = vsel %vm236_vm2, %v14786_v56, %v10923_v34  ;;  %v14787_v53 = vrot.slane %v10557_v57, 7  ;;  %v11209_v5 = vadd.f32 %v3603_v58, %v3530_v33  ;;  %v14792_v34 = vld [vmem:[#allocation42_spill] sm:$0xff]  ;;  %v14794_v33 = vld [vmem:[#allocation25_spill] sm:$0xff] }
 0x309   :  { %v3727_v25 = vsel %vm781_vm5, %v3725_v11, %v14785_v41  ;;  %v14789_v55 = vrot.slane %v14774_v3, 6  ;;  %v14791_v31 = vrot.slane %v14790_v63, 6  ;;  %v3858_v13 = vsel %vm236_vm2, %v14792_v34, %v10975_v61 }
 0x30a   :  { %v3523_v37 = vsel %vm502_vm6, %v14787_v53, %v13794_v35  ;;  %14788 = vst [vmem:[#allocation13_spill] sm:$0xff] %v11209_v5  ;;  %v3735_v57 = vadd.f32 %v3727_v25, %v3687_v39  ;;  %v14793_v56 = vrot.slane %v14780_v52, 7  ;;  %v3640_v3 = vadd.f32 %v14794_v33, %v3588_v30  ;;  %v11227_v53 = vld [vmem:[#allocation6 + $0x19] ss:$0 sm:$0xff]  ;;  %v11239_v25 = vld [vmem:[#allocation6 + $0x1e] ss:$0 sm:$0xff]  ;;  %v11259_v33 = vpop.permute.xlu0 %3787  ;;  %5179 = vrot.lane.b32.xlu1 %v11159_v18, %s6224_s11 }
 0x30b   :  { %v3681_v48 = vsel %vm781_vm5, %v14789_v55, %v3680_v8  ;;  %v3641_v29 = vadd.f32 %v14791_v31, %v3589_v54  ;;  %v3532_v41 = vadd.f32 %v3523_v37, %v3420_v32  ;;  %v11229_v54 = vadd.f32 %v3725_v11, %v3686_v6  ;;  %v14796_v55 = vld [vmem:[#allocation23_spill] sm:$0xff]  ;;  %v3882_v32 = vpop.permute.xlu1 %3881  ;;  %4550 = vrot.lane.b32.xlu0 %v10670_v43, %s6230_s17 }
 0x30c   :  { %v3607_v58 = vsel %vm502_vm6, %v14793_v56, %v3606_v51  ;;  %v14797_v61 = vrot.slane %v14796_v55, 7  ;;  %v14798_v39 = vrot.slane %v14784_v28, 6  ;;  %v11243_v30 = vmul.f32 %v11207_v49, %v10938_v10  ;;  %v14801_v31 = vld [vmem:[#allocation27_spill] sm:$0xff]  ;;  %v11261_v55 = vld [vmem:[#allocation6 + $0x28] ss:$0 sm:$0xff] }
 0x30d   :  { %14795 = vst [vmem:[#allocation40_spill] sm:$0xff] %v11229_v54  ;;  %v3860_v11 = vsel %vm241_vm3, %v3856_v12, %v11020_v19  ;;  %v3862_v6 = vsel %vm241_vm3, %v3858_v13, %v11056_v15  ;;  %v14800_v28 = vrot.slane %v10879_v0, 7  ;;  %v14802_v34 = vrot.slane %v14801_v31, 7  ;;  %v11267_v15 = vld [vmem:[#allocation6 + $0x1c] ss:$0 sm:$0xff] }
 0x30e   :  { %v11234_v63 = vsel %vm502_vm6, %v3606_v51, %v14797_v61  ;;  %v3729_v52 = vsel %vm781_vm5, %v14798_v39, %v3728_v36  ;;  %v14799_v51 = vrot.slane %v10888_v22, 6  ;;  %v3689_v61 = vadd.f32 %v3680_v8, %v3641_v29  ;;  %14804 = vst [vmem:[#allocation49_spill] sm:$0xff] %v11267_v15  ;;  %v6133_v22 = vld [vmem:[#allocation2 + $0xb8] sm:$0xff]  ;;  %v14806_v8 = vld [vmem:[#allocation53_spill] sm:$0xff]  ;;  %v11281_v39 = vld [vmem:[#allocation6 + $0x26] ss:$0 sm:$0xff]  ;;  %5187 = vrot.lane.b32.xlu1 %v11142_v46, %s6225_s12 }
 0x30f   :  { %v3551_v56 = vsel %vm502_vm6, %v14802_v34, %v14800_v28  ;;  %v11265_v19 = vsel %vm246_vm4, %v3860_v11, %v11101_v23  ;;  %v3921_v0 = vmul.f32 %v11227_v53, %v10938_v10  ;;  %v11274_v12 = vadd.f32 %v3607_v58, %v3532_v41  ;;  %v11279_v23 = vld [vmem:[#allocation6 + $0x21] ss:$0 sm:$0xff]  ;;  %v11287_v11 = vld [vmem:[#allocation6 + $0x2b] ss:$0 sm:$0xff]  ;;  %v11292_v58 = vld [vmem:[#allocation6 + $0x1b] ss:$0 sm:$0xff]  ;;  %4554 = vrot.lane.b32.xlu0 %v10725_v62, %s6230_s17 }
 0x310   :  { %v11252_v37 = vadd.f32 %v14799_v51, %v10950_v27  ;;  %14803 = vst [vmem:[#allocation52_spill] sm:$0xff] %v11265_v19  ;;  %v3906_v27 = vsel %vm236_vm2, %v6133_v22, %v3874_v60  ;;  %v3688_v13 = vadd.f32 %v3681_v48, %v3640_v3  ;;  %v3795_v29 = vsel %vm236_vm2, %v14806_v8, %v11068_v47  ;;  %v14809_v51 = vld [vmem:[#allocation26_spill] sm:$0xff]  ;;  %v3886_v48 = vpop.permute.xlu1 %3885 }
 0x311   :  { %14805 = vst [vmem:[#allocation29_spill] sm:$0xff] %v11274_v12  ;;  %14807 = vst [vmem:[#allocation43_spill] sm:$0xff] %v11279_v23  ;;  %v3947_v60 = vmul.f32 %v11239_v25, %v10938_v10  ;;  %v11290_v41 = vadd.f32 %v3551_v56, %v14809_v51  ;;  %v11297_v3 = vmul.f32 %v11261_v55, %v10938_v10  ;;  %v11304_v56 = vpop.permute.xlu0 %3807 }
 0x312   :  { %14808 = vst [vmem:[#allocation35_spill] sm:$0xff] %v11287_v11  ;;  %14810 = vst [vmem:[#allocation14_spill] sm:$0xff] %v11292_v58  ;;  %v3925_v28 = vadd.f32 %v3921_v0, %v3735_v57  ;;  %v3986_v31 = vmul.f32 %v11267_v15, %v11265_v19  ;;  %v3866_v34 = vsel %vm246_vm4, %v3862_v6, %v11126_v59  ;;  %v11321_v6 = vld [vmem:[#allocation6 + $0x25] ss:$0 sm:$0xff]  ;;  %5191 = vrot.lane.b32.xlu1 %v11159_v18, %s6225_s12 }
 0x313   :  { %v3910_v22 = vsel %vm241_vm3, %v3906_v27, %v3886_v48  ;;  %v3951_v8 = vadd.f32 %v3947_v60, %v3615_v40  ;;  %v11306_v51 = vadd.f32 %v3728_v36, %v3689_v61  ;;  %v3797_v1 = vsel %vm236_vm2, %v11031_v44, %v11106_v45  ;;  %14813 = vst [vmem:[#allocation39_spill] sm:$0xff] %v11321_v6  ;;  %v6134_v40 = vld [vmem:[#allocation2 + $0xa8] sm:$0xff]  ;;  %v11333_v61 = vld [vmem:[#allocation6 + $0x20] ss:$0 sm:$0xff] }
 0x314   :  { %v4012_v57 = vmul.f32 %v11279_v23, %v11265_v19  ;;  %v11315_v0 = vmul.f32 %v11281_v39, %v11265_v19  ;;  %v11319_v59 = vadd.f32 %v3729_v52, %v3688_v13  ;;  %v11325_v36 = vmul.f32 %v11287_v11, %v11265_v19  ;;  %14815 = vst [vmem:[#allocation56_spill] sm:$0xff] %v11333_v61  ;;  %v11335_v52 = vld [vmem:[#allocation6 + $0x2a] ss:$0 sm:$0xff] }
 0x315   :  { %v3904_v45 = vsel %vm236_vm2, %v6134_v40, %v11171_v9  ;;  %v3973_v44 = vmul.f32 %v11292_v58, %v11265_v19  ;;  %14816 = vst [vmem:[#allocation48_spill] sm:$0xff] %v11335_v52  ;;  %v3988_v27 = vmul.f32 %v11267_v15, %v3866_v34  ;;  %v4014_v13 = vmul.f32 %v11279_v23, %v3866_v34  ;;  %v3894_v9 = vpop.permute.xlu1 %3893  ;;  %v11355_v15 = vpop.permute.xlu0 %3811 }
 0x316   :  { %14811 = vst [vmem:[#allocation15_spill] sm:$0xff] %v11315_v0  ;;  %14812 = vst [vmem:[#allocation45_spill] sm:$0xff] %v11319_v59  ;;  %v11340_v60 = vmul.f32 %v11321_v6, %v3866_v34  ;;  %v3908_v48 = vsel %vm241_vm3, %v3904_v45, %v3882_v32  ;;  %v11344_v40 = vadd.f32 %v3986_v31, %v11048_v4  ;;  %4574 = vrot.lane.b32.xlu0 %v10670_v43, %s6231_s18 }
 0x317   :  { %14814 = vst [vmem:[#allocation50_spill] sm:$0xff] %v11325_v36  ;;  %v11347_v47 = vmul.f32 %v11281_v39, %v3866_v34  ;;  %v11350_v35 = vmul.f32 %v11335_v52, %v3866_v34  ;;  %v11353_v12 = vsel %vm246_vm4, %v3908_v48, %v3894_v9  ;;  %v11358_v23 = vmul.f32 %v11287_v11, %v3866_v34 }
 0x318   :  { %14817 = vst [vmem:[#allocation46_spill] sm:$0xff] %v11340_v60  ;;  %v3799_v32 = vsel %vm241_vm3, %v3795_v29, %v11140_v2  ;;  %v3999_v4 = vmul.f32 %v11333_v61, %v11265_v19  ;;  %v11370_v9 = vadd.f32 %v4012_v57, %v11052_v50  ;;  %v11379_v2 = vadd.f32 %v3988_v27, %v11190_v14 }
 0x319   :  { %14818 = vst [vmem:[#allocation44_spill] sm:$0xff] %v11347_v47  ;;  %14819 = vst [vmem:[#allocation57_spill] sm:$0xff] %v11350_v35  ;;  %v11374_v59 = vsel %vm246_vm4, %v3799_v32, %v11205_v26  ;;  %v11382_v29 = vadd.f32 %v4014_v13, %v11103_v20  ;;  %v11385_v31 = vadd.f32 %v3973_v44, %v3925_v28  ;;  %v3898_v48 = vpop.permute.xlu1 %3897  ;;  %v11394_v14 = vpop.permute.xlu0 %3819  ;;  %v14822_v44 = vld [vmem:[#allocation28_spill] sm:$0xff]  ;;  %v14824_v57 = vrot.slane %v11124_v42, 7  ;;  %v11424_v42 = vld [vmem:[#allocation6 + $0x30] ss:$0 sm:$0xff] }
 0x31a   :  { %14820 = vst [vmem:[#allocation32_spill] sm:$0xff] %v11358_v23  ;;  %v3923_v26 = vmul.f32 %v11227_v53, %v11015_v7  ;;  %v11392_v32 = vsel %vm246_vm4, %v3910_v22, %v3898_v48  ;;  %v11399_v27 = vmul.f32 %v10958_v16, %v11374_v59  ;;  %v11403_v28 = vmul.f32 %v11207_v49, %v11015_v7  ;;  %v14830_v35 = vld [vmem:[#allocation19_spill] sm:$0xff]  ;;  %v14834_v47 = vld [vmem:[#allocation38_spill] sm:$0xff] }
 0x31b   :  { %v14823_v13 = vrot.slane %v14822_v44, 7  ;;  %5199 = vrot.lane.b32.xlu1 %v11142_v46, %s6226_s13  ;;  %v3801_v22 = vsel %vm241_vm3, %v3797_v1, %v11176_v38  ;;  %v11414_v48 = vadd.f32 %v3999_v4, %v3951_v8  ;;  %v3949_v20 = vmul.f32 %v11239_v25, %v11015_v7  ;;  %4578 = vrot.lane.b32.xlu0 %v10725_v62, %s6231_s18 }
 0x31c   :  { %14821 = vst [vmem:[#allocation34_spill] sm:$0xff] %v11399_v27  ;;  %v11420_v50 = vmul.f32 %v11261_v55, %v11015_v7  ;;  %14825 = vst [vmem:[#allocation18_spill] sm:$0xff] %v11424_v42  ;;  %v11432_v38 = vsel %vm246_vm4, %v3801_v22, %v11259_v33  ;;  %v3975_v1 = vmul.f32 %v11292_v58, %v3866_v34  ;;  %v14827_v7 = vld [vmem:[#allocation41_spill] sm:$0xff]  ;;  %v14833_v22 = vld [vmem:[#allocation51_spill] sm:$0xff]  ;;  %v14838_v10 = vrot.slane %v11399_v27, 7 }
 0x31d   :  { %v3525_v45 = vsel %vm502_vm6, %v14824_v57, %v14823_v13  ;;  %v11428_v57 = vmul.f32 %v10966_v21, %v11374_v59  ;;  %v4001_v8 = vmul.f32 %v11333_v61, %v3866_v34  ;;  %v4457_v4 = vpop.permute.xlu1 %4456  ;;  %v11438_v44 = vmul.f32 %v14827_v7, %v11374_v59  ;;  %v11446_v36 = vpop.permute.xlu0 %3823 }
 0x31e   :  { %v11442_v13 = vmul.f32 %v11207_v49, %v11374_v59  ;;  %v3533_v60 = vadd.f32 %v3525_v45, %v14830_v35  ;;  %v3927_v23 = vadd.f32 %v3923_v26, %v11306_v51  ;;  %v11454_v34 = vmul.f32 %v11424_v42, %v11265_v19 }
 0x31f   :  { %14826 = vst [vmem:[#allocation24_spill] sm:$0xff] %v11428_v57  ;;  %14828 = vst [vmem:[#allocation16_spill] sm:$0xff] %v11438_v44  ;;  %5203 = vrot.lane.b32.xlu1 %v11159_v18, %s6226_s13  ;;  %v11458_v61 = vmul.f32 %v11321_v6, %v11265_v19  ;;  %v4080_v35 = vmul.f32 %v10958_v16, %v11432_v38  ;;  %4586 = vrot.lane.b32.xlu0 %v10670_v43, %s6232_s19 }
 0x320   :  { %14829 = vst [vmem:[#allocation21_spill] sm:$0xff] %v11442_v13  ;;  %14831 = vst [vmem:[#allocation20_spill] sm:$0xff] %v11454_v34  ;;  %v3617_v45 = vadd.f32 %v11234_v63, %v3533_v60  ;;  %v11468_v26 = vmul.f32 %v11335_v52, %v11265_v19  ;;  %v3933_v33 = vmul.f32 %v14833_v22, %v11374_v59  ;;  %v14836_v19 = vld [vmem:[#allocation55_spill] sm:$0xff] }
 0x321   :  { %v3959_v6 = vmul.f32 %v14834_v47, %v11374_v59  ;;  %v11477_v16 = vmul.f32 %v11261_v55, %v11374_v59  ;;  %v4461_v63 = vpop.permute.xlu1 %4460  ;;  %v3935_v51 = vmul.f32 %v14833_v22, %v11432_v38  ;;  %v11483_v42 = vadd.f32 %v3975_v1, %v3927_v23  ;;  %v3832_v0 = vpop.permute.xlu0 %3831 }
 0x322   :  { %14832 = vst [vmem:[#allocation58_spill] sm:$0xff] %v11468_v26  ;;  %v14837_v5 = vrot.slane %v14836_v19, 7  ;;  %v3961_v54 = vmul.f32 %v14834_v47, %v11432_v38  ;;  %v11494_v60 = vmul.f32 %v10966_v21, %v11432_v38  ;;  %v11498_v22 = vmul.f32 %v11207_v49, %v11432_v38  ;;  %v14843_v47 = vld [vmem:[#allocation17_spill] sm:$0xff] }
 0x323   :  { %14835 = vst [vmem:[#allocation31_spill] sm:$0xff] %v11477_v16  ;;  %5223 = vrot.lane.b32.xlu1 %v11142_v46, %s6227_s14  ;;  %v4089_v23 = vrot.slane %v4080_v35, 7  ;;  %v3953_v1 = vadd.f32 %v3949_v20, %v3617_v45  ;;  %v11504_v52 = vmul.f32 %v11261_v55, %v11432_v38  ;;  %4590 = vrot.lane.b32.xlu0 %v10725_v62, %s6232_s19  ;;  %v14844_v27 = vrot.slane %v14843_v47, 7  ;;  %v11520_v45 = vld [vmem:[#allocation6 + $0x1d] ss:$0 sm:$0xff] }
 0x324   :  { %v4088_v58 = vsel %vm502_vm6, %v14838_v10, %v14837_v5  ;;  %14839 = vst [vmem:[#allocation12_spill] sm:$0xff] %v11494_v60  ;;  %v11510_v21 = vadd.f32 %v3933_v33, %v11252_v37  ;;  %v14841_v5 = vld [vmem:[#allocation30_spill] sm:$0xff]  ;;  %v14845_v35 = vrot.slane %v11428_v57, 7  ;;  %v14848_v33 = vrot.slane %v11438_v44, 6  ;;  %v11536_v57 = vld [vmem:[#allocation6 + $0x22] ss:$0 sm:$0xff] }
 0x325   :  { %v11513_v49 = vadd.f32 %v3959_v6, %v14841_v5  ;;  %v4469_v26 = vpop.permute.xlu1 %4468  ;;  %v11524_v11 = vadd.f32 %v4088_v58, %v11344_v40  ;;  %v14846_v10 = vld [vmem:[#allocation22_spill] sm:$0xff]  ;;  %v11534_v5 = vadd.f32 %v3935_v51, %v11108_v17  ;;  %v11540_v55 = vadd.f32 %v3961_v54, %v11290_v41  ;;  %v11543_v40 = vld [vmem:[#allocation6 + $0x27] ss:$0 sm:$0xff]  ;;  %v14853_v58 = vld [vmem:[#allocation33_spill] sm:$0xff] }
 0x326   :  { %14840 = vst [vmem:[#allocation54_spill] sm:$0xff] %v11510_v21  ;;  %v4144_v20 = vsel %vm502_vm6, %v14845_v35, %v14844_v27  ;;  %v14847_v37 = vrot.slane %v14846_v10, 6  ;;  %v4503_v27 = vsel %vm236_vm2, %v4457_v4, %v4469_v26  ;;  %v3836_v35 = vpop.permute.xlu0 %3835  ;;  %v11545_v10 = vld [vmem:[#allocation6 + $0x2c] ss:$0 sm:$0xff]  ;;  %v11555_v4 = vld [vmem:[#allocation6 + $0x31] ss:$0 sm:$0xff]  ;;  %v4025_v54 = vmul.f32 %v11520_v45, %v11353_v12 }
 0x327   :  { %14842 = vst [vmem:[#allocation37_spill] sm:$0xff] %v11513_v49  ;;  %14849 = vst [vmem:[#allocation36_spill] sm:$0xff] %v11534_v5  ;;  %5227 = vrot.lane.b32.xlu1 %v11159_v18, %s6227_s14  ;;  %v4005_v41 = vadd.f32 %v4001_v8, %v3953_v1  ;;  %4598 = vrot.lane.b32.xlu0 %v10670_v43, %s6233_s20  ;;  %v14854_v44 = vrot.slane %v14853_v58, 7  ;;  %v14855_v51 = vrot.slane %v11297_v3, 7  ;;  %v14856_v47 = vrot.slane %v11477_v16, 7  ;;  %v14879_v5 = vld [vmem:[#allocation13_spill] sm:$0xff] }
 0x328   :  { %v11531_v6 = vsel %vm781_vm5, %v14848_v33, %v14847_v37  ;;  %14850 = vst [vmem:[#allocation42_spill] sm:$0xff] %v11540_v55  ;;  %v14851_v37 = vrot.slane %v11243_v30, 7  ;;  %v14852_v33 = vrot.slane %v11442_v13, 7  ;;  %v11573_v8 = vadd.f32 %v4144_v20, %v11370_v9  ;;  %v6135_v13 = vld [vmem:[#allocation2 + $0xa0] sm:$0xff] }
 0x329   :  { %v4116_v55 = vsel %vm502_vm6, %v14856_v47, %v14855_v51  ;;  %v4473_v49 = vpop.permute.xlu1 %4472  ;;  %v11577_v43 = vmul.f32 %v14827_v7, %v11432_v38  ;;  %v11585_v1 = vmul.f32 %v11545_v10, %v11353_v12  ;;  %v14858_v47 = vrot.slane %v14836_v19, 7 }
 0x32a   :  { %v4060_v17 = vsel %vm502_vm6, %v14852_v33, %v14851_v37  ;;  %v4092_v37 = vsel %vm502_vm6, %v4089_v23, %v14854_v44  ;;  %v4038_v33 = vmul.f32 %v11536_v57, %v11353_v12  ;;  %v11581_v44 = vmul.f32 %v11543_v40, %v11353_v12  ;;  %v3844_v26 = vpop.permute.xlu0 %3843 }
 0x32b   :  { %14857 = vst [vmem:[#allocation25_spill] sm:$0xff] %v11577_v43  ;;  %v4505_v58 = vsel %vm236_vm2, %v4461_v63, %v4473_v49  ;;  %v11591_v9 = vsel %vm502_vm6, %v14858_v47, %v4089_v23  ;;  %v11595_v7 = vmul.f32 %v11555_v4, %v11353_v12  ;;  %v14860_v20 = vrot.slane %v11403_v28, 7  ;;  %5235 = vrot.lane.b32.xlu1 %v11142_v46, %s6228_s15 }
 0x32c   :  { %14859 = vst [vmem:[#allocation23_spill] sm:$0xff] %v11591_v9  ;;  %v14861_v51 = vrot.slane %v11498_v22, 7  ;;  %v3855_v63 = vsel %vm236_vm2, %v11304_v56, %v11394_v14  ;;  %v11608_v19 = vadd.f32 %v4092_v37, %v11379_v2  ;;  %v4029_v23 = vadd.f32 %v4025_v54, %v11385_v31  ;;  %4602 = vrot.lane.b32.xlu0 %v10725_v62, %s6233_s20  ;;  %v14877_v62 = vld [vmem:[#allocation40_spill] sm:$0xff] }
 0x32d   :  { %v14862_v12 = vrot.slane %v11420_v50, 7  ;;  %v14863_v28 = vrot.slane %v11504_v52, 7  ;;  %v3859_v47 = vsel %vm241_vm3, %v3855_v63, %v3832_v0  ;;  %v14864_v56 = vrot.slane %v11079_v24, 7  ;;  %v4481_v0 = vpop.permute.xlu1 %4480 }
 0x32e   :  { %v4064_v16 = vsel %vm502_vm6, %v14861_v51, %v14860_v20  ;;  %v14865_v14 = vrot.slane %v11494_v60, 7  ;;  %v4042_v37 = vadd.f32 %v4038_v33, %v11414_v48  ;;  %v4027_v31 = vmul.f32 %v11520_v45, %v11392_v32  ;;  %v3848_v33 = vpop.permute.xlu0 %3847 }
 0x32f   :  { %v4120_v49 = vsel %vm502_vm6, %v14863_v28, %v14862_v12  ;;  %v4040_v50 = vmul.f32 %v11536_v57, %v11392_v32  ;;  %v11630_v54 = vsel %vm246_vm4, %v3859_v47, %v3844_v26  ;;  %v11636_v20 = vmul.f32 %v11543_v40, %v11392_v32  ;;  %5239 = vrot.lane.b32.xlu1 %v11159_v18, %s6228_s15  ;;  %v11650_v28 = vld [vmem:[#allocation2 + $0xe0] sm:$0xff] }
 0x330   :  { %v4148_v2 = vsel %vm502_vm6, %v14865_v14, %v14864_v56  ;;  %14866 = vst [vmem:[#allocation27_spill] sm:$0xff] %v11630_v54  ;;  %v3857_v48 = vsel %vm236_vm2, %v11355_v15, %v11446_v36  ;;  %v11644_v26 = vmul.f32 %v11545_v10, %v11392_v32  ;;  %v4507_v12 = vsel %vm241_vm3, %v4503_v27, %v4481_v0 }
 0x331   :  { %v3861_v63 = vsel %vm241_vm3, %v3857_v48, %v3836_v35  ;;  %v11654_v47 = vmul.f32 %v11281_v39, %v11630_v54  ;;  %5161 = vrot.lane.b32.xlu0 %v11650_v28, %s6223_s10  ;;  %v11662_v36 = vadd.f32 %v4148_v2, %v11382_v29  ;;  %v11665_v27 = vadd.f32 %v4060_v17, %v4029_v23  ;;  %v4485_v14 = vpop.permute.xlu1 %4484  ;;  %v6043_v17 = vld [vmem:[#allocation6 + $0x2d] ss:$0 sm:$0xff]  ;;  %v11691_v2 = vld [vmem:[#allocation6 + $0x2f] ss:$0 sm:$0xff] }
 0x332   :  { %v11657_v15 = vsel %vm246_vm4, %v3861_v63, %v3848_v33  ;;  %v4031_v35 = vadd.f32 %v4027_v31, %v11483_v42  ;;  %v4044_v56 = vadd.f32 %v4040_v50, %v4005_v41  ;;  %v3920_v0 = vmul.f32 %v11227_v53, %v11374_v59  ;;  %v11674_v51 = vpop.permute.xlu0 %3867  ;;  %v14872_v31 = vld [vmem:[#allocation35_spill] sm:$0xff] }
 0x333   :  { %14867 = vst [vmem:[#allocation53_spill] sm:$0xff] %v11654_v47  ;;  %14868 = vst [vmem:[#allocation26_spill] sm:$0xff] %v11657_v15  ;;  %v11670_v48 = vadd.f32 %v4116_v55, %v4042_v37  ;;  %v4509_v63 = vsel %vm241_vm3, %v4505_v58, %v4485_v14  ;;  %v3946_v29 = vmul.f32 %v11239_v25, %v11374_v59  ;;  %5247 = vrot.lane.b32.xlu1 %v11142_v46, %s6229_s16  ;;  %v11685_v55 = vld [vmem:[#allocation2 + $0xf0] sm:$0xff]  ;;  %v14878_v41 = vld [vmem:[#allocation47_spill] sm:$0xff] }
 0x334   :  { %14869 = vst [vmem:[#allocation28_spill] sm:$0xff] %v11662_v36  ;;  %v11681_v42 = vmul.f32 %v11281_v39, %v11657_v15  ;;  %v11689_v58 = vmul.f32 %v6043_v17, %v11374_v59  ;;  %v11696_v50 = vmul.f32 %v14872_v31, %v11630_v54  ;;  %v14874_v39 = vld [vmem:[#allocation58_spill] sm:$0xff]  ;;  %v11702_v23 = vmul.f32 %v6043_v17, %v11432_v38  ;;  %v14881_v14 = vld [vmem:[#allocation52_spill] sm:$0xff] }
 0x335   :  { %5165 = vrot.lane.b32.xlu0 %v11685_v55, %s6223_s10  ;;  %v11704_v33 = vadd.f32 %v4064_v16, %v4031_v35  ;;  %v11706_v59 = vadd.f32 %v4120_v49, %v4044_v56  ;;  %v4493_v24 = vpop.permute.xlu1 %4492  ;;  %v3924_v32 = vadd.f32 %v3920_v0, %v14877_v62  ;;  %v4331_v37 = vmul.f32 %v6043_v17, %v14878_v41  ;;  %v14884_v56 = vld [vmem:[#allocation15_spill] sm:$0xff] }
 0x336   :  { %14870 = vst [vmem:[#allocation41_spill] sm:$0xff] %v11681_v42  ;;  %14871 = vst [vmem:[#allocation19_spill] sm:$0xff] %v11689_v58  ;;  %v11711_v60 = vsel %vm246_vm4, %v4507_v12, %v4493_v24  ;;  %v3872_v9 = vpop.permute.xlu0 %3871  ;;  %v11714_v21 = vadd.f32 %v3946_v29, %v14879_v5  ;;  %v11718_v36 = vmul.f32 %v11691_v2, %v14881_v14  ;;  %v14882_v5 = vrot.slane %v11498_v22, 7  ;;  %v14890_v14 = vld [vmem:[#allocation14_spill] sm:$0xff]  ;;  %v14894_v62 = vld [vmem:[#allocation39_spill] sm:$0xff] }
 0x337   :  { %14873 = vst [vmem:[#allocation51_spill] sm:$0xff] %v11696_v50  ;;  %14875 = vst [vmem:[#allocation38_spill] sm:$0xff] %v11702_v23  ;;  %v3922_v16 = vmul.f32 %v11227_v53, %v11432_v38  ;;  %5251 = vrot.lane.b32.xlu1 %v11159_v18, %s6229_s16  ;;  %v3948_v24 = vmul.f32 %v11239_v25, %v11432_v38  ;;  %v14883_v12 = vrot.slane %v11243_v30, 7  ;;  %v14885_v0 = vrot.slane %v14884_v56, 7  ;;  %v14888_v38 = vld [vmem:[#allocation18_spill] sm:$0xff]  ;;  %v14896_v56 = vld [vmem:[#allocation45_spill] sm:$0xff] }
 0x338   :  { %14876 = vst [vmem:[#allocation55_spill] sm:$0xff] %v11706_v59  ;;  %14880 = vst [vmem:[#allocation30_spill] sm:$0xff] %v11714_v21  ;;  %v14886_v53 = vrot.slane %v11654_v47, 7  ;;  %v11743_v41 = vmul.f32 %v14872_v31, %v11657_v15  ;;  %v11750_v22 = vmul.f32 %v14888_v38, %v11630_v54  ;;  %v11766_v49 = vmul.f32 %v14894_v62, %v11630_v54  ;;  %v14901_v47 = vld [vmem:[#allocation29_spill] sm:$0xff] }
 0x339   :  { %v11733_v35 = vsel %vm502_vm6, %v14883_v12, %v14882_v5  ;;  %5173 = vrot.lane.b32.xlu0 %v11650_v28, %s6224_s11  ;;  %v4497_v30 = vpop.permute.xlu1 %4496  ;;  %v3972_v5 = vmul.f32 %v14890_v14, %v11630_v54  ;;  %v4337_v12 = vrot.slane %v4331_v37, 6  ;;  %v11770_v59 = vadd.f32 %v3922_v16, %v14896_v56  ;;  %v14897_v37 = vld [vmem:[#allocation44_spill] sm:$0xff]  ;;  %v14902_v16 = vld [vmem:[#allocation49_spill] sm:$0xff]  ;;  %v11792_v56 = vld [vmem:[#allocation6 + $0x47] ss:$0 sm:$0xff] }
 0x33a   :  { %v4200_v29 = vsel %vm502_vm6, %v14886_v53, %v14885_v0  ;;  %14887 = vst [vmem:[#allocation33_spill] sm:$0xff] %v11743_v41  ;;  %14889 = vst [vmem:[#allocation35_spill] sm:$0xff] %v11750_v22  ;;  %v14891_v0 = vrot.slane %v11504_v52, 7  ;;  %v14892_v53 = vrot.slane %v11297_v3, 7  ;;  %v11762_v17 = vsel %vm246_vm4, %v4509_v63, %v4497_v30  ;;  %v3880_v25 = vpop.permute.xlu0 %3879 }
 0x33b   :  { %14893 = vst [vmem:[#allocation58_spill] sm:$0xff] %v11762_v17  ;;  %14895 = vst [vmem:[#allocation40_spill] sm:$0xff] %v11766_v49  ;;  %v4210_v52 = vadd.f32 %v4200_v29, %v11524_v11  ;;  %v14898_v3 = vrot.slane %v14897_v37, 7  ;;  %5259 = vrot.lane.b32.xlu1 %v11142_v46, %s6230_s17  ;;  %v14900_v63 = vrot.slane %v11689_v58, 6  ;;  %v11786_v21 = vadd.f32 %v3948_v24, %v14901_v47  ;;  %v14905_v29 = vld [vmem:[#allocation50_spill] sm:$0xff] }
 0x33c   :  { %v11759_v31 = vsel %vm502_vm6, %v14892_v53, %v14891_v0  ;;  %v14899_v0 = vrot.slane %v11681_v42, 7  ;;  %v11790_v11 = vmul.f32 %v14902_v16, %v11630_v54  ;;  %14904 = vst [vmem:[#allocation13_spill] sm:$0xff] %v11792_v56  ;;  %v14906_v37 = vrot.slane %v14905_v29, 7  ;;  %v11811_v58 = vld [vmem:[#allocation6 + $0x33] ss:$0 sm:$0xff] }
 0x33d   :  { %v11783_v30 = vsel %vm781_vm5, %v14900_v63, %v4337_v12  ;;  %5177 = vrot.lane.b32.xlu0 %v11685_v55, %s6224_s11  ;;  %v14908_v47 = vrot.slane %v11702_v23, 6  ;;  %v11809_v63 = vmul.f32 %v14902_v16, %v11657_v15  ;;  %v11813_v29 = vld [vmem:[#allocation6 + $0x38] ss:$0 sm:$0xff]  ;;  %v11816_v42 = vadd.f32 %v3972_v5, %v3924_v32  ;;  %v11829_v32 = vld [vmem:[#allocation6 + $0x42] ss:$0 sm:$0xff] }
 0x33e   :  { %v4204_v53 = vsel %vm502_vm6, %v14899_v0, %v14898_v3  ;;  %14903 = vst [vmem:[#allocation47_spill] sm:$0xff] %v11790_v11  ;;  %v14907_v3 = vrot.slane %v11696_v50, 7  ;;  %v14911_v50 = vld [vmem:[#allocation56_spill] sm:$0xff]  ;;  %v3884_v17 = vpop.permute.xlu0 %3883 }
 0x33f   :  { %v11805_v24 = vsel %vm781_vm5, %v4337_v12, %v14908_v47  ;;  %14910 = vst [vmem:[#allocation18_spill] sm:$0xff] %v11809_v63  ;;  %v11820_v11 = vmul.f32 %v14911_v50, %v11630_v54  ;;  %v3903_v12 = vsel %vm236_vm2, %v6135_v13, %v11674_v51  ;;  %v6136_v47 = vld [vmem:[#allocation2 + $0xb0] sm:$0xff]  ;;  %v11825_v63 = vld [vmem:[#allocation6 + $0x3d] ss:$0 sm:$0xff]  ;;  %5263 = vrot.lane.b32.xlu1 %v11159_v18, %s6230_s17  ;;  %v14914_v13 = vld [vmem:[#allocation48_spill] sm:$0xff] }
 0x340   :  { %v4256_v0 = vsel %vm502_vm6, %v14907_v3, %v14906_v37  ;;  %14909 = vst [vmem:[#allocation52_spill] sm:$0xff] %v11805_v24  ;;  %v4517_v3 = vpop.permute.xlu1 %4516  ;;  %v3905_v16 = vsel %vm236_vm2, %v6136_v47, %v3872_v9  ;;  %14913 = vst [vmem:[#allocation39_spill] sm:$0xff] %v11825_v63  ;;  %v4212_v24 = vadd.f32 %v4204_v53, %v11608_v19  ;;  %v13841_v37 = vrot.slane %v11766_v49, 7 }
 0x341   :  { %14912 = vst [vmem:[#allocation14_spill] sm:$0xff] %v11820_v11  ;;  %v11832_v5 = vadd.f32 %v4256_v0, %v11573_v8  ;;  %v4370_v11 = vadd.f32 %v11531_v6, %v4210_v52  ;;  %v3909_v23 = vsel %vm241_vm3, %v3905_v16, %v3884_v17  ;;  %v11840_v9 = vmul.f32 %v14914_v13, %v11630_v54  ;;  %v14917_v8 = vld [vmem:[#allocation32_spill] sm:$0xff] }
 0x342   :  { %v11844_v19 = vmul.f32 %v11792_v56, %v11711_v60  ;;  %v11848_v51 = vmul.f32 %v11811_v58, %v11711_v60  ;;  %v11852_v6 = vmul.f32 %v11813_v29, %v11711_v60  ;;  %v14918_v17 = vrot.slane %v14917_v8, 7  ;;  %5185 = vrot.lane.b32.xlu0 %v11650_v28, %s6225_s12 }
 0x343   :  { %14915 = vst [vmem:[#allocation45_spill] sm:$0xff] %v11840_v9  ;;  %v14919_v52 = vrot.slane %v11743_v41, 7  ;;  %v11865_v0 = vmul.f32 %v11825_v63, %v11711_v60  ;;  %v14921_v16 = vrot.slane %v11458_v61, 7  ;;  %v14923_v56 = vrot.slane %v11577_v43, 6  ;;  %v3892_v63 = vpop.permute.xlu0 %3891  ;;  %5283 = vrot.lane.b32.xlu1 %v11142_v46, %s6231_s18 }
 0x344   :  { %14916 = vst [vmem:[#allocation44_spill] sm:$0xff] %v11844_v19  ;;  %v11867_v47 = vpop.permute.xlu1 %4520  ;;  %v3907_v19 = vsel %vm241_vm3, %v3903_v12, %v3880_v25  ;;  %v14925_v41 = vrot.slane %v11750_v22, 6  ;;  %v4000_v25 = vmul.f32 %v14911_v50, %v11657_v15  ;;  %v11955_v22 = vmul.f32 %v11691_v2, %v11657_v15 }
 0x345   :  { %v11859_v53 = vsel %vm502_vm6, %v14919_v52, %v14918_v17  ;;  %14920 = vst [vmem:[#allocation29_spill] sm:$0xff] %v11865_v0  ;;  %v4172_v8 = vsel %vm502_vm6, %v13841_v37, %v14921_v16  ;;  %v11877_v17 = vmul.f32 %v11691_v2, %v11630_v54  ;;  %v11881_v52 = vmul.f32 %v11829_v32, %v11711_v60 }
 0x346   :  { %v11885_v0 = vadd.f32 %v14923_v56, %v4212_v24  ;;  %v4164_v16 = vmul.f32 %v14894_v62, %v11657_v15  ;;  %v14924_v37 = vrot.slane %v11454_v34, 6  ;;  %v11896_v49 = vsel %vm246_vm4, %v3907_v19, %v3892_v63  ;;  %5189 = vrot.lane.b32.xlu0 %v11685_v55, %s6225_s12 }
 0x347   :  { %14922 = vst [vmem:[#allocation49_spill] sm:$0xff] %v11877_v17  ;;  %v3974_v56 = vmul.f32 %v14890_v14, %v11657_v15  ;;  %v11906_v62 = vmul.f32 %v14888_v38, %v11657_v15  ;;  %v11913_v63 = vmul.f32 %v11543_v40, %v11896_v49  ;;  %v14926_v14 = vrot.slane %v14874_v39, 7  ;;  %5287 = vrot.lane.b32.xlu1 %v11159_v18, %s6231_s18 }
 0x348   :  { %v4410_v54 = vsel %vm781_vm5, %v14925_v41, %v14924_v37  ;;  %v4182_v41 = vadd.f32 %v4172_v8, %v11665_v27  ;;  %v14927_v37 = vrot.slane %v11840_v9, 7  ;;  %v11929_v27 = vmul.f32 %v11555_v4, %v11896_v49 }
 0x349   :  { %v11908_v24 = vadd.f32 %v4410_v54, %v4370_v11  ;;  %v11925_v54 = vmul.f32 %v11545_v10, %v11896_v49  ;;  %v4529_v11 = vpop.permute.xlu1 %4528  ;;  %v13847_v12 = vrot.slane %v11913_v63, 7  ;;  %v4173_v8 = vrot.slane %v4164_v16, 7 }
 0x34a   :  { %v4228_v50 = vsel %vm502_vm6, %v14927_v37, %v14926_v14  ;;  %14929 = vst [vmem:[#allocation48_spill] sm:$0xff] %v11929_v27  ;;  %v11933_v19 = vsel %vm236_vm2, %v4517_v3, %v4529_v11  ;;  %v11937_v14 = vmul.f32 %v14914_v13, %v11657_v15  ;;  %v3896_v37 = vpop.permute.xlu0 %3895  ;;  %v3978_v34 = vadd.f32 %v3974_v56, %v11770_v59 }
 0x34b   :  { %14928 = vst [vmem:[#allocation56_spill] sm:$0xff] %v11925_v54  ;;  %v13851_v38 = vrot.slane %v11925_v54, 7  ;;  %v4004_v43 = vadd.f32 %v4000_v25, %v11786_v21  ;;  %v4238_v3 = vadd.f32 %v4228_v50, %v11670_v48  ;;  %v4024_v16 = vmul.f32 %v11520_v45, %v11896_v49  ;;  %5197 = vrot.lane.b32.xlu0 %v11650_v28, %s6226_s13  ;;  %v14936_v54 = vld [vmem:[#allocation46_spill] sm:$0xff] }
 0x34c   :  { %v14930_v13 = vrot.slane %v11581_v44, 7  ;;  %v14931_v59 = vrot.slane %v11585_v1, 7  ;;  %v14932_v56 = vrot.slane %v11595_v7, 6  ;;  %v14933_v25 = vrot.slane %v11929_v27, 6  ;;  %5295 = vrot.lane.b32.xlu1 %v11142_v46, %s6232_s19 }
 0x34d   :  { %v4533_v2 = vpop.permute.xlu1 %4532  ;;  %v14935_v9 = vrot.slane %v11877_v17, 6  ;;  %v14937_v15 = vrot.slane %v14936_v54, 7  ;;  %v14938_v54 = vrot.slane %v11458_v61, 7 }
 0x34e   :  { %v4284_v11 = vsel %vm502_vm6, %v13847_v12, %v14930_v13  ;;  %v4312_v48 = vsel %vm502_vm6, %v13851_v38, %v14931_v59  ;;  %v4434_v50 = vsel %vm781_vm5, %v14933_v25, %v14932_v56  ;;  %v3913_v13 = vsel %vm246_vm4, %v3909_v23, %v3896_v37  ;;  %v4455_v27 = vpop.permute.xlu0 %4454 }
 0x34f   :  { %v4294_v21 = vadd.f32 %v4284_v11, %v4182_v41  ;;  %v14934_v12 = vrot.slane %v11718_v36, 6  ;;  %v11975_v11 = vadd.f32 %v4312_v48, %v4238_v3  ;;  %v4176_v59 = vsel %vm502_vm6, %v4173_v8, %v14937_v15  ;;  %5201 = vrot.lane.b32.xlu0 %v11685_v55, %s6226_s13 }
 0x350   :  { %v4026_v23 = vmul.f32 %v11520_v45, %v3913_v13  ;;  %v4039_v37 = vmul.f32 %v11536_v57, %v3913_v13  ;;  %v4276_v25 = vmul.f32 %v11543_v40, %v3913_v13  ;;  %v4174_v15 = vsel %vm502_vm6, %v14938_v54, %v4173_v8  ;;  %5299 = vrot.lane.b32.xlu1 %v11159_v18, %s6232_s19 }
 0x351   :  { %v4386_v41 = vsel %vm781_vm5, %v14935_v9, %v14934_v12  ;;  %v4346_v56 = vadd.f32 %v11783_v30, %v4294_v21  ;;  %v4028_v9 = vadd.f32 %v4024_v16, %v11816_v42  ;;  %v4304_v12 = vmul.f32 %v11545_v10, %v3913_v13  ;;  %v4541_v48 = vpop.permute.xlu1 %4540 }
 0x352   :  { %v4428_v3 = vmul.f32 %v11555_v4, %v3913_v13  ;;  %v4030_v30 = vadd.f32 %v4026_v23, %v3978_v34  ;;  %v4043_v21 = vadd.f32 %v4039_v37, %v4004_v43  ;;  %v4285_v40 = vrot.slane %v4276_v25, 7  ;;  %v4459_v8 = vpop.permute.xlu0 %4458  ;;  %v12026_v25 = vld [vmem:[#allocation6 + $0x32] ss:$0 sm:$0xff] }
 0x353   :  { %v4394_v45 = vadd.f32 %v4386_v41, %v4346_v56  ;;  %v4184_v38 = vadd.f32 %v4176_v59, %v11704_v33  ;;  %v4313_v17 = vrot.slane %v4304_v12, 7  ;;  %v4565_v61 = vsel %vm236_vm2, %v11867_v47, %v4533_v2  ;;  %5221 = vrot.lane.b32.xlu0 %v11650_v28, %s6227_s14 }
 0x354   :  { %v4435_v42 = vrot.slane %v4428_v3, 6  ;;  %v4071_v10 = vadd.f32 %v11733_v35, %v4030_v30  ;;  %v4127_v4 = vadd.f32 %v11759_v31, %v4043_v21  ;;  %v14939_v13 = vrot.slane %v11581_v44, 7  ;;  %5307 = vrot.lane.b32.xlu1 %v11142_v46, %s6233_s20 }
 0x355   :  { %v4442_v16 = vadd.f32 %v4434_v50, %v4394_v45  ;;  %v14940_v43 = vrot.slane %v11937_v14, 7  ;;  %v14941_v33 = vrot.slane %v14874_v39, 7  ;;  %v14942_v47 = vrot.slane %v11636_v20, 7  ;;  %v4545_v37 = vpop.permute.xlu1 %4544 }
 0x356   :  { %v4286_v34 = vsel %vm502_vm6, %v14939_v13, %v4285_v40  ;;  %v14943_v35 = vrot.slane %v11585_v1, 7  ;;  %v14944_v44 = vrot.slane %v11644_v26, 7  ;;  %v4183_v59 = vadd.f32 %v4174_v15, %v4071_v10  ;;  %v12028_v1 = vld [vmem:[#allocation6 + $0x37] ss:$0 sm:$0xff]  ;;  %v4467_v12 = vpop.permute.xlu0 %4466 }
 0x357   :  { %v4230_v41 = vsel %vm502_vm6, %v14941_v33, %v14940_v43  ;;  %v4288_v50 = vsel %vm502_vm6, %v4285_v40, %v14942_v47  ;;  %v14945_v23 = vrot.slane %v11595_v7, 6  ;;  %v13854_v26 = vrot.slane %v11906_v62, 6  ;;  %v14946_v7 = vld [vmem:[#allocation38_spill] sm:$0xff]  ;;  %5225 = vrot.lane.b32.xlu0 %v11685_v55, %s6227_s14  ;;  %v14949_v10 = vld [vmem:[#allocation21_spill] sm:$0xff] }
 0x358   :  { %v4314_v31 = vsel %vm502_vm6, %v14943_v35, %v4313_v17  ;;  %v12019_v2 = vsel %vm502_vm6, %v4313_v17, %v14944_v44  ;;  %v4239_v39 = vadd.f32 %v4230_v41, %v4127_v4  ;;  %v4296_v56 = vadd.f32 %v4288_v50, %v4184_v38  ;;  %v14948_v40 = vld [vmem:[#allocation58_spill] sm:$0xff]  ;;  %v12061_v50 = vld [vmem:[#allocation6 + $0x34] ss:$0 sm:$0xff]  ;;  %5311 = vrot.lane.b32.xlu1 %v11159_v18, %s6233_s20 }
 0x359   :  { %v4436_v20 = vsel %vm781_vm5, %v14945_v23, %v4435_v42  ;;  %v4387_v17 = vrot.slane %v11955_v22, 6  ;;  %v4567_v54 = vsel %vm241_vm3, %v11933_v19, %v4541_v48  ;;  %v4569_v15 = vsel %vm241_vm3, %v4565_v61, %v4545_v37  ;;  %v12048_v48 = vld [vmem:[#allocation6 + $0x35] ss:$0 sm:$0xff]  ;;  %v4553_v41 = vpop.permute.xlu1 %4552  ;;  %v12059_v47 = vld [vmem:[#allocation6 + $0x3a] ss:$0 sm:$0xff]  ;;  %v14954_v37 = vld [vmem:[#allocation28_spill] sm:$0xff] }
 0x35a   :  { %v4295_v38 = vadd.f32 %v4286_v34, %v4183_v59  ;;  %v12035_v3 = vadd.f32 %v4314_v31, %v4239_v39  ;;  %v14947_v45 = vrot.slane %v14946_v7, 6  ;;  %v4502_v21 = vsel %vm236_vm2, %v4455_v27, %v4467_v12  ;;  %v14951_v34 = vld [vmem:[#allocation52_spill] sm:$0xff]  ;;  %v4471_v59 = vpop.permute.xlu0 %4470 }
 0x35b   :  { %v4643_v22 = vmul.f32 %v11811_v58, %v14948_v40  ;;  %v4669_v19 = vmul.f32 %v11813_v29, %v14948_v40  ;;  %v4628_v61 = vmul.f32 %v12026_v25, %v11711_v60  ;;  %v4654_v27 = vmul.f32 %v12028_v1, %v11711_v60  ;;  %5233 = vrot.lane.b32.xlu0 %v11650_v28, %s6228_s15 }
 0x35c   :  { %v4348_v30 = vadd.f32 %v14947_v45, %v4296_v56  ;;  %v4645_v46 = vadd.f32 %v11848_v51, %v11908_v24  ;;  %v14950_v4 = vrot.slane %v14949_v10, 7  ;;  %v4347_v43 = vadd.f32 %v14951_v34, %v4295_v38  ;;  %v14960_v10 = vld [vmem:[#allocation14_spill] sm:$0xff]  ;;  %v14962_v34 = vld [vmem:[#allocation47_spill] sm:$0xff] }
 0x35d   :  { %v14952_v35 = vrot.slane %v11718_v36, 6  ;;  %v12067_v44 = vsel %vm246_vm4, %v4567_v54, %v4553_v41  ;;  %v4632_v51 = vadd.f32 %v4628_v61, %v4442_v16  ;;  %v4658_v24 = vadd.f32 %v4654_v27, %v11975_v11  ;;  %v12075_v36 = vld [vmem:[#allocation6 + $0x39] ss:$0 sm:$0xff]  ;;  %v4557_v54 = vpop.permute.xlu1 %4556 }
 0x35e   :  { %v4069_v13 = vadd.f32 %v14950_v4, %v4028_v9  ;;  %v4396_v33 = vadd.f32 %v4387_v17, %v4348_v30  ;;  %v4504_v56 = vsel %vm236_vm2, %v4459_v8, %v4471_v59  ;;  %v4693_v23 = vmul.f32 %v12048_v48, %v12067_v44  ;;  %14953 = vst [vmem:[#allocation32_spill] sm:$0xff] %v12075_v36  ;;  %v4479_v30 = vpop.permute.xlu0 %4478  ;;  %v14963_v59 = vld [vmem:[#allocation36_spill] sm:$0xff] }
 0x35f   :  { %v4388_v31 = vsel %vm781_vm5, %v14952_v35, %v4387_v17  ;;  %v4268_v17 = vadd.f32 %v11859_v53, %v14954_v37  ;;  %v4671_v16 = vadd.f32 %v11852_v6, %v11832_v5  ;;  %v4719_v11 = vmul.f32 %v12059_v47, %v12067_v44  ;;  %v14955_v6 = vld [vmem:[#allocation40_spill] sm:$0xff]  ;;  %5237 = vrot.lane.b32.xlu0 %v11685_v55, %s6228_s15 }
 0x360   :  { %v4395_v9 = vadd.f32 %v4388_v31, %v4347_v43  ;;  %v4444_v39 = vadd.f32 %v4435_v42, %v4396_v33  ;;  %v4680_v18 = vmul.f32 %v12061_v50, %v12067_v44  ;;  %v4420_v42 = vadd.f32 %v13854_v26, %v11885_v0  ;;  %v6137_v26 = vld [vmem:[#allocation2 + $0xc8] sm:$0xff] }
 0x361   :  { %v4037_v8 = vmul.f32 %v11536_v57, %v11896_v49  ;;  %v12094_v5 = vadd.f32 %v4693_v23, %v4645_v46  ;;  %v14956_v12 = vrot.slane %v14955_v6, 7  ;;  %v12099_v7 = vsel %vm246_vm4, %v4569_v15, %v4557_v54  ;;  %v14959_v15 = vld [vmem:[#allocation30_spill] sm:$0xff]  ;;  %v4577_v31 = vpop.permute.xlu1 %4576  ;;  %v12144_v6 = vld [vmem:[#allocation6 + $0x41] ss:$0 sm:$0xff] }
 0x362   :  { %v12092_v53 = vadd.f32 %v4436_v20, %v4395_v9  ;;  %14957 = vst [vmem:[#allocation46_spill] sm:$0xff] %v12099_v7  ;;  %v12101_v45 = vadd.f32 %v4719_v11, %v4671_v16  ;;  %v4706_v0 = vmul.f32 %v12075_v36, %v12067_v44  ;;  %v4647_v61 = vadd.f32 %v4643_v22, %v4420_v42  ;;  %v14958_v20 = vld [vmem:[#allocation39_spill] sm:$0xff]  ;;  %v14966_v11 = vld [vmem:[#allocation44_spill] sm:$0xff]  ;;  %v12142_v54 = vld [vmem:[#allocation6 + $0x3c] ss:$0 sm:$0xff] }
 0x363   :  { %v4181_v38 = vadd.f32 %v14956_v12, %v4069_v13  ;;  %v4673_v27 = vadd.f32 %v4669_v19, %v4268_v17  ;;  %v4695_v57 = vmul.f32 %v12048_v48, %v12099_v7  ;;  %v4721_v49 = vmul.f32 %v12059_v47, %v12099_v7  ;;  %v14961_v19 = vld [vmem:[#allocation54_spill] sm:$0xff]  ;;  %v4483_v17 = vpop.permute.xlu0 %4482  ;;  %5245 = vrot.lane.b32.xlu0 %v11650_v28, %s6229_s16 }
 0x364   :  { %v12111_v46 = vmul.f32 %v14958_v20, %v14948_v40  ;;  %v4002_v4 = vadd.f32 %v14960_v10, %v14959_v15  ;;  %v4506_v13 = vsel %vm241_vm3, %v4502_v21, %v4479_v30  ;;  %v12118_v22 = vadd.f32 %v4680_v18, %v4632_v51  ;;  %v14964_v21 = vld [vmem:[#allocation18_spill] sm:$0xff]  ;;  %v14967_v30 = vld [vmem:[#allocation29_spill] sm:$0xff]  ;;  %v14971_v10 = vld [vmem:[#allocation55_spill] sm:$0xff] }
 0x365   :  { %v12122_v43 = vadd.f32 %v14962_v34, %v14961_v19  ;;  %v12126_v33 = vmul.f32 %v11829_v32, %v14948_v40  ;;  %v12128_v41 = vadd.f32 %v4695_v57, %v4647_v61  ;;  %v12130_v35 = vadd.f32 %v4721_v49, %v4673_v27  ;;  %v4581_v49 = vpop.permute.xlu1 %4580  ;;  %v14972_v34 = vld [vmem:[#allocation31_spill] sm:$0xff] }
 0x366   :  { %v12134_v9 = vadd.f32 %v14964_v21, %v14963_v59  ;;  %v4041_v23 = vadd.f32 %v4037_v8, %v4002_v4  ;;  %v14965_v51 = vrot.slane %v11913_v63, 7  ;;  %v12138_v16 = vadd.f32 %v4706_v0, %v4658_v24 }
 0x367   :  { %v4508_v42 = vsel %vm241_vm3, %v4504_v56, %v4483_v17  ;;  %v4630_v12 = vmul.f32 %v12026_v25, %v14948_v40  ;;  %v4682_v8 = vmul.f32 %v12061_v50, %v12099_v7  ;;  %v14968_v56 = vld [vmem:[#allocation57_spill] sm:$0xff]  ;;  %v14970_v61 = vrot.slane %v11937_v14, 7  ;;  %v4491_v14 = vpop.permute.xlu0 %4490  ;;  %5249 = vrot.lane.b32.xlu0 %v11685_v55, %s6229_s16 }
 0x368   :  { %v4293_v37 = vadd.f32 %v14965_v51, %v4181_v38  ;;  %v14969_v0 = vrot.slane %v14968_v56, 7  ;;  %v4656_v15 = vmul.f32 %v12028_v1, %v14948_v40  ;;  %v14973_v59 = vrot.slane %v14972_v34, 7  ;;  %v14974_v51 = vld [vmem:[#allocation19_spill] sm:$0xff] }
 0x369   :  { %v4634_v19 = vadd.f32 %v4630_v12, %v4444_v39  ;;  %v14975_v17 = vrot.slane %v14974_v51, 6  ;;  %v4611_v39 = vsel %vm236_vm2, %v6137_v26, %v4577_v31  ;;  %v12182_v12 = vsel %vm246_vm4, %v4506_v13, %v4491_v14 }
 0x36a   :  { %v4232_v27 = vsel %vm502_vm6, %v14970_v61, %v14969_v0  ;;  %v12166_v21 = vadd.f32 %v14973_v59, %v4041_v23  ;;  %v12174_v0 = vmul.f32 %v12142_v54, %v11711_v60  ;;  %v12178_v61 = vmul.f32 %v12144_v6, %v11711_v60  ;;  %v6138_v59 = vld [vmem:[#allocation2 + $0xd8] sm:$0xff] }
 0x36b   :  { %v4240_v4 = vadd.f32 %v4232_v27, %v14971_v10  ;;  %v12170_v56 = vadd.f32 %v14975_v17, %v4293_v37  ;;  %v12185_v27 = vadd.f32 %v4682_v8, %v4634_v19  ;;  %v12189_v37 = vmul.f32 %v14958_v20, %v12182_v12  ;;  %v4589_v8 = vpop.permute.xlu1 %4588  ;;  %v4495_v57 = vpop.permute.xlu0 %4494  ;;  %5257 = vrot.lane.b32.xlu0 %v11650_v28, %s6230_s17 }
 0x36c   :  { %v12193_v10 = vmul.f32 %v11829_v32, %v12182_v12  ;;  %v4708_v26 = vmul.f32 %v12075_v36, %v12099_v7  ;;  %v4760_v13 = vmul.f32 %v12142_v54, %v14948_v40  ;;  %v4816_v19 = vmul.f32 %v12144_v6, %v14948_v40 }
 0x36d   :  { %v4324_v23 = vadd.f32 %v12019_v2, %v4240_v4  ;;  %v14976_v2 = vld [vmem:[#allocation13_spill] sm:$0xff]  ;;  %v12207_v4 = vmul.f32 %v12142_v54, %v12182_v12  ;;  %v4613_v51 = vsel %vm236_vm2, %v6138_v59, %v4581_v49  ;;  %v13856_v17 = vrot.slane %v12189_v37, 7 }
 0x36e   :  { %v12203_v31 = vmul.f32 %v14976_v2, %v12182_v12  ;;  %v13855_v14 = vrot.slane %v12193_v10, 7  ;;  %v12216_v24 = vmul.f32 %v12144_v6, %v12182_v12  ;;  %v4615_v38 = vsel %vm241_vm3, %v4611_v39, %v4589_v8 }
 0x36f   :  { %14978 = vst [vmem:[#allocation58_spill] sm:$0xff] %v12207_v4  ;;  %v4660_v34 = vadd.f32 %v4656_v15, %v4324_v23  ;;  %v12221_v63 = vsel %vm246_vm4, %v4508_v42, %v4495_v57  ;;  %v14980_v49 = vrot.slane %v14967_v30, 7  ;;  %v14981_v23 = vrot.slane %v11881_v52, 7  ;;  %v4515_v57 = vpop.permute.xlu0 %4514  ;;  %5261 = vrot.lane.b32.xlu0 %v11685_v55, %s6230_s17 }
 0x370   :  { %14977 = vst [vmem:[#allocation38_spill] sm:$0xff] %v12203_v31  ;;  %14979 = vst [vmem:[#allocation21_spill] sm:$0xff] %v12216_v24  ;;  %v13860_v18 = vrot.slane %v12203_v31, 6  ;;  %v13861_v42 = vrot.slane %v12174_v0, 7  ;;  %v14982_v8 = vrot.slane %v14966_v11, 6  ;;  %v4770_v36 = vrot.slane %v4760_v13, 7 }
 0x371   :  { %v4795_v15 = vsel %vm502_vm6, %v13856_v17, %v14980_v49  ;;  %v4851_v59 = vsel %vm502_vm6, %v13855_v14, %v14981_v23  ;;  %v4787_v23 = vmul.f32 %v14958_v20, %v12221_v63  ;;  %v4843_v14 = vmul.f32 %v11829_v32, %v12221_v63  ;;  %v4593_v17 = vpop.permute.xlu1 %4592  ;;  %v12261_v32 = vld [vmem:[#allocation6 + $0x36] ss:$0 sm:$0xff] }
 0x372   :  { %v12239_v39 = vadd.f32 %v4795_v15, %v12094_v5  ;;  %v12246_v49 = vsel %vm781_vm5, %v13860_v18, %v14982_v8  ;;  %v4617_v40 = vsel %vm241_vm3, %v4613_v51, %v4593_v17  ;;  %v14984_v5 = vrot.slane %v12207_v4, 7  ;;  %v12263_v51 = vld [vmem:[#allocation6 + $0x3b] ss:$0 sm:$0xff] }
 0x373   :  { %14983 = vst [vmem:[#allocation52_spill] sm:$0xff] %v12246_v49  ;;  %v4826_v31 = vrot.slane %v4816_v19, 7  ;;  %v4796_v8 = vrot.slane %v4787_v23, 7  ;;  %v4852_v18 = vrot.slane %v4843_v14, 7  ;;  %v13863_v49 = vrot.slane %v12216_v24, 7  ;;  %14985 = vst [vmem:[#allocation28_spill] sm:$0xff] %v12263_v51  ;;  %v4519_v24 = vpop.permute.xlu0 %4518  ;;  %5281 = vrot.lane.b32.xlu0 %v11650_v28, %s6231_s18 }
 0x374   :  { %v4767_v15 = vsel %vm502_vm6, %v14984_v5, %v13861_v42  ;;  %v4712_v20 = vadd.f32 %v4708_v26, %v4660_v34  ;;  %v12267_v17 = vmul.f32 %v12142_v54, %v12221_v63  ;;  %v12271_v13 = vmul.f32 %v12144_v6, %v12221_v63 }
 0x375   :  { %v12274_v19 = vadd.f32 %v4851_v59, %v12101_v45  ;;  %v12278_v26 = vmul.f32 %v14976_v2, %v12221_v63  ;;  %v4601_v34 = vpop.permute.xlu1 %4600  ;;  %v14987_v14 = vrot.slane %v12178_v61, 7  ;;  %v14988_v54 = vrot.slane %v14967_v30, 7 }
 0x376   :  { %v14989_v6 = vrot.slane %v11881_v52, 7  ;;  %v14991_v2 = vrot.slane %v12111_v46, 7  ;;  %v12299_v42 = vsel %vm246_vm4, %v4615_v38, %v4601_v34  ;;  %v4824_v30 = vrot.slane %v12271_v13, 7  ;;  %v14995_v52 = vld [vmem:[#allocation43_spill] sm:$0xff] }
 0x377   :  { %14986 = vst [vmem:[#allocation40_spill] sm:$0xff] %v12274_v19  ;;  %v4823_v23 = vsel %vm502_vm6, %v13863_v49, %v14987_v14  ;;  %v12288_v5 = vsel %vm502_vm6, %v14988_v54, %v4796_v8  ;;  %14992 = vst [vmem:[#allocation30_spill] sm:$0xff] %v12299_v42  ;;  %v4768_v14 = vrot.slane %v12267_v17, 7  ;;  %v14994_v49 = vld [vmem:[#allocation27_spill] sm:$0xff]  ;;  %v4745_v38 = vmul.f32 %v12263_v51, %v12299_v42  ;;  %v14998_v17 = vld [vmem:[#allocation49_spill] sm:$0xff] }
 0x378   :  { %v12293_v45 = vsel %vm502_vm6, %v14989_v6, %v4852_v18  ;;  %v4799_v59 = vsel %vm502_vm6, %v4796_v8, %v14991_v2  ;;  %v4011_v4 = vmul.f32 %v14995_v52, %v14994_v49  ;;  %v14996_v6 = vld [vmem:[#allocation34_spill] sm:$0xff]  ;;  %v4732_v8 = vmul.f32 %v12261_v32, %v12299_v42  ;;  %v15003_v42 = vld [vmem:[#allocation45_spill] sm:$0xff]  ;;  %5285 = vrot.lane.b32.xlu0 %v11685_v55, %s6231_s18 }
 0x379   :  { %14990 = vst [vmem:[#allocation39_spill] sm:$0xff] %v12293_v45  ;;  %v12304_v54 = vadd.f32 %v4799_v59, %v12128_v41  ;;  %v14997_v45 = vrot.slane %v14996_v6, 7  ;;  %v14999_v34 = vrot.slane %v14998_v17, 6  ;;  %v4771_v41 = vsel %vm502_vm6, %v4768_v14, %v4770_v36  ;;  %v15002_v6 = vld [vmem:[#allocation23_spill] sm:$0xff] }
 0x37a   :  { %v4827_v49 = vsel %vm502_vm6, %v4824_v30, %v4826_v31  ;;  %v15000_v2 = vrot.slane %v12126_v33, 7  ;;  %v4736_v17 = vadd.f32 %v4732_v8, %v12118_v22  ;;  %v15004_v36 = vrot.slane %v15003_v42, 7  ;;  %v4527_v33 = vpop.permute.xlu0 %4526 }
 0x37b   :  { %14993 = vst [vmem:[#allocation14_spill] sm:$0xff] %v12304_v54  ;;  %v4097_v46 = vadd.f32 %v14997_v45, %v12122_v43  ;;  %v4393_v13 = vadd.f32 %v14999_v34, %v12170_v56  ;;  %v15001_v45 = vld [vmem:[#allocation26_spill] sm:$0xff]  ;;  %v4099_v54 = vadd.f32 %v15002_v6, %v12134_v9  ;;  %v4749_v56 = vadd.f32 %v4745_v38, %v12138_v16  ;;  %v4605_v34 = vpop.permute.xlu1 %4604 }
 0x37c   :  { %v4855_v43 = vsel %vm502_vm6, %v4852_v18, %v15000_v2  ;;  %v4013_v59 = vmul.f32 %v14995_v52, %v15001_v45  ;;  %v4237_v19 = vadd.f32 %v15004_v36, %v12166_v21  ;;  %v12335_v31 = vsel %vm246_vm4, %v4617_v40, %v4605_v34  ;;  %v15005_v21 = vld [vmem:[#allocation41_spill] sm:$0xff]  ;;  %v15007_v40 = vld [vmem:[#allocation15_spill] sm:$0xff]  ;;  %5293 = vrot.lane.b32.xlu0 %v11650_v28, %s6232_s19 }
 0x37d   :  { %v12338_v18 = vadd.f32 %v4855_v43, %v12130_v35  ;;  %v13867_v52 = vrot.slane %v12278_v26, 6  ;;  %v12341_v2 = vadd.f32 %v4767_v15, %v4736_v17  ;;  %v12343_v9 = vadd.f32 %v4823_v23, %v4749_v56  ;;  %v15009_v35 = vld [vmem:[#allocation48_spill] sm:$0xff]  ;;  %v6068_v36 = vld [vmem:[#allocation6 + $0x46] ss:$0 sm:$0xff] }
 0x37e   :  { %v4734_v22 = vmul.f32 %v12261_v32, %v12335_v31  ;;  %v4747_v16 = vmul.f32 %v12263_v51, %v12335_v31  ;;  %v15006_v42 = vrot.slane %v15005_v21, 7  ;;  %v15008_v8 = vrot.slane %v15007_v40, 7 }
 0x37f   :  { %v15010_v43 = vrot.slane %v15009_v35, 6  ;;  %v4562_v15 = vsel %vm236_vm2, %v4515_v57, %v4527_v33  ;;  %v15011_v23 = vrot.slane %v14966_v11, 6  ;;  %v12367_v34 = vpop.permute.xlu1 %5163  ;;  %v4653_v57 = vmul.f32 %v12028_v1, %v12182_v12  ;;  %v15013_v33 = vld [vmem:[#allocation37_spill] sm:$0xff] }
 0x380   :  { %v4202_v38 = vsel %vm502_vm6, %v15008_v8, %v15006_v42  ;;  %v4738_v17 = vadd.f32 %v4734_v22, %v12185_v27  ;;  %v4751_v56 = vadd.f32 %v4747_v16, %v4712_v20  ;;  %15012 = vst [vmem:[#allocation54_spill] sm:$0xff] %v12367_v34  ;;  %v4015_v21 = vadd.f32 %v4011_v4, %v15013_v33  ;;  %v15014_v42 = vld [vmem:[#allocation53_spill] sm:$0xff]  ;;  %v15016_v8 = vld [vmem:[#allocation42_spill] sm:$0xff]  ;;  %v4531_v20 = vpop.permute.xlu0 %4530 }
 0x381   :  { %v4441_v45 = vadd.f32 %v15010_v43, %v4393_v13  ;;  %v12364_v6 = vsel %vm781_vm5, %v15011_v23, %v13867_v52  ;;  %v4627_v13 = vmul.f32 %v12026_v25, %v12182_v12  ;;  %v15015_v40 = vrot.slane %v15014_v42, 7  ;;  %v15017_v43 = vld [vmem:[#allocation56_spill] sm:$0xff]  ;;  %5297 = vrot.lane.b32.xlu0 %v11685_v55, %s6232_s19 }
 0x382   :  { %v4017_v35 = vadd.f32 %v4013_v59, %v15016_v8  ;;  %v15018_v23 = vrot.slane %v15017_v43, 7  ;;  %v12379_v22 = vadd.f32 %v4771_v41, %v4738_v17  ;;  %v12381_v16 = vadd.f32 %v4827_v49, %v4751_v56  ;;  %v15022_v17 = vld [vmem:[#allocation12_spill] sm:$0xff]  ;;  %v15024_v56 = vld [vmem:[#allocation17_spill] sm:$0xff]  ;;  %v12424_v8 = vld [vmem:[#allocation6 + $0x3f] ss:$0 sm:$0xff] }
 0x383   :  { %v4209_v11 = vadd.f32 %v15015_v40, %v4097_v46  ;;  %v4564_v52 = vsel %vm236_vm2, %v4519_v24, %v4531_v20  ;;  %v12384_v34 = vadd.f32 %v4627_v13, %v4441_v45  ;;  %v4211_v51 = vadd.f32 %v4202_v38, %v4099_v54  ;;  %v12394_v59 = vpop.permute.xlu1 %5167  ;;  %v15028_v40 = vld [vmem:[#allocation22_spill] sm:$0xff]  ;;  %v12426_v43 = vld [vmem:[#allocation6 + $0x44] ss:$0 sm:$0xff] }
 0x384   :  { %v4321_v27 = vadd.f32 %v15018_v23, %v4237_v19  ;;  %15019 = vst [vmem:[#allocation47_spill] sm:$0xff] %v12381_v16  ;;  %v12391_v46 = vmul.f32 %v6068_v36, %v12182_v12  ;;  %v5038_v19 = vmul.f32 %v6068_v36, %v11711_v60  ;;  %v4629_v41 = vmul.f32 %v12026_v25, %v12221_v63  ;;  %v4539_v25 = vpop.permute.xlu0 %4538 }
 0x385   :  { %v4655_v24 = vmul.f32 %v12028_v1, %v12221_v63  ;;  %v15020_v54 = vrot.slane %v12174_v0, 7  ;;  %v15021_v38 = vrot.slane %v12178_v61, 7  ;;  %v15023_v60 = vrot.slane %v15022_v17, 7  ;;  %5305 = vrot.lane.b32.xlu0 %v11650_v28, %s6233_s20 }
 0x386   :  { %v12388_v4 = vadd.f32 %v4653_v57, %v4321_v27  ;;  %v15025_v13 = vrot.slane %v15024_v56, 7  ;;  %v13871_v33 = vrot.slane %v12391_v46, 6  ;;  %v5044_v1 = vrot.slane %v5038_v19, 6 }
 0x387   :  { %v12403_v49 = vsel %vm502_vm6, %v15020_v54, %v4768_v14  ;;  %v12408_v45 = vsel %vm502_vm6, %v15021_v38, %v4824_v30  ;;  %v12417_v0 = vmul.f32 %v6068_v36, %v12221_v63  ;;  %v15026_v14 = vld [vmem:[#allocation25_spill] sm:$0xff]  ;;  %v15029_v61 = vrot.slane %v15028_v40, 6  ;;  %v15030_v36 = vld [vmem:[#allocation24_spill] sm:$0xff] }
 0x388   :  { %v4146_v57 = vsel %vm502_vm6, %v15025_v13, %v15023_v60  ;;  %v15027_v42 = vrot.slane %v15026_v14, 6  ;;  %v4566_v23 = vsel %vm241_vm3, %v4562_v15, %v4539_v25  ;;  %v12430_v27 = vadd.f32 %v4629_v41, %v12092_v53  ;;  %v15032_v60 = vld [vmem:[#allocation16_spill] sm:$0xff] }
 0x389   :  { %v12433_v20 = vadd.f32 %v4655_v24, %v12035_v3  ;;  %v15031_v19 = vrot.slane %v15030_v36, 7  ;;  %v12442_v17 = vsel %vm781_vm5, %v13871_v33, %v5044_v1  ;;  %v13870_v15 = vrot.slane %v12417_v0, 6  ;;  %v12447_v3 = vpop.permute.xlu1 %5175  ;;  %5309 = vrot.lane.b32.xlu0 %v11685_v55, %s6233_s20  ;;  %v6071_v33 = vld [vmem:[#allocation6 + $0x49] ss:$0 sm:$0xff] }
 0x38a   :  { %v4364_v30 = vsel %vm781_vm5, %v15029_v61, %v15027_v42  ;;  %v15033_v53 = vrot.slane %v15032_v60, 6  ;;  %v4155_v56 = vadd.f32 %v4146_v57, %v4017_v35  ;;  %v15034_v24 = vrot.slane %v11906_v62, 6  ;;  %v4543_v42 = vpop.permute.xlu0 %4542  ;;  %v15037_v57 = vld [vmem:[#allocation33_spill] sm:$0xff]  ;;  %v15039_v61 = vld [vmem:[#allocation50_spill] sm:$0xff]  ;;  %v15041_v60 = vld [vmem:[#allocation51_spill] sm:$0xff] }
 0x38b   :  { %v4153_v54 = vadd.f32 %v15031_v19, %v4015_v21  ;;  %v4371_v38 = vadd.f32 %v4364_v30, %v4211_v51  ;;  %v15035_v21 = vld [vmem:[#allocation20_spill] sm:$0xff]  ;;  %v12456_v25 = vmul.f32 %v12424_v8, %v12067_v44  ;;  %v12460_v14 = vmul.f32 %v12426_v43, %v12067_v44 }
 0x38c   :  { %v4369_v41 = vadd.f32 %v15033_v53, %v4209_v11  ;;  %v15036_v51 = vrot.slane %v15035_v21, 6  ;;  %v12465_v11 = vsel %vm781_vm5, %v5044_v1, %v13870_v15  ;;  %v4640_v62 = vmul.f32 %v11811_v58, %v12182_v12 }
 0x38d   :  { %v4666_v35 = vmul.f32 %v11813_v29, %v12182_v12  ;;  %v15038_v40 = vrot.slane %v15037_v57, 7  ;;  %v15040_v30 = vrot.slane %v15039_v61, 7  ;;  %v4568_v19 = vsel %vm241_vm3, %v4564_v52, %v4543_v42  ;;  %v12493_v42 = vpop.permute.xlu1 %5179 }
 0x38e   :  { %v4412_v13 = vsel %vm781_vm5, %v15036_v51, %v15034_v24  ;;  %v15042_v53 = vrot.slane %v15041_v60, 7  ;;  %v12483_v1 = vmul.f32 %v12424_v8, %v12099_v7  ;;  %v12487_v12 = vmul.f32 %v12426_v43, %v12099_v7  ;;  %v15043_v51 = vld [vmem:[#allocation35_spill] sm:$0xff] }
 0x38f   :  { %v4258_v36 = vsel %vm502_vm6, %v15040_v30, %v15038_v40  ;;  %v4419_v21 = vadd.f32 %v4412_v13, %v4371_v38  ;;  %v15044_v57 = vrot.slane %v15043_v51, 6  ;;  %v4642_v52 = vmul.f32 %v11811_v58, %v12221_v63  ;;  %v4551_v30 = vpop.permute.xlu0 %4550 }
 0x390   :  { %v4265_v24 = vadd.f32 %v15042_v53, %v4153_v54  ;;  %v12495_v54 = vld [vmem:[#allocation6 + $0x3e] ss:$0 sm:$0xff]  ;;  %v4906_v28 = vrot.slane %v12456_v25, 7  ;;  %v4267_v13 = vadd.f32 %v4258_v36, %v4155_v56  ;;  %v4668_v61 = vmul.f32 %v11813_v29, %v12221_v63 }
 0x391   :  { %v4417_v40 = vadd.f32 %v15044_v57, %v4369_v41  ;;  %v12503_v60 = vmul.f32 %v12495_v54, %v12099_v7  ;;  %v12506_v58 = vsel %vm246_vm4, %v4566_v23, %v4551_v30  ;;  %v4910_v63 = vrot.slane %v12483_v1, 7 }
 0x392   :  { %v4670_v53 = vadd.f32 %v4666_v35, %v4265_v24  ;;  %v4692_v51 = vmul.f32 %v12048_v48, %v12506_v58  ;;  %v4718_v25 = vmul.f32 %v12059_v47, %v12506_v58  ;;  %v4897_v56 = vmul.f32 %v12424_v8, %v12506_v58  ;;  %v12520_v35 = vpop.permute.xlu1 %5187 }
 0x393   :  { %v4644_v41 = vadd.f32 %v4640_v62, %v4417_v40  ;;  %v4953_v29 = vmul.f32 %v12426_v43, %v12506_v58  ;;  %v4966_v23 = vrot.slane %v12487_v12, 7  ;;  %v4646_v62 = vadd.f32 %v4642_v52, %v4419_v21  ;;  %v4555_v15 = vpop.permute.xlu0 %4554 }
 0x394   :  { %v4679_v36 = vmul.f32 %v12061_v50, %v12506_v58  ;;  %v4672_v24 = vadd.f32 %v4668_v61, %v4267_v13  ;;  %v4722_v40 = vadd.f32 %v4718_v25, %v4670_v53  ;;  %v4905_v30 = vrot.slane %v4897_v56, 7 }
 0x395   :  { %v4696_v57 = vadd.f32 %v4692_v51, %v4644_v41  ;;  %v4961_v38 = vrot.slane %v4953_v29, 7  ;;  %v12525_v16 = vsel %vm246_vm4, %v4568_v19, %v4555_v15  ;;  %v12528_v55 = vmul.f32 %v6071_v33, %v12506_v58 }
 0x396   :  { %v12531_v21 = vadd.f32 %v4679_v36, %v12384_v34  ;;  %v15045_v1 = vrot.slane %v12189_v37, 7  ;;  %v15046_v52 = vrot.slane %v12193_v10, 7  ;;  %v4907_v61 = vsel %vm502_vm6, %v4905_v30, %v4906_v28  ;;  %v12549_v53 = vpop.permute.xlu1 %5191 }
 0x397   :  { %v4694_v41 = vmul.f32 %v12048_v48, %v12525_v16  ;;  %v4917_v15 = vadd.f32 %v4907_v61, %v12239_v39  ;;  %v4720_v19 = vmul.f32 %v12059_v47, %v12525_v16  ;;  %v4899_v34 = vmul.f32 %v12424_v8, %v12525_v16  ;;  %15047 = vst [vmem:[#allocation36_spill] sm:$0xff] %v12549_v53  ;;  %v4575_v56 = vpop.permute.xlu0 %4574  ;;  %v12554_v39 = vld [vmem:[#allocation6 + $0x40] ss:$0 sm:$0xff]  ;;  %v15075_v53 = vld [vmem:[#allocation21_spill] sm:$0xff] }
 0x398   :  { %v4804_v12 = vadd.f32 %v15045_v1, %v4696_v57  ;;  %v4860_v13 = vadd.f32 %v15046_v52, %v4722_v40  ;;  %v12547_v37 = vmul.f32 %v12426_v43, %v12525_v16  ;;  %v5110_v48 = vmul.f32 %v6071_v33, %v12067_v44  ;;  %v12560_v57 = vld [vmem:[#allocation6 + $0x45] ss:$0 sm:$0xff]  ;;  %v15050_v40 = vld [vmem:[#allocation38_spill] sm:$0xff]  ;;  %v15052_v52 = vld [vmem:[#allocation40_spill] sm:$0xff] }
 0x399   :  { %v4698_v25 = vadd.f32 %v4694_v41, %v4646_v62  ;;  %v4724_v29 = vadd.f32 %v4720_v19, %v4672_v24  ;;  %v4908_v47 = vrot.slane %v4899_v34, 7  ;;  %v15049_v36 = vrot.slane %v12460_v14, 7  ;;  %v12571_v24 = vld [vmem:[#allocation6 + $0x4a] ss:$0 sm:$0xff]  ;;  %v15054_v61 = vld [vmem:[#allocation39_spill] sm:$0xff] }
 0x39a   :  { %v4916_v10 = vadd.f32 %v4905_v30, %v4804_v12  ;;  %v12551_v51 = vadd.f32 %v4961_v38, %v4860_v13  ;;  %v13873_v43 = vrot.slane %v12528_v55, 6  ;;  %v15051_v30 = vrot.slane %v15050_v40, 6  ;;  %v12577_v19 = vpop.permute.xlu1 %5199  ;;  %v15057_v40 = vld [vmem:[#allocation30_spill] sm:$0xff] }
 0x39b   :  { %v4963_v8 = vsel %vm502_vm6, %v4961_v38, %v15049_v36  ;;  %v4806_v62 = vadd.f32 %v12288_v5, %v4698_v25  ;;  %v13872_v12 = vrot.slane %v12547_v37, 7  ;;  %v12574_v41 = vadd.f32 %v15054_v61, %v4724_v29  ;;  %15055 = vst [vmem:[#allocation29_spill] sm:$0xff] %v12577_v19  ;;  %v12589_v61 = vld [vmem:[#allocation6 + $0x43] ss:$0 sm:$0xff] }
 0x39c   :  { %15048 = vst [vmem:[#allocation18_spill] sm:$0xff] %v12551_v51  ;;  %v12564_v1 = vadd.f32 %v15051_v30, %v4916_v10  ;;  %v12569_v13 = vadd.f32 %v4963_v8, %v15052_v52  ;;  %v4909_v38 = vsel %vm502_vm6, %v4906_v28, %v4908_v47  ;;  %v4911_v34 = vsel %vm502_vm6, %v4908_v47, %v4910_v63  ;;  %v15056_v10 = vld [vmem:[#allocation52_spill] sm:$0xff]  ;;  %v4579_v8 = vpop.permute.xlu0 %4578  ;;  %v15058_v30 = vld [vmem:[#allocation14_spill] sm:$0xff] }
 0x39d   :  { %v5077_v36 = vadd.f32 %v15056_v10, %v4917_v15  ;;  %v12583_v5 = vmul.f32 %v12554_v39, %v15057_v40  ;;  %v4918_v25 = vadd.f32 %v4909_v38, %v4806_v62  ;;  %v4919_v52 = vadd.f32 %v4911_v34, %v15058_v30  ;;  %15059 = vst [vmem:[#allocation57_spill] sm:$0xff] %v12589_v61  ;;  %v6070_v34 = vld [vmem:[#allocation6 + $0x48] ss:$0 sm:$0xff] }
 0x39e   :  { %15053 = vst [vmem:[#allocation44_spill] sm:$0xff] %v12569_v13  ;;  %v4967_v29 = vsel %vm502_vm6, %v13872_v12, %v4966_v23  ;;  %v12594_v63 = vmul.f32 %v12560_v57, %v15057_v40  ;;  %v5116_v15 = vrot.slane %v5110_v48, 6  ;;  %v12598_v47 = vmul.f32 %v12571_v24, %v15057_v40  ;;  %v12608_v10 = vpop.permute.xlu1 %5203 }
 0x39f   :  { %v12601_v62 = vadd.f32 %v4967_v29, %v12338_v18  ;;  %v5078_v38 = vadd.f32 %v12364_v6, %v4918_v25  ;;  %v12606_v23 = vmul.f32 %v12495_v54, %v12067_v44  ;;  %15061 = vst [vmem:[#allocation31_spill] sm:$0xff] %v12608_v10  ;;  %v15062_v30 = vrot.slane %v12278_v26, 6  ;;  %v15063_v18 = vld [vmem:[#allocation32_spill] sm:$0xff] }
 0x3a0   :  { %v5111_v48 = vmul.f32 %v6071_v33, %v12525_v16  ;;  %v5117_v40 = vsel %vm781_vm5, %v13873_v43, %v5116_v15  ;;  %v4705_v29 = vmul.f32 %v15063_v18, %v12506_v58  ;;  %v4587_v28 = vpop.permute.xlu0 %4586  ;;  %v12623_v51 = vmul.f32 %v12495_v54, %v12506_v58 }
 0x3a1   :  { %15060 = vst [vmem:[#allocation55_spill] sm:$0xff] %v12601_v62  ;;  %v5079_v12 = vadd.f32 %v15062_v30, %v4919_v52  ;;  %v12619_v25 = vadd.f32 %v5117_v40, %v5077_v36  ;;  %v4926_v26 = vmul.f32 %v12589_v61, %v12067_v44  ;;  %v6139_v52 = vld [vmem:[#allocation2 + $0xc0] sm:$0xff]  ;;  %v12630_v62 = vmul.f32 %v6070_v34, %v12067_v44 }
 0x3a2   :  { %v4610_v30 = vsel %vm236_vm2, %v6139_v52, %v4575_v56  ;;  %v5118_v43 = vrot.slane %v5111_v48, 6  ;;  %v12635_v40 = vmul.f32 %v12554_v39, %v12335_v31  ;;  %v12639_v6 = vmul.f32 %v12560_v57, %v12335_v31  ;;  %v12645_v56 = vpop.permute.xlu1 %5223  ;;  %v6140_v52 = vld [vmem:[#allocation2 + $0xd0] sm:$0xff] }
 0x3a3   :  { %15064 = vst [vmem:[#allocation19_spill] sm:$0xff] %v12619_v25  ;;  %v4614_v25 = vsel %vm241_vm3, %v4610_v30, %v4587_v28  ;;  %15066 = vst [vmem:[#allocation27_spill] sm:$0xff] %v12645_v56  ;;  %v4709_v44 = vadd.f32 %v4705_v29, %v12388_v4  ;;  %v4878_v48 = vrot.slane %v12606_v23, 7  ;;  %v4612_v36 = vsel %vm236_vm2, %v6140_v52, %v4579_v8 }
 0x3a4   :  { %v5119_v33 = vsel %vm781_vm5, %v5116_v15, %v5118_v43  ;;  %v12643_v13 = vadd.f32 %v5118_v43, %v5079_v12  ;;  %v4591_v7 = vpop.permute.xlu0 %4590  ;;  %v4877_v31 = vrot.slane %v12623_v51, 7  ;;  %v4934_v19 = vrot.slane %v4926_v26, 7 }
 0x3a5   :  { %v12650_v10 = vadd.f32 %v5119_v33, %v5078_v38  ;;  %v4616_v28 = vsel %vm241_vm3, %v4612_v36, %v4591_v7  ;;  %v4925_v43 = vmul.f32 %v12589_v61, %v12506_v58  ;;  %v12657_v12 = vmul.f32 %v6070_v34, %v12506_v58 }
 0x3a6   :  { %15065 = vst [vmem:[#allocation13_spill] sm:$0xff] %v12643_v13  ;;  %v5092_v4 = vrot.slane %v12630_v62, 6  ;;  %v4879_v15 = vsel %vm502_vm6, %v4877_v31, %v4878_v48  ;;  %v4681_v8 = vmul.f32 %v12061_v50, %v12525_v16  ;;  %v4707_v38 = vmul.f32 %v15063_v18, %v12525_v16  ;;  %v12667_v7 = vpop.permute.xlu1 %5227 }
 0x3a7   :  { %15067 = vst [vmem:[#allocation43_spill] sm:$0xff] %v12650_v10  ;;  %v4871_v51 = vmul.f32 %v12495_v54, %v12525_v16  ;;  %15068 = vst [vmem:[#allocation34_spill] sm:$0xff] %v12667_v7  ;;  %v4889_v23 = vadd.f32 %v4879_v15, %v12341_v2  ;;  %v4933_v29 = vrot.slane %v4925_v43, 7  ;;  %v13875_v58 = vrot.slane %v12657_v12, 6  ;;  %v15069_v15 = vld [vmem:[#allocation28_spill] sm:$0xff] }
 0x3a8   :  { %v12673_v62 = vmul.f32 %v12589_v61, %v12525_v16  ;;  %v4599_v26 = vpop.permute.xlu0 %4598  ;;  %v4685_v50 = vadd.f32 %v4681_v8, %v12430_v27  ;;  %v4711_v33 = vadd.f32 %v4707_v38, %v12433_v20  ;;  %v12678_v30 = vmul.f32 %v6070_v34, %v12525_v16 }
 0x3a9   :  { %v4880_v18 = vrot.slane %v4871_v51, 7  ;;  %v4935_v54 = vsel %vm502_vm6, %v4933_v29, %v4934_v19  ;;  %v5093_v2 = vsel %vm781_vm5, %v13875_v58, %v5092_v4  ;;  %v4618_v36 = vsel %vm246_vm4, %v4614_v25, %v4599_v26 }
 0x3aa   :  { %v4945_v43 = vadd.f32 %v4935_v54, %v12343_v9  ;;  %v4731_v27 = vmul.f32 %v12261_v32, %v4618_v36  ;;  %v4744_v20 = vmul.f32 %v15069_v15, %v4618_v36  ;;  %v4981_v8 = vmul.f32 %v12554_v39, %v4618_v36  ;;  %v12692_v38 = vpop.permute.xlu1 %5235 }
 0x3ab   :  { %v5009_v16 = vmul.f32 %v12560_v57, %v4618_v36  ;;  %v5133_v34 = vmul.f32 %v12571_v24, %v4618_v36  ;;  %15070 = vst [vmem:[#allocation49_spill] sm:$0xff] %v12692_v38  ;;  %v4881_v51 = vsel %vm502_vm6, %v4878_v48, %v4880_v18  ;;  %v15071_v25 = vrot.slane %v12503_v60, 7  ;;  %v15073_v48 = vld [vmem:[#allocation58_spill] sm:$0xff] }
 0x3ac   :  { %v4994_v9 = vrot.slane %v12635_v40, 7  ;;  %v4735_v54 = vadd.f32 %v4731_v27, %v12531_v21  ;;  %v4748_v58 = vadd.f32 %v4744_v20, %v4709_v44  ;;  %v4989_v52 = vrot.slane %v4981_v8, 7  ;;  %v4603_v10 = vpop.permute.xlu0 %4602 }
 0x3ad   :  { %v4883_v26 = vsel %vm502_vm6, %v4880_v18, %v15071_v25  ;;  %v5017_v13 = vrot.slane %v5009_v16, 7  ;;  %v5139_v56 = vrot.slane %v5133_v34, 6  ;;  %v15072_v36 = vrot.slane %v12673_v62, 7 }
 0x3ae   :  { %v4891_v7 = vadd.f32 %v4883_v26, %v12379_v22  ;;  %v15074_v61 = vrot.slane %v15073_v48, 7  ;;  %v15076_v18 = vrot.slane %v15075_v53, 7  ;;  %v15077_v40 = vrot.slane %v12583_v5, 7  ;;  %v12719_v16 = vpop.permute.xlu1 %5239 }
 0x3af   :  { %v4937_v38 = vsel %vm502_vm6, %v4934_v19, %v15072_v36  ;;  %v5094_v44 = vrot.slane %v12678_v30, 6  ;;  %v15078_v20 = vrot.slane %v12594_v63, 7  ;;  %v15079_v8 = vrot.slane %v12598_v47, 6 }
 0x3b0   :  { %v4776_v60 = vadd.f32 %v15074_v61, %v4735_v54  ;;  %v4832_v25 = vadd.f32 %v15076_v18, %v4748_v58  ;;  %v4991_v21 = vsel %vm502_vm6, %v4989_v52, %v15077_v40  ;;  %v4620_v61 = vsel %vm246_vm4, %v4616_v28, %v4603_v10  ;;  %v12724_v30 = vpop.permute.xlu0 %5161 }
 0x3b1   :  { %v5001_v27 = vadd.f32 %v4991_v21, %v4889_v23  ;;  %v5019_v22 = vsel %vm502_vm6, %v5017_v13, %v15078_v20  ;;  %v5141_v19 = vsel %vm781_vm5, %v5139_v56, %v15079_v8  ;;  %v5095_v26 = vsel %vm781_vm5, %v5092_v4, %v5094_v44 }
 0x3b2   :  { %v4888_v53 = vadd.f32 %v4877_v31, %v4776_v60  ;;  %v4944_v58 = vadd.f32 %v4933_v29, %v4832_v25  ;;  %v12721_v34 = vadd.f32 %v5019_v22, %v4945_v43  ;;  %v4733_v54 = vmul.f32 %v12261_v32, %v4620_v61  ;;  %v12734_v25 = vpop.permute.xlu1 %5247 }
 0x3b3   :  { %v5053_v23 = vadd.f32 %v12442_v17, %v5001_v27  ;;  %v4746_v36 = vmul.f32 %v15069_v15, %v4620_v61  ;;  %v4983_v48 = vmul.f32 %v12554_v39, %v4620_v61  ;;  %v5011_v31 = vmul.f32 %v12560_v57, %v4620_v61 }
 0x3b4   :  { %v5000_v18 = vadd.f32 %v4989_v52, %v4888_v53  ;;  %v12730_v10 = vadd.f32 %v5017_v13, %v4944_v58  ;;  %v5135_v28 = vmul.f32 %v12571_v24, %v4620_v61  ;;  %v4737_v43 = vadd.f32 %v4733_v54, %v4685_v50  ;;  %v12739_v52 = vpop.permute.xlu0 %5165 }
 0x3b5   :  { %v5101_v29 = vadd.f32 %v5093_v2, %v5053_v23  ;;  %v4750_v4 = vadd.f32 %v4746_v36, %v4711_v33  ;;  %v4992_v60 = vrot.slane %v4983_v48, 7  ;;  %v5022_v17 = vrot.slane %v12639_v6, 7 }
 0x3b6   :  { %15080 = vst [vmem:[#allocation26_spill] sm:$0xff] %v12730_v10  ;;  %v15081_v32 = vrot.slane %v12391_v46, 6  ;;  %v5020_v40 = vrot.slane %v5011_v31, 7  ;;  %v5142_v39 = vrot.slane %v5135_v28, 6  ;;  %v4778_v57 = vadd.f32 %v12403_v49, %v4737_v43  ;;  %v15094_v31 = vld [vmem:[#allocation29_spill] sm:$0xff] }
 0x3b7   :  { %v12741_v13 = vadd.f32 %v5141_v19, %v5101_v29  ;;  %v4834_v24 = vadd.f32 %v12408_v45, %v4750_v4  ;;  %v15082_v50 = vrot.slane %v12583_v5, 7  ;;  %v15083_v2 = vrot.slane %v12657_v12, 6  ;;  %v5252_v19 = vpop.permute.xlu1 %5251  ;;  %v12802_v28 = vld [vmem:[#allocation6 + $0x51] ss:$0 sm:$0xff]  ;;  %v12806_v29 = vld [vmem:[#allocation6 + $0x5b] ss:$0 sm:$0xff] }
 0x3b8   :  { %v5052_v15 = vadd.f32 %v15081_v32, %v5000_v18  ;;  %v4995_v46 = vsel %vm502_vm6, %v4992_v60, %v4994_v9  ;;  %v15084_v21 = vmov %v15078_v20  ;;  %v12755_v20 = vsel %vm502_vm6, %v5020_v40, %v5022_v17  ;;  %v12762_v12 = vpop.permute.xlu0 %5173  ;;  %v12794_v18 = vld [vmem:[#allocation6 + $0x60] ss:$0 sm:$0xff]  ;;  %v15098_v17 = vld [vmem:[#allocation57_spill] sm:$0xff] }
 0x3b9   :  { %v4993_v33 = vsel %vm502_vm6, %v15082_v50, %v4992_v60  ;;  %v5021_v27 = vsel %vm502_vm6, %v15084_v21, %v5020_v40  ;;  %v4890_v22 = vadd.f32 %v4881_v51, %v4778_v57  ;;  %v4946_v49 = vadd.f32 %v4937_v38, %v4834_v24  ;;  %v15097_v60 = vld [vmem:[#allocation46_spill] sm:$0xff] }
 0x3ba   :  { %v5100_v6 = vadd.f32 %v15083_v2, %v5052_v15  ;;  %v5003_v8 = vadd.f32 %v4995_v46, %v4891_v7  ;;  %v15085_v45 = vrot.slane %v12598_v47, 6  ;;  %v15087_v63 = vrot.slane %v12528_v55, 6  ;;  %v15092_v55 = vld [vmem:[#allocation54_spill] sm:$0xff] }
 0x3bb   :  { %v5002_v53 = vadd.f32 %v4993_v33, %v4890_v22  ;;  %v12769_v58 = vadd.f32 %v5021_v27, %v4946_v49  ;;  %v15089_v38 = vrot.slane %v12417_v0, 6  ;;  %v5212_v47 = vsel %vm236_vm2, %v12394_v59, %v12493_v42  ;;  %v5260_v48 = vpop.permute.xlu1 %5259  ;;  %v15100_v21 = vld [vmem:[#allocation34_spill] sm:$0xff]  ;;  %v12851_v49 = vld [vmem:[#allocation6 + $0x55] ss:$0 sm:$0xff] }
 0x3bc   :  { %v5143_v5 = vsel %vm781_vm5, %v15085_v45, %v5142_v39  ;;  %v12760_v61 = vadd.f32 %v5139_v56, %v5100_v6  ;;  %v12767_v9 = vadd.f32 %v15087_v63, %v12564_v1  ;;  %v15090_v56 = vrot.slane %v12547_v37, 7  ;;  %v12790_v42 = vpop.permute.xlu0 %5177  ;;  %v15093_v37 = vld [vmem:[#allocation36_spill] sm:$0xff]  ;;  %v15101_v63 = vld [vmem:[#allocation49_spill] sm:$0xff] }
 0x3bd   :  { %15088 = vst [vmem:[#allocation45_spill] sm:$0xff] %v12769_v58  ;;  %v5055_v7 = vadd.f32 %v15089_v38, %v5003_v8  ;;  %v15091_v51 = vrot.slane %v12460_v14, 7  ;;  %v5210_v1 = vsel %vm236_vm2, %v15092_v55, %v12447_v3  ;;  %v5054_v54 = vadd.f32 %v12465_v11, %v5002_v53  ;;  %v15102_v53 = vld [vmem:[#allocation27_spill] sm:$0xff]  ;;  %v12866_v55 = vld [vmem:[#allocation6 + $0x4b] ss:$0 sm:$0xff] }
 0x3be   :  { %15086 = vst [vmem:[#allocation23_spill] sm:$0xff] %v12760_v61  ;;  %v5214_v59 = vsel %vm241_vm3, %v5210_v1, %v12520_v35  ;;  %v5216_v14 = vsel %vm241_vm3, %v5212_v47, %v15093_v37  ;;  %v12808_v35 = vld [vmem:[#allocation6 + $0x4c] ss:$0 sm:$0xff]  ;;  %v4928_v32 = vmul.f32 %v15098_v17, %v15097_v60  ;;  %v5272_v27 = vsel %vm236_vm2, %v15100_v21, %v12719_v16  ;;  %v12868_v1 = vld [vmem:[#allocation6 + $0x50] ss:$0 sm:$0xff] }
 0x3bf   :  { %v4965_v23 = vsel %vm502_vm6, %v15091_v51, %v15090_v56  ;;  %v5103_v36 = vadd.f32 %v5094_v44, %v5055_v7  ;;  %v12798_v3 = vsel %vm246_vm4, %v5214_v59, %v15094_v31  ;;  %v5102_v11 = vadd.f32 %v5095_v26, %v5054_v54  ;;  %v5264_v4 = vpop.permute.xlu1 %5263  ;;  %v15099_v26 = vld [vmem:[#allocation31_spill] sm:$0xff]  ;;  %v15103_v56 = vld [vmem:[#allocation44_spill] sm:$0xff] }
 0x3c0   :  { %v12786_v0 = vadd.f32 %v4965_v23, %v12574_v41  ;;  %15095 = vst [vmem:[#allocation41_spill] sm:$0xff] %v12798_v3  ;;  %v12804_v41 = vld [vmem:[#allocation6 + $0x56] ss:$0 sm:$0xff]  ;;  %v12816_v15 = vmul.f32 %v12794_v18, %v12798_v3  ;;  %v12820_v40 = vsel %vm246_vm4, %v5216_v14, %v15099_v26  ;;  %v5374_v57 = vmul.f32 %v12802_v28, %v12798_v3  ;;  %v15104_v54 = vld [vmem:[#allocation19_spill] sm:$0xff]  ;;  %v12886_v26 = vld [vmem:[#allocation6 + $0x58] ss:$0 sm:$0xff] }
 0x3c1   :  { %v12800_v44 = vadd.f32 %v5142_v39, %v5103_v36  ;;  %v12810_v43 = vadd.f32 %v5143_v5, %v5102_v11  ;;  %v12822_v39 = vpop.permute.xlu0 %5185  ;;  %v12828_v24 = vmul.f32 %v12804_v41, %v12798_v3  ;;  %v12832_v50 = vmul.f32 %v12806_v29, %v12798_v3  ;;  %v12872_v37 = vld [vmem:[#allocation6 + $0x62] ss:$0 sm:$0xff]  ;;  %v12881_v11 = vld [vmem:[#allocation6 + $0x5a] ss:$0 sm:$0xff]  ;;  %15109 = vst [vmem:[#allocation42_spill] sm:$0xff] %v12886_v26 }
 0x3c2   :  { %v5348_v33 = vmul.f32 %v12808_v35, %v12798_v3  ;;  %v5376_v2 = vmul.f32 %v12802_v28, %v12820_v40  ;;  %v12840_v6 = vmul.f32 %v12804_v41, %v12820_v40  ;;  %v12844_v46 = vmul.f32 %v12806_v29, %v12820_v40  ;;  %15105 = vst [vmem:[#allocation48_spill] sm:$0xff] %v12872_v37  ;;  %v12936_v17 = vld [vmem:[#allocation6 + $0x4d] ss:$0 sm:$0xff] }
 0x3c3   :  { %15096 = vst [vmem:[#allocation15_spill] sm:$0xff] %v12810_v43  ;;  %v12849_v22 = vpop.permute.xlu1 %5283  ;;  %v4938_v8 = vrot.slane %v4928_v32, 7  ;;  %v5350_v5 = vmul.f32 %v12808_v35, %v12820_v40  ;;  %v5270_v38 = vsel %vm236_vm2, %v15102_v53, %v15101_v63  ;;  %v5378_v51 = vadd.f32 %v5374_v57, %v15103_v56  ;;  %v12896_v63 = vld [vmem:[#allocation6 + $0x53] ss:$0 sm:$0xff]  ;;  %v12898_v53 = vld [vmem:[#allocation6 + $0x5d] ss:$0 sm:$0xff] }
 0x3c4   :  { %v5274_v23 = vsel %vm241_vm3, %v5270_v38, %v12734_v25  ;;  %v5352_v36 = vadd.f32 %v5348_v33, %v15104_v54  ;;  %v5276_v59 = vsel %vm241_vm3, %v5272_v27, %v5252_v19  ;;  %v12879_v31 = vmul.f32 %v12851_v49, %v12798_v3  ;;  %v15108_v25 = vld [vmem:[#allocation55_spill] sm:$0xff]  ;;  %v15111_v33 = vld [vmem:[#allocation13_spill] sm:$0xff]  ;;  %v12894_v27 = vld [vmem:[#allocation6 + $0x4e] ss:$0 sm:$0xff]  ;;  %15112 = vst [vmem:[#allocation56_spill] sm:$0xff] %v12898_v53 }
 0x3c5   :  { %v12859_v7 = vpop.permute.xlu0 %5189  ;;  %v12875_v14 = vsel %vm246_vm4, %v5274_v23, %v5260_v48  ;;  %v5380_v60 = vadd.f32 %v5376_v2, %v15108_v25  ;;  %v15110_v57 = vrot.slane %v12673_v62, 7  ;;  %v5354_v21 = vadd.f32 %v5350_v5, %v15111_v33  ;;  %v15113_v23 = vld [vmem:[#allocation47_spill] sm:$0xff]  ;;  %15117 = vst [vmem:[#allocation22_spill] sm:$0xff] %v12936_v17 }
 0x3c6   :  { %15106 = vst [vmem:[#allocation37_spill] sm:$0xff] %v12875_v14  ;;  %15107 = vst [vmem:[#allocation53_spill] sm:$0xff] %v12879_v31  ;;  %v5335_v38 = vmul.f32 %v12866_v55, %v12798_v3  ;;  %v5361_v56 = vmul.f32 %v12868_v1, %v12798_v3  ;;  %v5209_v62 = vsel %vm236_vm2, %v12724_v30, %v12762_v12 }
 0x3c7   :  { %v12888_v19 = vpop.permute.xlu1 %5287  ;;  %v4939_v48 = vsel %vm502_vm6, %v15110_v57, %v4938_v8  ;;  %v12910_v8 = vmul.f32 %v12872_v37, %v12875_v14  ;;  %v5280_v5 = vsel %vm246_vm4, %v5276_v59, %v5264_v4  ;;  %v12915_v25 = vmul.f32 %v12881_v11, %v12798_v3  ;;  %v12928_v59 = vld [vmem:[#allocation6 + $0x57] ss:$0 sm:$0xff] }
 0x3c8   :  { %v4947_v54 = vadd.f32 %v4939_v48, %v15113_v23  ;;  %v12919_v57 = vmul.f32 %v12886_v26, %v12875_v14  ;;  %v5339_v33 = vadd.f32 %v5335_v38, %v12741_v13  ;;  %v5365_v30 = vadd.f32 %v5361_v56, %v12721_v34  ;;  %15116 = vst [vmem:[#allocation25_spill] sm:$0xff] %v12928_v59  ;;  %v12938_v48 = vld [vmem:[#allocation6 + $0x52] ss:$0 sm:$0xff]  ;;  %v12946_v38 = vld [vmem:[#allocation6 + $0x5c] ss:$0 sm:$0xff] }
 0x3c9   :  { %v5198_v2 = vpop.permute.xlu0 %5197  ;;  %15114 = vst [vmem:[#allocation12_spill] sm:$0xff] %v12910_v8  ;;  %v5400_v12 = vmul.f32 %v12894_v27, %v12875_v14  ;;  %v5426_v4 = vmul.f32 %v12896_v63, %v12875_v14  ;;  %v12932_v23 = vmul.f32 %v12898_v53, %v12875_v14  ;;  %15118 = vst [vmem:[#allocation24_spill] sm:$0xff] %v12938_v48 }
 0x3ca   :  { %15115 = vst [vmem:[#allocation17_spill] sm:$0xff] %v12919_v57  ;;  %v12941_v34 = vadd.f32 %v12755_v20, %v4947_v54  ;;  %v5211_v13 = vsel %vm236_vm2, %v12739_v52, %v12790_v42  ;;  %15119 = vst [vmem:[#allocation16_spill] sm:$0xff] %v12946_v38  ;;  %v5402_v56 = vmul.f32 %v12894_v27, %v5280_v5 }
 0x3cb   :  { %v12934_v32 = vpop.permute.xlu1 %5295  ;;  %v5428_v45 = vmul.f32 %v12896_v63, %v5280_v5  ;;  %v12951_v16 = vmul.f32 %v12928_v59, %v5280_v5  ;;  %v12955_v43 = vmul.f32 %v12886_v26, %v5280_v5  ;;  %v12958_v20 = vmul.f32 %v12946_v38, %v5280_v5 }
 0x3cc   :  { %v12961_v52 = vmul.f32 %v12898_v53, %v5280_v5  ;;  %v5213_v54 = vsel %vm241_vm3, %v5209_v62, %v12822_v39  ;;  %v5387_v3 = vmul.f32 %v12936_v17, %v12875_v14  ;;  %v5413_v58 = vmul.f32 %v12938_v48, %v12875_v14 }
 0x3cd   :  { %15120 = vst [vmem:[#allocation20_spill] sm:$0xff] %v12951_v16  ;;  %v5202_v47 = vpop.permute.xlu0 %5201  ;;  %15121 = vst [vmem:[#allocation33_spill] sm:$0xff] %v12955_v43  ;;  %v12971_v10 = vadd.f32 %v5400_v12, %v5352_v36  ;;  %v12973_v61 = vadd.f32 %v5426_v4, %v5378_v51  ;;  %v12976_v37 = vsel %vm246_vm4, %v5213_v54, %v5198_v2  ;;  %v6141_v4 = vld [vmem:[#allocation2 + $0xe8] sm:$0xff] }
 0x3ce   :  { %15122 = vst [vmem:[#allocation50_spill] sm:$0xff] %v12958_v20  ;;  %15123 = vst [vmem:[#allocation51_spill] sm:$0xff] %v12961_v52  ;;  %v12978_v42 = vadd.f32 %v5402_v56, %v5354_v21  ;;  %v12980_v57 = vadd.f32 %v5428_v45, %v5380_v60  ;;  %v5337_v26 = vmul.f32 %v12866_v55, %v12820_v40 }
 0x3cf   :  { %v5300_v53 = vpop.permute.xlu1 %5299  ;;  %v5318_v45 = vsel %vm236_vm2, %v6141_v4, %v12849_v22  ;;  %v5215_v60 = vsel %vm241_vm3, %v5211_v13, %v12859_v7  ;;  %v12997_v21 = vmul.f32 %v12804_v41, %v12976_v37  ;;  %v13001_v56 = vmul.f32 %v12806_v29, %v12976_v37 }
 0x3d0   :  { %v13003_v54 = vadd.f32 %v5387_v3, %v5339_v33  ;;  %v5389_v51 = vmul.f32 %v12936_v17, %v5280_v5  ;;  %v13008_v39 = vmul.f32 %v12851_v49, %v12820_v40  ;;  %v13012_v22 = vmul.f32 %v12881_v11, %v12820_v40 }
 0x3d1   :  { %v12983_v62 = vpop.permute.xlu0 %5221  ;;  %v13014_v7 = vadd.f32 %v5413_v58, %v5365_v30  ;;  %v5363_v4 = vmul.f32 %v12868_v1, %v12820_v40  ;;  %v13021_v3 = vmul.f32 %v12938_v48, %v5280_v5  ;;  %v5341_v33 = vadd.f32 %v5337_v26, %v12800_v44  ;;  %v6142_v40 = vld [vmem:[#allocation2 + $0xf8] sm:$0xff] }
 0x3d2   :  { %v5347_v12 = vmul.f32 %v12808_v35, %v12976_v37  ;;  %v13028_v36 = vmul.f32 %v12794_v18, %v12976_v37  ;;  %v13031_v58 = vsel %vm246_vm4, %v5215_v60, %v5202_v47  ;;  %v13035_v8 = vmul.f32 %v12928_v59, %v12875_v14 }
 0x3d3   :  { %v5308_v30 = vpop.permute.xlu1 %5307  ;;  %v5320_v5 = vsel %vm236_vm2, %v6142_v40, %v12888_v19  ;;  %v13043_v2 = vmul.f32 %v12851_v49, %v12976_v37  ;;  %v13047_v20 = vadd.f32 %v5389_v51, %v5341_v33  ;;  %v13051_v16 = vmul.f32 %v12946_v38, %v12875_v14 }
 0x3d4   :  { %15124 = vst [vmem:[#allocation35_spill] sm:$0xff] %v13028_v36  ;;  %15125 = vst [vmem:[#allocation38_spill] sm:$0xff] %v13035_v8  ;;  %v5373_v19 = vmul.f32 %v12802_v28, %v12976_v37  ;;  %v5494_v40 = vmul.f32 %v12804_v41, %v13031_v58  ;;  %v13059_v26 = vmul.f32 %v12806_v29, %v13031_v58  ;;  %v15128_v48 = vrot.slane %v12828_v24, 7  ;;  %v13096_v41 = vld [vmem:[#allocation6 + $0x54] ss:$0 sm:$0xff]  ;;  %v15132_v8 = vld [vmem:[#allocation18_spill] sm:$0xff] }
 0x3d5   :  { %v13016_v13 = vpop.permute.xlu0 %5225  ;;  %15126 = vst [vmem:[#allocation40_spill] sm:$0xff] %v13043_v2  ;;  %v13063_v47 = vmul.f32 %v12881_v11, %v12976_v37  ;;  %v13068_v33 = vadd.f32 %v5347_v12, %v12767_v9  ;;  %v5322_v44 = vsel %vm241_vm3, %v5318_v45, %v12934_v32  ;;  %v15129_v29 = vrot.slane %v12997_v21, 7 }
 0x3d6   :  { %v15130_v38 = vrot.slane %v12832_v50, 7  ;;  %v15131_v14 = vrot.slane %v13001_v56, 7  ;;  %v5349_v12 = vmul.f32 %v12808_v35, %v13031_v58  ;;  %v5375_v32 = vmul.f32 %v12802_v28, %v13031_v58 }
 0x3d7   :  { %15127 = vst [vmem:[#allocation39_spill] sm:$0xff] %v13063_v47  ;;  %v5502_v17 = vsel %vm502_vm6, %v15129_v29, %v15128_v48  ;;  %v13091_v45 = vmul.f32 %v12794_v18, %v13031_v58  ;;  %v5324_v48 = vsel %vm241_vm3, %v5320_v5, %v5300_v53  ;;  %v13094_v29 = vld [vmem:[#allocation6 + $0x4f] ss:$0 sm:$0xff]  ;;  %v13100_v35 = vadd.f32 %v5373_v19, %v15132_v8  ;;  %v13123_v19 = vld [vmem:[#allocation6 + $0x5e] ss:$0 sm:$0xff] }
 0x3d8   :  { %v5558_v9 = vsel %vm502_vm6, %v15131_v14, %v15130_v38  ;;  %v5326_v14 = vsel %vm246_vm4, %v5322_v44, %v5308_v30  ;;  %v5312_v38 = vpop.permute.xlu1 %5311  ;;  %v5503_v60 = vrot.slane %v5494_v40, 7  ;;  %v5559_v52 = vrot.slane %v13059_v26, 7  ;;  %v13121_v26 = vld [vmem:[#allocation6 + $0x59] ss:$0 sm:$0xff] }
 0x3d9   :  { %v13065_v51 = vpop.permute.xlu0 %5233  ;;  %v13105_v18 = vadd.f32 %v5502_v17, %v12971_v10  ;;  %v13108_v53 = vadd.f32 %v5558_v9, %v12973_v61  ;;  %v15133_v5 = vrot.slane %v12816_v15, 6  ;;  %v15134_v30 = vrot.slane %v13028_v36, 6  ;;  %v13125_v10 = vld [vmem:[#allocation6 + $0x63] ss:$0 sm:$0xff] }
 0x3da   :  { %v13119_v8 = vmul.f32 %v12851_v49, %v13031_v58  ;;  %v5439_v61 = vmul.f32 %v13094_v29, %v5326_v14  ;;  %v5452_v17 = vmul.f32 %v13096_v41, %v5326_v14  ;;  %v5328_v40 = vsel %vm246_vm4, %v5324_v48, %v5312_v38 }
 0x3db   :  { %v13115_v44 = vsel %vm781_vm5, %v15134_v30, %v15133_v5  ;;  %v13132_v9 = vmul.f32 %v12881_v11, %v13031_v58  ;;  %v15136_v5 = vld [vmem:[#allocation43_spill] sm:$0xff]  ;;  %v13138_v49 = vadd.f32 %v5375_v32, %v12786_v0  ;;  %v15137_v36 = vrot.slane %v12879_v31, 7 }
 0x3dc   :  { %15135 = vst [vmem:[#allocation52_spill] sm:$0xff] %v13115_v44  ;;  %v13135_v30 = vadd.f32 %v5349_v12, %v15136_v5  ;;  %v15138_v44 = vrot.slane %v13043_v2, 7  ;;  %v15139_v48 = vrot.slane %v12840_v6, 7  ;;  %v15140_v11 = vrot.slane %v12844_v46, 7 }
 0x3dd   :  { %v5238_v43 = vpop.permute.xlu0 %5237  ;;  %v15141_v5 = vrot.slane %v12915_v25, 7  ;;  %v15142_v0 = vrot.slane %v13063_v47, 7  ;;  %v5367_v28 = vadd.f32 %v5363_v4, %v12941_v34  ;;  %v13159_v2 = vmul.f32 %v13121_v26, %v5326_v14 }
 0x3de   :  { %v5474_v59 = vsel %vm502_vm6, %v15138_v44, %v15137_v36  ;;  %v5506_v38 = vsel %vm502_vm6, %v5503_v60, %v15139_v48  ;;  %v5562_v12 = vsel %vm502_vm6, %v5559_v52, %v15140_v11  ;;  %v13162_v6 = vmul.f32 %v13123_v19, %v5326_v14 }
 0x3df   :  { %v5530_v32 = vsel %vm502_vm6, %v15142_v0, %v15141_v5  ;;  %v13165_v36 = vmul.f32 %v13125_v10, %v5326_v14  ;;  %v5441_v46 = vmul.f32 %v13094_v29, %v5328_v40  ;;  %v5443_v44 = vadd.f32 %v5439_v61, %v13003_v54 }
 0x3e0   :  { %v5456_v48 = vadd.f32 %v5452_v17, %v13014_v7  ;;  %v13908_v11 = vrot.slane %v13119_v8, 7  ;;  %v13907_v34 = vrot.slane %v13132_v9, 7  ;;  %v13173_v4 = vadd.f32 %v5506_v38, %v12978_v42 }
 0x3e1   :  { %v5246_v31 = vpop.permute.xlu0 %5245  ;;  %v15143_v5 = vrot.slane %v13091_v45, 6  ;;  %v15144_v0 = vrot.slane %v12816_v15, 6  ;;  %v5454_v47 = vmul.f32 %v13096_v41, %v5328_v40  ;;  %v15145_v54 = vrot.slane %v12828_v24, 7 }
 0x3e2   :  { %v13189_v61 = vadd.f32 %v5562_v12, %v12980_v57  ;;  %v5419_v42 = vadd.f32 %v13021_v3, %v5367_v28  ;;  %v13193_v17 = vmul.f32 %v13121_v26, %v5328_v40  ;;  %v13196_v15 = vmul.f32 %v13123_v19, %v5328_v40 }
 0x3e3   :  { %v13180_v14 = vsel %vm781_vm5, %v15144_v0, %v15143_v5  ;;  %v13186_v7 = vsel %vm502_vm6, %v15145_v54, %v5503_v60  ;;  %v5445_v60 = vadd.f32 %v5441_v46, %v13047_v20  ;;  %v13202_v54 = vadd.f32 %v5474_v59, %v5443_v44 }
 0x3e4   :  { %v13204_v57 = vadd.f32 %v5530_v32, %v5456_v48  ;;  %v15146_v3 = vrot.slane %v13008_v39, 7  ;;  %v15147_v40 = vrot.slane %v13012_v22, 7  ;;  %v5458_v0 = vadd.f32 %v5454_v47, %v5419_v42 }
 0x3e5   :  { %v5250_v38 = vpop.permute.xlu0 %5249  ;;  %v5269_v59 = vsel %vm236_vm2, %v12983_v62, %v13065_v51  ;;  %v15148_v20 = vrot.slane %v12832_v50, 7  ;;  %v5334_v39 = vmul.f32 %v12866_v55, %v12976_v37  ;;  %v5360_v47 = vmul.f32 %v12868_v1, %v12976_v37 }
 0x3e6   :  { %v5478_v28 = vsel %vm502_vm6, %v13908_v11, %v15146_v3  ;;  %v5534_v12 = vsel %vm502_vm6, %v13907_v34, %v15147_v40  ;;  %v5273_v44 = vsel %vm241_vm3, %v5269_v59, %v5246_v31  ;;  %v5271_v50 = vsel %vm236_vm2, %v13016_v13, %v5238_v43  ;;  %v15149_v3 = vld [vmem:[#allocation42_spill] sm:$0xff]  ;;  %v15151_v13 = vld [vmem:[#allocation48_spill] sm:$0xff] }
 0x3e7   :  { %v5560_v32 = vsel %vm502_vm6, %v15148_v20, %v5559_v52  ;;  %v13229_v42 = vadd.f32 %v5478_v28, %v5445_v60  ;;  %v15150_v60 = vld [vmem:[#allocation56_spill] sm:$0xff]  ;;  %v13245_v59 = vadd.f32 %v5534_v12, %v5458_v0  ;;  %v5275_v43 = vsel %vm241_vm3, %v5271_v50, %v5250_v38  ;;  %v13255_v34 = vld [vmem:[#allocation6 + $0x5f] ss:$0 sm:$0xff] }
 0x3e8   :  { %v15153_v38 = vld [vmem:[#allocation26_spill] sm:$0xff] }
 0x3e9   :  { %v5258_v48 = vpop.permute.xlu0 %5257  ;;  %v13261_v12 = vadd.f32 %v5360_v47, %v15153_v38 }
 0x3ea   :  { %v13234_v52 = vsel %vm246_vm4, %v5273_v44, %v5258_v48  ;;  %v15152_v44 = vld [vmem:[#allocation23_spill] sm:$0xff] }
 0x3eb   :  { %v5399_v51 = vmul.f32 %v12894_v27, %v13234_v52  ;;  %v5425_v31 = vmul.f32 %v12896_v63, %v13234_v52  ;;  %v5604_v40 = vmul.f32 %v15149_v3, %v13234_v52  ;;  %v5660_v28 = vmul.f32 %v15150_v60, %v13234_v52 }
 0x3ec   :  { %v5816_v20 = vmul.f32 %v15151_v13, %v13234_v52  ;;  %v13251_v48 = vadd.f32 %v5334_v39, %v15152_v44  ;;  %v13265_v39 = vmul.f32 %v13255_v34, %v12976_v37 }
 0x3ed   :  { %v5403_v22 = vadd.f32 %v5399_v51, %v13068_v33  ;;  %v5429_v46 = vadd.f32 %v5425_v31, %v13100_v35  ;;  %v5612_v24 = vrot.slane %v5604_v40, 7  ;;  %v5668_v5 = vrot.slane %v5660_v28, 7  ;;  %v5262_v62 = vpop.permute.xlu0 %5261  ;;  %v15156_v31 = vld [vmem:[#allocation17_spill] sm:$0xff] }
 0x3ee   :  { %v5822_v11 = vrot.slane %v5816_v20, 6  ;;  %v13258_v0 = vsel %vm246_vm4, %v5275_v43, %v5262_v62  ;;  %v15154_v33 = vrot.slane %v12997_v21, 7  ;;  %v15155_v35 = vrot.slane %v13001_v56, 7  ;;  %v15159_v21 = vld [vmem:[#allocation25_spill] sm:$0xff] }
 0x3ef   :  { %v15157_v40 = vrot.slane %v15156_v31, 7  ;;  %v15158_v62 = vrot.slane %v12932_v23, 7  ;;  %v5401_v37 = vmul.f32 %v12894_v27, %v13258_v0  ;;  %v5427_v44 = vmul.f32 %v12896_v63, %v13258_v0  ;;  %v15163_v63 = vld [vmem:[#allocation12_spill] sm:$0xff] }
 0x3f0   :  { %v5511_v50 = vadd.f32 %v15154_v33, %v5403_v22  ;;  %v5567_v51 = vadd.f32 %v15155_v35, %v5429_v46  ;;  %v13283_v22 = vmul.f32 %v15159_v21, %v13234_v52  ;;  %v5606_v38 = vmul.f32 %v15149_v3, %v13258_v0 }
 0x3f1   :  { %v5614_v28 = vsel %vm502_vm6, %v5612_v24, %v15157_v40  ;;  %v5670_v43 = vsel %vm502_vm6, %v5668_v5, %v15158_v62  ;;  %v13289_v33 = vpop.permute.xlu0 %5281  ;;  %v5662_v27 = vmul.f32 %v15150_v60, %v13258_v0  ;;  %v15164_v40 = vrot.slane %v15163_v63, 6  ;;  %v13304_v60 = vld [vmem:[#allocation6 + $0x61] ss:$0 sm:$0xff] }
 0x3f2   :  { %v5624_v47 = vadd.f32 %v5614_v28, %v13105_v18  ;;  %v5680_v20 = vadd.f32 %v5670_v43, %v13108_v53  ;;  %v5623_v56 = vadd.f32 %v5612_v24, %v5511_v50  ;;  %v5679_v46 = vadd.f32 %v5668_v5, %v5567_v51  ;;  %v15160_v18 = vld [vmem:[#allocation52_spill] sm:$0xff]  ;;  %v15161_v5 = vld [vmem:[#allocation35_spill] sm:$0xff] }
 0x3f3   :  { %v5405_v53 = vadd.f32 %v5401_v37, %v13135_v30  ;;  %v5818_v24 = vmul.f32 %v15151_v13, %v13258_v0  ;;  %v15162_v50 = vrot.slane %v15161_v5, 6  ;;  %v5824_v3 = vsel %vm781_vm5, %v5822_v11, %v15164_v40  ;;  %v15166_v5 = vld [vmem:[#allocation33_spill] sm:$0xff] }
 0x3f4   :  { %v5784_v35 = vadd.f32 %v15160_v18, %v5624_v47  ;;  %5876 = vst [vmem:[#allocation8 + $0xae] sm:$0xff] %v5680_v20  ;;  %5875 = vst [vmem:[#allocation8 + $0xa6] sm:$0xfc] %v5679_v46  ;;  %v5431_v28 = vadd.f32 %v5427_v44, %v13138_v49  ;;  %v5615_v62 = vrot.slane %v5606_v38, 7  ;;  %v5671_v47 = vrot.slane %v5662_v27, 7  ;;  %v15171_v27 = vld [vmem:[#allocation41_spill] sm:$0xff] }
 0x3f5   :  { %v5783_v51 = vadd.f32 %v15162_v50, %v5623_v56  ;;  %v5513_v30 = vadd.f32 %v13186_v7, %v5405_v53  ;;  %v5825_v20 = vrot.slane %v5818_v24, 6  ;;  %v15165_v18 = vrot.slane %v15156_v31, 7  ;;  %v5286_v40 = vpop.permute.xlu0 %5285 }
 0x3f6   :  { %v5832_v43 = vadd.f32 %v5824_v3, %v5784_v35  ;;  %v5569_v13 = vadd.f32 %v5560_v32, %v5431_v28  ;;  %v15167_v50 = vrot.slane %v15166_v5, 7  ;;  %v15168_v7 = vrot.slane %v12932_v23, 7  ;;  %v15169_v35 = vld [vmem:[#allocation51_spill] sm:$0xff] }
 0x3f7   :  { %v5831_v37 = vadd.f32 %v5822_v11, %v5783_v51  ;;  %v5616_v56 = vsel %vm502_vm6, %v15165_v18, %v5615_v62  ;;  %v15170_v11 = vrot.slane %v15169_v35, 7  ;;  %v13322_v24 = vmul.f32 %v13255_v34, %v15171_v27  ;;  %v15172_v51 = vld [vmem:[#allocation37_spill] sm:$0xff] }
 0x3f8   :  { %v5618_v46 = vsel %vm502_vm6, %v5615_v62, %v15167_v50  ;;  %5866 = vst [vmem:[#allocation8 + $0x7e] sm:$0xff] %v5832_v43  ;;  %v5625_v49 = vadd.f32 %v5616_v56, %v5513_v30  ;;  %v5672_v38 = vsel %vm502_vm6, %v15168_v7, %v5671_v47  ;;  %v13326_v3 = vmul.f32 %v13304_v60, %v15172_v51  ;;  %v15177_v18 = vld [vmem:[#allocation53_spill] sm:$0xff] }
 0x3f9   :  { %v5626_v44 = vadd.f32 %v5618_v46, %v13173_v4  ;;  %v5674_v32 = vsel %vm502_vm6, %v5671_v47, %v15170_v11  ;;  %5865 = vst [vmem:[#allocation8 + $0x76] sm:$0xfc] %v5831_v37  ;;  %v5681_v31 = vadd.f32 %v5672_v38, %v5569_v13  ;;  %v15173_v4 = vrot.slane %v13091_v45, 6  ;;  %v5294_v47 = vpop.permute.xlu0 %5293  ;;  %v15179_v46 = vld [vmem:[#allocation22_spill] sm:$0xff] }
 0x3fa   :  { %v5682_v53 = vadd.f32 %v5674_v32, %v13189_v61  ;;  %v5785_v23 = vadd.f32 %v13180_v14, %v5625_v49  ;;  %v5336_v62 = vmul.f32 %v12866_v55, %v13031_v58  ;;  %v5362_v43 = vmul.f32 %v12868_v1, %v13031_v58  ;;  %v15175_v14 = vld [vmem:[#allocation16_spill] sm:$0xff] }
 0x3fb   :  { %v5786_v28 = vadd.f32 %v15173_v4, %v5626_v44  ;;  %v15174_v61 = vrot.slane %v15163_v63, 6  ;;  %5877 = vst [vmem:[#allocation8 + $0xb6] sm:$0xff] %v5681_v31  ;;  %v5584_v37 = vrot.slane %v13283_v22, 7  ;;  %v13341_v13 = vmul.f32 %v15175_v14, %v13234_v52  ;;  %v15183_v31 = vld [vmem:[#allocation15_spill] sm:$0xff]  ;;  %v15186_v4 = vld [vmem:[#allocation45_spill] sm:$0xff] }
 0x3fc   :  { %5878 = vst [vmem:[#allocation8 + $0xbe] sm:$0x3] %v5682_v53  ;;  %v15176_v45 = vrot.slane %v13119_v8, 7  ;;  %v15178_v55 = vrot.slane %v15177_v18, 7  ;;  %v13352_v5 = vmul.f32 %v13304_v60, %v13234_v52  ;;  %v5578_v50 = vmul.f32 %v15159_v21, %v13258_v0  ;;  %v15182_v21 = vld [vmem:[#allocation24_spill] sm:$0xff] }
 0x3fd   :  { %v5826_v30 = vsel %vm781_vm5, %v15174_v61, %v5825_v20  ;;  %v5834_v63 = vadd.f32 %v5825_v20, %v5786_v28  ;;  %v5386_v49 = vmul.f32 %v15179_v46, %v13234_v52  ;;  %v5750_v44 = vrot.slane %v13265_v39, 6  ;;  %v5298_v53 = vpop.permute.xlu0 %5297 }
 0x3fe   :  { %v13348_v56 = vsel %vm502_vm6, %v15178_v55, %v15176_v45  ;;  %v5833_v1 = vadd.f32 %v5826_v30, %v5785_v23  ;;  %v15180_v8 = vrot.slane %v13132_v9, 7  ;;  %v15181_v7 = vrot.slane %v12915_v25, 7  ;;  %v15184_v25 = vld [vmem:[#allocation38_spill] sm:$0xff]  ;;  %v6143_v30 = vld [vmem:[#allocation2 + $0xe0] sm:$0xff] }
 0x3ff   :  { %v13368_v20 = vmul.f32 %v13255_v34, %v13031_v58  ;;  %5868 = vst [vmem:[#allocation8 + $0x8e] sm:$0x3] %v5834_v63  ;;  %v5412_v35 = vmul.f32 %v15182_v21, %v13234_v52  ;;  %v5751_v11 = vrot.slane %v13322_v24, 6  ;;  %v5799_v32 = vrot.slane %v13326_v3, 6 }
 0x400   :  { %v13364_v38 = vsel %vm502_vm6, %v15181_v7, %v15180_v8  ;;  %5867 = vst [vmem:[#allocation8 + $0x86] sm:$0xff] %v5833_v1  ;;  %v5340_v9 = vadd.f32 %v5336_v62, %v15183_v31  ;;  %v15185_v27 = vrot.slane %v15184_v25, 7  ;;  %v5640_v58 = vrot.slane %v13341_v13, 7  ;;  %v6144_v1 = vld [vmem:[#allocation2 + $0xf0] sm:$0xff] }
 0x401   :  { %v5388_v34 = vmul.f32 %v15179_v46, %v13258_v0  ;;  %v5414_v52 = vmul.f32 %v15182_v21, %v13258_v0  ;;  %v5798_v23 = vrot.slane %v13352_v5, 6  ;;  %v5366_v28 = vadd.f32 %v5362_v43, %v15186_v4  ;;  %v5306_v46 = vpop.permute.xlu0 %5305 }
 0x402   :  { %v5586_v51 = vsel %vm502_vm6, %v5584_v37, %v15185_v27  ;;  %v5587_v62 = vrot.slane %v5578_v50, 7  ;;  %v5634_v61 = vmul.f32 %v15175_v14, %v13258_v0  ;;  %v5317_v45 = vsel %vm236_vm2, %v6143_v30, %v13289_v33 }
 0x403   :  { %v5390_v13 = vadd.f32 %v5386_v49, %v13251_v48  ;;  %v5752_v18 = vsel %vm781_vm5, %v5750_v44, %v5751_v11  ;;  %v5753_v55 = vrot.slane %v13368_v20, 6  ;;  %v5319_v43 = vsel %vm236_vm2, %v6144_v1, %v5286_v40 }
 0x404   :  { %v5321_v63 = vsel %vm241_vm3, %v5317_v45, %v5294_v47  ;;  %v5416_v14 = vadd.f32 %v5412_v35, %v13261_v12  ;;  %v5596_v50 = vadd.f32 %v5586_v51, %v13202_v54  ;;  %v15187_v33 = vrot.slane %v13051_v16, 7  ;;  %v15188_v54 = vld [vmem:[#allocation20_spill] sm:$0xff] }
 0x405   :  { %v5392_v49 = vadd.f32 %v5388_v34, %v5340_v9  ;;  %v5418_v8 = vadd.f32 %v5414_v52, %v5366_v28  ;;  %v13407_v7 = vmul.f32 %v13304_v60, %v13258_v0  ;;  %v5800_v40 = vsel %vm781_vm5, %v5798_v23, %v5799_v32  ;;  %v5310_v1 = vpop.permute.xlu0 %5309 }
 0x406   :  { %v5642_v48 = vsel %vm502_vm6, %v5640_v58, %v15187_v33  ;;  %v5325_v12 = vsel %vm246_vm4, %v5321_v63, %v5306_v46  ;;  %v15189_v47 = vrot.slane %v15188_v54, 7  ;;  %v5643_v35 = vrot.slane %v5634_v61, 7 }
 0x407   :  { %v5438_v31 = vmul.f32 %v13094_v29, %v5325_v12  ;;  %v5451_v9 = vmul.f32 %v13096_v41, %v5325_v12  ;;  %v5688_v0 = vmul.f32 %v13121_v26, %v5325_v12  ;;  %v5716_v60 = vmul.f32 %v13123_v19, %v5325_v12 }
 0x408   :  { %v5590_v21 = vsel %vm502_vm6, %v5587_v62, %v15189_v47  ;;  %v5323_v27 = vsel %vm241_vm3, %v5319_v43, %v5298_v53  ;;  %v5652_v51 = vadd.f32 %v5642_v48, %v13204_v57  ;;  %v5840_v34 = vmul.f32 %v13125_v10, %v5325_v12  ;;  %v15191_v43 = vld [vmem:[#allocation40_spill] sm:$0xff]  ;;  %v15193_v12 = vld [vmem:[#allocation39_spill] sm:$0xff] }
 0x409   :  { %v15190_v52 = vrot.slane %v15184_v25, 7  ;;  %v5442_v28 = vadd.f32 %v5438_v31, %v5390_v13  ;;  %v5455_v61 = vadd.f32 %v5451_v9, %v5416_v14  ;;  %v5696_v30 = vrot.slane %v5688_v0, 7 }
 0x40a   :  { %v5724_v45 = vrot.slane %v5716_v60, 7  ;;  %v5598_v63 = vadd.f32 %v5590_v21, %v13229_v42  ;;  %v5644_v46 = vsel %vm502_vm6, %v15187_v33, %v5643_v35  ;;  %v5801_v53 = vrot.slane %v13407_v7, 6 }
 0x40b   :  { %v5588_v4 = vsel %vm502_vm6, %v15190_v52, %v5587_v62  ;;  %v5327_v57 = vsel %vm246_vm4, %v5323_v27, %v5310_v1  ;;  %v15192_v48 = vrot.slane %v15191_v43, 7  ;;  %v15194_v62 = vrot.slane %v15193_v12, 7 }
 0x40c   :  { %v15195_v14 = vrot.slane %v13159_v2, 7  ;;  %v15196_v42 = vrot.slane %v13162_v6, 7  ;;  %v5846_v31 = vrot.slane %v5840_v34, 6  ;;  %v5440_v7 = vmul.f32 %v13094_v29, %v5327_v57 }
 0x40d   :  { %v5483_v25 = vadd.f32 %v15192_v48, %v5442_v28  ;;  %v5539_v13 = vadd.f32 %v15194_v62, %v5455_v61  ;;  %v5453_v60 = vmul.f32 %v13096_v41, %v5327_v57  ;;  %v5690_v27 = vmul.f32 %v13121_v26, %v5327_v57  ;;  %v15197_v28 = vld [vmem:[#allocation50_spill] sm:$0xff] }
 0x40e   :  { %v5698_v54 = vsel %vm502_vm6, %v5696_v30, %v15195_v14  ;;  %v5726_v16 = vsel %vm502_vm6, %v5724_v45, %v15196_v42  ;;  %v15198_v61 = vrot.slane %v15197_v28, 7  ;;  %v5444_v33 = vadd.f32 %v5440_v7, %v5392_v49 }
 0x40f   :  { %v5708_v47 = vadd.f32 %v5698_v54, %v5596_v50  ;;  %v5736_v21 = vadd.f32 %v5726_v16, %v5652_v51  ;;  %v5595_v9 = vadd.f32 %v5584_v37, %v5483_v25  ;;  %v5651_v0 = vadd.f32 %v5640_v58, %v5539_v13 }
 0x410   :  { %v5646_v1 = vsel %vm502_vm6, %v5643_v35, %v15198_v61  ;;  %v5718_v50 = vmul.f32 %v13123_v19, %v5327_v57  ;;  %v5457_v29 = vadd.f32 %v5453_v60, %v5418_v8  ;;  %v5699_v43 = vrot.slane %v5690_v27, 7 }
 0x411   :  { %v5760_v52 = vadd.f32 %v5752_v18, %v5708_v47  ;;  %5871 = vst [vmem:[#allocation8 + $0x96] sm:$0xff] %v5736_v21  ;;  %v5707_v51 = vadd.f32 %v5696_v30, %v5595_v9  ;;  %v5735_v34 = vadd.f32 %v5724_v45, %v5651_v0  ;;  %v15199_v37 = vrot.slane %v13165_v36, 6 }
 0x412   :  { %v5485_v26 = vadd.f32 %v13348_v56, %v5444_v33  ;;  %v5727_v58 = vrot.slane %v5718_v50, 7  ;;  %v5541_v49 = vadd.f32 %v13364_v38, %v5457_v29  ;;  %v15200_v19 = vrot.slane %v13193_v17, 7 }
 0x413   :  { %v5808_v22 = vadd.f32 %v5800_v40, %v5760_v52  ;;  %v5848_v41 = vsel %vm781_vm5, %v5846_v31, %v15199_v37  ;;  %v5759_v18 = vadd.f32 %v5750_v44, %v5707_v51  ;;  %5870 = vst [vmem:[#allocation8 + $0x8e] sm:$0xfc] %v5735_v34  ;;  %v5842_v8 = vmul.f32 %v13125_v10, %v5327_v57 }
 0x414   :  { %v5702_v35 = vsel %vm502_vm6, %v5699_v43, %v15200_v19  ;;  %v5654_v30 = vadd.f32 %v5646_v1, %v13245_v59  ;;  %v5597_v45 = vadd.f32 %v5588_v4, %v5485_v26  ;;  %v5653_v25 = vadd.f32 %v5644_v46, %v5541_v49 }
 0x415   :  { %v5856_v40 = vadd.f32 %v5848_v41, %v5808_v22  ;;  %v5710_v48 = vadd.f32 %v5702_v35, %v5598_v63  ;;  %v5807_v56 = vadd.f32 %v5798_v23, %v5759_v18  ;;  %v15201_v39 = vmov %v15195_v14 }
 0x416   :  { %v5700_v44 = vsel %vm502_vm6, %v15201_v39, %v5699_v43  ;;  %v15202_v38 = vrot.slane %v13196_v15, 7  ;;  %v15203_v10 = vmov %v15196_v42  ;;  %v5754_v2 = vsel %vm781_vm5, %v5751_v11, %v5753_v55 }
 0x417   :  { %5861 = vst [vmem:[#allocation8 + $0x66] sm:$0xff] %v5856_v40  ;;  %v5709_v12 = vadd.f32 %v5700_v44, %v5597_v45  ;;  %v5728_v59 = vsel %vm502_vm6, %v15203_v10, %v5727_v58  ;;  %v5762_v5 = vadd.f32 %v5753_v55, %v5710_v48  ;;  %v5855_v23 = vadd.f32 %v5846_v31, %v5807_v56 }
 0x418   :  { %v5730_v17 = vsel %vm502_vm6, %v5727_v58, %v15202_v38  ;;  %v5737_v15 = vadd.f32 %v5728_v59, %v5653_v25  ;;  %v5849_v63 = vrot.slane %v5842_v8, 6  ;;  %v5802_v6 = vsel %vm781_vm5, %v5799_v32, %v5801_v53 }
 0x419   :  { %v5738_v4 = vadd.f32 %v5730_v17, %v5654_v30  ;;  %v5761_v46 = vadd.f32 %v5754_v2, %v5709_v12  ;;  %v5810_v57 = vadd.f32 %v5801_v53, %v5762_v5  ;;  %5860 = vst [vmem:[#allocation8 + $0x5e] sm:$0xfc] %v5855_v23  ;;  %v15204_v20 = vmov %v15199_v37 }
 0x41a   :  { %5872 = vst [vmem:[#allocation8 + $0x9e] sm:$0xff] %v5737_v15  ;;  %v5850_v24 = vsel %vm781_vm5, %v15204_v20, %v5849_v63 }
 0x41b   :  { %5873 = vst [vmem:[#allocation8 + $0xa6] sm:$0x3] %v5738_v4  ;;  %v5809_v62 = vadd.f32 %v5802_v6, %v5761_v46  ;;  %v5858_v13 = vadd.f32 %v5849_v63, %v5810_v57 }
 0x41d   :  { %v5857_v11 = vadd.f32 %v5850_v24, %v5809_v62  ;;  %5863 = vst [vmem:[#allocation8 + $0x76] sm:$0x3] %v5858_v13 }
 0x41f   :  { %5862 = vst [vmem:[#allocation8 + $0x6e] sm:$0xff] %v5857_v11 }
 0x420   :  { %6200 = shalt.err (!%p6197_p6)
}
 0x421   :  { %s6201_s4 = scalar_lea.hbm %s13507_s3, 3072 }
 0x422   :  { %p6202_p7 = scmp.ne.s32.totalorder %s13507_s3, %s6201_s4  ;;  %p6205_p8 = scmp.lt.u32.totalorder %s6201_s4, %s13507_s3 }
 0x424   :  { %p6207_p9 = pnand %p6205_p8, %p6202_p7 }
 0x426   :  { %6210 = shalt.err (!%p6207_p9)
}
 0x427   :  { %5890 = dma.vmem_to_hbm [thread:$0]  %s5885_s27, 3072, %s13507_s3, [#allocation5], %s6218_s22, %s6218_s22, %s6219_s23  }
 0x428   :  { %6215 = dma.done.wait [#allocation5], 3072  }
 0x429   :  { %6216 = vsyncadd [#allocation5], 4294964224 }
 0x42a   :  { %5894 = vsyncpa [#allocation4], 1 }
 0x42b   :  { %5895 = vsyncpa [#allocation7], 1 }
 0x42c   :  { %5896 = vsyncpa [#allocation5], 1 }

</bundles_post_ra>
